<compile_context>
chip_gen: v7x
topology: tpu7x:2x2x1
jax: 0.10.0
libtpu: 0.0.40
codegen_flags: <defaults>
</compile_context>

<pallas_src>
import math

import jax
import jax.numpy as jnp
from jax.experimental import pallas as pl
from jax.experimental.pallas import tpu as pltpu

# ----------------------------- configuration --------------------------------
D_MODEL    = 64                # d_model constructor arg (small but /8)
NHEAD      = 8                 # nn.Transformer default
HEAD_DIM   = D_MODEL // NHEAD
NUM_ENC    = 6                 # nn.Transformer default
NUM_DEC    = 6                 # nn.Transformer default
NUM_LAYERS = NUM_ENC + NUM_DEC
DFF        = 2048              # nn.Transformer default dim_feedforward
DFF_CHUNK  = 512               # FFN hidden processed in 4 lane-aligned chunks
MAX_LEN    = 64                # PositionalEncoding max_len
SRC_VOCAB  = 50
TGT_VOCAB  = 60
PAD_IDX    = 2                 # padding_idx / key-padding token
NEG        = -1e30             # additive mask value (stand-in for -inf)
LN_EPS     = 1e-5
OUT_PAD    = 128               # vocab projection padded to a lane-dense width
ATTN_SCALE = 1.0 / math.sqrt(HEAD_DIM)


# ------------------------- in-kernel building blocks -------------------------
def _layer_norm(x, w, b):
    """LayerNorm over the last dim (f32); rsqrt goes to the EUP slot."""
    mu = jnp.mean(x, axis=-1, keepdims=True)
    xc = x - mu
    var = jnp.mean(xc * xc, axis=-1, keepdims=True)
    return xc * jax.lax.rsqrt(var + LN_EPS) * w + b


def _heads_softmax_project(q, k, v, B, Sq, Sk, w_o, b_o, mask):
    """Per-head softmax attention + merged output projection.

    q: (B*Sq, D), k/v: (B*Sk, D) f32 (already projected, lane-dense).
    w_o: (D, D) f32 head-merged output weight, b_o: (1, D).
    mask: None or additive f32 (B, Sq, Sk) (pre-broadcast, hoisted).
    The output projection is accumulated over sublane-aligned 8-row slices of
    w_o, equivalent to concat(heads) @ w_o.
    """
    q3 = q.reshape(B, Sq, D_MODEL) * ATTN_SCALE
    k3 = k.reshape(B, Sk, D_MODEL)
    v3 = v.reshape(B, Sk, D_MODEL)
    acc = None
    for h in range(NHEAD):
        lo, hi = h * HEAD_DIM, (h + 1) * HEAD_DIM
        s = jnp.einsum("bqd,bkd->bqk", q3[:, :, lo:hi], k3[:, :, lo:hi],
                       preferred_element_type=jnp.float32)
        if mask is not None:
            s = s + mask
        s = s - jnp.max(s, axis=-1, keepdims=True)
        p = jnp.exp(s)
        p = p / jnp.sum(p, axis=-1, keepdims=True)
        o = jnp.einsum("bqk,bkd->bqd", p, v3[:, :, lo:hi],
                       preferred_element_type=jnp.float32)
        proj = jnp.dot(o.reshape(B * Sq, HEAD_DIM), w_o[lo:hi, :],
                       preferred_element_type=jnp.float32)
        acc = proj if acc is None else acc + proj
    return acc + b_o


def _self_attention(x, B, S, w_qkv, b_qkv, w_o, b_o, mask):
    """One fused (BS,64)x(64,192) QKV matmul on bf16 weights, then heads."""
    qkv = jnp.dot(x.astype(jnp.bfloat16), w_qkv,
                  preferred_element_type=jnp.float32) + b_qkv
    q = qkv[:, 0:D_MODEL]
    k = qkv[:, D_MODEL:2 * D_MODEL]
    v = qkv[:, 2 * D_MODEL:3 * D_MODEL]
    return _heads_softmax_project(q, k, v, B, S, S, w_o, b_o, mask)


def _cross_attention(x, mem, B, St, Ss, w_q, b_q, w_kv, b_kv, w_o, b_o):
    """Q from decoder state, fused KV from encoder memory (no mask: the
    module passes no memory_key_padding_mask)."""
    q = jnp.dot(x.astype(jnp.bfloat16), w_q,
                preferred_element_type=jnp.float32) + b_q
    kv = jnp.dot(mem.astype(jnp.bfloat16), w_kv,
                 preferred_element_type=jnp.float32) + b_kv
    k = kv[:, 0:D_MODEL]
    v = kv[:, D_MODEL:2 * D_MODEL]
    return _heads_softmax_project(q, k, v, B, St, Ss, w_o, b_o, None)


def _ffn(x, w1_ref, b1_ref, w2_ref, b2_ref):
    """relu FFN, chunked over DFF so the (BS, DFF) hidden never exceeds
    ~8 live vregs; weights bf16, accumulation f32."""
    xb = x.astype(jnp.bfloat16)
    ff = jnp.zeros((x.shape[0], D_MODEL), jnp.float32)
    for c in range(DFF // DFF_CHUNK):
        lo = c * DFF_CHUNK
        hi = lo + DFF_CHUNK
        h = jnp.dot(xb, w1_ref[0, :, lo:hi],
                    preferred_element_type=jnp.float32) + b1_ref[0, :, lo:hi]
        h = jnp.maximum(h, 0.0)
        ff = ff + jnp.dot(h.astype(jnp.bfloat16), w2_ref[0, lo:hi, :],
                          preferred_element_type=jnp.float32)
    return ff + b2_ref[0]


# --------------------------- fused enc+dec kernel -----------------------------
def _make_kernel(B, Ss, St):
    def kernel(src_ref, tgt_ref, smask_ref, tmask_ref,
               sa_qkv_w, sa_qkv_b, sa_wo_w, sa_wo_b, n1w, n1b,
               ca_q_w, ca_q_b, ca_kv_w, ca_kv_b, ca_wo_w, ca_wo_b, n2w, n2b,
               w1, b1, w2, b2, n3w, n3b,
               enc_fnw, enc_fnb, dec_fnw, dec_fnb, ow, ob,
               out_ref, mem_sc, x_sc):
        layer = pl.program_id(0)

        @pl.when(layer == 0)
        def _():
            mem_sc[...] = src_ref[...]

        @pl.when(layer == NUM_ENC)
        def _():
            # encoder finished: apply nn.TransformerEncoder final LayerNorm
            # once, keep memory resident in VMEM, load target embeddings.
            mem_sc[...] = _layer_norm(mem_sc[...], enc_fnw[...], enc_fnb[...])
            x_sc[...] = tgt_ref[...]

        @pl.when(layer < NUM_ENC)
        def _():
            x = mem_sc[...]
            mask = jnp.broadcast_to(smask_ref[...], (B, Ss, Ss))  # hoisted
            attn = _self_attention(x, B, Ss, sa_qkv_w[0], sa_qkv_b[0],
                                   sa_wo_w[0], sa_wo_b[0], mask)
            x = _layer_norm(x + attn, n1w[0], n1b[0])
            ff = _ffn(x, w1, b1, w2, b2)
            x = _layer_norm(x + ff, n3w[0], n3b[0])
            mem_sc[...] = x

        @pl.when(layer >= NUM_ENC)
        def _():
            x = x_sc[...]
            tmask = tmask_ref[...]                       # causal + key-padding
            attn = _self_attention(x, B, St, sa_qkv_w[0], sa_qkv_b[0],
                                   sa_wo_w[0], sa_wo_b[0], tmask)
            x = _layer_norm(x + attn, n1w[0], n1b[0])
            cattn = _cross_attention(x, mem_sc[...], B, St, Ss,
                                     ca_q_w[0], ca_q_b[0],
                                     ca_kv_w[0], ca_kv_b[0],
                                     ca_wo_w[0], ca_wo_b[0])
            x = _layer_norm(x + cattn, n2w[0], n2b[0])
            ff = _ffn(x, w1, b1, w2, b2)
            x = _layer_norm(x + ff, n3w[0], n3b[0])
            x_sc[...] = x

        @pl.when(layer == NUM_LAYERS - 1)
        def _():
            # final decoder LayerNorm + lane-dense (padded-128) vocab proj
            xf = _layer_norm(x_sc[...], dec_fnw[...], dec_fnb[...])
            out_ref[...] = (jnp.dot(xf.astype(jnp.bfloat16), ow[...],
                                    preferred_element_type=jnp.float32)
                            + ob[...])

    return kernel


def transformer_stack(src2d, tgt2d, src_mask, tgt_mask, t, B, Ss, St):
    BSs, BSt = B * Ss, B * St
    per_l = lambda l: (l, 0, 0)                                   # 12-stacked
    dec_l = lambda l: (jnp.maximum(l - NUM_ENC, 0), 0, 0)         # decoder only
    c2 = lambda l: (0, 0)
    c3 = lambda l: (0, 0, 0)
    return pl.pallas_call(
        _make_kernel(B, Ss, St),
        out_shape=jax.ShapeDtypeStruct((BSt, OUT_PAD), jnp.float32),
        grid=(NUM_LAYERS,),
        in_specs=[
            pl.BlockSpec((BSs, D_MODEL), c2),                      # src emb
            pl.BlockSpec((BSt, D_MODEL), c2),                      # tgt emb
            pl.BlockSpec((B, 1, Ss), c3),                          # src mask
            pl.BlockSpec((B, St, St), c3),                         # tgt mask
            pl.BlockSpec((1, D_MODEL, 3 * D_MODEL), per_l),        # sa_qkv_w
            pl.BlockSpec((1, 1, 3 * D_MODEL), per_l),              # sa_qkv_b
            pl.BlockSpec((1, D_MODEL, D_MODEL), per_l),            # sa_wo_w
            pl.BlockSpec((1, 1, D_MODEL), per_l),                  # sa_wo_b
            pl.BlockSpec((1, 1, D_MODEL), per_l),                  # n1w
            pl.BlockSpec((1, 1, D_MODEL), per_l),                  # n1b
            pl.BlockSpec((1, D_MODEL, D_MODEL), dec_l),            # ca_q_w
            pl.BlockSpec((1, 1, D_MODEL), dec_l),                  # ca_q_b
            pl.BlockSpec((1, D_MODEL, 2 * D_MODEL), dec_l),        # ca_kv_w
            pl.BlockSpec((1, 1, 2 * D_MODEL), dec_l),              # ca_kv_b
            pl.BlockSpec((1, D_MODEL, D_MODEL), dec_l),            # ca_wo_w
            pl.BlockSpec((1, 1, D_MODEL), dec_l),                  # ca_wo_b
            pl.BlockSpec((1, 1, D_MODEL), dec_l),                  # n2w
            pl.BlockSpec((1, 1, D_MODEL), dec_l),                  # n2b
            pl.BlockSpec((1, D_MODEL, DFF), per_l),                # w1
            pl.BlockSpec((1, 1, DFF), per_l),                      # b1
            pl.BlockSpec((1, DFF, D_MODEL), per_l),                # w2
            pl.BlockSpec((1, 1, D_MODEL), per_l),                  # b2
            pl.BlockSpec((1, 1, D_MODEL), per_l),                  # n3w
            pl.BlockSpec((1, 1, D_MODEL), per_l),                  # n3b
            pl.BlockSpec((1, D_MODEL), c2),                        # enc final ln w
            pl.BlockSpec((1, D_MODEL), c2),                        # enc final ln b
            pl.BlockSpec((1, D_MODEL), c2),                        # dec final ln w
            pl.BlockSpec((1, D_MODEL), c2),                        # dec final ln b
            pl.BlockSpec((D_MODEL, OUT_PAD), c2),                  # out_w
            pl.BlockSpec((1, OUT_PAD), c2),                        # out_b
        ],
        out_specs=pl.BlockSpec((BSt, OUT_PAD), c2),
        scratch_shapes=[pltpu.VMEM((BSs, D_MODEL), jnp.float32),   # enc memory
                        pltpu.VMEM((BSt, D_MODEL), jnp.float32)],  # dec state
        compiler_params=pltpu.CompilerParams(
            dimension_semantics=("arbitrary",)),
    )(src2d, tgt2d, src_mask, tgt_mask,
      t["sa_qkv_w"], t["sa_qkv_b"], t["sa_wo_w"], t["sa_wo_b"],
      t["n1w"], t["n1b"],
      t["ca_q_w"], t["ca_q_b"], t["ca_kv_w"], t["ca_kv_b"],
      t["ca_wo_w"], t["ca_wo_b"], t["n2w"], t["n2b"],
      t["w1"], t["b1"], t["w2"], t["b2"], t["n3w"], t["n3b"],
      t["enc_fnw"], t["enc_fnb"], t["dec_fnw"], t["dec_fnb"],
      t["out_w"], t["out_b"])


# ----------------------------- plain-JAX glue --------------------------------
def positional_encoding(seq_len, d_model):
    pos = jnp.arange(MAX_LEN, dtype=jnp.float32)[:, None]
    div = jnp.exp(jnp.arange(0, d_model, 2, dtype=jnp.float32)
                  * (-math.log(10000.0) / d_model))
    pe = jnp.zeros((MAX_LEN, d_model), jnp.float32)
    pe = pe.at[:, 0::2].set(jnp.sin(pos * div))
    pe = pe.at[:, 1::2].set(jnp.cos(pos * div))
    return pe[:seq_len]


@jax.jit
def translate_forward(params, src_tokens, tgt_tokens):
    B, Ss = src_tokens.shape
    St = tgt_tokens.shape[1]

    # embeddings (padding_idx row zero) + positional encoding; dropout = id
    # TODO(synk): training-mode dropout (PE / attn / FFN) is identity here.
    src = params["src_emb"][src_tokens] + positional_encoding(Ss, D_MODEL)[None]
    tgt = params["tgt_emb"][tgt_tokens] + positional_encoding(St, D_MODEL)[None]

    # tiny additive masks (shared across heads inside the fused kernel)
    src_kpm = src_tokens == PAD_IDX
    tgt_kpm = tgt_tokens == PAD_IDX
    src_mask = jnp.where(src_kpm, NEG, 0.0).astype(jnp.float32)[:, None, :]
    causal = jnp.triu(jnp.full((St, St), NEG, jnp.float32), k=1)
    tgt_mask = (causal[None, :, :]
                + jnp.where(tgt_kpm, NEG, 0.0)[:, None, :]).astype(jnp.float32)
    # nn.Transformer is called without memory_key_padding_mask -> no cross mask

    logits = transformer_stack(
        src.reshape(B * Ss, D_MODEL).astype(jnp.float32),
        tgt.reshape(B * St, D_MODEL).astype(jnp.float32),
        src_mask, tgt_mask, params["t"], B, Ss, St)
    return logits[:, :TGT_VOCAB].reshape(B, St, TGT_VOCAB)


# ----------------------------- parameter init --------------------------------
def init_params(key):
    keys = iter(jax.random.split(key, 32))
    bf16 = jnp.bfloat16

    def nrm(shape, scale=0.02, dtype=jnp.float32):
        return (scale * jax.random.normal(next(keys), shape, jnp.float32)
                ).astype(dtype)

    def ones(shape):
        return jnp.ones(shape, jnp.float32)

    def zeros(shape):
        return jnp.zeros(shape, jnp.float32)

    L, Ld = NUM_LAYERS, NUM_DEC
    # layers 0..5 = encoder, 6..11 = decoder; cross-attn arrays decoder-only
    t = {
        # self-attention: head-merged, lane-dense, bf16 matmul weights
        "sa_qkv_w": nrm((L, D_MODEL, 3 * D_MODEL), dtype=bf16),
        "sa_qkv_b": zeros((L, 1, 3 * D_MODEL)),
        "sa_wo_w": nrm((L, D_MODEL, D_MODEL)),           # f32 (8-row slices)
        "sa_wo_b": zeros((L, 1, D_MODEL)),
        "n1w": ones((L, 1, D_MODEL)), "n1b": zeros((L, 1, D_MODEL)),
        # cross-attention (decoder layers only)
        "ca_q_w": nrm((Ld, D_MODEL, D_MODEL), dtype=bf16),
        "ca_q_b": zeros((Ld, 1, D_MODEL)),
        "ca_kv_w": nrm((Ld, D_MODEL, 2 * D_MODEL), dtype=bf16),
        "ca_kv_b": zeros((Ld, 1, 2 * D_MODEL)),
        "ca_wo_w": nrm((Ld, D_MODEL, D_MODEL)),
        "ca_wo_b": zeros((Ld, 1, D_MODEL)),
        "n2w": ones((Ld, 1, D_MODEL)), "n2b": zeros((Ld, 1, D_MODEL)),
        # feed-forward (bf16 weights, streamed per layer)
        "w1": nrm((L, D_MODEL, DFF), dtype=bf16), "b1": zeros((L, 1, DFF)),
        "w2": nrm((L, DFF, D_MODEL), dtype=bf16), "b2": zeros((L, 1, D_MODEL)),
        "n3w": ones((L, 1, D_MODEL)), "n3b": zeros((L, 1, D_MODEL)),
        # stack-final LayerNorms (nn.TransformerEncoder/Decoder norm)
        "enc_fnw": ones((1, D_MODEL)), "enc_fnb": zeros((1, D_MODEL)),
        "dec_fnw": ones((1, D_MODEL)), "dec_fnb": zeros((1, D_MODEL)),
        # vocab projection padded from 60 -> 128 columns (lane-dense store)
        "out_w": jnp.zeros((D_MODEL, OUT_PAD), jnp.float32)
                 .at[:, :TGT_VOCAB].set(nrm((D_MODEL, TGT_VOCAB)))
                 .astype(bf16),
        "out_b": zeros((1, OUT_PAD)),
    }

    src_emb = nrm((SRC_VOCAB, D_MODEL), scale=1.0).at[PAD_IDX].set(0.0)
    tgt_emb = nrm((TGT_VOCAB, D_MODEL), scale=1.0).at[PAD_IDX].set(0.0)

    return {"src_emb": src_emb, "tgt_emb": tgt_emb, "t": t}


# --------------------------------- main ---------------------------------------
if __name__ == "__main__":
    root = jax.random.PRNGKey(0)
    k_param, k_src, k_tgt = jax.random.split(root, 3)

    params = init_params(k_param)

    B, S_SRC, S_TGT = 2, 8, 8
    src = jax.random.randint(k_src, (B, S_SRC), 0, SRC_VOCAB, dtype=jnp.int32)
    tgt = jax.random.randint(k_tgt, (B, S_TGT), 0, TGT_VOCAB, dtype=jnp.int32)
    # guarantee at least one padding token so the key-padding-mask path is hit
    src = src.at[0, -1].set(PAD_IDX)
    tgt = tgt.at[1, -1].set(PAD_IDX)

    out = translate_forward(params, src, tgt)
    out = jax.block_until_ready(out)

    assert out.shape == (B, S_TGT, TGT_VOCAB), out.shape
    assert bool(jnp.all(jnp.isfinite(out)))
    print("KERNEL_OK")
</pallas_src>

<mosaic_0001>
module attributes {stable_mosaic.version = 11 : i64} {
  func.func @kernel(%arg0: i32, %arg1: memref<16x64xf32, #tpu.memory_space<vmem>>, %arg2: memref<16x64xf32, #tpu.memory_space<vmem>>, %arg3: memref<2x1x8xf32, #tpu.memory_space<vmem>>, %arg4: memref<2x8x8xf32, #tpu.memory_space<vmem>>, %arg5: memref<1x64x192xbf16, #tpu.memory_space<vmem>>, %arg6: memref<1x1x192xf32, #tpu.memory_space<vmem>>, %arg7: memref<1x64x64xf32, #tpu.memory_space<vmem>>, %arg8: memref<1x1x64xf32, #tpu.memory_space<vmem>>, %arg9: memref<1x1x64xf32, #tpu.memory_space<vmem>>, %arg10: memref<1x1x64xf32, #tpu.memory_space<vmem>>, %arg11: memref<1x64x64xbf16, #tpu.memory_space<vmem>>, %arg12: memref<1x1x64xf32, #tpu.memory_space<vmem>>, %arg13: memref<1x64x128xbf16, #tpu.memory_space<vmem>>, %arg14: memref<1x1x128xf32, #tpu.memory_space<vmem>>, %arg15: memref<1x64x64xf32, #tpu.memory_space<vmem>>, %arg16: memref<1x1x64xf32, #tpu.memory_space<vmem>>, %arg17: memref<1x1x64xf32, #tpu.memory_space<vmem>>, %arg18: memref<1x1x64xf32, #tpu.memory_space<vmem>>, %arg19: memref<1x64x2048xbf16, #tpu.memory_space<vmem>>, %arg20: memref<1x1x2048xf32, #tpu.memory_space<vmem>>, %arg21: memref<1x2048x64xbf16, #tpu.memory_space<vmem>>, %arg22: memref<1x1x64xf32, #tpu.memory_space<vmem>>, %arg23: memref<1x1x64xf32, #tpu.memory_space<vmem>>, %arg24: memref<1x1x64xf32, #tpu.memory_space<vmem>>, %arg25: memref<1x64xf32, #tpu.memory_space<vmem>>, %arg26: memref<1x64xf32, #tpu.memory_space<vmem>>, %arg27: memref<1x64xf32, #tpu.memory_space<vmem>>, %arg28: memref<1x64xf32, #tpu.memory_space<vmem>>, %arg29: memref<64x128xbf16, #tpu.memory_space<vmem>>, %arg30: memref<1x128xf32, #tpu.memory_space<vmem>>, %arg31: memref<16x128xf32, #tpu.memory_space<vmem>>, %arg32: memref<16x64xf32, #tpu.memory_space<vmem>>, %arg33: memref<16x64xf32, #tpu.memory_space<vmem>>) attributes {dimension_semantics = [#tpu.dimension_semantics<arbitrary>], iteration_bounds = array<i64: 12>, scalar_prefetch = 0 : i64, scratch_operands = 2 : i64, tpu.core_type = #tpu.core_type<tc>, window_params = [{pipeline_mode = #tpu.pipeline_mode<synchronous>, transform_indices = @transform_0, window_bounds = array<i64: 16, 64>}, {pipeline_mode = #tpu.pipeline_mode<synchronous>, transform_indices = @transform_1, window_bounds = array<i64: 16, 64>}, {pipeline_mode = #tpu.pipeline_mode<synchronous>, transform_indices = @transform_2, window_bounds = array<i64: 2, 1, 8>}, {pipeline_mode = #tpu.pipeline_mode<synchronous>, transform_indices = @transform_3, window_bounds = array<i64: 2, 8, 8>}, {transform_indices = @transform_4, window_bounds = array<i64: 1, 64, 192>}, {transform_indices = @transform_5, window_bounds = array<i64: 1, 1, 192>}, {transform_indices = @transform_6, window_bounds = array<i64: 1, 64, 64>}, {transform_indices = @transform_7, window_bounds = array<i64: 1, 1, 64>}, {transform_indices = @transform_8, window_bounds = array<i64: 1, 1, 64>}, {transform_indices = @transform_9, window_bounds = array<i64: 1, 1, 64>}, {transform_indices = @transform_10, window_bounds = array<i64: 1, 64, 64>}, {transform_indices = @transform_11, window_bounds = array<i64: 1, 1, 64>}, {transform_indices = @transform_12, window_bounds = array<i64: 1, 64, 128>}, {transform_indices = @transform_13, window_bounds = array<i64: 1, 1, 128>}, {transform_indices = @transform_14, window_bounds = array<i64: 1, 64, 64>}, {transform_indices = @transform_15, window_bounds = array<i64: 1, 1, 64>}, {transform_indices = @transform_16, window_bounds = array<i64: 1, 1, 64>}, {transform_indices = @transform_17, window_bounds = array<i64: 1, 1, 64>}, {transform_indices = @transform_18, window_bounds = array<i64: 1, 64, 2048>}, {transform_indices = @transform_19, window_bounds = array<i64: 1, 1, 2048>}, {transform_indices = @transform_20, window_bounds = array<i64: 1, 2048, 64>}, {transform_indices = @transform_21, window_bounds = array<i64: 1, 1, 64>}, {transform_indices = @transform_22, window_bounds = array<i64: 1, 1, 64>}, {transform_indices = @transform_23, window_bounds = array<i64: 1, 1, 64>}, {pipeline_mode = #tpu.pipeline_mode<synchronous>, transform_indices = @transform_24, window_bounds = array<i64: 1, 64>}, {pipeline_mode = #tpu.pipeline_mode<synchronous>, transform_indices = @transform_25, window_bounds = array<i64: 1, 64>}, {pipeline_mode = #tpu.pipeline_mode<synchronous>, transform_indices = @transform_26, window_bounds = array<i64: 1, 64>}, {pipeline_mode = #tpu.pipeline_mode<synchronous>, transform_indices = @transform_27, window_bounds = array<i64: 1, 64>}, {pipeline_mode = #tpu.pipeline_mode<synchronous>, transform_indices = @transform_28, window_bounds = array<i64: 64, 128>}, {pipeline_mode = #tpu.pipeline_mode<synchronous>, transform_indices = @transform_29, window_bounds = array<i64: 1, 128>}, {pipeline_mode = #tpu.pipeline_mode<synchronous>, transform_indices = @transform_30, window_bounds = array<i64: 16, 128>}]} {
    %c0_i32 = arith.constant 0 : i32
    %0 = arith.cmpi eq, %arg0, %c0_i32 : i32
    %1 = arith.extui %0 : i1 to i32
    %c0_i32_0 = arith.constant 0 : i32
    %2 = arith.cmpi ne, %1, %c0_i32_0 : i32
    scf.if %2 {
      %c0 = arith.constant 0 : index
      %c0_7 = arith.constant 0 : index
      %15 = vector.load %arg1[%c0, %c0_7] : memref<16x64xf32, #tpu.memory_space<vmem>>, vector<16x64xf32>
      %c0_8 = arith.constant 0 : index
      %c0_9 = arith.constant 0 : index
      %16 = vector.load %arg32[%c0_8, %c0_9] : memref<16x64xf32, #tpu.memory_space<vmem>>, vector<16x64xf32>
      tpu.vector_store %arg32[%c0_8, %c0_9], %15 {strides = array<i32>} : memref<16x64xf32, #tpu.memory_space<vmem>>, vector<16x64xf32>,
    } else {
    }
    %c6_i32 = arith.constant 6 : i32
    %3 = arith.cmpi eq, %arg0, %c6_i32 : i32
    %4 = arith.extui %3 : i1 to i32
    %c0_i32_1 = arith.constant 0 : i32
    %5 = arith.cmpi ne, %4, %c0_i32_1 : i32
    scf.if %5 {
      %c0 = arith.constant 0 : index
      %c0_7 = arith.constant 0 : index
      %15 = vector.load %arg32[%c0, %c0_7] : memref<16x64xf32, #tpu.memory_space<vmem>>, vector<16x64xf32>
      %c0_8 = arith.constant 0 : index
      %c0_9 = arith.constant 0 : index
      %16 = vector.load %arg25[%c0_8, %c0_9] : memref<1x64xf32, #tpu.memory_space<vmem>>, vector<1x64xf32>
      %c0_10 = arith.constant 0 : index
      %c0_11 = arith.constant 0 : index
      %17 = vector.load %arg26[%c0_10, %c0_11] : memref<1x64xf32, #tpu.memory_space<vmem>>, vector<1x64xf32>
      %cst = arith.constant dense<0.000000e+00> : vector<16xf32>
      %18 = vector.multi_reduction <add>, %15, %cst [1] : vector<16x64xf32> to vector<16xf32>
      %19 = vector.shape_cast %18 : vector<16xf32> to vector<16x1xf32>
      %cst_12 = arith.constant 6.400000e+01 : f32
      %20 = vector.broadcast %cst_12 : f32 to vector<16x1xf32>
      %21 = arith.divf %19, %20 : vector<16x1xf32>
      %22 = vector.broadcast %21 : vector<16x1xf32> to vector<16x64xf32>
      %23 = arith.subf %15, %22 : vector<16x64xf32>
      %24 = arith.mulf %23, %23 : vector<16x64xf32>
      %cst_13 = arith.constant dense<0.000000e+00> : vector<16xf32>
      %25 = vector.multi_reduction <add>, %24, %cst_13 [1] : vector<16x64xf32> to vector<16xf32>
      %26 = vector.shape_cast %25 : vector<16xf32> to vector<16x1xf32>
      %cst_14 = arith.constant 6.400000e+01 : f32
      %27 = vector.broadcast %cst_14 : f32 to vector<16x1xf32>
      %28 = arith.divf %26, %27 : vector<16x1xf32>
      %cst_15 = arith.constant 9.99999974E-6 : f32
      %29 = vector.broadcast %cst_15 : f32 to vector<16x1xf32>
      %30 = arith.addf %28, %29 : vector<16x1xf32>
      %31 = math.rsqrt %30 : vector<16x1xf32>
      %32 = vector.broadcast %31 : vector<16x1xf32> to vector<16x64xf32>
      %33 = arith.mulf %23, %32 : vector<16x64xf32>
      %34 = vector.broadcast %16 : vector<1x64xf32> to vector<16x64xf32>
      %35 = arith.mulf %33, %34 : vector<16x64xf32>
      %36 = vector.broadcast %17 : vector<1x64xf32> to vector<16x64xf32>
      %37 = arith.addf %35, %36 : vector<16x64xf32>
      %c0_16 = arith.constant 0 : index
      %c0_17 = arith.constant 0 : index
      %38 = vector.load %arg32[%c0_16, %c0_17] : memref<16x64xf32, #tpu.memory_space<vmem>>, vector<16x64xf32>
      tpu.vector_store %arg32[%c0_16, %c0_17], %37 {strides = array<i32>} : memref<16x64xf32, #tpu.memory_space<vmem>>, vector<16x64xf32>,
      %c0_18 = arith.constant 0 : index
      %c0_19 = arith.constant 0 : index
      %39 = vector.load %arg2[%c0_18, %c0_19] : memref<16x64xf32, #tpu.memory_space<vmem>>, vector<16x64xf32>
      %c0_20 = arith.constant 0 : index
      %c0_21 = arith.constant 0 : index
      %40 = vector.load %arg33[%c0_20, %c0_21] : memref<16x64xf32, #tpu.memory_space<vmem>>, vector<16x64xf32>
      tpu.vector_store %arg33[%c0_20, %c0_21], %39 {strides = array<i32>} : memref<16x64xf32, #tpu.memory_space<vmem>>, vector<16x64xf32>,
    } else {
    }
    %c6_i32_2 = arith.constant 6 : i32
    %6 = arith.cmpi slt, %arg0, %c6_i32_2 : i32
    %7 = arith.extui %6 : i1 to i32
    %c0_i32_3 = arith.constant 0 : i32
    %8 = arith.cmpi ne, %7, %c0_i32_3 : i32
    scf.if %8 {
      %c0 = arith.constant 0 : index
      %c0_7 = arith.constant 0 : index
      %15 = vector.load %arg32[%c0, %c0_7] : memref<16x64xf32, #tpu.memory_space<vmem>>, vector<16x64xf32>
      %c0_8 = arith.constant 0 : index
      %c0_9 = arith.constant 0 : index
      %c0_10 = arith.constant 0 : index
      %16 = vector.load %arg3[%c0_8, %c0_9, %c0_10] : memref<2x1x8xf32, #tpu.memory_space<vmem>>, vector<2x1x8xf32>
      %17 = vector.shape_cast %16 : vector<2x1x8xf32> to vector<2x1x8xf32>
      %18 = vector.broadcast %17 : vector<2x1x8xf32> to vector<2x8x8xf32>
      %c0_11 = arith.constant 0 : index
      %c0_12 = arith.constant 0 : index
      %c0_13 = arith.constant 0 : index
      %19 = vector.load %arg5[%c0_11, %c0_12, %c0_13] : memref<1x64x192xbf16, #tpu.memory_space<vmem>>, vector<1x64x192xbf16>
      %20 = vector.shape_cast %19 : vector<1x64x192xbf16> to vector<64x192xbf16>
      %c0_14 = arith.constant 0 : index
      %c0_15 = arith.constant 0 : index
      %c0_16 = arith.constant 0 : index
      %21 = vector.load %arg6[%c0_14, %c0_15, %c0_16] : memref<1x1x192xf32, #tpu.memory_space<vmem>>, vector<1x1x192xf32>
      %22 = vector.shape_cast %21 : vector<1x1x192xf32> to vector<1x192xf32>
      %c0_17 = arith.constant 0 : index
      %c0_18 = arith.constant 0 : index
      %c0_19 = arith.constant 0 : index
      %23 = vector.load %arg7[%c0_17, %c0_18, %c0_19] : memref<1x64x64xf32, #tpu.memory_space<vmem>>, vector<1x64x64xf32>
      %24 = vector.shape_cast %23 : vector<1x64x64xf32> to vector<64x64xf32>
      %c0_20 = arith.constant 0 : index
      %c0_21 = arith.constant 0 : index
      %c0_22 = arith.constant 0 : index
      %25 = vector.load %arg8[%c0_20, %c0_21, %c0_22] : memref<1x1x64xf32, #tpu.memory_space<vmem>>, vector<1x1x64xf32>
      %26 = vector.shape_cast %25 : vector<1x1x64xf32> to vector<1x64xf32>
      %27 = arith.truncf %15 : vector<16x64xf32> to vector<16x64xbf16>
      %cst = arith.constant dense<0.000000e+00> : vector<16x192xf32>
      %28 = tpu.matmul %27, %20, %cst {dimension_numbers = #tpu.dot_dimension_numbers<[1], [0], [0], [1], [0, 0, 1, 1], [], []>} : vector<16x64xbf16>, vector<64x192xbf16>, vector<16x192xf32> -> vector<16x192xf32>
      %29 = vector.broadcast %22 : vector<1x192xf32> to vector<16x192xf32>
      %30 = arith.addf %28, %29 : vector<16x192xf32>
      %31 = vector.extract_strided_slice %30 {offsets = [0, 0], sizes = [16, 64], strides = [1, 1]} : vector<16x192xf32> to vector<16x64xf32>
      %32 = vector.extract_strided_slice %30 {offsets = [0, 64], sizes = [16, 64], strides = [1, 1]} : vector<16x192xf32> to vector<16x64xf32>
      %33 = vector.extract_strided_slice %30 {offsets = [0, 128], sizes = [16, 64], strides = [1, 1]} : vector<16x192xf32> to vector<16x64xf32>
      %34 = vector.shape_cast %31 : vector<16x64xf32> to vector<2x8x64xf32>
      %cst_23 = arith.constant 0.353553385 : f32
      %35 = vector.broadcast %cst_23 : f32 to vector<2x8x64xf32>
      %36 = arith.mulf %34, %35 : vector<2x8x64xf32>
      %37 = vector.shape_cast %32 : vector<16x64xf32> to vector<2x8x64xf32>
      %38 = vector.shape_cast %33 : vector<16x64xf32> to vector<2x8x64xf32>
      %39 = vector.extract_strided_slice %36 {offsets = [0, 0, 0], sizes = [2, 8, 8], strides = [1, 1, 1]} : vector<2x8x64xf32> to vector<2x8x8xf32>
      %40 = vector.extract_strided_slice %37 {offsets = [0, 0, 0], sizes = [2, 8, 8], strides = [1, 1, 1]} : vector<2x8x64xf32> to vector<2x8x8xf32>
      "tpu.trace_start"() <{level = 10 : i32, message = "bqd,bkd->bqk"}> : () -> ()
      %cst_24 = arith.constant dense<0.000000e+00> : vector<2x8x8xf32>
      %41 = tpu.matmul %39, %40, %cst_24 {dimension_numbers = #tpu.dot_dimension_numbers<[2], [2], [1], [1], [0, 0, 0, 1, 1, 1], [0], [0]>} : vector<2x8x8xf32>, vector<2x8x8xf32>, vector<2x8x8xf32> -> vector<2x8x8xf32>
      "tpu.trace_stop"() : () -> ()
      %42 = arith.addf %41, %18 : vector<2x8x8xf32>
      %cst_25 = arith.constant dense<0xFF800000> : vector<2x8xf32>
      %43 = vector.multi_reduction <maximumf>, %42, %cst_25 [2] : vector<2x8x8xf32> to vector<2x8xf32>
      %44 = vector.shape_cast %43 : vector<2x8xf32> to vector<2x8x1xf32>
      %45 = vector.broadcast %44 : vector<2x8x1xf32> to vector<2x8x8xf32>
      %46 = arith.subf %42, %45 : vector<2x8x8xf32>
      %47 = math.exp %46 : vector<2x8x8xf32>
      %cst_26 = arith.constant dense<0.000000e+00> : vector<2x8xf32>
      %48 = vector.multi_reduction <add>, %47, %cst_26 [2] : vector<2x8x8xf32> to vector<2x8xf32>
      %49 = vector.shape_cast %48 : vector<2x8xf32> to vector<2x8x1xf32>
      %50 = vector.broadcast %49 : vector<2x8x1xf32> to vector<2x8x8xf32>
      %51 = arith.divf %47, %50 : vector<2x8x8xf32>
      %52 = vector.extract_strided_slice %38 {offsets = [0, 0, 0], sizes = [2, 8, 8], strides = [1, 1, 1]} : vector<2x8x64xf32> to vector<2x8x8xf32>
      "tpu.trace_start"() <{level = 10 : i32, message = "bqk,bkd->bqd"}> : () -> ()
      %cst_27 = arith.constant dense<0.000000e+00> : vector<2x8x8xf32>
      %53 = tpu.matmul %51, %52, %cst_27 {dimension_numbers = #tpu.dot_dimension_numbers<[2], [1], [1], [2], [0, 0, 0, 1, 1, 2], [0], [0]>} : vector<2x8x8xf32>, vector<2x8x8xf32>, vector<2x8x8xf32> -> vector<2x8x8xf32>
      "tpu.trace_stop"() : () -> ()
      %54 = vector.shape_cast %53 : vector<2x8x8xf32> to vector<16x8xf32>
      %55 = vector.extract_strided_slice %24 {offsets = [0, 0], sizes = [8, 64], strides = [1, 1]} : vector<64x64xf32> to vector<8x64xf32>
      %cst_28 = arith.constant dense<0.000000e+00> : vector<16x64xf32>
      %56 = tpu.matmul %54, %55, %cst_28 {dimension_numbers = #tpu.dot_dimension_numbers<[1], [0], [0], [1], [0, 0, 1, 1], [], []>} : vector<16x8xf32>, vector<8x64xf32>, vector<16x64xf32> -> vector<16x64xf32>
      %57 = vector.extract_strided_slice %36 {offsets = [0, 0, 8], sizes = [2, 8, 8], strides = [1, 1, 1]} : vector<2x8x64xf32> to vector<2x8x8xf32>
      %58 = vector.extract_strided_slice %37 {offsets = [0, 0, 8], sizes = [2, 8, 8], strides = [1, 1, 1]} : vector<2x8x64xf32> to vector<2x8x8xf32>
      "tpu.trace_start"() <{level = 10 : i32, message = "bqd,bkd->bqk"}> : () -> ()
      %cst_29 = arith.constant dense<0.000000e+00> : vector<2x8x8xf32>
      %59 = tpu.matmul %57, %58, %cst_29 {dimension_numbers = #tpu.dot_dimension_numbers<[2], [2], [1], [1], [0, 0, 0, 1, 1, 1], [0], [0]>} : vector<2x8x8xf32>, vector<2x8x8xf32>, vector<2x8x8xf32> -> vector<2x8x8xf32>
      "tpu.trace_stop"() : () -> ()
      %60 = arith.addf %59, %18 : vector<2x8x8xf32>
      %cst_30 = arith.constant dense<0xFF800000> : vector<2x8xf32>
      %61 = vector.multi_reduction <maximumf>, %60, %cst_30 [2] : vector<2x8x8xf32> to vector<2x8xf32>
      %62 = vector.shape_cast %61 : vector<2x8xf32> to vector<2x8x1xf32>
      %63 = vector.broadcast %62 : vector<2x8x1xf32> to vector<2x8x8xf32>
      %64 = arith.subf %60, %63 : vector<2x8x8xf32>
      %65 = math.exp %64 : vector<2x8x8xf32>
      %cst_31 = arith.constant dense<0.000000e+00> : vector<2x8xf32>
      %66 = vector.multi_reduction <add>, %65, %cst_31 [2] : vector<2x8x8xf32> to vector<2x8xf32>
      %67 = vector.shape_cast %66 : vector<2x8xf32> to vector<2x8x1xf32>
      %68 = vector.broadcast %67 : vector<2x8x1xf32> to vector<2x8x8xf32>
      %69 = arith.divf %65, %68 : vector<2x8x8xf32>
      %70 = vector.extract_strided_slice %38 {offsets = [0, 0, 8], sizes = [2, 8, 8], strides = [1, 1, 1]} : vector<2x8x64xf32> to vector<2x8x8xf32>
      "tpu.trace_start"() <{level = 10 : i32, message = "bqk,bkd->bqd"}> : () -> ()
      %cst_32 = arith.constant dense<0.000000e+00> : vector<2x8x8xf32>
      %71 = tpu.matmul %69, %70, %cst_32 {dimension_numbers = #tpu.dot_dimension_numbers<[2], [1], [1], [2], [0, 0, 0, 1, 1, 2], [0], [0]>} : vector<2x8x8xf32>, vector<2x8x8xf32>, vector<2x8x8xf32> -> vector<2x8x8xf32>
      "tpu.trace_stop"() : () -> ()
      %72 = vector.shape_cast %71 : vector<2x8x8xf32> to vector<16x8xf32>
      %73 = vector.extract_strided_slice %24 {offsets = [8, 0], sizes = [8, 64], strides = [1, 1]} : vector<64x64xf32> to vector<8x64xf32>
      %cst_33 = arith.constant dense<0.000000e+00> : vector<16x64xf32>
      %74 = tpu.matmul %72, %73, %cst_33 {dimension_numbers = #tpu.dot_dimension_numbers<[1], [0], [0], [1], [0, 0, 1, 1], [], []>} : vector<16x8xf32>, vector<8x64xf32>, vector<16x64xf32> -> vector<16x64xf32>
      %75 = arith.addf %56, %74 : vector<16x64xf32>
      %76 = vector.extract_strided_slice %36 {offsets = [0, 0, 16], sizes = [2, 8, 8], strides = [1, 1, 1]} : vector<2x8x64xf32> to vector<2x8x8xf32>
      %77 = vector.extract_strided_slice %37 {offsets = [0, 0, 16], sizes = [2, 8, 8], strides = [1, 1, 1]} : vector<2x8x64xf32> to vector<2x8x8xf32>
      "tpu.trace_start"() <{level = 10 : i32, message = "bqd,bkd->bqk"}> : () -> ()
      %cst_34 = arith.constant dense<0.000000e+00> : vector<2x8x8xf32>
      %78 = tpu.matmul %76, %77, %cst_34 {dimension_numbers = #tpu.dot_dimension_numbers<[2], [2], [1], [1], [0, 0, 0, 1, 1, 1], [0], [0]>} : vector<2x8x8xf32>, vector<2x8x8xf32>, vector<2x8x8xf32> -> vector<2x8x8xf32>
      "tpu.trace_stop"() : () -> ()
      %79 = arith.addf %78, %18 : vector<2x8x8xf32>
      %cst_35 = arith.constant dense<0xFF800000> : vector<2x8xf32>
      %80 = vector.multi_reduction <maximumf>, %79, %cst_35 [2] : vector<2x8x8xf32> to vector<2x8xf32>
      %81 = vector.shape_cast %80 : vector<2x8xf32> to vector<2x8x1xf32>
      %82 = vector.broadcast %81 : vector<2x8x1xf32> to vector<2x8x8xf32>
      %83 = arith.subf %79, %82 : vector<2x8x8xf32>
      %84 = math.exp %83 : vector<2x8x8xf32>
      %cst_36 = arith.constant dense<0.000000e+00> : vector<2x8xf32>
      %85 = vector.multi_reduction <add>, %84, %cst_36 [2] : vector<2x8x8xf32> to vector<2x8xf32>
      %86 = vector.shape_cast %85 : vector<2x8xf32> to vector<2x8x1xf32>
      %87 = vector.broadcast %86 : vector<2x8x1xf32> to vector<2x8x8xf32>
      %88 = arith.divf %84, %87 : vector<2x8x8xf32>
      %89 = vector.extract_strided_slice %38 {offsets = [0, 0, 16], sizes = [2, 8, 8], strides = [1, 1, 1]} : vector<2x8x64xf32> to vector<2x8x8xf32>
      "tpu.trace_start"() <{level = 10 : i32, message = "bqk,bkd->bqd"}> : () -> ()
      %cst_37 = arith.constant dense<0.000000e+00> : vector<2x8x8xf32>
      %90 = tpu.matmul %88, %89, %cst_37 {dimension_numbers = #tpu.dot_dimension_numbers<[2], [1], [1], [2], [0, 0, 0, 1, 1, 2], [0], [0]>} : vector<2x8x8xf32>, vector<2x8x8xf32>, vector<2x8x8xf32> -> vector<2x8x8xf32>
      "tpu.trace_stop"() : () -> ()
      %91 = vector.shape_cast %90 : vector<2x8x8xf32> to vector<16x8xf32>
      %92 = vector.extract_strided_slice %24 {offsets = [16, 0], sizes = [8, 64], strides = [1, 1]} : vector<64x64xf32> to vector<8x64xf32>
      %cst_38 = arith.constant dense<0.000000e+00> : vector<16x64xf32>
      %93 = tpu.matmul %91, %92, %cst_38 {dimension_numbers = #tpu.dot_dimension_numbers<[1], [0], [0], [1], [0, 0, 1, 1], [], []>} : vector<16x8xf32>, vector<8x64xf32>, vector<16x64xf32> -> vector<16x64xf32>
      %94 = arith.addf %75, %93 : vector<16x64xf32>
      %95 = vector.extract_strided_slice %36 {offsets = [0, 0, 24], sizes = [2, 8, 8], strides = [1, 1, 1]} : vector<2x8x64xf32> to vector<2x8x8xf32>
      %96 = vector.extract_strided_slice %37 {offsets = [0, 0, 24], sizes = [2, 8, 8], strides = [1, 1, 1]} : vector<2x8x64xf32> to vector<2x8x8xf32>
      "tpu.trace_start"() <{level = 10 : i32, message = "bqd,bkd->bqk"}> : () -> ()
      %cst_39 = arith.constant dense<0.000000e+00> : vector<2x8x8xf32>
      %97 = tpu.matmul %95, %96, %cst_39 {dimension_numbers = #tpu.dot_dimension_numbers<[2], [2], [1], [1], [0, 0, 0, 1, 1, 1], [0], [0]>} : vector<2x8x8xf32>, vector<2x8x8xf32>, vector<2x8x8xf32> -> vector<2x8x8xf32>
      "tpu.trace_stop"() : () -> ()
      %98 = arith.addf %97, %18 : vector<2x8x8xf32>
      %cst_40 = arith.constant dense<0xFF800000> : vector<2x8xf32>
      %99 = vector.multi_reduction <maximumf>, %98, %cst_40 [2] : vector<2x8x8xf32> to vector<2x8xf32>
      %100 = vector.shape_cast %99 : vector<2x8xf32> to vector<2x8x1xf32>
      %101 = vector.broadcast %100 : vector<2x8x1xf32> to vector<2x8x8xf32>
      %102 = arith.subf %98, %101 : vector<2x8x8xf32>
      %103 = math.exp %102 : vector<2x8x8xf32>
      %cst_41 = arith.constant dense<0.000000e+00> : vector<2x8xf32>
      %104 = vector.multi_reduction <add>, %103, %cst_41 [2] : vector<2x8x8xf32> to vector<2x8xf32>
      %105 = vector.shape_cast %104 : vector<2x8xf32> to vector<2x8x1xf32>
      %106 = vector.broadcast %105 : vector<2x8x1xf32> to vector<2x8x8xf32>
      %107 = arith.divf %103, %106 : vector<2x8x8xf32>
      %108 = vector.extract_strided_slice %38 {offsets = [0, 0, 24], sizes = [2, 8, 8], strides = [1, 1, 1]} : vector<2x8x64xf32> to vector<2x8x8xf32>
      "tpu.trace_start"() <{level = 10 : i32, message = "bqk,bkd->bqd"}> : () -> ()
      %cst_42 = arith.constant dense<0.000000e+00> : vector<2x8x8xf32>
      %109 = tpu.matmul %107, %108, %cst_42 {dimension_numbers = #tpu.dot_dimension_numbers<[2], [1], [1], [2], [0, 0, 0, 1, 1, 2], [0], [0]>} : vector<2x8x8xf32>, vector<2x8x8xf32>, vector<2x8x8xf32> -> vector<2x8x8xf32>
      "tpu.trace_stop"() : () -> ()
      %110 = vector.shape_cast %109 : vector<2x8x8xf32> to vector<16x8xf32>
      %111 = vector.extract_strided_slice %24 {offsets = [24, 0], sizes = [8, 64], strides = [1, 1]} : vector<64x64xf32> to vector<8x64xf32>
      %cst_43 = arith.constant dense<0.000000e+00> : vector<16x64xf32>
      %112 = tpu.matmul %110, %111, %cst_43 {dimension_numbers = #tpu.dot_dimension_numbers<[1], [0], [0], [1], [0, 0, 1, 1], [], []>} : vector<16x8xf32>, vector<8x64xf32>, vector<16x64xf32> -> vector<16x64xf32>
      %113 = arith.addf %94, %112 : vector<16x64xf32>
      %114 = vector.extract_strided_slice %36 {offsets = [0, 0, 32], sizes = [2, 8, 8], strides = [1, 1, 1]} : vector<2x8x64xf32> to vector<2x8x8xf32>
      %115 = vector.extract_strided_slice %37 {offsets = [0, 0, 32], sizes = [2, 8, 8], strides = [1, 1, 1]} : vector<2x8x64xf32> to vector<2x8x8xf32>
      "tpu.trace_start"() <{level = 10 : i32, message = "bqd,bkd->bqk"}> : () -> ()
      %cst_44 = arith.constant dense<0.000000e+00> : vector<2x8x8xf32>
      %116 = tpu.matmul %114, %115, %cst_44 {dimension_numbers = #tpu.dot_dimension_numbers<[2], [2], [1], [1], [0, 0, 0, 1, 1, 1], [0], [0]>} : vector<2x8x8xf32>, vector<2x8x8xf32>, vector<2x8x8xf32> -> vector<2x8x8xf32>
      "tpu.trace_stop"() : () -> ()
      %117 = arith.addf %116, %18 : vector<2x8x8xf32>
      %cst_45 = arith.constant dense<0xFF800000> : vector<2x8xf32>
      %118 = vector.multi_reduction <maximumf>, %117, %cst_45 [2] : vector<2x8x8xf32> to vector<2x8xf32>
      %119 = vector.shape_cast %118 : vector<2x8xf32> to vector<2x8x1xf32>
      %120 = vector.broadcast %119 : vector<2x8x1xf32> to vector<2x8x8xf32>
      %121 = arith.subf %117, %120 : vector<2x8x8xf32>
      %122 = math.exp %121 : vector<2x8x8xf32>
      %cst_46 = arith.constant dense<0.000000e+00> : vector<2x8xf32>
      %123 = vector.multi_reduction <add>, %122, %cst_46 [2] : vector<2x8x8xf32> to vector<2x8xf32>
      %124 = vector.shape_cast %123 : vector<2x8xf32> to vector<2x8x1xf32>
      %125 = vector.broadcast %124 : vector<2x8x1xf32> to vector<2x8x8xf32>
      %126 = arith.divf %122, %125 : vector<2x8x8xf32>
      %127 = vector.extract_strided_slice %38 {offsets = [0, 0, 32], sizes = [2, 8, 8], strides = [1, 1, 1]} : vector<2x8x64xf32> to vector<2x8x8xf32>
      "tpu.trace_start"() <{level = 10 : i32, message = "bqk,bkd->bqd"}> : () -> ()
      %cst_47 = arith.constant dense<0.000000e+00> : vector<2x8x8xf32>
      %128 = tpu.matmul %126, %127, %cst_47 {dimension_numbers = #tpu.dot_dimension_numbers<[2], [1], [1], [2], [0, 0, 0, 1, 1, 2], [0], [0]>} : vector<2x8x8xf32>, vector<2x8x8xf32>, vector<2x8x8xf32> -> vector<2x8x8xf32>
      "tpu.trace_stop"() : () -> ()
      %129 = vector.shape_cast %128 : vector<2x8x8xf32> to vector<16x8xf32>
      %130 = vector.extract_strided_slice %24 {offsets = [32, 0], sizes = [8, 64], strides = [1, 1]} : vector<64x64xf32> to vector<8x64xf32>
      %cst_48 = arith.constant dense<0.000000e+00> : vector<16x64xf32>
      %131 = tpu.matmul %129, %130, %cst_48 {dimension_numbers = #tpu.dot_dimension_numbers<[1], [0], [0], [1], [0, 0, 1, 1], [], []>} : vector<16x8xf32>, vector<8x64xf32>, vector<16x64xf32> -> vector<16x64xf32>
      %132 = arith.addf %113, %131 : vector<16x64xf32>
      %133 = vector.extract_strided_slice %36 {offsets = [0, 0, 40], sizes = [2, 8, 8], strides = [1, 1, 1]} : vector<2x8x64xf32> to vector<2x8x8xf32>
      %134 = vector.extract_strided_slice %37 {offsets = [0, 0, 40], sizes = [2, 8, 8], strides = [1, 1, 1]} : vector<2x8x64xf32> to vector<2x8x8xf32>
      "tpu.trace_start"() <{level = 10 : i32, message = "bqd,bkd->bqk"}> : () -> ()
      %cst_49 = arith.constant dense<0.000000e+00> : vector<2x8x8xf32>
      %135 = tpu.matmul %133, %134, %cst_49 {dimension_numbers = #tpu.dot_dimension_numbers<[2], [2], [1], [1], [0, 0, 0, 1, 1, 1], [0], [0]>} : vector<2x8x8xf32>, vector<2x8x8xf32>, vector<2x8x8xf32> -> vector<2x8x8xf32>
      "tpu.trace_stop"() : () -> ()
      %136 = arith.addf %135, %18 : vector<2x8x8xf32>
      %cst_50 = arith.constant dense<0xFF800000> : vector<2x8xf32>
      %137 = vector.multi_reduction <maximumf>, %136, %cst_50 [2] : vector<2x8x8xf32> to vector<2x8xf32>
      %138 = vector.shape_cast %137 : vector<2x8xf32> to vector<2x8x1xf32>
      %139 = vector.broadcast %138 : vector<2x8x1xf32> to vector<2x8x8xf32>
      %140 = arith.subf %136, %139 : vector<2x8x8xf32>
      %141 = math.exp %140 : vector<2x8x8xf32>
      %cst_51 = arith.constant dense<0.000000e+00> : vector<2x8xf32>
      %142 = vector.multi_reduction <add>, %141, %cst_51 [2] : vector<2x8x8xf32> to vector<2x8xf32>
      %143 = vector.shape_cast %142 : vector<2x8xf32> to vector<2x8x1xf32>
      %144 = vector.broadcast %143 : vector<2x8x1xf32> to vector<2x8x8xf32>
      %145 = arith.divf %141, %144 : vector<2x8x8xf32>
      %146 = vector.extract_strided_slice %38 {offsets = [0, 0, 40], sizes = [2, 8, 8], strides = [1, 1, 1]} : vector<2x8x64xf32> to vector<2x8x8xf32>
      "tpu.trace_start"() <{level = 10 : i32, message = "bqk,bkd->bqd"}> : () -> ()
      %cst_52 = arith.constant dense<0.000000e+00> : vector<2x8x8xf32>
      %147 = tpu.matmul %145, %146, %cst_52 {dimension_numbers = #tpu.dot_dimension_numbers<[2], [1], [1], [2], [0, 0, 0, 1, 1, 2], [0], [0]>} : vector<2x8x8xf32>, vector<2x8x8xf32>, vector<2x8x8xf32> -> vector<2x8x8xf32>
      "tpu.trace_stop"() : () -> ()
      %148 = vector.shape_cast %147 : vector<2x8x8xf32> to vector<16x8xf32>
      %149 = vector.extract_strided_slice %24 {offsets = [40, 0], sizes = [8, 64], strides = [1, 1]} : vector<64x64xf32> to vector<8x64xf32>
      %cst_53 = arith.constant dense<0.000000e+00> : vector<16x64xf32>
      %150 = tpu.matmul %148, %149, %cst_53 {dimension_numbers = #tpu.dot_dimension_numbers<[1], [0], [0], [1], [0, 0, 1, 1], [], []>} : vector<16x8xf32>, vector<8x64xf32>, vector<16x64xf32> -> vector<16x64xf32>
      %151 = arith.addf %132, %150 : vector<16x64xf32>
      %152 = vector.extract_strided_slice %36 {offsets = [0, 0, 48], sizes = [2, 8, 8], strides = [1, 1, 1]} : vector<2x8x64xf32> to vector<2x8x8xf32>
      %153 = vector.extract_strided_slice %37 {offsets = [0, 0, 48], sizes = [2, 8, 8], strides = [1, 1, 1]} : vector<2x8x64xf32> to vector<2x8x8xf32>
      "tpu.trace_start"() <{level = 10 : i32, message = "bqd,bkd->bqk"}> : () -> ()
      %cst_54 = arith.constant dense<0.000000e+00> : vector<2x8x8xf32>
      %154 = tpu.matmul %152, %153, %cst_54 {dimension_numbers = #tpu.dot_dimension_numbers<[2], [2], [1], [1], [0, 0, 0, 1, 1, 1], [0], [0]>} : vector<2x8x8xf32>, vector<2x8x8xf32>, vector<2x8x8xf32> -> vector<2x8x8xf32>
      "tpu.trace_stop"() : () -> ()
      %155 = arith.addf %154, %18 : vector<2x8x8xf32>
      %cst_55 = arith.constant dense<0xFF800000> : vector<2x8xf32>
      %156 = vector.multi_reduction <maximumf>, %155, %cst_55 [2] : vector<2x8x8xf32> to vector<2x8xf32>
      %157 = vector.shape_cast %156 : vector<2x8xf32> to vector<2x8x1xf32>
      %158 = vector.broadcast %157 : vector<2x8x1xf32> to vector<2x8x8xf32>
      %159 = arith.subf %155, %158 : vector<2x8x8xf32>
      %160 = math.exp %159 : vector<2x8x8xf32>
      %cst_56 = arith.constant dense<0.000000e+00> : vector<2x8xf32>
      %161 = vector.multi_reduction <add>, %160, %cst_56 [2] : vector<2x8x8xf32> to vector<2x8xf32>
      %162 = vector.shape_cast %161 : vector<2x8xf32> to vector<2x8x1xf32>
      %163 = vector.broadcast %162 : vector<2x8x1xf32> to vector<2x8x8xf32>
      %164 = arith.divf %160, %163 : vector<2x8x8xf32>
      %165 = vector.extract_strided_slice %38 {offsets = [0, 0, 48], sizes = [2, 8, 8], strides = [1, 1, 1]} : vector<2x8x64xf32> to vector<2x8x8xf32>
      "tpu.trace_start"() <{level = 10 : i32, message = "bqk,bkd->bqd"}> : () -> ()
      %cst_57 = arith.constant dense<0.000000e+00> : vector<2x8x8xf32>
      %166 = tpu.matmul %164, %165, %cst_57 {dimension_numbers = #tpu.dot_dimension_numbers<[2], [1], [1], [2], [0, 0, 0, 1, 1, 2], [0], [0]>} : vector<2x8x8xf32>, vector<2x8x8xf32>, vector<2x8x8xf32> -> vector<2x8x8xf32>
      "tpu.trace_stop"() : () -> ()
      %167 = vector.shape_cast %166 : vector<2x8x8xf32> to vector<16x8xf32>
      %168 = vector.extract_strided_slice %24 {offsets = [48, 0], sizes = [8, 64], strides = [1, 1]} : vector<64x64xf32> to vector<8x64xf32>
      %cst_58 = arith.constant dense<0.000000e+00> : vector<16x64xf32>
      %169 = tpu.matmul %167, %168, %cst_58 {dimension_numbers = #tpu.dot_dimension_numbers<[1], [0], [0], [1], [0, 0, 1, 1], [], []>} : vector<16x8xf32>, vector<8x64xf32>, vector<16x64xf32> -> vector<16x64xf32>
      %170 = arith.addf %151, %169 : vector<16x64xf32>
      %171 = vector.extract_strided_slice %36 {offsets = [0, 0, 56], sizes = [2, 8, 8], strides = [1, 1, 1]} : vector<2x8x64xf32> to vector<2x8x8xf32>
      %172 = vector.extract_strided_slice %37 {offsets = [0, 0, 56], sizes = [2, 8, 8], strides = [1, 1, 1]} : vector<2x8x64xf32> to vector<2x8x8xf32>
      "tpu.trace_start"() <{level = 10 : i32, message = "bqd,bkd->bqk"}> : () -> ()
      %cst_59 = arith.constant dense<0.000000e+00> : vector<2x8x8xf32>
      %173 = tpu.matmul %171, %172, %cst_59 {dimension_numbers = #tpu.dot_dimension_numbers<[2], [2], [1], [1], [0, 0, 0, 1, 1, 1], [0], [0]>} : vector<2x8x8xf32>, vector<2x8x8xf32>, vector<2x8x8xf32> -> vector<2x8x8xf32>
      "tpu.trace_stop"() : () -> ()
      %174 = arith.addf %173, %18 : vector<2x8x8xf32>
      %cst_60 = arith.constant dense<0xFF800000> : vector<2x8xf32>
      %175 = vector.multi_reduction <maximumf>, %174, %cst_60 [2] : vector<2x8x8xf32> to vector<2x8xf32>
      %176 = vector.shape_cast %175 : vector<2x8xf32> to vector<2x8x1xf32>
      %177 = vector.broadcast %176 : vector<2x8x1xf32> to vector<2x8x8xf32>
      %178 = arith.subf %174, %177 : vector<2x8x8xf32>
      %179 = math.exp %178 : vector<2x8x8xf32>
      %cst_61 = arith.constant dense<0.000000e+00> : vector<2x8xf32>
      %180 = vector.multi_reduction <add>, %179, %cst_61 [2] : vector<2x8x8xf32> to vector<2x8xf32>
      %181 = vector.shape_cast %180 : vector<2x8xf32> to vector<2x8x1xf32>
      %182 = vector.broadcast %181 : vector<2x8x1xf32> to vector<2x8x8xf32>
      %183 = arith.divf %179, %182 : vector<2x8x8xf32>
      %184 = vector.extract_strided_slice %38 {offsets = [0, 0, 56], sizes = [2, 8, 8], strides = [1, 1, 1]} : vector<2x8x64xf32> to vector<2x8x8xf32>
      "tpu.trace_start"() <{level = 10 : i32, message = "bqk,bkd->bqd"}> : () -> ()
      %cst_62 = arith.constant dense<0.000000e+00> : vector<2x8x8xf32>
      %185 = tpu.matmul %183, %184, %cst_62 {dimension_numbers = #tpu.dot_dimension_numbers<[2], [1], [1], [2], [0, 0, 0, 1, 1, 2], [0], [0]>} : vector<2x8x8xf32>, vector<2x8x8xf32>, vector<2x8x8xf32> -> vector<2x8x8xf32>
      "tpu.trace_stop"() : () -> ()
      %186 = vector.shape_cast %185 : vector<2x8x8xf32> to vector<16x8xf32>
      %187 = vector.extract_strided_slice %24 {offsets = [56, 0], sizes = [8, 64], strides = [1, 1]} : vector<64x64xf32> to vector<8x64xf32>
      %cst_63 = arith.constant dense<0.000000e+00> : vector<16x64xf32>
      %188 = tpu.matmul %186, %187, %cst_63 {dimension_numbers = #tpu.dot_dimension_numbers<[1], [0], [0], [1], [0, 0, 1, 1], [], []>} : vector<16x8xf32>, vector<8x64xf32>, vector<16x64xf32> -> vector<16x64xf32>
      %189 = arith.addf %170, %188 : vector<16x64xf32>
      %190 = vector.broadcast %26 : vector<1x64xf32> to vector<16x64xf32>
      %191 = arith.addf %189, %190 : vector<16x64xf32>
      %192 = arith.addf %15, %191 : vector<16x64xf32>
      %c0_64 = arith.constant 0 : index
      %c0_65 = arith.constant 0 : index
      %c0_66 = arith.constant 0 : index
      %193 = vector.load %arg9[%c0_64, %c0_65, %c0_66] : memref<1x1x64xf32, #tpu.memory_space<vmem>>, vector<1x1x64xf32>
      %194 = vector.shape_cast %193 : vector<1x1x64xf32> to vector<1x64xf32>
      %c0_67 = arith.constant 0 : index
      %c0_68 = arith.constant 0 : index
      %c0_69 = arith.constant 0 : index
      %195 = vector.load %arg10[%c0_67, %c0_68, %c0_69] : memref<1x1x64xf32, #tpu.memory_space<vmem>>, vector<1x1x64xf32>
      %196 = vector.shape_cast %195 : vector<1x1x64xf32> to vector<1x64xf32>
      %cst_70 = arith.constant dense<0.000000e+00> : vector<16xf32>
      %197 = vector.multi_reduction <add>, %192, %cst_70 [1] : vector<16x64xf32> to vector<16xf32>
      %198 = vector.shape_cast %197 : vector<16xf32> to vector<16x1xf32>
      %cst_71 = arith.constant 6.400000e+01 : f32
      %199 = vector.broadcast %cst_71 : f32 to vector<16x1xf32>
      %200 = arith.divf %198, %199 : vector<16x1xf32>
      %201 = vector.broadcast %200 : vector<16x1xf32> to vector<16x64xf32>
      %202 = arith.subf %192, %201 : vector<16x64xf32>
      %203 = arith.mulf %202, %202 : vector<16x64xf32>
      %cst_72 = arith.constant dense<0.000000e+00> : vector<16xf32>
      %204 = vector.multi_reduction <add>, %203, %cst_72 [1] : vector<16x64xf32> to vector<16xf32>
      %205 = vector.shape_cast %204 : vector<16xf32> to vector<16x1xf32>
      %cst_73 = arith.constant 6.400000e+01 : f32
      %206 = vector.broadcast %cst_73 : f32 to vector<16x1xf32>
      %207 = arith.divf %205, %206 : vector<16x1xf32>
      %cst_74 = arith.constant 9.99999974E-6 : f32
      %208 = vector.broadcast %cst_74 : f32 to vector<16x1xf32>
      %209 = arith.addf %207, %208 : vector<16x1xf32>
      %210 = math.rsqrt %209 : vector<16x1xf32>
      %211 = vector.broadcast %210 : vector<16x1xf32> to vector<16x64xf32>
      %212 = arith.mulf %202, %211 : vector<16x64xf32>
      %213 = vector.broadcast %194 : vector<1x64xf32> to vector<16x64xf32>
      %214 = arith.mulf %212, %213 : vector<16x64xf32>
      %215 = vector.broadcast %196 : vector<1x64xf32> to vector<16x64xf32>
      %216 = arith.addf %214, %215 : vector<16x64xf32>
      %217 = arith.truncf %216 : vector<16x64xf32> to vector<16x64xbf16>
      %cst_75 = arith.constant 0.000000e+00 : f32
      %218 = vector.broadcast %cst_75 : f32 to vector<16x64xf32>
      %c0_76 = arith.constant 0 : index
      %c0_77 = arith.constant 0 : index
      %c0_78 = arith.constant 0 : index
      %219 = vector.load %arg19[%c0_76, %c0_77, %c0_78] : memref<1x64x2048xbf16, #tpu.memory_space<vmem>>, vector<1x64x512xbf16>
      %220 = vector.shape_cast %219 : vector<1x64x512xbf16> to vector<64x512xbf16>
      %cst_79 = arith.constant dense<0.000000e+00> : vector<16x512xf32>
      %221 = tpu.matmul %217, %220, %cst_79 {dimension_numbers = #tpu.dot_dimension_numbers<[1], [0], [0], [1], [0, 0, 1, 1], [], []>} : vector<16x64xbf16>, vector<64x512xbf16>, vector<16x512xf32> -> vector<16x512xf32>
      %c0_80 = arith.constant 0 : index
      %c0_81 = arith.constant 0 : index
      %c0_82 = arith.constant 0 : index
      %222 = vector.load %arg20[%c0_80, %c0_81, %c0_82] : memref<1x1x2048xf32, #tpu.memory_space<vmem>>, vector<1x1x512xf32>
      %223 = vector.shape_cast %222 : vector<1x1x512xf32> to vector<1x512xf32>
      %224 = vector.broadcast %223 : vector<1x512xf32> to vector<16x512xf32>
      %225 = arith.addf %221, %224 : vector<16x512xf32>
      %cst_83 = arith.constant 0.000000e+00 : f32
      %226 = vector.broadcast %cst_83 : f32 to vector<16x512xf32>
      %227 = arith.maximumf %225, %226 : vector<16x512xf32>
      %228 = arith.truncf %227 : vector<16x512xf32> to vector<16x512xbf16>
      %c0_84 = arith.constant 0 : index
      %c0_85 = arith.constant 0 : index
      %c0_86 = arith.constant 0 : index
      %229 = vector.load %arg21[%c0_84, %c0_85, %c0_86] : memref<1x2048x64xbf16, #tpu.memory_space<vmem>>, vector<1x512x64xbf16>
      %230 = vector.shape_cast %229 : vector<1x512x64xbf16> to vector<512x64xbf16>
      %cst_87 = arith.constant dense<0.000000e+00> : vector<16x64xf32>
      %231 = tpu.matmul %228, %230, %cst_87 {dimension_numbers = #tpu.dot_dimension_numbers<[1], [0], [0], [1], [0, 0, 1, 1], [], []>} : vector<16x512xbf16>, vector<512x64xbf16>, vector<16x64xf32> -> vector<16x64xf32>
      %232 = arith.addf %218, %231 : vector<16x64xf32>
      %c0_88 = arith.constant 0 : index
      %c0_89 = arith.constant 0 : index
      %c512 = arith.constant 512 : index
      %233 = vector.load %arg19[%c0_88, %c0_89, %c512] : memref<1x64x2048xbf16, #tpu.memory_space<vmem>>, vector<1x64x512xbf16>
      %234 = vector.shape_cast %233 : vector<1x64x512xbf16> to vector<64x512xbf16>
      %cst_90 = arith.constant dense<0.000000e+00> : vector<16x512xf32>
      %235 = tpu.matmul %217, %234, %cst_90 {dimension_numbers = #tpu.dot_dimension_numbers<[1], [0], [0], [1], [0, 0, 1, 1], [], []>} : vector<16x64xbf16>, vector<64x512xbf16>, vector<16x512xf32> -> vector<16x512xf32>
      %c0_91 = arith.constant 0 : index
      %c0_92 = arith.constant 0 : index
      %c512_93 = arith.constant 512 : index
      %236 = vector.load %arg20[%c0_91, %c0_92, %c512_93] : memref<1x1x2048xf32, #tpu.memory_space<vmem>>, vector<1x1x512xf32>
      %237 = vector.shape_cast %236 : vector<1x1x512xf32> to vector<1x512xf32>
      %238 = vector.broadcast %237 : vector<1x512xf32> to vector<16x512xf32>
      %239 = arith.addf %235, %238 : vector<16x512xf32>
      %cst_94 = arith.constant 0.000000e+00 : f32
      %240 = vector.broadcast %cst_94 : f32 to vector<16x512xf32>
      %241 = arith.maximumf %239, %240 : vector<16x512xf32>
      %242 = arith.truncf %241 : vector<16x512xf32> to vector<16x512xbf16>
      %c0_95 = arith.constant 0 : index
      %c512_96 = arith.constant 512 : index
      %c0_97 = arith.constant 0 : index
      %243 = vector.load %arg21[%c0_95, %c512_96, %c0_97] : memref<1x2048x64xbf16, #tpu.memory_space<vmem>>, vector<1x512x64xbf16>
      %244 = vector.shape_cast %243 : vector<1x512x64xbf16> to vector<512x64xbf16>
      %cst_98 = arith.constant dense<0.000000e+00> : vector<16x64xf32>
      %245 = tpu.matmul %242, %244, %cst_98 {dimension_numbers = #tpu.dot_dimension_numbers<[1], [0], [0], [1], [0, 0, 1, 1], [], []>} : vector<16x512xbf16>, vector<512x64xbf16>, vector<16x64xf32> -> vector<16x64xf32>
      %246 = arith.addf %232, %245 : vector<16x64xf32>
      %c0_99 = arith.constant 0 : index
      %c0_100 = arith.constant 0 : index
      %c1024 = arith.constant 1024 : index
      %247 = vector.load %arg19[%c0_99, %c0_100, %c1024] : memref<1x64x2048xbf16, #tpu.memory_space<vmem>>, vector<1x64x512xbf16>
      %248 = vector.shape_cast %247 : vector<1x64x512xbf16> to vector<64x512xbf16>
      %cst_101 = arith.constant dense<0.000000e+00> : vector<16x512xf32>
      %249 = tpu.matmul %217, %248, %cst_101 {dimension_numbers = #tpu.dot_dimension_numbers<[1], [0], [0], [1], [0, 0, 1, 1], [], []>} : vector<16x64xbf16>, vector<64x512xbf16>, vector<16x512xf32> -> vector<16x512xf32>
      %c0_102 = arith.constant 0 : index
      %c0_103 = arith.constant 0 : index
      %c1024_104 = arith.constant 1024 : index
      %250 = vector.load %arg20[%c0_102, %c0_103, %c1024_104] : memref<1x1x2048xf32, #tpu.memory_space<vmem>>, vector<1x1x512xf32>
      %251 = vector.shape_cast %250 : vector<1x1x512xf32> to vector<1x512xf32>
      %252 = vector.broadcast %251 : vector<1x512xf32> to vector<16x512xf32>
      %253 = arith.addf %249, %252 : vector<16x512xf32>
      %cst_105 = arith.constant 0.000000e+00 : f32
      %254 = vector.broadcast %cst_105 : f32 to vector<16x512xf32>
      %255 = arith.maximumf %253, %254 : vector<16x512xf32>
      %256 = arith.truncf %255 : vector<16x512xf32> to vector<16x512xbf16>
      %c0_106 = arith.constant 0 : index
      %c1024_107 = arith.constant 1024 : index
      %c0_108 = arith.constant 0 : index
      %257 = vector.load %arg21[%c0_106, %c1024_107, %c0_108] : memref<1x2048x64xbf16, #tpu.memory_space<vmem>>, vector<1x512x64xbf16>
      %258 = vector.shape_cast %257 : vector<1x512x64xbf16> to vector<512x64xbf16>
      %cst_109 = arith.constant dense<0.000000e+00> : vector<16x64xf32>
      %259 = tpu.matmul %256, %258, %cst_109 {dimension_numbers = #tpu.dot_dimension_numbers<[1], [0], [0], [1], [0, 0, 1, 1], [], []>} : vector<16x512xbf16>, vector<512x64xbf16>, vector<16x64xf32> -> vector<16x64xf32>
      %260 = arith.addf %246, %259 : vector<16x64xf32>
      %c0_110 = arith.constant 0 : index
      %c0_111 = arith.constant 0 : index
      %c1536 = arith.constant 1536 : index
      %261 = vector.load %arg19[%c0_110, %c0_111, %c1536] : memref<1x64x2048xbf16, #tpu.memory_space<vmem>>, vector<1x64x512xbf16>
      %262 = vector.shape_cast %261 : vector<1x64x512xbf16> to vector<64x512xbf16>
      %cst_112 = arith.constant dense<0.000000e+00> : vector<16x512xf32>
      %263 = tpu.matmul %217, %262, %cst_112 {dimension_numbers = #tpu.dot_dimension_numbers<[1], [0], [0], [1], [0, 0, 1, 1], [], []>} : vector<16x64xbf16>, vector<64x512xbf16>, vector<16x512xf32> -> vector<16x512xf32>
      %c0_113 = arith.constant 0 : index
      %c0_114 = arith.constant 0 : index
      %c1536_115 = arith.constant 1536 : index
      %264 = vector.load %arg20[%c0_113, %c0_114, %c1536_115] : memref<1x1x2048xf32, #tpu.memory_space<vmem>>, vector<1x1x512xf32>
      %265 = vector.shape_cast %264 : vector<1x1x512xf32> to vector<1x512xf32>
      %266 = vector.broadcast %265 : vector<1x512xf32> to vector<16x512xf32>
      %267 = arith.addf %263, %266 : vector<16x512xf32>
      %cst_116 = arith.constant 0.000000e+00 : f32
      %268 = vector.broadcast %cst_116 : f32 to vector<16x512xf32>
      %269 = arith.maximumf %267, %268 : vector<16x512xf32>
      %270 = arith.truncf %269 : vector<16x512xf32> to vector<16x512xbf16>
      %c0_117 = arith.constant 0 : index
      %c1536_118 = arith.constant 1536 : index
      %c0_119 = arith.constant 0 : index
      %271 = vector.load %arg21[%c0_117, %c1536_118, %c0_119] : memref<1x2048x64xbf16, #tpu.memory_space<vmem>>, vector<1x512x64xbf16>
      %272 = vector.shape_cast %271 : vector<1x512x64xbf16> to vector<512x64xbf16>
      %cst_120 = arith.constant dense<0.000000e+00> : vector<16x64xf32>
      %273 = tpu.matmul %270, %272, %cst_120 {dimension_numbers = #tpu.dot_dimension_numbers<[1], [0], [0], [1], [0, 0, 1, 1], [], []>} : vector<16x512xbf16>, vector<512x64xbf16>, vector<16x64xf32> -> vector<16x64xf32>
      %274 = arith.addf %260, %273 : vector<16x64xf32>
      %c0_121 = arith.constant 0 : index
      %c0_122 = arith.constant 0 : index
      %c0_123 = arith.constant 0 : index
      %275 = vector.load %arg22[%c0_121, %c0_122, %c0_123] : memref<1x1x64xf32, #tpu.memory_space<vmem>>, vector<1x1x64xf32>
      %276 = vector.shape_cast %275 : vector<1x1x64xf32> to vector<1x64xf32>
      %277 = vector.broadcast %276 : vector<1x64xf32> to vector<16x64xf32>
      %278 = arith.addf %274, %277 : vector<16x64xf32>
      %279 = arith.addf %216, %278 : vector<16x64xf32>
      %c0_124 = arith.constant 0 : index
      %c0_125 = arith.constant 0 : index
      %c0_126 = arith.constant 0 : index
      %280 = vector.load %arg23[%c0_124, %c0_125, %c0_126] : memref<1x1x64xf32, #tpu.memory_space<vmem>>, vector<1x1x64xf32>
      %281 = vector.shape_cast %280 : vector<1x1x64xf32> to vector<1x64xf32>
      %c0_127 = arith.constant 0 : index
      %c0_128 = arith.constant 0 : index
      %c0_129 = arith.constant 0 : index
      %282 = vector.load %arg24[%c0_127, %c0_128, %c0_129] : memref<1x1x64xf32, #tpu.memory_space<vmem>>, vector<1x1x64xf32>
      %283 = vector.shape_cast %282 : vector<1x1x64xf32> to vector<1x64xf32>
      %cst_130 = arith.constant dense<0.000000e+00> : vector<16xf32>
      %284 = vector.multi_reduction <add>, %279, %cst_130 [1] : vector<16x64xf32> to vector<16xf32>
      %285 = vector.shape_cast %284 : vector<16xf32> to vector<16x1xf32>
      %cst_131 = arith.constant 6.400000e+01 : f32
      %286 = vector.broadcast %cst_131 : f32 to vector<16x1xf32>
      %287 = arith.divf %285, %286 : vector<16x1xf32>
      %288 = vector.broadcast %287 : vector<16x1xf32> to vector<16x64xf32>
      %289 = arith.subf %279, %288 : vector<16x64xf32>
      %290 = arith.mulf %289, %289 : vector<16x64xf32>
      %cst_132 = arith.constant dense<0.000000e+00> : vector<16xf32>
      %291 = vector.multi_reduction <add>, %290, %cst_132 [1] : vector<16x64xf32> to vector<16xf32>
      %292 = vector.shape_cast %291 : vector<16xf32> to vector<16x1xf32>
      %cst_133 = arith.constant 6.400000e+01 : f32
      %293 = vector.broadcast %cst_133 : f32 to vector<16x1xf32>
      %294 = arith.divf %292, %293 : vector<16x1xf32>
      %cst_134 = arith.constant 9.99999974E-6 : f32
      %295 = vector.broadcast %cst_134 : f32 to vector<16x1xf32>
      %296 = arith.addf %294, %295 : vector<16x1xf32>
      %297 = math.rsqrt %296 : vector<16x1xf32>
      %298 = vector.broadcast %297 : vector<16x1xf32> to vector<16x64xf32>
      %299 = arith.mulf %289, %298 : vector<16x64xf32>
      %300 = vector.broadcast %281 : vector<1x64xf32> to vector<16x64xf32>
      %301 = arith.mulf %299, %300 : vector<16x64xf32>
      %302 = vector.broadcast %283 : vector<1x64xf32> to vector<16x64xf32>
      %303 = arith.addf %301, %302 : vector<16x64xf32>
      %c0_135 = arith.constant 0 : index
      %c0_136 = arith.constant 0 : index
      %304 = vector.load %arg32[%c0_135, %c0_136] : memref<16x64xf32, #tpu.memory_space<vmem>>, vector<16x64xf32>
      tpu.vector_store %arg32[%c0_135, %c0_136], %303 {strides = array<i32>} : memref<16x64xf32, #tpu.memory_space<vmem>>, vector<16x64xf32>,
    } else {
    }
    %c6_i32_4 = arith.constant 6 : i32
    %9 = arith.cmpi sge, %arg0, %c6_i32_4 : i32
    %10 = arith.extui %9 : i1 to i32
    %c0_i32_5 = arith.constant 0 : i32
    %11 = arith.cmpi ne, %10, %c0_i32_5 : i32
    scf.if %11 {
      %c0 = arith.constant 0 : index
      %c0_7 = arith.constant 0 : index
      %15 = vector.load %arg33[%c0, %c0_7] : memref<16x64xf32, #tpu.memory_space<vmem>>, vector<16x64xf32>
      %c0_8 = arith.constant 0 : index
      %c0_9 = arith.constant 0 : index
      %c0_10 = arith.constant 0 : index
      %16 = vector.load %arg4[%c0_8, %c0_9, %c0_10] : memref<2x8x8xf32, #tpu.memory_space<vmem>>, vector<2x8x8xf32>
      %c0_11 = arith.constant 0 : index
      %c0_12 = arith.constant 0 : index
      %c0_13 = arith.constant 0 : index
      %17 = vector.load %arg5[%c0_11, %c0_12, %c0_13] : memref<1x64x192xbf16, #tpu.memory_space<vmem>>, vector<1x64x192xbf16>
      %18 = vector.shape_cast %17 : vector<1x64x192xbf16> to vector<64x192xbf16>
      %c0_14 = arith.constant 0 : index
      %c0_15 = arith.constant 0 : index
      %c0_16 = arith.constant 0 : index
      %19 = vector.load %arg6[%c0_14, %c0_15, %c0_16] : memref<1x1x192xf32, #tpu.memory_space<vmem>>, vector<1x1x192xf32>
      %20 = vector.shape_cast %19 : vector<1x1x192xf32> to vector<1x192xf32>
      %c0_17 = arith.constant 0 : index
      %c0_18 = arith.constant 0 : index
      %c0_19 = arith.constant 0 : index
      %21 = vector.load %arg7[%c0_17, %c0_18, %c0_19] : memref<1x64x64xf32, #tpu.memory_space<vmem>>, vector<1x64x64xf32>
      %22 = vector.shape_cast %21 : vector<1x64x64xf32> to vector<64x64xf32>
      %c0_20 = arith.constant 0 : index
      %c0_21 = arith.constant 0 : index
      %c0_22 = arith.constant 0 : index
      %23 = vector.load %arg8[%c0_20, %c0_21, %c0_22] : memref<1x1x64xf32, #tpu.memory_space<vmem>>, vector<1x1x64xf32>
      %24 = vector.shape_cast %23 : vector<1x1x64xf32> to vector<1x64xf32>
      %25 = arith.truncf %15 : vector<16x64xf32> to vector<16x64xbf16>
      %cst = arith.constant dense<0.000000e+00> : vector<16x192xf32>
      %26 = tpu.matmul %25, %18, %cst {dimension_numbers = #tpu.dot_dimension_numbers<[1], [0], [0], [1], [0, 0, 1, 1], [], []>} : vector<16x64xbf16>, vector<64x192xbf16>, vector<16x192xf32> -> vector<16x192xf32>
      %27 = vector.broadcast %20 : vector<1x192xf32> to vector<16x192xf32>
      %28 = arith.addf %26, %27 : vector<16x192xf32>
      %29 = vector.extract_strided_slice %28 {offsets = [0, 0], sizes = [16, 64], strides = [1, 1]} : vector<16x192xf32> to vector<16x64xf32>
      %30 = vector.extract_strided_slice %28 {offsets = [0, 64], sizes = [16, 64], strides = [1, 1]} : vector<16x192xf32> to vector<16x64xf32>
      %31 = vector.extract_strided_slice %28 {offsets = [0, 128], sizes = [16, 64], strides = [1, 1]} : vector<16x192xf32> to vector<16x64xf32>
      %32 = vector.shape_cast %29 : vector<16x64xf32> to vector<2x8x64xf32>
      %cst_23 = arith.constant 0.353553385 : f32
      %33 = vector.broadcast %cst_23 : f32 to vector<2x8x64xf32>
      %34 = arith.mulf %32, %33 : vector<2x8x64xf32>
      %35 = vector.shape_cast %30 : vector<16x64xf32> to vector<2x8x64xf32>
      %36 = vector.shape_cast %31 : vector<16x64xf32> to vector<2x8x64xf32>
      %37 = vector.extract_strided_slice %34 {offsets = [0, 0, 0], sizes = [2, 8, 8], strides = [1, 1, 1]} : vector<2x8x64xf32> to vector<2x8x8xf32>
      %38 = vector.extract_strided_slice %35 {offsets = [0, 0, 0], sizes = [2, 8, 8], strides = [1, 1, 1]} : vector<2x8x64xf32> to vector<2x8x8xf32>
      "tpu.trace_start"() <{level = 10 : i32, message = "bqd,bkd->bqk"}> : () -> ()
      %cst_24 = arith.constant dense<0.000000e+00> : vector<2x8x8xf32>
      %39 = tpu.matmul %37, %38, %cst_24 {dimension_numbers = #tpu.dot_dimension_numbers<[2], [2], [1], [1], [0, 0, 0, 1, 1, 1], [0], [0]>} : vector<2x8x8xf32>, vector<2x8x8xf32>, vector<2x8x8xf32> -> vector<2x8x8xf32>
      "tpu.trace_stop"() : () -> ()
      %40 = arith.addf %39, %16 : vector<2x8x8xf32>
      %cst_25 = arith.constant dense<0xFF800000> : vector<2x8xf32>
      %41 = vector.multi_reduction <maximumf>, %40, %cst_25 [2] : vector<2x8x8xf32> to vector<2x8xf32>
      %42 = vector.shape_cast %41 : vector<2x8xf32> to vector<2x8x1xf32>
      %43 = vector.broadcast %42 : vector<2x8x1xf32> to vector<2x8x8xf32>
      %44 = arith.subf %40, %43 : vector<2x8x8xf32>
      %45 = math.exp %44 : vector<2x8x8xf32>
      %cst_26 = arith.constant dense<0.000000e+00> : vector<2x8xf32>
      %46 = vector.multi_reduction <add>, %45, %cst_26 [2] : vector<2x8x8xf32> to vector<2x8xf32>
      %47 = vector.shape_cast %46 : vector<2x8xf32> to vector<2x8x1xf32>
      %48 = vector.broadcast %47 : vector<2x8x1xf32> to vector<2x8x8xf32>
      %49 = arith.divf %45, %48 : vector<2x8x8xf32>
      %50 = vector.extract_strided_slice %36 {offsets = [0, 0, 0], sizes = [2, 8, 8], strides = [1, 1, 1]} : vector<2x8x64xf32> to vector<2x8x8xf32>
      "tpu.trace_start"() <{level = 10 : i32, message = "bqk,bkd->bqd"}> : () -> ()
      %cst_27 = arith.constant dense<0.000000e+00> : vector<2x8x8xf32>
      %51 = tpu.matmul %49, %50, %cst_27 {dimension_numbers = #tpu.dot_dimension_numbers<[2], [1], [1], [2], [0, 0, 0, 1, 1, 2], [0], [0]>} : vector<2x8x8xf32>, vector<2x8x8xf32>, vector<2x8x8xf32> -> vector<2x8x8xf32>
      "tpu.trace_stop"() : () -> ()
      %52 = vector.shape_cast %51 : vector<2x8x8xf32> to vector<16x8xf32>
      %53 = vector.extract_strided_slice %22 {offsets = [0, 0], sizes = [8, 64], strides = [1, 1]} : vector<64x64xf32> to vector<8x64xf32>
      %cst_28 = arith.constant dense<0.000000e+00> : vector<16x64xf32>
      %54 = tpu.matmul %52, %53, %cst_28 {dimension_numbers = #tpu.dot_dimension_numbers<[1], [0], [0], [1], [0, 0, 1, 1], [], []>} : vector<16x8xf32>, vector<8x64xf32>, vector<16x64xf32> -> vector<16x64xf32>
      %55 = vector.extract_strided_slice %34 {offsets = [0, 0, 8], sizes = [2, 8, 8], strides = [1, 1, 1]} : vector<2x8x64xf32> to vector<2x8x8xf32>
      %56 = vector.extract_strided_slice %35 {offsets = [0, 0, 8], sizes = [2, 8, 8], strides = [1, 1, 1]} : vector<2x8x64xf32> to vector<2x8x8xf32>
      "tpu.trace_start"() <{level = 10 : i32, message = "bqd,bkd->bqk"}> : () -> ()
      %cst_29 = arith.constant dense<0.000000e+00> : vector<2x8x8xf32>
      %57 = tpu.matmul %55, %56, %cst_29 {dimension_numbers = #tpu.dot_dimension_numbers<[2], [2], [1], [1], [0, 0, 0, 1, 1, 1], [0], [0]>} : vector<2x8x8xf32>, vector<2x8x8xf32>, vector<2x8x8xf32> -> vector<2x8x8xf32>
      "tpu.trace_stop"() : () -> ()
      %58 = arith.addf %57, %16 : vector<2x8x8xf32>
      %cst_30 = arith.constant dense<0xFF800000> : vector<2x8xf32>
      %59 = vector.multi_reduction <maximumf>, %58, %cst_30 [2] : vector<2x8x8xf32> to vector<2x8xf32>
      %60 = vector.shape_cast %59 : vector<2x8xf32> to vector<2x8x1xf32>
      %61 = vector.broadcast %60 : vector<2x8x1xf32> to vector<2x8x8xf32>
      %62 = arith.subf %58, %61 : vector<2x8x8xf32>
      %63 = math.exp %62 : vector<2x8x8xf32>
      %cst_31 = arith.constant dense<0.000000e+00> : vector<2x8xf32>
      %64 = vector.multi_reduction <add>, %63, %cst_31 [2] : vector<2x8x8xf32> to vector<2x8xf32>
      %65 = vector.shape_cast %64 : vector<2x8xf32> to vector<2x8x1xf32>
      %66 = vector.broadcast %65 : vector<2x8x1xf32> to vector<2x8x8xf32>
      %67 = arith.divf %63, %66 : vector<2x8x8xf32>
      %68 = vector.extract_strided_slice %36 {offsets = [0, 0, 8], sizes = [2, 8, 8], strides = [1, 1, 1]} : vector<2x8x64xf32> to vector<2x8x8xf32>
      "tpu.trace_start"() <{level = 10 : i32, message = "bqk,bkd->bqd"}> : () -> ()
      %cst_32 = arith.constant dense<0.000000e+00> : vector<2x8x8xf32>
      %69 = tpu.matmul %67, %68, %cst_32 {dimension_numbers = #tpu.dot_dimension_numbers<[2], [1], [1], [2], [0, 0, 0, 1, 1, 2], [0], [0]>} : vector<2x8x8xf32>, vector<2x8x8xf32>, vector<2x8x8xf32> -> vector<2x8x8xf32>
      "tpu.trace_stop"() : () -> ()
      %70 = vector.shape_cast %69 : vector<2x8x8xf32> to vector<16x8xf32>
      %71 = vector.extract_strided_slice %22 {offsets = [8, 0], sizes = [8, 64], strides = [1, 1]} : vector<64x64xf32> to vector<8x64xf32>
      %cst_33 = arith.constant dense<0.000000e+00> : vector<16x64xf32>
      %72 = tpu.matmul %70, %71, %cst_33 {dimension_numbers = #tpu.dot_dimension_numbers<[1], [0], [0], [1], [0, 0, 1, 1], [], []>} : vector<16x8xf32>, vector<8x64xf32>, vector<16x64xf32> -> vector<16x64xf32>
      %73 = arith.addf %54, %72 : vector<16x64xf32>
      %74 = vector.extract_strided_slice %34 {offsets = [0, 0, 16], sizes = [2, 8, 8], strides = [1, 1, 1]} : vector<2x8x64xf32> to vector<2x8x8xf32>
      %75 = vector.extract_strided_slice %35 {offsets = [0, 0, 16], sizes = [2, 8, 8], strides = [1, 1, 1]} : vector<2x8x64xf32> to vector<2x8x8xf32>
      "tpu.trace_start"() <{level = 10 : i32, message = "bqd,bkd->bqk"}> : () -> ()
      %cst_34 = arith.constant dense<0.000000e+00> : vector<2x8x8xf32>
      %76 = tpu.matmul %74, %75, %cst_34 {dimension_numbers = #tpu.dot_dimension_numbers<[2], [2], [1], [1], [0, 0, 0, 1, 1, 1], [0], [0]>} : vector<2x8x8xf32>, vector<2x8x8xf32>, vector<2x8x8xf32> -> vector<2x8x8xf32>
      "tpu.trace_stop"() : () -> ()
      %77 = arith.addf %76, %16 : vector<2x8x8xf32>
      %cst_35 = arith.constant dense<0xFF800000> : vector<2x8xf32>
      %78 = vector.multi_reduction <maximumf>, %77, %cst_35 [2] : vector<2x8x8xf32> to vector<2x8xf32>
      %79 = vector.shape_cast %78 : vector<2x8xf32> to vector<2x8x1xf32>
      %80 = vector.broadcast %79 : vector<2x8x1xf32> to vector<2x8x8xf32>
      %81 = arith.subf %77, %80 : vector<2x8x8xf32>
      %82 = math.exp %81 : vector<2x8x8xf32>
      %cst_36 = arith.constant dense<0.000000e+00> : vector<2x8xf32>
      %83 = vector.multi_reduction <add>, %82, %cst_36 [2] : vector<2x8x8xf32> to vector<2x8xf32>
      %84 = vector.shape_cast %83 : vector<2x8xf32> to vector<2x8x1xf32>
      %85 = vector.broadcast %84 : vector<2x8x1xf32> to vector<2x8x8xf32>
      %86 = arith.divf %82, %85 : vector<2x8x8xf32>
      %87 = vector.extract_strided_slice %36 {offsets = [0, 0, 16], sizes = [2, 8, 8], strides = [1, 1, 1]} : vector<2x8x64xf32> to vector<2x8x8xf32>
      "tpu.trace_start"() <{level = 10 : i32, message = "bqk,bkd->bqd"}> : () -> ()
      %cst_37 = arith.constant dense<0.000000e+00> : vector<2x8x8xf32>
      %88 = tpu.matmul %86, %87, %cst_37 {dimension_numbers = #tpu.dot_dimension_numbers<[2], [1], [1], [2], [0, 0, 0, 1, 1, 2], [0], [0]>} : vector<2x8x8xf32>, vector<2x8x8xf32>, vector<2x8x8xf32> -> vector<2x8x8xf32>
      "tpu.trace_stop"() : () -> ()
      %89 = vector.shape_cast %88 : vector<2x8x8xf32> to vector<16x8xf32>
      %90 = vector.extract_strided_slice %22 {offsets = [16, 0], sizes = [8, 64], strides = [1, 1]} : vector<64x64xf32> to vector<8x64xf32>
      %cst_38 = arith.constant dense<0.000000e+00> : vector<16x64xf32>
      %91 = tpu.matmul %89, %90, %cst_38 {dimension_numbers = #tpu.dot_dimension_numbers<[1], [0], [0], [1], [0, 0, 1, 1], [], []>} : vector<16x8xf32>, vector<8x64xf32>, vector<16x64xf32> -> vector<16x64xf32>
      %92 = arith.addf %73, %91 : vector<16x64xf32>
      %93 = vector.extract_strided_slice %34 {offsets = [0, 0, 24], sizes = [2, 8, 8], strides = [1, 1, 1]} : vector<2x8x64xf32> to vector<2x8x8xf32>
      %94 = vector.extract_strided_slice %35 {offsets = [0, 0, 24], sizes = [2, 8, 8], strides = [1, 1, 1]} : vector<2x8x64xf32> to vector<2x8x8xf32>
      "tpu.trace_start"() <{level = 10 : i32, message = "bqd,bkd->bqk"}> : () -> ()
      %cst_39 = arith.constant dense<0.000000e+00> : vector<2x8x8xf32>
      %95 = tpu.matmul %93, %94, %cst_39 {dimension_numbers = #tpu.dot_dimension_numbers<[2], [2], [1], [1], [0, 0, 0, 1, 1, 1], [0], [0]>} : vector<2x8x8xf32>, vector<2x8x8xf32>, vector<2x8x8xf32> -> vector<2x8x8xf32>
      "tpu.trace_stop"() : () -> ()
      %96 = arith.addf %95, %16 : vector<2x8x8xf32>
      %cst_40 = arith.constant dense<0xFF800000> : vector<2x8xf32>
      %97 = vector.multi_reduction <maximumf>, %96, %cst_40 [2] : vector<2x8x8xf32> to vector<2x8xf32>
      %98 = vector.shape_cast %97 : vector<2x8xf32> to vector<2x8x1xf32>
      %99 = vector.broadcast %98 : vector<2x8x1xf32> to vector<2x8x8xf32>
      %100 = arith.subf %96, %99 : vector<2x8x8xf32>
      %101 = math.exp %100 : vector<2x8x8xf32>
      %cst_41 = arith.constant dense<0.000000e+00> : vector<2x8xf32>
      %102 = vector.multi_reduction <add>, %101, %cst_41 [2] : vector<2x8x8xf32> to vector<2x8xf32>
      %103 = vector.shape_cast %102 : vector<2x8xf32> to vector<2x8x1xf32>
      %104 = vector.broadcast %103 : vector<2x8x1xf32> to vector<2x8x8xf32>
      %105 = arith.divf %101, %104 : vector<2x8x8xf32>
      %106 = vector.extract_strided_slice %36 {offsets = [0, 0, 24], sizes = [2, 8, 8], strides = [1, 1, 1]} : vector<2x8x64xf32> to vector<2x8x8xf32>
      "tpu.trace_start"() <{level = 10 : i32, message = "bqk,bkd->bqd"}> : () -> ()
      %cst_42 = arith.constant dense<0.000000e+00> : vector<2x8x8xf32>
      %107 = tpu.matmul %105, %106, %cst_42 {dimension_numbers = #tpu.dot_dimension_numbers<[2], [1], [1], [2], [0, 0, 0, 1, 1, 2], [0], [0]>} : vector<2x8x8xf32>, vector<2x8x8xf32>, vector<2x8x8xf32> -> vector<2x8x8xf32>
      "tpu.trace_stop"() : () -> ()
      %108 = vector.shape_cast %107 : vector<2x8x8xf32> to vector<16x8xf32>
      %109 = vector.extract_strided_slice %22 {offsets = [24, 0], sizes = [8, 64], strides = [1, 1]} : vector<64x64xf32> to vector<8x64xf32>
      %cst_43 = arith.constant dense<0.000000e+00> : vector<16x64xf32>
      %110 = tpu.matmul %108, %109, %cst_43 {dimension_numbers = #tpu.dot_dimension_numbers<[1], [0], [0], [1], [0, 0, 1, 1], [], []>} : vector<16x8xf32>, vector<8x64xf32>, vector<16x64xf32> -> vector<16x64xf32>
      %111 = arith.addf %92, %110 : vector<16x64xf32>
      %112 = vector.extract_strided_slice %34 {offsets = [0, 0, 32], sizes = [2, 8, 8], strides = [1, 1, 1]} : vector<2x8x64xf32> to vector<2x8x8xf32>
      %113 = vector.extract_strided_slice %35 {offsets = [0, 0, 32], sizes = [2, 8, 8], strides = [1, 1, 1]} : vector<2x8x64xf32> to vector<2x8x8xf32>
      "tpu.trace_start"() <{level = 10 : i32, message = "bqd,bkd->bqk"}> : () -> ()
      %cst_44 = arith.constant dense<0.000000e+00> : vector<2x8x8xf32>
      %114 = tpu.matmul %112, %113, %cst_44 {dimension_numbers = #tpu.dot_dimension_numbers<[2], [2], [1], [1], [0, 0, 0, 1, 1, 1], [0], [0]>} : vector<2x8x8xf32>, vector<2x8x8xf32>, vector<2x8x8xf32> -> vector<2x8x8xf32>
      "tpu.trace_stop"() : () -> ()
      %115 = arith.addf %114, %16 : vector<2x8x8xf32>
      %cst_45 = arith.constant dense<0xFF800000> : vector<2x8xf32>
      %116 = vector.multi_reduction <maximumf>, %115, %cst_45 [2] : vector<2x8x8xf32> to vector<2x8xf32>
      %117 = vector.shape_cast %116 : vector<2x8xf32> to vector<2x8x1xf32>
      %118 = vector.broadcast %117 : vector<2x8x1xf32> to vector<2x8x8xf32>
      %119 = arith.subf %115, %118 : vector<2x8x8xf32>
      %120 = math.exp %119 : vector<2x8x8xf32>
      %cst_46 = arith.constant dense<0.000000e+00> : vector<2x8xf32>
      %121 = vector.multi_reduction <add>, %120, %cst_46 [2] : vector<2x8x8xf32> to vector<2x8xf32>
      %122 = vector.shape_cast %121 : vector<2x8xf32> to vector<2x8x1xf32>
      %123 = vector.broadcast %122 : vector<2x8x1xf32> to vector<2x8x8xf32>
      %124 = arith.divf %120, %123 : vector<2x8x8xf32>
      %125 = vector.extract_strided_slice %36 {offsets = [0, 0, 32], sizes = [2, 8, 8], strides = [1, 1, 1]} : vector<2x8x64xf32> to vector<2x8x8xf32>
      "tpu.trace_start"() <{level = 10 : i32, message = "bqk,bkd->bqd"}> : () -> ()
      %cst_47 = arith.constant dense<0.000000e+00> : vector<2x8x8xf32>
      %126 = tpu.matmul %124, %125, %cst_47 {dimension_numbers = #tpu.dot_dimension_numbers<[2], [1], [1], [2], [0, 0, 0, 1, 1, 2], [0], [0]>} : vector<2x8x8xf32>, vector<2x8x8xf32>, vector<2x8x8xf32> -> vector<2x8x8xf32>
      "tpu.trace_stop"() : () -> ()
      %127 = vector.shape_cast %126 : vector<2x8x8xf32> to vector<16x8xf32>
      %128 = vector.extract_strided_slice %22 {offsets = [32, 0], sizes = [8, 64], strides = [1, 1]} : vector<64x64xf32> to vector<8x64xf32>
      %cst_48 = arith.constant dense<0.000000e+00> : vector<16x64xf32>
      %129 = tpu.matmul %127, %128, %cst_48 {dimension_numbers = #tpu.dot_dimension_numbers<[1], [0], [0], [1], [0, 0, 1, 1], [], []>} : vector<16x8xf32>, vector<8x64xf32>, vector<16x64xf32> -> vector<16x64xf32>
      %130 = arith.addf %111, %129 : vector<16x64xf32>
      %131 = vector.extract_strided_slice %34 {offsets = [0, 0, 40], sizes = [2, 8, 8], strides = [1, 1, 1]} : vector<2x8x64xf32> to vector<2x8x8xf32>
      %132 = vector.extract_strided_slice %35 {offsets = [0, 0, 40], sizes = [2, 8, 8], strides = [1, 1, 1]} : vector<2x8x64xf32> to vector<2x8x8xf32>
      "tpu.trace_start"() <{level = 10 : i32, message = "bqd,bkd->bqk"}> : () -> ()
      %cst_49 = arith.constant dense<0.000000e+00> : vector<2x8x8xf32>
      %133 = tpu.matmul %131, %132, %cst_49 {dimension_numbers = #tpu.dot_dimension_numbers<[2], [2], [1], [1], [0, 0, 0, 1, 1, 1], [0], [0]>} : vector<2x8x8xf32>, vector<2x8x8xf32>, vector<2x8x8xf32> -> vector<2x8x8xf32>
      "tpu.trace_stop"() : () -> ()
      %134 = arith.addf %133, %16 : vector<2x8x8xf32>
      %cst_50 = arith.constant dense<0xFF800000> : vector<2x8xf32>
      %135 = vector.multi_reduction <maximumf>, %134, %cst_50 [2] : vector<2x8x8xf32> to vector<2x8xf32>
      %136 = vector.shape_cast %135 : vector<2x8xf32> to vector<2x8x1xf32>
      %137 = vector.broadcast %136 : vector<2x8x1xf32> to vector<2x8x8xf32>
      %138 = arith.subf %134, %137 : vector<2x8x8xf32>
      %139 = math.exp %138 : vector<2x8x8xf32>
      %cst_51 = arith.constant dense<0.000000e+00> : vector<2x8xf32>
      %140 = vector.multi_reduction <add>, %139, %cst_51 [2] : vector<2x8x8xf32> to vector<2x8xf32>
      %141 = vector.shape_cast %140 : vector<2x8xf32> to vector<2x8x1xf32>
      %142 = vector.broadcast %141 : vector<2x8x1xf32> to vector<2x8x8xf32>
      %143 = arith.divf %139, %142 : vector<2x8x8xf32>
      %144 = vector.extract_strided_slice %36 {offsets = [0, 0, 40], sizes = [2, 8, 8], strides = [1, 1, 1]} : vector<2x8x64xf32> to vector<2x8x8xf32>
      "tpu.trace_start"() <{level = 10 : i32, message = "bqk,bkd->bqd"}> : () -> ()
      %cst_52 = arith.constant dense<0.000000e+00> : vector<2x8x8xf32>
      %145 = tpu.matmul %143, %144, %cst_52 {dimension_numbers = #tpu.dot_dimension_numbers<[2], [1], [1], [2], [0, 0, 0, 1, 1, 2], [0], [0]>} : vector<2x8x8xf32>, vector<2x8x8xf32>, vector<2x8x8xf32> -> vector<2x8x8xf32>
      "tpu.trace_stop"() : () -> ()
      %146 = vector.shape_cast %145 : vector<2x8x8xf32> to vector<16x8xf32>
      %147 = vector.extract_strided_slice %22 {offsets = [40, 0], sizes = [8, 64], strides = [1, 1]} : vector<64x64xf32> to vector<8x64xf32>
      %cst_53 = arith.constant dense<0.000000e+00> : vector<16x64xf32>
      %148 = tpu.matmul %146, %147, %cst_53 {dimension_numbers = #tpu.dot_dimension_numbers<[1], [0], [0], [1], [0, 0, 1, 1], [], []>} : vector<16x8xf32>, vector<8x64xf32>, vector<16x64xf32> -> vector<16x64xf32>
      %149 = arith.addf %130, %148 : vector<16x64xf32>
      %150 = vector.extract_strided_slice %34 {offsets = [0, 0, 48], sizes = [2, 8, 8], strides = [1, 1, 1]} : vector<2x8x64xf32> to vector<2x8x8xf32>
      %151 = vector.extract_strided_slice %35 {offsets = [0, 0, 48], sizes = [2, 8, 8], strides = [1, 1, 1]} : vector<2x8x64xf32> to vector<2x8x8xf32>
      "tpu.trace_start"() <{level = 10 : i32, message = "bqd,bkd->bqk"}> : () -> ()
      %cst_54 = arith.constant dense<0.000000e+00> : vector<2x8x8xf32>
      %152 = tpu.matmul %150, %151, %cst_54 {dimension_numbers = #tpu.dot_dimension_numbers<[2], [2], [1], [1], [0, 0, 0, 1, 1, 1], [0], [0]>} : vector<2x8x8xf32>, vector<2x8x8xf32>, vector<2x8x8xf32> -> vector<2x8x8xf32>
      "tpu.trace_stop"() : () -> ()
      %153 = arith.addf %152, %16 : vector<2x8x8xf32>
      %cst_55 = arith.constant dense<0xFF800000> : vector<2x8xf32>
      %154 = vector.multi_reduction <maximumf>, %153, %cst_55 [2] : vector<2x8x8xf32> to vector<2x8xf32>
      %155 = vector.shape_cast %154 : vector<2x8xf32> to vector<2x8x1xf32>
      %156 = vector.broadcast %155 : vector<2x8x1xf32> to vector<2x8x8xf32>
      %157 = arith.subf %153, %156 : vector<2x8x8xf32>
      %158 = math.exp %157 : vector<2x8x8xf32>
      %cst_56 = arith.constant dense<0.000000e+00> : vector<2x8xf32>
      %159 = vector.multi_reduction <add>, %158, %cst_56 [2] : vector<2x8x8xf32> to vector<2x8xf32>
      %160 = vector.shape_cast %159 : vector<2x8xf32> to vector<2x8x1xf32>
      %161 = vector.broadcast %160 : vector<2x8x1xf32> to vector<2x8x8xf32>
      %162 = arith.divf %158, %161 : vector<2x8x8xf32>
      %163 = vector.extract_strided_slice %36 {offsets = [0, 0, 48], sizes = [2, 8, 8], strides = [1, 1, 1]} : vector<2x8x64xf32> to vector<2x8x8xf32>
      "tpu.trace_start"() <{level = 10 : i32, message = "bqk,bkd->bqd"}> : () -> ()
      %cst_57 = arith.constant dense<0.000000e+00> : vector<2x8x8xf32>
      %164 = tpu.matmul %162, %163, %cst_57 {dimension_numbers = #tpu.dot_dimension_numbers<[2], [1], [1], [2], [0, 0, 0, 1, 1, 2], [0], [0]>} : vector<2x8x8xf32>, vector<2x8x8xf32>, vector<2x8x8xf32> -> vector<2x8x8xf32>
      "tpu.trace_stop"() : () -> ()
      %165 = vector.shape_cast %164 : vector<2x8x8xf32> to vector<16x8xf32>
      %166 = vector.extract_strided_slice %22 {offsets = [48, 0], sizes = [8, 64], strides = [1, 1]} : vector<64x64xf32> to vector<8x64xf32>
      %cst_58 = arith.constant dense<0.000000e+00> : vector<16x64xf32>
      %167 = tpu.matmul %165, %166, %cst_58 {dimension_numbers = #tpu.dot_dimension_numbers<[1], [0], [0], [1], [0, 0, 1, 1], [], []>} : vector<16x8xf32>, vector<8x64xf32>, vector<16x64xf32> -> vector<16x64xf32>
      %168 = arith.addf %149, %167 : vector<16x64xf32>
      %169 = vector.extract_strided_slice %34 {offsets = [0, 0, 56], sizes = [2, 8, 8], strides = [1, 1, 1]} : vector<2x8x64xf32> to vector<2x8x8xf32>
      %170 = vector.extract_strided_slice %35 {offsets = [0, 0, 56], sizes = [2, 8, 8], strides = [1, 1, 1]} : vector<2x8x64xf32> to vector<2x8x8xf32>
      "tpu.trace_start"() <{level = 10 : i32, message = "bqd,bkd->bqk"}> : () -> ()
      %cst_59 = arith.constant dense<0.000000e+00> : vector<2x8x8xf32>
      %171 = tpu.matmul %169, %170, %cst_59 {dimension_numbers = #tpu.dot_dimension_numbers<[2], [2], [1], [1], [0, 0, 0, 1, 1, 1], [0], [0]>} : vector<2x8x8xf32>, vector<2x8x8xf32>, vector<2x8x8xf32> -> vector<2x8x8xf32>
      "tpu.trace_stop"() : () -> ()
      %172 = arith.addf %171, %16 : vector<2x8x8xf32>
      %cst_60 = arith.constant dense<0xFF800000> : vector<2x8xf32>
      %173 = vector.multi_reduction <maximumf>, %172, %cst_60 [2] : vector<2x8x8xf32> to vector<2x8xf32>
      %174 = vector.shape_cast %173 : vector<2x8xf32> to vector<2x8x1xf32>
      %175 = vector.broadcast %174 : vector<2x8x1xf32> to vector<2x8x8xf32>
      %176 = arith.subf %172, %175 : vector<2x8x8xf32>
      %177 = math.exp %176 : vector<2x8x8xf32>
      %cst_61 = arith.constant dense<0.000000e+00> : vector<2x8xf32>
      %178 = vector.multi_reduction <add>, %177, %cst_61 [2] : vector<2x8x8xf32> to vector<2x8xf32>
      %179 = vector.shape_cast %178 : vector<2x8xf32> to vector<2x8x1xf32>
      %180 = vector.broadcast %179 : vector<2x8x1xf32> to vector<2x8x8xf32>
      %181 = arith.divf %177, %180 : vector<2x8x8xf32>
      %182 = vector.extract_strided_slice %36 {offsets = [0, 0, 56], sizes = [2, 8, 8], strides = [1, 1, 1]} : vector<2x8x64xf32> to vector<2x8x8xf32>
      "tpu.trace_start"() <{level = 10 : i32, message = "bqk,bkd->bqd"}> : () -> ()
      %cst_62 = arith.constant dense<0.000000e+00> : vector<2x8x8xf32>
      %183 = tpu.matmul %181, %182, %cst_62 {dimension_numbers = #tpu.dot_dimension_numbers<[2], [1], [1], [2], [0, 0, 0, 1, 1, 2], [0], [0]>} : vector<2x8x8xf32>, vector<2x8x8xf32>, vector<2x8x8xf32> -> vector<2x8x8xf32>
      "tpu.trace_stop"() : () -> ()
      %184 = vector.shape_cast %183 : vector<2x8x8xf32> to vector<16x8xf32>
      %185 = vector.extract_strided_slice %22 {offsets = [56, 0], sizes = [8, 64], strides = [1, 1]} : vector<64x64xf32> to vector<8x64xf32>
      %cst_63 = arith.constant dense<0.000000e+00> : vector<16x64xf32>
      %186 = tpu.matmul %184, %185, %cst_63 {dimension_numbers = #tpu.dot_dimension_numbers<[1], [0], [0], [1], [0, 0, 1, 1], [], []>} : vector<16x8xf32>, vector<8x64xf32>, vector<16x64xf32> -> vector<16x64xf32>
      %187 = arith.addf %168, %186 : vector<16x64xf32>
      %188 = vector.broadcast %24 : vector<1x64xf32> to vector<16x64xf32>
      %189 = arith.addf %187, %188 : vector<16x64xf32>
      %190 = arith.addf %15, %189 : vector<16x64xf32>
      %c0_64 = arith.constant 0 : index
      %c0_65 = arith.constant 0 : index
      %c0_66 = arith.constant 0 : index
      %191 = vector.load %arg9[%c0_64, %c0_65, %c0_66] : memref<1x1x64xf32, #tpu.memory_space<vmem>>, vector<1x1x64xf32>
      %192 = vector.shape_cast %191 : vector<1x1x64xf32> to vector<1x64xf32>
      %c0_67 = arith.constant 0 : index
      %c0_68 = arith.constant 0 : index
      %c0_69 = arith.constant 0 : index
      %193 = vector.load %arg10[%c0_67, %c0_68, %c0_69] : memref<1x1x64xf32, #tpu.memory_space<vmem>>, vector<1x1x64xf32>
      %194 = vector.shape_cast %193 : vector<1x1x64xf32> to vector<1x64xf32>
      %cst_70 = arith.constant dense<0.000000e+00> : vector<16xf32>
      %195 = vector.multi_reduction <add>, %190, %cst_70 [1] : vector<16x64xf32> to vector<16xf32>
      %196 = vector.shape_cast %195 : vector<16xf32> to vector<16x1xf32>
      %cst_71 = arith.constant 6.400000e+01 : f32
      %197 = vector.broadcast %cst_71 : f32 to vector<16x1xf32>
      %198 = arith.divf %196, %197 : vector<16x1xf32>
      %199 = vector.broadcast %198 : vector<16x1xf32> to vector<16x64xf32>
      %200 = arith.subf %190, %199 : vector<16x64xf32>
      %201 = arith.mulf %200, %200 : vector<16x64xf32>
      %cst_72 = arith.constant dense<0.000000e+00> : vector<16xf32>
      %202 = vector.multi_reduction <add>, %201, %cst_72 [1] : vector<16x64xf32> to vector<16xf32>
      %203 = vector.shape_cast %202 : vector<16xf32> to vector<16x1xf32>
      %cst_73 = arith.constant 6.400000e+01 : f32
      %204 = vector.broadcast %cst_73 : f32 to vector<16x1xf32>
      %205 = arith.divf %203, %204 : vector<16x1xf32>
      %cst_74 = arith.constant 9.99999974E-6 : f32
      %206 = vector.broadcast %cst_74 : f32 to vector<16x1xf32>
      %207 = arith.addf %205, %206 : vector<16x1xf32>
      %208 = math.rsqrt %207 : vector<16x1xf32>
      %209 = vector.broadcast %208 : vector<16x1xf32> to vector<16x64xf32>
      %210 = arith.mulf %200, %209 : vector<16x64xf32>
      %211 = vector.broadcast %192 : vector<1x64xf32> to vector<16x64xf32>
      %212 = arith.mulf %210, %211 : vector<16x64xf32>
      %213 = vector.broadcast %194 : vector<1x64xf32> to vector<16x64xf32>
      %214 = arith.addf %212, %213 : vector<16x64xf32>
      %c0_75 = arith.constant 0 : index
      %c0_76 = arith.constant 0 : index
      %215 = vector.load %arg32[%c0_75, %c0_76] : memref<16x64xf32, #tpu.memory_space<vmem>>, vector<16x64xf32>
      %c0_77 = arith.constant 0 : index
      %c0_78 = arith.constant 0 : index
      %c0_79 = arith.constant 0 : index
      %216 = vector.load %arg11[%c0_77, %c0_78, %c0_79] : memref<1x64x64xbf16, #tpu.memory_space<vmem>>, vector<1x64x64xbf16>
      %217 = vector.shape_cast %216 : vector<1x64x64xbf16> to vector<64x64xbf16>
      %c0_80 = arith.constant 0 : index
      %c0_81 = arith.constant 0 : index
      %c0_82 = arith.constant 0 : index
      %218 = vector.load %arg12[%c0_80, %c0_81, %c0_82] : memref<1x1x64xf32, #tpu.memory_space<vmem>>, vector<1x1x64xf32>
      %219 = vector.shape_cast %218 : vector<1x1x64xf32> to vector<1x64xf32>
      %c0_83 = arith.constant 0 : index
      %c0_84 = arith.constant 0 : index
      %c0_85 = arith.constant 0 : index
      %220 = vector.load %arg13[%c0_83, %c0_84, %c0_85] : memref<1x64x128xbf16, #tpu.memory_space<vmem>>, vector<1x64x128xbf16>
      %221 = vector.shape_cast %220 : vector<1x64x128xbf16> to vector<64x128xbf16>
      %c0_86 = arith.constant 0 : index
      %c0_87 = arith.constant 0 : index
      %c0_88 = arith.constant 0 : index
      %222 = vector.load %arg14[%c0_86, %c0_87, %c0_88] : memref<1x1x128xf32, #tpu.memory_space<vmem>>, vector<1x1x128xf32>
      %223 = vector.shape_cast %222 : vector<1x1x128xf32> to vector<1x128xf32>
      %c0_89 = arith.constant 0 : index
      %c0_90 = arith.constant 0 : index
      %c0_91 = arith.constant 0 : index
      %224 = vector.load %arg15[%c0_89, %c0_90, %c0_91] : memref<1x64x64xf32, #tpu.memory_space<vmem>>, vector<1x64x64xf32>
      %225 = vector.shape_cast %224 : vector<1x64x64xf32> to vector<64x64xf32>
      %c0_92 = arith.constant 0 : index
      %c0_93 = arith.constant 0 : index
      %c0_94 = arith.constant 0 : index
      %226 = vector.load %arg16[%c0_92, %c0_93, %c0_94] : memref<1x1x64xf32, #tpu.memory_space<vmem>>, vector<1x1x64xf32>
      %227 = vector.shape_cast %226 : vector<1x1x64xf32> to vector<1x64xf32>
      %228 = arith.truncf %214 : vector<16x64xf32> to vector<16x64xbf16>
      %cst_95 = arith.constant dense<0.000000e+00> : vector<16x64xf32>
      %229 = tpu.matmul %228, %217, %cst_95 {dimension_numbers = #tpu.dot_dimension_numbers<[1], [0], [0], [1], [0, 0, 1, 1], [], []>} : vector<16x64xbf16>, vector<64x64xbf16>, vector<16x64xf32> -> vector<16x64xf32>
      %230 = vector.broadcast %219 : vector<1x64xf32> to vector<16x64xf32>
      %231 = arith.addf %229, %230 : vector<16x64xf32>
      %232 = arith.truncf %215 : vector<16x64xf32> to vector<16x64xbf16>
      %cst_96 = arith.constant dense<0.000000e+00> : vector<16x128xf32>
      %233 = tpu.matmul %232, %221, %cst_96 {dimension_numbers = #tpu.dot_dimension_numbers<[1], [0], [0], [1], [0, 0, 1, 1], [], []>} : vector<16x64xbf16>, vector<64x128xbf16>, vector<16x128xf32> -> vector<16x128xf32>
      %234 = vector.broadcast %223 : vector<1x128xf32> to vector<16x128xf32>
      %235 = arith.addf %233, %234 : vector<16x128xf32>
      %236 = vector.extract_strided_slice %235 {offsets = [0, 0], sizes = [16, 64], strides = [1, 1]} : vector<16x128xf32> to vector<16x64xf32>
      %237 = vector.extract_strided_slice %235 {offsets = [0, 64], sizes = [16, 64], strides = [1, 1]} : vector<16x128xf32> to vector<16x64xf32>
      %238 = vector.shape_cast %231 : vector<16x64xf32> to vector<2x8x64xf32>
      %cst_97 = arith.constant 0.353553385 : f32
      %239 = vector.broadcast %cst_97 : f32 to vector<2x8x64xf32>
      %240 = arith.mulf %238, %239 : vector<2x8x64xf32>
      %241 = vector.shape_cast %236 : vector<16x64xf32> to vector<2x8x64xf32>
      %242 = vector.shape_cast %237 : vector<16x64xf32> to vector<2x8x64xf32>
      %243 = vector.extract_strided_slice %240 {offsets = [0, 0, 0], sizes = [2, 8, 8], strides = [1, 1, 1]} : vector<2x8x64xf32> to vector<2x8x8xf32>
      %244 = vector.extract_strided_slice %241 {offsets = [0, 0, 0], sizes = [2, 8, 8], strides = [1, 1, 1]} : vector<2x8x64xf32> to vector<2x8x8xf32>
      "tpu.trace_start"() <{level = 10 : i32, message = "bqd,bkd->bqk"}> : () -> ()
      %cst_98 = arith.constant dense<0.000000e+00> : vector<2x8x8xf32>
      %245 = tpu.matmul %243, %244, %cst_98 {dimension_numbers = #tpu.dot_dimension_numbers<[2], [2], [1], [1], [0, 0, 0, 1, 1, 1], [0], [0]>} : vector<2x8x8xf32>, vector<2x8x8xf32>, vector<2x8x8xf32> -> vector<2x8x8xf32>
      "tpu.trace_stop"() : () -> ()
      %cst_99 = arith.constant dense<0xFF800000> : vector<2x8xf32>
      %246 = vector.multi_reduction <maximumf>, %245, %cst_99 [2] : vector<2x8x8xf32> to vector<2x8xf32>
      %247 = vector.shape_cast %246 : vector<2x8xf32> to vector<2x8x1xf32>
      %248 = vector.broadcast %247 : vector<2x8x1xf32> to vector<2x8x8xf32>
      %249 = arith.subf %245, %248 : vector<2x8x8xf32>
      %250 = math.exp %249 : vector<2x8x8xf32>
      %cst_100 = arith.constant dense<0.000000e+00> : vector<2x8xf32>
      %251 = vector.multi_reduction <add>, %250, %cst_100 [2] : vector<2x8x8xf32> to vector<2x8xf32>
      %252 = vector.shape_cast %251 : vector<2x8xf32> to vector<2x8x1xf32>
      %253 = vector.broadcast %252 : vector<2x8x1xf32> to vector<2x8x8xf32>
      %254 = arith.divf %250, %253 : vector<2x8x8xf32>
      %255 = vector.extract_strided_slice %242 {offsets = [0, 0, 0], sizes = [2, 8, 8], strides = [1, 1, 1]} : vector<2x8x64xf32> to vector<2x8x8xf32>
      "tpu.trace_start"() <{level = 10 : i32, message = "bqk,bkd->bqd"}> : () -> ()
      %cst_101 = arith.constant dense<0.000000e+00> : vector<2x8x8xf32>
      %256 = tpu.matmul %254, %255, %cst_101 {dimension_numbers = #tpu.dot_dimension_numbers<[2], [1], [1], [2], [0, 0, 0, 1, 1, 2], [0], [0]>} : vector<2x8x8xf32>, vector<2x8x8xf32>, vector<2x8x8xf32> -> vector<2x8x8xf32>
      "tpu.trace_stop"() : () -> ()
      %257 = vector.shape_cast %256 : vector<2x8x8xf32> to vector<16x8xf32>
      %258 = vector.extract_strided_slice %225 {offsets = [0, 0], sizes = [8, 64], strides = [1, 1]} : vector<64x64xf32> to vector<8x64xf32>
      %cst_102 = arith.constant dense<0.000000e+00> : vector<16x64xf32>
      %259 = tpu.matmul %257, %258, %cst_102 {dimension_numbers = #tpu.dot_dimension_numbers<[1], [0], [0], [1], [0, 0, 1, 1], [], []>} : vector<16x8xf32>, vector<8x64xf32>, vector<16x64xf32> -> vector<16x64xf32>
      %260 = vector.extract_strided_slice %240 {offsets = [0, 0, 8], sizes = [2, 8, 8], strides = [1, 1, 1]} : vector<2x8x64xf32> to vector<2x8x8xf32>
      %261 = vector.extract_strided_slice %241 {offsets = [0, 0, 8], sizes = [2, 8, 8], strides = [1, 1, 1]} : vector<2x8x64xf32> to vector<2x8x8xf32>
      "tpu.trace_start"() <{level = 10 : i32, message = "bqd,bkd->bqk"}> : () -> ()
      %cst_103 = arith.constant dense<0.000000e+00> : vector<2x8x8xf32>
      %262 = tpu.matmul %260, %261, %cst_103 {dimension_numbers = #tpu.dot_dimension_numbers<[2], [2], [1], [1], [0, 0, 0, 1, 1, 1], [0], [0]>} : vector<2x8x8xf32>, vector<2x8x8xf32>, vector<2x8x8xf32> -> vector<2x8x8xf32>
      "tpu.trace_stop"() : () -> ()
      %cst_104 = arith.constant dense<0xFF800000> : vector<2x8xf32>
      %263 = vector.multi_reduction <maximumf>, %262, %cst_104 [2] : vector<2x8x8xf32> to vector<2x8xf32>
      %264 = vector.shape_cast %263 : vector<2x8xf32> to vector<2x8x1xf32>
      %265 = vector.broadcast %264 : vector<2x8x1xf32> to vector<2x8x8xf32>
      %266 = arith.subf %262, %265 : vector<2x8x8xf32>
      %267 = math.exp %266 : vector<2x8x8xf32>
      %cst_105 = arith.constant dense<0.000000e+00> : vector<2x8xf32>
      %268 = vector.multi_reduction <add>, %267, %cst_105 [2] : vector<2x8x8xf32> to vector<2x8xf32>
      %269 = vector.shape_cast %268 : vector<2x8xf32> to vector<2x8x1xf32>
      %270 = vector.broadcast %269 : vector<2x8x1xf32> to vector<2x8x8xf32>
      %271 = arith.divf %267, %270 : vector<2x8x8xf32>
      %272 = vector.extract_strided_slice %242 {offsets = [0, 0, 8], sizes = [2, 8, 8], strides = [1, 1, 1]} : vector<2x8x64xf32> to vector<2x8x8xf32>
      "tpu.trace_start"() <{level = 10 : i32, message = "bqk,bkd->bqd"}> : () -> ()
      %cst_106 = arith.constant dense<0.000000e+00> : vector<2x8x8xf32>
      %273 = tpu.matmul %271, %272, %cst_106 {dimension_numbers = #tpu.dot_dimension_numbers<[2], [1], [1], [2], [0, 0, 0, 1, 1, 2], [0], [0]>} : vector<2x8x8xf32>, vector<2x8x8xf32>, vector<2x8x8xf32> -> vector<2x8x8xf32>
      "tpu.trace_stop"() : () -> ()
      %274 = vector.shape_cast %273 : vector<2x8x8xf32> to vector<16x8xf32>
      %275 = vector.extract_strided_slice %225 {offsets = [8, 0], sizes = [8, 64], strides = [1, 1]} : vector<64x64xf32> to vector<8x64xf32>
      %cst_107 = arith.constant dense<0.000000e+00> : vector<16x64xf32>
      %276 = tpu.matmul %274, %275, %cst_107 {dimension_numbers = #tpu.dot_dimension_numbers<[1], [0], [0], [1], [0, 0, 1, 1], [], []>} : vector<16x8xf32>, vector<8x64xf32>, vector<16x64xf32> -> vector<16x64xf32>
      %277 = arith.addf %259, %276 : vector<16x64xf32>
      %278 = vector.extract_strided_slice %240 {offsets = [0, 0, 16], sizes = [2, 8, 8], strides = [1, 1, 1]} : vector<2x8x64xf32> to vector<2x8x8xf32>
      %279 = vector.extract_strided_slice %241 {offsets = [0, 0, 16], sizes = [2, 8, 8], strides = [1, 1, 1]} : vector<2x8x64xf32> to vector<2x8x8xf32>
      "tpu.trace_start"() <{level = 10 : i32, message = "bqd,bkd->bqk"}> : () -> ()
      %cst_108 = arith.constant dense<0.000000e+00> : vector<2x8x8xf32>
      %280 = tpu.matmul %278, %279, %cst_108 {dimension_numbers = #tpu.dot_dimension_numbers<[2], [2], [1], [1], [0, 0, 0, 1, 1, 1], [0], [0]>} : vector<2x8x8xf32>, vector<2x8x8xf32>, vector<2x8x8xf32> -> vector<2x8x8xf32>
      "tpu.trace_stop"() : () -> ()
      %cst_109 = arith.constant dense<0xFF800000> : vector<2x8xf32>
      %281 = vector.multi_reduction <maximumf>, %280, %cst_109 [2] : vector<2x8x8xf32> to vector<2x8xf32>
      %282 = vector.shape_cast %281 : vector<2x8xf32> to vector<2x8x1xf32>
      %283 = vector.broadcast %282 : vector<2x8x1xf32> to vector<2x8x8xf32>
      %284 = arith.subf %280, %283 : vector<2x8x8xf32>
      %285 = math.exp %284 : vector<2x8x8xf32>
      %cst_110 = arith.constant dense<0.000000e+00> : vector<2x8xf32>
      %286 = vector.multi_reduction <add>, %285, %cst_110 [2] : vector<2x8x8xf32> to vector<2x8xf32>
      %287 = vector.shape_cast %286 : vector<2x8xf32> to vector<2x8x1xf32>
      %288 = vector.broadcast %287 : vector<2x8x1xf32> to vector<2x8x8xf32>
      %289 = arith.divf %285, %288 : vector<2x8x8xf32>
      %290 = vector.extract_strided_slice %242 {offsets = [0, 0, 16], sizes = [2, 8, 8], strides = [1, 1, 1]} : vector<2x8x64xf32> to vector<2x8x8xf32>
      "tpu.trace_start"() <{level = 10 : i32, message = "bqk,bkd->bqd"}> : () -> ()
      %cst_111 = arith.constant dense<0.000000e+00> : vector<2x8x8xf32>
      %291 = tpu.matmul %289, %290, %cst_111 {dimension_numbers = #tpu.dot_dimension_numbers<[2], [1], [1], [2], [0, 0, 0, 1, 1, 2], [0], [0]>} : vector<2x8x8xf32>, vector<2x8x8xf32>, vector<2x8x8xf32> -> vector<2x8x8xf32>
      "tpu.trace_stop"() : () -> ()
      %292 = vector.shape_cast %291 : vector<2x8x8xf32> to vector<16x8xf32>
      %293 = vector.extract_strided_slice %225 {offsets = [16, 0], sizes = [8, 64], strides = [1, 1]} : vector<64x64xf32> to vector<8x64xf32>
      %cst_112 = arith.constant dense<0.000000e+00> : vector<16x64xf32>
      %294 = tpu.matmul %292, %293, %cst_112 {dimension_numbers = #tpu.dot_dimension_numbers<[1], [0], [0], [1], [0, 0, 1, 1], [], []>} : vector<16x8xf32>, vector<8x64xf32>, vector<16x64xf32> -> vector<16x64xf32>
      %295 = arith.addf %277, %294 : vector<16x64xf32>
      %296 = vector.extract_strided_slice %240 {offsets = [0, 0, 24], sizes = [2, 8, 8], strides = [1, 1, 1]} : vector<2x8x64xf32> to vector<2x8x8xf32>
      %297 = vector.extract_strided_slice %241 {offsets = [0, 0, 24], sizes = [2, 8, 8], strides = [1, 1, 1]} : vector<2x8x64xf32> to vector<2x8x8xf32>
      "tpu.trace_start"() <{level = 10 : i32, message = "bqd,bkd->bqk"}> : () -> ()
      %cst_113 = arith.constant dense<0.000000e+00> : vector<2x8x8xf32>
      %298 = tpu.matmul %296, %297, %cst_113 {dimension_numbers = #tpu.dot_dimension_numbers<[2], [2], [1], [1], [0, 0, 0, 1, 1, 1], [0], [0]>} : vector<2x8x8xf32>, vector<2x8x8xf32>, vector<2x8x8xf32> -> vector<2x8x8xf32>
      "tpu.trace_stop"() : () -> ()
      %cst_114 = arith.constant dense<0xFF800000> : vector<2x8xf32>
      %299 = vector.multi_reduction <maximumf>, %298, %cst_114 [2] : vector<2x8x8xf32> to vector<2x8xf32>
      %300 = vector.shape_cast %299 : vector<2x8xf32> to vector<2x8x1xf32>
      %301 = vector.broadcast %300 : vector<2x8x1xf32> to vector<2x8x8xf32>
      %302 = arith.subf %298, %301 : vector<2x8x8xf32>
      %303 = math.exp %302 : vector<2x8x8xf32>
      %cst_115 = arith.constant dense<0.000000e+00> : vector<2x8xf32>
      %304 = vector.multi_reduction <add>, %303, %cst_115 [2] : vector<2x8x8xf32> to vector<2x8xf32>
      %305 = vector.shape_cast %304 : vector<2x8xf32> to vector<2x8x1xf32>
      %306 = vector.broadcast %305 : vector<2x8x1xf32> to vector<2x8x8xf32>
      %307 = arith.divf %303, %306 : vector<2x8x8xf32>
      %308 = vector.extract_strided_slice %242 {offsets = [0, 0, 24], sizes = [2, 8, 8], strides = [1, 1, 1]} : vector<2x8x64xf32> to vector<2x8x8xf32>
      "tpu.trace_start"() <{level = 10 : i32, message = "bqk,bkd->bqd"}> : () -> ()
      %cst_116 = arith.constant dense<0.000000e+00> : vector<2x8x8xf32>
      %309 = tpu.matmul %307, %308, %cst_116 {dimension_numbers = #tpu.dot_dimension_numbers<[2], [1], [1], [2], [0, 0, 0, 1, 1, 2], [0], [0]>} : vector<2x8x8xf32>, vector<2x8x8xf32>, vector<2x8x8xf32> -> vector<2x8x8xf32>
      "tpu.trace_stop"() : () -> ()
      %310 = vector.shape_cast %309 : vector<2x8x8xf32> to vector<16x8xf32>
      %311 = vector.extract_strided_slice %225 {offsets = [24, 0], sizes = [8, 64], strides = [1, 1]} : vector<64x64xf32> to vector<8x64xf32>
      %cst_117 = arith.constant dense<0.000000e+00> : vector<16x64xf32>
      %312 = tpu.matmul %310, %311, %cst_117 {dimension_numbers = #tpu.dot_dimension_numbers<[1], [0], [0], [1], [0, 0, 1, 1], [], []>} : vector<16x8xf32>, vector<8x64xf32>, vector<16x64xf32> -> vector<16x64xf32>
      %313 = arith.addf %295, %312 : vector<16x64xf32>
      %314 = vector.extract_strided_slice %240 {offsets = [0, 0, 32], sizes = [2, 8, 8], strides = [1, 1, 1]} : vector<2x8x64xf32> to vector<2x8x8xf32>
      %315 = vector.extract_strided_slice %241 {offsets = [0, 0, 32], sizes = [2, 8, 8], strides = [1, 1, 1]} : vector<2x8x64xf32> to vector<2x8x8xf32>
      "tpu.trace_start"() <{level = 10 : i32, message = "bqd,bkd->bqk"}> : () -> ()
      %cst_118 = arith.constant dense<0.000000e+00> : vector<2x8x8xf32>
      %316 = tpu.matmul %314, %315, %cst_118 {dimension_numbers = #tpu.dot_dimension_numbers<[2], [2], [1], [1], [0, 0, 0, 1, 1, 1], [0], [0]>} : vector<2x8x8xf32>, vector<2x8x8xf32>, vector<2x8x8xf32> -> vector<2x8x8xf32>
      "tpu.trace_stop"() : () -> ()
      %cst_119 = arith.constant dense<0xFF800000> : vector<2x8xf32>
      %317 = vector.multi_reduction <maximumf>, %316, %cst_119 [2] : vector<2x8x8xf32> to vector<2x8xf32>
      %318 = vector.shape_cast %317 : vector<2x8xf32> to vector<2x8x1xf32>
      %319 = vector.broadcast %318 : vector<2x8x1xf32> to vector<2x8x8xf32>
      %320 = arith.subf %316, %319 : vector<2x8x8xf32>
      %321 = math.exp %320 : vector<2x8x8xf32>
      %cst_120 = arith.constant dense<0.000000e+00> : vector<2x8xf32>
      %322 = vector.multi_reduction <add>, %321, %cst_120 [2] : vector<2x8x8xf32> to vector<2x8xf32>
      %323 = vector.shape_cast %322 : vector<2x8xf32> to vector<2x8x1xf32>
      %324 = vector.broadcast %323 : vector<2x8x1xf32> to vector<2x8x8xf32>
      %325 = arith.divf %321, %324 : vector<2x8x8xf32>
      %326 = vector.extract_strided_slice %242 {offsets = [0, 0, 32], sizes = [2, 8, 8], strides = [1, 1, 1]} : vector<2x8x64xf32> to vector<2x8x8xf32>
      "tpu.trace_start"() <{level = 10 : i32, message = "bqk,bkd->bqd"}> : () -> ()
      %cst_121 = arith.constant dense<0.000000e+00> : vector<2x8x8xf32>
      %327 = tpu.matmul %325, %326, %cst_121 {dimension_numbers = #tpu.dot_dimension_numbers<[2], [1], [1], [2], [0, 0, 0, 1, 1, 2], [0], [0]>} : vector<2x8x8xf32>, vector<2x8x8xf32>, vector<2x8x8xf32> -> vector<2x8x8xf32>
      "tpu.trace_stop"() : () -> ()
      %328 = vector.shape_cast %327 : vector<2x8x8xf32> to vector<16x8xf32>
      %329 = vector.extract_strided_slice %225 {offsets = [32, 0], sizes = [8, 64], strides = [1, 1]} : vector<64x64xf32> to vector<8x64xf32>
      %cst_122 = arith.constant dense<0.000000e+00> : vector<16x64xf32>
      %330 = tpu.matmul %328, %329, %cst_122 {dimension_numbers = #tpu.dot_dimension_numbers<[1], [0], [0], [1], [0, 0, 1, 1], [], []>} : vector<16x8xf32>, vector<8x64xf32>, vector<16x64xf32> -> vector<16x64xf32>
      %331 = arith.addf %313, %330 : vector<16x64xf32>
      %332 = vector.extract_strided_slice %240 {offsets = [0, 0, 40], sizes = [2, 8, 8], strides = [1, 1, 1]} : vector<2x8x64xf32> to vector<2x8x8xf32>
      %333 = vector.extract_strided_slice %241 {offsets = [0, 0, 40], sizes = [2, 8, 8], strides = [1, 1, 1]} : vector<2x8x64xf32> to vector<2x8x8xf32>
      "tpu.trace_start"() <{level = 10 : i32, message = "bqd,bkd->bqk"}> : () -> ()
      %cst_123 = arith.constant dense<0.000000e+00> : vector<2x8x8xf32>
      %334 = tpu.matmul %332, %333, %cst_123 {dimension_numbers = #tpu.dot_dimension_numbers<[2], [2], [1], [1], [0, 0, 0, 1, 1, 1], [0], [0]>} : vector<2x8x8xf32>, vector<2x8x8xf32>, vector<2x8x8xf32> -> vector<2x8x8xf32>
      "tpu.trace_stop"() : () -> ()
      %cst_124 = arith.constant dense<0xFF800000> : vector<2x8xf32>
      %335 = vector.multi_reduction <maximumf>, %334, %cst_124 [2] : vector<2x8x8xf32> to vector<2x8xf32>
      %336 = vector.shape_cast %335 : vector<2x8xf32> to vector<2x8x1xf32>
      %337 = vector.broadcast %336 : vector<2x8x1xf32> to vector<2x8x8xf32>
      %338 = arith.subf %334, %337 : vector<2x8x8xf32>
      %339 = math.exp %338 : vector<2x8x8xf32>
      %cst_125 = arith.constant dense<0.000000e+00> : vector<2x8xf32>
      %340 = vector.multi_reduction <add>, %339, %cst_125 [2] : vector<2x8x8xf32> to vector<2x8xf32>
      %341 = vector.shape_cast %340 : vector<2x8xf32> to vector<2x8x1xf32>
      %342 = vector.broadcast %341 : vector<2x8x1xf32> to vector<2x8x8xf32>
      %343 = arith.divf %339, %342 : vector<2x8x8xf32>
      %344 = vector.extract_strided_slice %242 {offsets = [0, 0, 40], sizes = [2, 8, 8], strides = [1, 1, 1]} : vector<2x8x64xf32> to vector<2x8x8xf32>
      "tpu.trace_start"() <{level = 10 : i32, message = "bqk,bkd->bqd"}> : () -> ()
      %cst_126 = arith.constant dense<0.000000e+00> : vector<2x8x8xf32>
      %345 = tpu.matmul %343, %344, %cst_126 {dimension_numbers = #tpu.dot_dimension_numbers<[2], [1], [1], [2], [0, 0, 0, 1, 1, 2], [0], [0]>} : vector<2x8x8xf32>, vector<2x8x8xf32>, vector<2x8x8xf32> -> vector<2x8x8xf32>
      "tpu.trace_stop"() : () -> ()
      %346 = vector.shape_cast %345 : vector<2x8x8xf32> to vector<16x8xf32>
      %347 = vector.extract_strided_slice %225 {offsets = [40, 0], sizes = [8, 64], strides = [1, 1]} : vector<64x64xf32> to vector<8x64xf32>
      %cst_127 = arith.constant dense<0.000000e+00> : vector<16x64xf32>
      %348 = tpu.matmul %346, %347, %cst_127 {dimension_numbers = #tpu.dot_dimension_numbers<[1], [0], [0], [1], [0, 0, 1, 1], [], []>} : vector<16x8xf32>, vector<8x64xf32>, vector<16x64xf32> -> vector<16x64xf32>
      %349 = arith.addf %331, %348 : vector<16x64xf32>
      %350 = vector.extract_strided_slice %240 {offsets = [0, 0, 48], sizes = [2, 8, 8], strides = [1, 1, 1]} : vector<2x8x64xf32> to vector<2x8x8xf32>
      %351 = vector.extract_strided_slice %241 {offsets = [0, 0, 48], sizes = [2, 8, 8], strides = [1, 1, 1]} : vector<2x8x64xf32> to vector<2x8x8xf32>
      "tpu.trace_start"() <{level = 10 : i32, message = "bqd,bkd->bqk"}> : () -> ()
      %cst_128 = arith.constant dense<0.000000e+00> : vector<2x8x8xf32>
      %352 = tpu.matmul %350, %351, %cst_128 {dimension_numbers = #tpu.dot_dimension_numbers<[2], [2], [1], [1], [0, 0, 0, 1, 1, 1], [0], [0]>} : vector<2x8x8xf32>, vector<2x8x8xf32>, vector<2x8x8xf32> -> vector<2x8x8xf32>
      "tpu.trace_stop"() : () -> ()
      %cst_129 = arith.constant dense<0xFF800000> : vector<2x8xf32>
      %353 = vector.multi_reduction <maximumf>, %352, %cst_129 [2] : vector<2x8x8xf32> to vector<2x8xf32>
      %354 = vector.shape_cast %353 : vector<2x8xf32> to vector<2x8x1xf32>
      %355 = vector.broadcast %354 : vector<2x8x1xf32> to vector<2x8x8xf32>
      %356 = arith.subf %352, %355 : vector<2x8x8xf32>
      %357 = math.exp %356 : vector<2x8x8xf32>
      %cst_130 = arith.constant dense<0.000000e+00> : vector<2x8xf32>
      %358 = vector.multi_reduction <add>, %357, %cst_130 [2] : vector<2x8x8xf32> to vector<2x8xf32>
      %359 = vector.shape_cast %358 : vector<2x8xf32> to vector<2x8x1xf32>
      %360 = vector.broadcast %359 : vector<2x8x1xf32> to vector<2x8x8xf32>
      %361 = arith.divf %357, %360 : vector<2x8x8xf32>
      %362 = vector.extract_strided_slice %242 {offsets = [0, 0, 48], sizes = [2, 8, 8], strides = [1, 1, 1]} : vector<2x8x64xf32> to vector<2x8x8xf32>
      "tpu.trace_start"() <{level = 10 : i32, message = "bqk,bkd->bqd"}> : () -> ()
      %cst_131 = arith.constant dense<0.000000e+00> : vector<2x8x8xf32>
      %363 = tpu.matmul %361, %362, %cst_131 {dimension_numbers = #tpu.dot_dimension_numbers<[2], [1], [1], [2], [0, 0, 0, 1, 1, 2], [0], [0]>} : vector<2x8x8xf32>, vector<2x8x8xf32>, vector<2x8x8xf32> -> vector<2x8x8xf32>
      "tpu.trace_stop"() : () -> ()
      %364 = vector.shape_cast %363 : vector<2x8x8xf32> to vector<16x8xf32>
      %365 = vector.extract_strided_slice %225 {offsets = [48, 0], sizes = [8, 64], strides = [1, 1]} : vector<64x64xf32> to vector<8x64xf32>
      %cst_132 = arith.constant dense<0.000000e+00> : vector<16x64xf32>
      %366 = tpu.matmul %364, %365, %cst_132 {dimension_numbers = #tpu.dot_dimension_numbers<[1], [0], [0], [1], [0, 0, 1, 1], [], []>} : vector<16x8xf32>, vector<8x64xf32>, vector<16x64xf32> -> vector<16x64xf32>
      %367 = arith.addf %349, %366 : vector<16x64xf32>
      %368 = vector.extract_strided_slice %240 {offsets = [0, 0, 56], sizes = [2, 8, 8], strides = [1, 1, 1]} : vector<2x8x64xf32> to vector<2x8x8xf32>
      %369 = vector.extract_strided_slice %241 {offsets = [0, 0, 56], sizes = [2, 8, 8], strides = [1, 1, 1]} : vector<2x8x64xf32> to vector<2x8x8xf32>
      "tpu.trace_start"() <{level = 10 : i32, message = "bqd,bkd->bqk"}> : () -> ()
      %cst_133 = arith.constant dense<0.000000e+00> : vector<2x8x8xf32>
      %370 = tpu.matmul %368, %369, %cst_133 {dimension_numbers = #tpu.dot_dimension_numbers<[2], [2], [1], [1], [0, 0, 0, 1, 1, 1], [0], [0]>} : vector<2x8x8xf32>, vector<2x8x8xf32>, vector<2x8x8xf32> -> vector<2x8x8xf32>
      "tpu.trace_stop"() : () -> ()
      %cst_134 = arith.constant dense<0xFF800000> : vector<2x8xf32>
      %371 = vector.multi_reduction <maximumf>, %370, %cst_134 [2] : vector<2x8x8xf32> to vector<2x8xf32>
      %372 = vector.shape_cast %371 : vector<2x8xf32> to vector<2x8x1xf32>
      %373 = vector.broadcast %372 : vector<2x8x1xf32> to vector<2x8x8xf32>
      %374 = arith.subf %370, %373 : vector<2x8x8xf32>
      %375 = math.exp %374 : vector<2x8x8xf32>
      %cst_135 = arith.constant dense<0.000000e+00> : vector<2x8xf32>
      %376 = vector.multi_reduction <add>, %375, %cst_135 [2] : vector<2x8x8xf32> to vector<2x8xf32>
      %377 = vector.shape_cast %376 : vector<2x8xf32> to vector<2x8x1xf32>
      %378 = vector.broadcast %377 : vector<2x8x1xf32> to vector<2x8x8xf32>
      %379 = arith.divf %375, %378 : vector<2x8x8xf32>
      %380 = vector.extract_strided_slice %242 {offsets = [0, 0, 56], sizes = [2, 8, 8], strides = [1, 1, 1]} : vector<2x8x64xf32> to vector<2x8x8xf32>
      "tpu.trace_start"() <{level = 10 : i32, message = "bqk,bkd->bqd"}> : () -> ()
      %cst_136 = arith.constant dense<0.000000e+00> : vector<2x8x8xf32>
      %381 = tpu.matmul %379, %380, %cst_136 {dimension_numbers = #tpu.dot_dimension_numbers<[2], [1], [1], [2], [0, 0, 0, 1, 1, 2], [0], [0]>} : vector<2x8x8xf32>, vector<2x8x8xf32>, vector<2x8x8xf32> -> vector<2x8x8xf32>
      "tpu.trace_stop"() : () -> ()
      %382 = vector.shape_cast %381 : vector<2x8x8xf32> to vector<16x8xf32>
      %383 = vector.extract_strided_slice %225 {offsets = [56, 0], sizes = [8, 64], strides = [1, 1]} : vector<64x64xf32> to vector<8x64xf32>
      %cst_137 = arith.constant dense<0.000000e+00> : vector<16x64xf32>
      %384 = tpu.matmul %382, %383, %cst_137 {dimension_numbers = #tpu.dot_dimension_numbers<[1], [0], [0], [1], [0, 0, 1, 1], [], []>} : vector<16x8xf32>, vector<8x64xf32>, vector<16x64xf32> -> vector<16x64xf32>
      %385 = arith.addf %367, %384 : vector<16x64xf32>
      %386 = vector.broadcast %227 : vector<1x64xf32> to vector<16x64xf32>
      %387 = arith.addf %385, %386 : vector<16x64xf32>
      %388 = arith.addf %214, %387 : vector<16x64xf32>
      %c0_138 = arith.constant 0 : index
      %c0_139 = arith.constant 0 : index
      %c0_140 = arith.constant 0 : index
      %389 = vector.load %arg17[%c0_138, %c0_139, %c0_140] : memref<1x1x64xf32, #tpu.memory_space<vmem>>, vector<1x1x64xf32>
      %390 = vector.shape_cast %389 : vector<1x1x64xf32> to vector<1x64xf32>
      %c0_141 = arith.constant 0 : index
      %c0_142 = arith.constant 0 : index
      %c0_143 = arith.constant 0 : index
      %391 = vector.load %arg18[%c0_141, %c0_142, %c0_143] : memref<1x1x64xf32, #tpu.memory_space<vmem>>, vector<1x1x64xf32>
      %392 = vector.shape_cast %391 : vector<1x1x64xf32> to vector<1x64xf32>
      %cst_144 = arith.constant dense<0.000000e+00> : vector<16xf32>
      %393 = vector.multi_reduction <add>, %388, %cst_144 [1] : vector<16x64xf32> to vector<16xf32>
      %394 = vector.shape_cast %393 : vector<16xf32> to vector<16x1xf32>
      %cst_145 = arith.constant 6.400000e+01 : f32
      %395 = vector.broadcast %cst_145 : f32 to vector<16x1xf32>
      %396 = arith.divf %394, %395 : vector<16x1xf32>
      %397 = vector.broadcast %396 : vector<16x1xf32> to vector<16x64xf32>
      %398 = arith.subf %388, %397 : vector<16x64xf32>
      %399 = arith.mulf %398, %398 : vector<16x64xf32>
      %cst_146 = arith.constant dense<0.000000e+00> : vector<16xf32>
      %400 = vector.multi_reduction <add>, %399, %cst_146 [1] : vector<16x64xf32> to vector<16xf32>
      %401 = vector.shape_cast %400 : vector<16xf32> to vector<16x1xf32>
      %cst_147 = arith.constant 6.400000e+01 : f32
      %402 = vector.broadcast %cst_147 : f32 to vector<16x1xf32>
      %403 = arith.divf %401, %402 : vector<16x1xf32>
      %cst_148 = arith.constant 9.99999974E-6 : f32
      %404 = vector.broadcast %cst_148 : f32 to vector<16x1xf32>
      %405 = arith.addf %403, %404 : vector<16x1xf32>
      %406 = math.rsqrt %405 : vector<16x1xf32>
      %407 = vector.broadcast %406 : vector<16x1xf32> to vector<16x64xf32>
      %408 = arith.mulf %398, %407 : vector<16x64xf32>
      %409 = vector.broadcast %390 : vector<1x64xf32> to vector<16x64xf32>
      %410 = arith.mulf %408, %409 : vector<16x64xf32>
      %411 = vector.broadcast %392 : vector<1x64xf32> to vector<16x64xf32>
      %412 = arith.addf %410, %411 : vector<16x64xf32>
      %413 = arith.truncf %412 : vector<16x64xf32> to vector<16x64xbf16>
      %cst_149 = arith.constant 0.000000e+00 : f32
      %414 = vector.broadcast %cst_149 : f32 to vector<16x64xf32>
      %c0_150 = arith.constant 0 : index
      %c0_151 = arith.constant 0 : index
      %c0_152 = arith.constant 0 : index
      %415 = vector.load %arg19[%c0_150, %c0_151, %c0_152] : memref<1x64x2048xbf16, #tpu.memory_space<vmem>>, vector<1x64x512xbf16>
      %416 = vector.shape_cast %415 : vector<1x64x512xbf16> to vector<64x512xbf16>
      %cst_153 = arith.constant dense<0.000000e+00> : vector<16x512xf32>
      %417 = tpu.matmul %413, %416, %cst_153 {dimension_numbers = #tpu.dot_dimension_numbers<[1], [0], [0], [1], [0, 0, 1, 1], [], []>} : vector<16x64xbf16>, vector<64x512xbf16>, vector<16x512xf32> -> vector<16x512xf32>
      %c0_154 = arith.constant 0 : index
      %c0_155 = arith.constant 0 : index
      %c0_156 = arith.constant 0 : index
      %418 = vector.load %arg20[%c0_154, %c0_155, %c0_156] : memref<1x1x2048xf32, #tpu.memory_space<vmem>>, vector<1x1x512xf32>
      %419 = vector.shape_cast %418 : vector<1x1x512xf32> to vector<1x512xf32>
      %420 = vector.broadcast %419 : vector<1x512xf32> to vector<16x512xf32>
      %421 = arith.addf %417, %420 : vector<16x512xf32>
      %cst_157 = arith.constant 0.000000e+00 : f32
      %422 = vector.broadcast %cst_157 : f32 to vector<16x512xf32>
      %423 = arith.maximumf %421, %422 : vector<16x512xf32>
      %424 = arith.truncf %423 : vector<16x512xf32> to vector<16x512xbf16>
      %c0_158 = arith.constant 0 : index
      %c0_159 = arith.constant 0 : index
      %c0_160 = arith.constant 0 : index
      %425 = vector.load %arg21[%c0_158, %c0_159, %c0_160] : memref<1x2048x64xbf16, #tpu.memory_space<vmem>>, vector<1x512x64xbf16>
      %426 = vector.shape_cast %425 : vector<1x512x64xbf16> to vector<512x64xbf16>
      %cst_161 = arith.constant dense<0.000000e+00> : vector<16x64xf32>
      %427 = tpu.matmul %424, %426, %cst_161 {dimension_numbers = #tpu.dot_dimension_numbers<[1], [0], [0], [1], [0, 0, 1, 1], [], []>} : vector<16x512xbf16>, vector<512x64xbf16>, vector<16x64xf32> -> vector<16x64xf32>
      %428 = arith.addf %414, %427 : vector<16x64xf32>
      %c0_162 = arith.constant 0 : index
      %c0_163 = arith.constant 0 : index
      %c512 = arith.constant 512 : index
      %429 = vector.load %arg19[%c0_162, %c0_163, %c512] : memref<1x64x2048xbf16, #tpu.memory_space<vmem>>, vector<1x64x512xbf16>
      %430 = vector.shape_cast %429 : vector<1x64x512xbf16> to vector<64x512xbf16>
      %cst_164 = arith.constant dense<0.000000e+00> : vector<16x512xf32>
      %431 = tpu.matmul %413, %430, %cst_164 {dimension_numbers = #tpu.dot_dimension_numbers<[1], [0], [0], [1], [0, 0, 1, 1], [], []>} : vector<16x64xbf16>, vector<64x512xbf16>, vector<16x512xf32> -> vector<16x512xf32>
      %c0_165 = arith.constant 0 : index
      %c0_166 = arith.constant 0 : index
      %c512_167 = arith.constant 512 : index
      %432 = vector.load %arg20[%c0_165, %c0_166, %c512_167] : memref<1x1x2048xf32, #tpu.memory_space<vmem>>, vector<1x1x512xf32>
      %433 = vector.shape_cast %432 : vector<1x1x512xf32> to vector<1x512xf32>
      %434 = vector.broadcast %433 : vector<1x512xf32> to vector<16x512xf32>
      %435 = arith.addf %431, %434 : vector<16x512xf32>
      %cst_168 = arith.constant 0.000000e+00 : f32
      %436 = vector.broadcast %cst_168 : f32 to vector<16x512xf32>
      %437 = arith.maximumf %435, %436 : vector<16x512xf32>
      %438 = arith.truncf %437 : vector<16x512xf32> to vector<16x512xbf16>
      %c0_169 = arith.constant 0 : index
      %c512_170 = arith.constant 512 : index
      %c0_171 = arith.constant 0 : index
      %439 = vector.load %arg21[%c0_169, %c512_170, %c0_171] : memref<1x2048x64xbf16, #tpu.memory_space<vmem>>, vector<1x512x64xbf16>
      %440 = vector.shape_cast %439 : vector<1x512x64xbf16> to vector<512x64xbf16>
      %cst_172 = arith.constant dense<0.000000e+00> : vector<16x64xf32>
      %441 = tpu.matmul %438, %440, %cst_172 {dimension_numbers = #tpu.dot_dimension_numbers<[1], [0], [0], [1], [0, 0, 1, 1], [], []>} : vector<16x512xbf16>, vector<512x64xbf16>, vector<16x64xf32> -> vector<16x64xf32>
      %442 = arith.addf %428, %441 : vector<16x64xf32>
      %c0_173 = arith.constant 0 : index
      %c0_174 = arith.constant 0 : index
      %c1024 = arith.constant 1024 : index
      %443 = vector.load %arg19[%c0_173, %c0_174, %c1024] : memref<1x64x2048xbf16, #tpu.memory_space<vmem>>, vector<1x64x512xbf16>
      %444 = vector.shape_cast %443 : vector<1x64x512xbf16> to vector<64x512xbf16>
      %cst_175 = arith.constant dense<0.000000e+00> : vector<16x512xf32>
      %445 = tpu.matmul %413, %444, %cst_175 {dimension_numbers = #tpu.dot_dimension_numbers<[1], [0], [0], [1], [0, 0, 1, 1], [], []>} : vector<16x64xbf16>, vector<64x512xbf16>, vector<16x512xf32> -> vector<16x512xf32>
      %c0_176 = arith.constant 0 : index
      %c0_177 = arith.constant 0 : index
      %c1024_178 = arith.constant 1024 : index
      %446 = vector.load %arg20[%c0_176, %c0_177, %c1024_178] : memref<1x1x2048xf32, #tpu.memory_space<vmem>>, vector<1x1x512xf32>
      %447 = vector.shape_cast %446 : vector<1x1x512xf32> to vector<1x512xf32>
      %448 = vector.broadcast %447 : vector<1x512xf32> to vector<16x512xf32>
      %449 = arith.addf %445, %448 : vector<16x512xf32>
      %cst_179 = arith.constant 0.000000e+00 : f32
      %450 = vector.broadcast %cst_179 : f32 to vector<16x512xf32>
      %451 = arith.maximumf %449, %450 : vector<16x512xf32>
      %452 = arith.truncf %451 : vector<16x512xf32> to vector<16x512xbf16>
      %c0_180 = arith.constant 0 : index
      %c1024_181 = arith.constant 1024 : index
      %c0_182 = arith.constant 0 : index
      %453 = vector.load %arg21[%c0_180, %c1024_181, %c0_182] : memref<1x2048x64xbf16, #tpu.memory_space<vmem>>, vector<1x512x64xbf16>
      %454 = vector.shape_cast %453 : vector<1x512x64xbf16> to vector<512x64xbf16>
      %cst_183 = arith.constant dense<0.000000e+00> : vector<16x64xf32>
      %455 = tpu.matmul %452, %454, %cst_183 {dimension_numbers = #tpu.dot_dimension_numbers<[1], [0], [0], [1], [0, 0, 1, 1], [], []>} : vector<16x512xbf16>, vector<512x64xbf16>, vector<16x64xf32> -> vector<16x64xf32>
      %456 = arith.addf %442, %455 : vector<16x64xf32>
      %c0_184 = arith.constant 0 : index
      %c0_185 = arith.constant 0 : index
      %c1536 = arith.constant 1536 : index
      %457 = vector.load %arg19[%c0_184, %c0_185, %c1536] : memref<1x64x2048xbf16, #tpu.memory_space<vmem>>, vector<1x64x512xbf16>
      %458 = vector.shape_cast %457 : vector<1x64x512xbf16> to vector<64x512xbf16>
      %cst_186 = arith.constant dense<0.000000e+00> : vector<16x512xf32>
      %459 = tpu.matmul %413, %458, %cst_186 {dimension_numbers = #tpu.dot_dimension_numbers<[1], [0], [0], [1], [0, 0, 1, 1], [], []>} : vector<16x64xbf16>, vector<64x512xbf16>, vector<16x512xf32> -> vector<16x512xf32>
      %c0_187 = arith.constant 0 : index
      %c0_188 = arith.constant 0 : index
      %c1536_189 = arith.constant 1536 : index
      %460 = vector.load %arg20[%c0_187, %c0_188, %c1536_189] : memref<1x1x2048xf32, #tpu.memory_space<vmem>>, vector<1x1x512xf32>
      %461 = vector.shape_cast %460 : vector<1x1x512xf32> to vector<1x512xf32>
      %462 = vector.broadcast %461 : vector<1x512xf32> to vector<16x512xf32>
      %463 = arith.addf %459, %462 : vector<16x512xf32>
      %cst_190 = arith.constant 0.000000e+00 : f32
      %464 = vector.broadcast %cst_190 : f32 to vector<16x512xf32>
      %465 = arith.maximumf %463, %464 : vector<16x512xf32>
      %466 = arith.truncf %465 : vector<16x512xf32> to vector<16x512xbf16>
      %c0_191 = arith.constant 0 : index
      %c1536_192 = arith.constant 1536 : index
      %c0_193 = arith.constant 0 : index
      %467 = vector.load %arg21[%c0_191, %c1536_192, %c0_193] : memref<1x2048x64xbf16, #tpu.memory_space<vmem>>, vector<1x512x64xbf16>
      %468 = vector.shape_cast %467 : vector<1x512x64xbf16> to vector<512x64xbf16>
      %cst_194 = arith.constant dense<0.000000e+00> : vector<16x64xf32>
      %469 = tpu.matmul %466, %468, %cst_194 {dimension_numbers = #tpu.dot_dimension_numbers<[1], [0], [0], [1], [0, 0, 1, 1], [], []>} : vector<16x512xbf16>, vector<512x64xbf16>, vector<16x64xf32> -> vector<16x64xf32>
      %470 = arith.addf %456, %469 : vector<16x64xf32>
      %c0_195 = arith.constant 0 : index
      %c0_196 = arith.constant 0 : index
      %c0_197 = arith.constant 0 : index
      %471 = vector.load %arg22[%c0_195, %c0_196, %c0_197] : memref<1x1x64xf32, #tpu.memory_space<vmem>>, vector<1x1x64xf32>
      %472 = vector.shape_cast %471 : vector<1x1x64xf32> to vector<1x64xf32>
      %473 = vector.broadcast %472 : vector<1x64xf32> to vector<16x64xf32>
      %474 = arith.addf %470, %473 : vector<16x64xf32>
      %475 = arith.addf %412, %474 : vector<16x64xf32>
      %c0_198 = arith.constant 0 : index
      %c0_199 = arith.constant 0 : index
      %c0_200 = arith.constant 0 : index
      %476 = vector.load %arg23[%c0_198, %c0_199, %c0_200] : memref<1x1x64xf32, #tpu.memory_space<vmem>>, vector<1x1x64xf32>
      %477 = vector.shape_cast %476 : vector<1x1x64xf32> to vector<1x64xf32>
      %c0_201 = arith.constant 0 : index
      %c0_202 = arith.constant 0 : index
      %c0_203 = arith.constant 0 : index
      %478 = vector.load %arg24[%c0_201, %c0_202, %c0_203] : memref<1x1x64xf32, #tpu.memory_space<vmem>>, vector<1x1x64xf32>
      %479 = vector.shape_cast %478 : vector<1x1x64xf32> to vector<1x64xf32>
      %cst_204 = arith.constant dense<0.000000e+00> : vector<16xf32>
      %480 = vector.multi_reduction <add>, %475, %cst_204 [1] : vector<16x64xf32> to vector<16xf32>
      %481 = vector.shape_cast %480 : vector<16xf32> to vector<16x1xf32>
      %cst_205 = arith.constant 6.400000e+01 : f32
      %482 = vector.broadcast %cst_205 : f32 to vector<16x1xf32>
      %483 = arith.divf %481, %482 : vector<16x1xf32>
      %484 = vector.broadcast %483 : vector<16x1xf32> to vector<16x64xf32>
      %485 = arith.subf %475, %484 : vector<16x64xf32>
      %486 = arith.mulf %485, %485 : vector<16x64xf32>
      %cst_206 = arith.constant dense<0.000000e+00> : vector<16xf32>
      %487 = vector.multi_reduction <add>, %486, %cst_206 [1] : vector<16x64xf32> to vector<16xf32>
      %488 = vector.shape_cast %487 : vector<16xf32> to vector<16x1xf32>
      %cst_207 = arith.constant 6.400000e+01 : f32
      %489 = vector.broadcast %cst_207 : f32 to vector<16x1xf32>
      %490 = arith.divf %488, %489 : vector<16x1xf32>
      %cst_208 = arith.constant 9.99999974E-6 : f32
      %491 = vector.broadcast %cst_208 : f32 to vector<16x1xf32>
      %492 = arith.addf %490, %491 : vector<16x1xf32>
      %493 = math.rsqrt %492 : vector<16x1xf32>
      %494 = vector.broadcast %493 : vector<16x1xf32> to vector<16x64xf32>
      %495 = arith.mulf %485, %494 : vector<16x64xf32>
      %496 = vector.broadcast %477 : vector<1x64xf32> to vector<16x64xf32>
      %497 = arith.mulf %495, %496 : vector<16x64xf32>
      %498 = vector.broadcast %479 : vector<1x64xf32> to vector<16x64xf32>
      %499 = arith.addf %497, %498 : vector<16x64xf32>
      %c0_209 = arith.constant 0 : index
      %c0_210 = arith.constant 0 : index
      %500 = vector.load %arg33[%c0_209, %c0_210] : memref<16x64xf32, #tpu.memory_space<vmem>>, vector<16x64xf32>
      tpu.vector_store %arg33[%c0_209, %c0_210], %499 {strides = array<i32>} : memref<16x64xf32, #tpu.memory_space<vmem>>, vector<16x64xf32>,
    } else {
    }
    %c11_i32 = arith.constant 11 : i32
    %12 = arith.cmpi eq, %arg0, %c11_i32 : i32
    %13 = arith.extui %12 : i1 to i32
    %c0_i32_6 = arith.constant 0 : i32
    %14 = arith.cmpi ne, %13, %c0_i32_6 : i32
    scf.if %14 {
      %c0 = arith.constant 0 : index
      %c0_7 = arith.constant 0 : index
      %15 = vector.load %arg33[%c0, %c0_7] : memref<16x64xf32, #tpu.memory_space<vmem>>, vector<16x64xf32>
      %c0_8 = arith.constant 0 : index
      %c0_9 = arith.constant 0 : index
      %16 = vector.load %arg27[%c0_8, %c0_9] : memref<1x64xf32, #tpu.memory_space<vmem>>, vector<1x64xf32>
      %c0_10 = arith.constant 0 : index
      %c0_11 = arith.constant 0 : index
      %17 = vector.load %arg28[%c0_10, %c0_11] : memref<1x64xf32, #tpu.memory_space<vmem>>, vector<1x64xf32>
      %cst = arith.constant dense<0.000000e+00> : vector<16xf32>
      %18 = vector.multi_reduction <add>, %15, %cst [1] : vector<16x64xf32> to vector<16xf32>
      %19 = vector.shape_cast %18 : vector<16xf32> to vector<16x1xf32>
      %cst_12 = arith.constant 6.400000e+01 : f32
      %20 = vector.broadcast %cst_12 : f32 to vector<16x1xf32>
      %21 = arith.divf %19, %20 : vector<16x1xf32>
      %22 = vector.broadcast %21 : vector<16x1xf32> to vector<16x64xf32>
      %23 = arith.subf %15, %22 : vector<16x64xf32>
      %24 = arith.mulf %23, %23 : vector<16x64xf32>
      %cst_13 = arith.constant dense<0.000000e+00> : vector<16xf32>
      %25 = vector.multi_reduction <add>, %24, %cst_13 [1] : vector<16x64xf32> to vector<16xf32>
      %26 = vector.shape_cast %25 : vector<16xf32> to vector<16x1xf32>
      %cst_14 = arith.constant 6.400000e+01 : f32
      %27 = vector.broadcast %cst_14 : f32 to vector<16x1xf32>
      %28 = arith.divf %26, %27 : vector<16x1xf32>
      %cst_15 = arith.constant 9.99999974E-6 : f32
      %29 = vector.broadcast %cst_15 : f32 to vector<16x1xf32>
      %30 = arith.addf %28, %29 : vector<16x1xf32>
      %31 = math.rsqrt %30 : vector<16x1xf32>
      %32 = vector.broadcast %31 : vector<16x1xf32> to vector<16x64xf32>
      %33 = arith.mulf %23, %32 : vector<16x64xf32>
      %34 = vector.broadcast %16 : vector<1x64xf32> to vector<16x64xf32>
      %35 = arith.mulf %33, %34 : vector<16x64xf32>
      %36 = vector.broadcast %17 : vector<1x64xf32> to vector<16x64xf32>
      %37 = arith.addf %35, %36 : vector<16x64xf32>
      %38 = arith.truncf %37 : vector<16x64xf32> to vector<16x64xbf16>
      %c0_16 = arith.constant 0 : index
      %c0_17 = arith.constant 0 : index
      %39 = vector.load %arg29[%c0_16, %c0_17] : memref<64x128xbf16, #tpu.memory_space<vmem>>, vector<64x128xbf16>
      %cst_18 = arith.constant dense<0.000000e+00> : vector<16x128xf32>
      %40 = tpu.matmul %38, %39, %cst_18 {dimension_numbers = #tpu.dot_dimension_numbers<[1], [0], [0], [1], [0, 0, 1, 1], [], []>} : vector<16x64xbf16>, vector<64x128xbf16>, vector<16x128xf32> -> vector<16x128xf32>
      %c0_19 = arith.constant 0 : index
      %c0_20 = arith.constant 0 : index
      %41 = vector.load %arg30[%c0_19, %c0_20] : memref<1x128xf32, #tpu.memory_space<vmem>>, vector<1x128xf32>
      %42 = vector.broadcast %41 : vector<1x128xf32> to vector<16x128xf32>
      %43 = arith.addf %40, %42 : vector<16x128xf32>
      %c0_21 = arith.constant 0 : index
      %c0_22 = arith.constant 0 : index
      %44 = vector.load %arg31[%c0_21, %c0_22] : memref<16x128xf32, #tpu.memory_space<vmem>>, vector<16x128xf32>
      tpu.vector_store %arg31[%c0_21, %c0_22], %43 {strides = array<i32>} : memref<16x128xf32, #tpu.memory_space<vmem>>, vector<16x128xf32>,
    } else {
    }
    return
  }
  func.func @transform_0(%arg0: i32) -> (i32, i32) {
    %c0_i32 = arith.constant 0 : i32
    %c0_i32_0 = arith.constant 0 : i32
    %c0_i32_1 = arith.constant 0 : i32
    return %c0_i32, %c0_i32_0 : i32, i32
  }
  func.func @transform_1(%arg0: i32) -> (i32, i32) {
    %c0_i32 = arith.constant 0 : i32
    %c0_i32_0 = arith.constant 0 : i32
    %c0_i32_1 = arith.constant 0 : i32
    return %c0_i32, %c0_i32_0 : i32, i32
  }
  func.func @transform_2(%arg0: i32) -> (i32, i32, i32) {
    %c0_i32 = arith.constant 0 : i32
    %c0_i32_0 = arith.constant 0 : i32
    %c0_i32_1 = arith.constant 0 : i32
    %c0_i32_2 = arith.constant 0 : i32
    return %c0_i32, %c0_i32_0, %c0_i32_1 : i32, i32, i32
  }
  func.func @transform_3(%arg0: i32) -> (i32, i32, i32) {
    %c0_i32 = arith.constant 0 : i32
    %c0_i32_0 = arith.constant 0 : i32
    %c0_i32_1 = arith.constant 0 : i32
    %c0_i32_2 = arith.constant 0 : i32
    return %c0_i32, %c0_i32_0, %c0_i32_1 : i32, i32, i32
  }
  func.func @transform_4(%arg0: i32) -> (i32, i32, i32) {
    %c0_i32 = arith.constant 0 : i32
    %c0_i32_0 = arith.constant 0 : i32
    %c0_i32_1 = arith.constant 0 : i32
    return %arg0, %c0_i32, %c0_i32_0 : i32, i32, i32
  }
  func.func @transform_5(%arg0: i32) -> (i32, i32, i32) {
    %c0_i32 = arith.constant 0 : i32
    %c0_i32_0 = arith.constant 0 : i32
    %c0_i32_1 = arith.constant 0 : i32
    return %arg0, %c0_i32, %c0_i32_0 : i32, i32, i32
  }
  func.func @transform_6(%arg0: i32) -> (i32, i32, i32) {
    %c0_i32 = arith.constant 0 : i32
    %c0_i32_0 = arith.constant 0 : i32
    %c0_i32_1 = arith.constant 0 : i32
    return %arg0, %c0_i32, %c0_i32_0 : i32, i32, i32
  }
  func.func @transform_7(%arg0: i32) -> (i32, i32, i32) {
    %c0_i32 = arith.constant 0 : i32
    %c0_i32_0 = arith.constant 0 : i32
    %c0_i32_1 = arith.constant 0 : i32
    return %arg0, %c0_i32, %c0_i32_0 : i32, i32, i32
  }
  func.func @transform_8(%arg0: i32) -> (i32, i32, i32) {
    %c0_i32 = arith.constant 0 : i32
    %c0_i32_0 = arith.constant 0 : i32
    %c0_i32_1 = arith.constant 0 : i32
    return %arg0, %c0_i32, %c0_i32_0 : i32, i32, i32
  }
  func.func @transform_9(%arg0: i32) -> (i32, i32, i32) {
    %c0_i32 = arith.constant 0 : i32
    %c0_i32_0 = arith.constant 0 : i32
    %c0_i32_1 = arith.constant 0 : i32
    return %arg0, %c0_i32, %c0_i32_0 : i32, i32, i32
  }
  func.func @transform_10(%arg0: i32) -> (i32, i32, i32) {
    %c6_i32 = arith.constant 6 : i32
    %0 = arith.subi %arg0, %c6_i32 : i32
    %c0_i32 = arith.constant 0 : i32
    %1 = arith.maxsi %0, %c0_i32 : i32
    %c0_i32_0 = arith.constant 0 : i32
    %c0_i32_1 = arith.constant 0 : i32
    %c0_i32_2 = arith.constant 0 : i32
    return %1, %c0_i32_0, %c0_i32_1 : i32, i32, i32
  }
  func.func @transform_11(%arg0: i32) -> (i32, i32, i32) {
    %c6_i32 = arith.constant 6 : i32
    %0 = arith.subi %arg0, %c6_i32 : i32
    %c0_i32 = arith.constant 0 : i32
    %1 = arith.maxsi %0, %c0_i32 : i32
    %c0_i32_0 = arith.constant 0 : i32
    %c0_i32_1 = arith.constant 0 : i32
    %c0_i32_2 = arith.constant 0 : i32
    return %1, %c0_i32_0, %c0_i32_1 : i32, i32, i32
  }
  func.func @transform_12(%arg0: i32) -> (i32, i32, i32) {
    %c6_i32 = arith.constant 6 : i32
    %0 = arith.subi %arg0, %c6_i32 : i32
    %c0_i32 = arith.constant 0 : i32
    %1 = arith.maxsi %0, %c0_i32 : i32
    %c0_i32_0 = arith.constant 0 : i32
    %c0_i32_1 = arith.constant 0 : i32
    %c0_i32_2 = arith.constant 0 : i32
    return %1, %c0_i32_0, %c0_i32_1 : i32, i32, i32
  }
  func.func @transform_13(%arg0: i32) -> (i32, i32, i32) {
    %c6_i32 = arith.constant 6 : i32
    %0 = arith.subi %arg0, %c6_i32 : i32
    %c0_i32 = arith.constant 0 : i32
    %1 = arith.maxsi %0, %c0_i32 : i32
    %c0_i32_0 = arith.constant 0 : i32
    %c0_i32_1 = arith.constant 0 : i32
    %c0_i32_2 = arith.constant 0 : i32
    return %1, %c0_i32_0, %c0_i32_1 : i32, i32, i32
  }
  func.func @transform_14(%arg0: i32) -> (i32, i32, i32) {
    %c6_i32 = arith.constant 6 : i32
    %0 = arith.subi %arg0, %c6_i32 : i32
    %c0_i32 = arith.constant 0 : i32
    %1 = arith.maxsi %0, %c0_i32 : i32
    %c0_i32_0 = arith.constant 0 : i32
    %c0_i32_1 = arith.constant 0 : i32
    %c0_i32_2 = arith.constant 0 : i32
    return %1, %c0_i32_0, %c0_i32_1 : i32, i32, i32
  }
  func.func @transform_15(%arg0: i32) -> (i32, i32, i32) {
    %c6_i32 = arith.constant 6 : i32
    %0 = arith.subi %arg0, %c6_i32 : i32
    %c0_i32 = arith.constant 0 : i32
    %1 = arith.maxsi %0, %c0_i32 : i32
    %c0_i32_0 = arith.constant 0 : i32
    %c0_i32_1 = arith.constant 0 : i32
    %c0_i32_2 = arith.constant 0 : i32
    return %1, %c0_i32_0, %c0_i32_1 : i32, i32, i32
  }
  func.func @transform_16(%arg0: i32) -> (i32, i32, i32) {
    %c6_i32 = arith.constant 6 : i32
    %0 = arith.subi %arg0, %c6_i32 : i32
    %c0_i32 = arith.constant 0 : i32
    %1 = arith.maxsi %0, %c0_i32 : i32
    %c0_i32_0 = arith.constant 0 : i32
    %c0_i32_1 = arith.constant 0 : i32
    %c0_i32_2 = arith.constant 0 : i32
    return %1, %c0_i32_0, %c0_i32_1 : i32, i32, i32
  }
  func.func @transform_17(%arg0: i32) -> (i32, i32, i32) {
    %c6_i32 = arith.constant 6 : i32
    %0 = arith.subi %arg0, %c6_i32 : i32
    %c0_i32 = arith.constant 0 : i32
    %1 = arith.maxsi %0, %c0_i32 : i32
    %c0_i32_0 = arith.constant 0 : i32
    %c0_i32_1 = arith.constant 0 : i32
    %c0_i32_2 = arith.constant 0 : i32
    return %1, %c0_i32_0, %c0_i32_1 : i32, i32, i32
  }
  func.func @transform_18(%arg0: i32) -> (i32, i32, i32) {
    %c0_i32 = arith.constant 0 : i32
    %c0_i32_0 = arith.constant 0 : i32
    %c0_i32_1 = arith.constant 0 : i32
    return %arg0, %c0_i32, %c0_i32_0 : i32, i32, i32
  }
  func.func @transform_19(%arg0: i32) -> (i32, i32, i32) {
    %c0_i32 = arith.constant 0 : i32
    %c0_i32_0 = arith.constant 0 : i32
    %c0_i32_1 = arith.constant 0 : i32
    return %arg0, %c0_i32, %c0_i32_0 : i32, i32, i32
  }
  func.func @transform_20(%arg0: i32) -> (i32, i32, i32) {
    %c0_i32 = arith.constant 0 : i32
    %c0_i32_0 = arith.constant 0 : i32
    %c0_i32_1 = arith.constant 0 : i32
    return %arg0, %c0_i32, %c0_i32_0 : i32, i32, i32
  }
  func.func @transform_21(%arg0: i32) -> (i32, i32, i32) {
    %c0_i32 = arith.constant 0 : i32
    %c0_i32_0 = arith.constant 0 : i32
    %c0_i32_1 = arith.constant 0 : i32
    return %arg0, %c0_i32, %c0_i32_0 : i32, i32, i32
  }
  func.func @transform_22(%arg0: i32) -> (i32, i32, i32) {
    %c0_i32 = arith.constant 0 : i32
    %c0_i32_0 = arith.constant 0 : i32
    %c0_i32_1 = arith.constant 0 : i32
    return %arg0, %c0_i32, %c0_i32_0 : i32, i32, i32
  }
  func.func @transform_23(%arg0: i32) -> (i32, i32, i32) {
    %c0_i32 = arith.constant 0 : i32
    %c0_i32_0 = arith.constant 0 : i32
    %c0_i32_1 = arith.constant 0 : i32
    return %arg0, %c0_i32, %c0_i32_0 : i32, i32, i32
  }
  func.func @transform_24(%arg0: i32) -> (i32, i32) {
    %c0_i32 = arith.constant 0 : i32
    %c0_i32_0 = arith.constant 0 : i32
    %c0_i32_1 = arith.constant 0 : i32
    return %c0_i32, %c0_i32_0 : i32, i32
  }
  func.func @transform_25(%arg0: i32) -> (i32, i32) {
    %c0_i32 = arith.constant 0 : i32
    %c0_i32_0 = arith.constant 0 : i32
    %c0_i32_1 = arith.constant 0 : i32
    return %c0_i32, %c0_i32_0 : i32, i32
  }
  func.func @transform_26(%arg0: i32) -> (i32, i32) {
    %c0_i32 = arith.constant 0 : i32
    %c0_i32_0 = arith.constant 0 : i32
    %c0_i32_1 = arith.constant 0 : i32
    return %c0_i32, %c0_i32_0 : i32, i32
  }
  func.func @transform_27(%arg0: i32) -> (i32, i32) {
    %c0_i32 = arith.constant 0 : i32
    %c0_i32_0 = arith.constant 0 : i32
    %c0_i32_1 = arith.constant 0 : i32
    return %c0_i32, %c0_i32_0 : i32, i32
  }
  func.func @transform_28(%arg0: i32) -> (i32, i32) {
    %c0_i32 = arith.constant 0 : i32
    %c0_i32_0 = arith.constant 0 : i32
    %c0_i32_1 = arith.constant 0 : i32
    return %c0_i32, %c0_i32_0 : i32, i32
  }
  func.func @transform_29(%arg0: i32) -> (i32, i32) {
    %c0_i32 = arith.constant 0 : i32
    %c0_i32_0 = arith.constant 0 : i32
    %c0_i32_1 = arith.constant 0 : i32
    return %c0_i32, %c0_i32_0 : i32, i32
  }
  func.func @transform_30(%arg0: i32) -> (i32, i32) {
    %c0_i32 = arith.constant 0 : i32
    %c0_i32_0 = arith.constant 0 : i32
    %c0_i32_1 = arith.constant 0 : i32
    return %c0_i32, %c0_i32_0 : i32, i32
  }
}

</mosaic_0001>

<bundles_post_ra>
// kernel: translate_forward.1
= control target key start
LH: loop header
LB: loop body
LE: loop exit
PB: predicated region body
PF: predicated region fallthrough
CT: control target
= control target key end

     0   :  { %s19586_s6 = smov 1   ;;  %s19587_s10 = smov 2   ;;  %s21620_s0 = inlined_call_operand.smem [shape: u32[31], index: -1, kind: input, shape index: {}] }
   0x1   :  { %s19662_s5 = sld [smem:[%s21620_s0]]   ;;  %s19588_s14 = smov 3  }
   0x2   :  { %s19667_s9 = sld [smem:[%s21620_s0 + %s19586_s6]]   ;;  %s19589_s18 = smov 4  }
   0x3   :  { %s19672_s13 = sld [smem:[%s21620_s0 + %s19587_s10]]   ;;  %s19590_s22 = smov 5  }
   0x4   :  { %s19677_s17 = sld [smem:[%s21620_s0 + %s19588_s14]]   ;;  %s19591_s26 = smov 6  }
   0x5   :  { %s19682_s21 = sld [smem:[%s21620_s0 + %s19589_s18]]   ;;  %s19592_s30 = smov 7  }
   0x6   :  { %s19687_s25 = sld [smem:[%s21620_s0 + %s19590_s22]]   ;;  %s19593_s4 = smov 8  }
   0x7   :  { %21645 = sst [smem:[#allocation4_spill]] %s19662_s5  ;;  %s19594_s10 = smov 9  }
   0x8   :  { %21646 = sst [smem:[#allocation5_spill]] %s19667_s9  ;;  %s19595_s15 = smov 10  }
   0x9   :  { %21647 = sst [smem:[#allocation6_spill]] %s19672_s13  ;;  %s19596_s20 = smov 11  }
   0xa   :  { %21648 = sst [smem:[#allocation7_spill]] %s19677_s17  ;;  %s19598_s1 = smov 13  }
   0xb   :  { %21649 = sst [smem:[#allocation8_spill]] %s19682_s21  ;;  %s19599_s7 = smov 14  }
   0xc   :  { %21650 = sst [smem:[#allocation9_spill]] %s19687_s25  ;;  %s19601_s22 = smov 16  }
   0xd   :  { %s19692_s29 = sld [smem:[%s21620_s0 + %s19591_s26]]   ;;  %s19597_s26 = smov 12  }
   0xe   :  { %s19697_s3 = sld [smem:[%s21620_s0 + %s19592_s30]]   ;;  %s19602_s28 = smov 17  }
   0xf   :  { %s19702_s8 = sld [smem:[%s21620_s0 + %s19593_s4]]  }
  0x10   :  { %s19707_s14 = sld [smem:[%s21620_s0 + %s19594_s10]]  }
  0x11   :  { %s19712_s19 = sld [smem:[%s21620_s0 + %s19595_s15]]   ;;  %s19600_s15 = smov 15  }
  0x12   :  { %s19717_s24 = sld [smem:[%s21620_s0 + %s19596_s20]]  }
  0x13   :  { %21651 = sst [smem:[#allocation10_spill]] %s19692_s29 }
  0x14   :  { %21652 = sst [smem:[#allocation11_spill]] %s19697_s3 }
  0x15   :  { %21653 = sst [smem:[#allocation12_spill]] %s19702_s8 }
  0x16   :  { %21654 = sst [smem:[#allocation13_spill]] %s19707_s14 }
  0x17   :  { %21655 = sst [smem:[#allocation14_spill]] %s19712_s19 }
  0x18   :  { %21656 = sst [smem:[#allocation15_spill]] %s19717_s24 }
  0x19   :  { %s19722_s30 = sld [smem:[%s21620_s0 + %s19597_s26]]  }
  0x1a   :  { %s19727_s6 = sld [smem:[%s21620_s0 + %s19598_s1]]  }
  0x1b   :  { %s19732_s12 = sld [smem:[%s21620_s0 + %s19599_s7]]   ;;  %s19603_s7 = smov 18  }
  0x1c   :  { %s19737_s20 = sld [smem:[%s21620_s0 + %s19600_s15]]   ;;  %s19604_s15 = smov 19  }
  0x1d   :  { %s19742_s27 = sld [smem:[%s21620_s0 + %s19601_s22]]   ;;  %s19605_s22 = smov 20  }
  0x1e   :  { %s19747_s4 = sld [smem:[%s21620_s0 + %s19602_s28]]   ;;  %s19606_s28 = smov 21  }
  0x1f   :  { %s19752_s17 = sld [smem:[%s21620_s0 + %s19603_s7]]   ;;  %s19607_s7 = smov 22  }
  0x20   :  { %s19757_s13 = sld [smem:[%s21620_s0 + %s19604_s15]]   ;;  %s19608_s15 = smov 23  }
  0x21   :  { %s19762_s9 = sld [smem:[%s21620_s0 + %s19605_s22]]   ;;  %s19609_s22 = smov 24  }
  0x22   :  { %s19767_s5 = sld [smem:[%s21620_s0 + %s19606_s28]]   ;;  %s19610_s28 = smov 25  }
  0x25   :  { %21657 = sst [smem:[#allocation16_spill]] %s19752_s17 }
  0x26   :  { %21658 = sst [smem:[#allocation17_spill]] %s19757_s13 }
  0x27   :  { %21659 = sst [smem:[#allocation18_spill]] %s19762_s9 }
  0x28   :  { %21660 = sst [smem:[#allocation19_spill]] %s19767_s5 }
  0x29   :  { %s19772_s17 = sld [smem:[%s21620_s0 + %s19607_s7]]   ;;  %s19611_s7 = smov 26  }
  0x2a   :  { %s19777_s13 = sld [smem:[%s21620_s0 + %s19608_s15]]   ;;  %s19612_s15 = smov 27  }
  0x2b   :  { %s19782_s9 = sld [smem:[%s21620_s0 + %s19609_s22]]   ;;  %s19613_s22 = smov 28  }
  0x2c   :  { %s19787_s5 = sld [smem:[%s21620_s0 + %s19610_s28]]   ;;  %s19614_s28 = smov 29  }
  0x2f   :  { %21661 = sst [smem:[#allocation20_spill]] %s19772_s17 }
  0x30   :  { %21662 = sst [smem:[#allocation21_spill]] %s19777_s13 }
  0x31   :  { %21663 = sst [smem:[#allocation22_spill]] %s19782_s9 }
  0x32   :  { %21664 = sst [smem:[#allocation23_spill]] %s19787_s5 }
  0x33   :  { %s19792_s17 = sld [smem:[%s21620_s0 + %s19611_s7]]   ;;  %s19615_s7 = smov 30  }
  0x34   :  { %s19797_s13 = sld [smem:[%s21620_s0 + %s19612_s15]]   ;;  %s19814_s15 = smov 0  }
  0x35   :  { %s19802_s9 = sld [smem:[%s21620_s0 + %s19613_s22]]  }
  0x36   :  { %s19807_s5 = sld [smem:[%s21620_s0 + %s19614_s28]]  }
  0x39   :  { %21665 = sst [smem:[#allocation24_spill]] %s19792_s17 }
  0x3a   :  { %21666 = sst [smem:[#allocation25_spill]] %s19797_s13 }
  0x3b   :  { %21667 = sst [smem:[#allocation26_spill]] %s19802_s9 }
  0x3c   :  { %21668 = sst [smem:[#allocation27_spill]] %s19807_s5 }
  0x3d   :  { %s19812_s17 = sld [smem:[%s21620_s0 + %s19615_s7]]  }
  0x43   :  { %21669 = sst [smem:[#allocation28_spill]] %s19812_s17 }
  0x44 LB: > { %21670 = sst [smem:[#allocation29_spill]] %s19584_s15  ;;  %s19820_s16 = sadd.s32 4294967295, %s19584_s15   ;;  %s19584_s15 = sphi %s19814_s15, %s71_s15  }
  0x45   : > { %21671 = sst [smem:[#allocation30_spill]] %s19820_s16  ;;  %p16933_p0 = scmp.ge.s32.totalorder %s19584_s15, 1 }
  0x46   : > { %p1100_p1 = scmp.lt.s32.totalorder %s19584_s15, 13 }
  0x48   : > { %p1101_p2 = pnand %p16933_p0, %p1100_p1 }
  0x4a   : > { %1104 = sbr.rel (%p1101_p2) target bundleno = 19198 (0x4afe), region = 140 }
  0x51   : > { %s21672_s21 = sld [smem:[#allocation8_spill]]  ;;  %s21673_s25 = sld [smem:[#allocation9_spill]] }
  0x52   : > { %s21674_s29 = sld [smem:[#allocation10_spill]]  ;;  %s21675_s3 = sld [smem:[#allocation11_spill]] }
  0x53   : > { %s21676_s8 = sld [smem:[#allocation12_spill]]  ;;  %s21677_s14 = sld [smem:[#allocation13_spill]] }
  0x54   : > { %p1268_p3 = scmp.lt.s32.totalorder %s19820_s16, 11  ;;  %s16939_s0 = sadd.s32 4294967290, %s19820_s16 }
  0x55   : > { %p1292_p4 = scmp.gt.s32.totalorder %s16939_s0, 0  ;;  %p16940_p5 = scmp.lt.s32.totalorder %s16939_s0, 5 }
  0x56   : > { %s21679_s19 = sld [smem:[#allocation14_spill]]  ;;  %s21684_s7 = sld [smem:[#allocation16_spill]] }
  0x57   : > { %s19827_s18 = scalar_select %p1268_p3, %s19820_s16, 11 }
  0x58   : > { %s21734_s0 = smov (!%p1292_p4, %s16939_s0), 0  ;;  %s21686_s11 = sld [smem:[#allocation17_spill]] }
  0x59   : > { %s17654_s22 = sshll.u32 %s19827_s18, 6  ;;  %s16936_s23 = sshll.u32 %s19827_s18, 1 }
  0x5a   : > { %s19832_s26 = scalar_lea.vmem %s21672_s21, %s17654_s22  ;;  %s19835_s28 = scalar_lea.vmem %s21673_s25, %s16936_s23 }
  0x5b   : > { %21680 = sst [smem:[#allocation31_spill]] %s19832_s26  ;;  %s19838_s1 = scalar_lea.vmem %s21674_s29, %s17654_s22 }
  0x5c   : > { %21681 = sst [smem:[#allocation32_spill]] %s19835_s28  ;;  %s19842_s2 = scalar_lea.vmem %s21675_s3, %s19827_s18 }
  0x5d   : > { %21682 = sst [smem:[#allocation33_spill]] %s19838_s1  ;;  %s19846_s10 = scalar_lea.vmem %s21676_s8, %s19827_s18 }
  0x5e   : > { %21683 = sst [smem:[#allocation34_spill]] %s19842_s2  ;;  %s19850_s15 = scalar_lea.vmem %s21677_s14, %s19827_s18 }
  0x5f   : > { %21685 = sst [smem:[#allocation35_spill]] %s19846_s10  ;;  %s21736_s0 = smov (!%p16940_p5, %s21734_s0), 5 }
  0x60   : > { %21687 = sst [smem:[#allocation36_spill]] %s19850_s15  ;;  %s21688_s22 = sld [smem:[#allocation19_spill]] }
  0x61   : > { %s17675_s23 = sshll.u32 %s19827_s18, 9  ;;  %s21689_s3 = sld [smem:[#allocation18_spill]] }
  0x62   : > { %s16995_s21 = sshll.u32 %s19827_s18, 4  ;;  %s21690_s8 = sld [smem:[#allocation20_spill]] }
  0x63   : > { %s17658_s25 = sshll.u32 %s21736_s0, 5  ;;  %s21691_s14 = sld [smem:[#allocation21_spill]] }
  0x64   : > { %s19860_s17 = scalar_lea.vmem %s21679_s19, %s17658_s25  ;;  %s19863_s5 = scalar_lea.vmem %s19722_s30, %s17658_s25 }
  0x65   : > { %s17668_s9 = sshll.u32 %s21736_s0, 6  ;;  %s19878_s28 = scalar_lea.vmem %s21684_s7, %s17675_s23 }
  0x66   : > { %s19869_s15 = scalar_lea.vmem %s19732_s12, %s17668_s9  ;;  %s19881_s26 = scalar_lea.vmem %s21686_s11, %s16995_s21 }
  0x67   : > { %s17676_s16 = sshll.u32 %s19827_s18, 10  ;;  %s19886_s24 = scalar_lea.vmem %s21688_s22, %s19827_s18 }
  0x68   : > { %s19889_s29 = scalar_lea.vmem %s21689_s3, %s17676_s16  ;;  %s19893_s19 = scalar_lea.vmem %s21690_s8, %s19827_s18 }
  0x69   : > { %s19897_s25 = scalar_lea.vmem %s21691_s14, %s19827_s18  ;;  %s21692_s13 = sld [smem:[#allocation30_spill]] }
  0x6f   : > { %p16998_p6 = scmp.ne.s32.totalorder %s21692_s13, 0 }
  0x70   : > { %s21693_s9 = sld [smem:[#allocation4_spill]] (!%p16998_p6)  ;;  %vm1399_vm0 = vcmask (!%p16998_p6), 523264  }
  0x71   : > { %1396 = sbr.rel (%p16998_p6) target bundleno = 120 (0x78), region = 144 }
  0x76   : > { %v1397_v0 = vld [vmem:[%s21693_s9] sm:$0xff] (!%p16998_p6)  ;;  %v1398_v1 = vld [vmem:[%s21693_s9 + $0x8] sm:$0xff] (!%p16998_p6) }
  0x77   : > { %1400 = vst.msk [vmem:[#allocation2] sm:$0xff] (!%p16998_p6), %vm1399_vm0, %v1397_v0  ;;  %1401 = vst.msk [vmem:[#allocation2 + $0x8] sm:$0xff] (!%p16998_p6), %vm1399_vm0, %v1398_v1 }
  0x78 PF: > { %s21694_s21 = sld [smem:[#allocation30_spill]] }
  0x7e   : > { %p16999_p7 = scmp.ne.s32.totalorder %s21694_s21, 6 }
  0x7f   : > { %v1406_v2 = vld [vmem:[#allocation2] sm:$0xff] (!%p16999_p7)  ;;  %s21695_s3 = sld [smem:[#allocation5_spill]] (!%p16999_p7)  ;;  %vm1410_vm1 = vcmask (!%p16999_p7), 523264   ;;  %v1407_v6 = vld [vmem:[#allocation2 + $0x8] sm:$0xff] (!%p16999_p7)  ;;  %s21696_s13 = sld [smem:[#allocation22_spill]] (!%p16999_p7) }
  0x80   : > { %1405 = sbr.rel (%p16999_p7) target bundleno = 446 (0x1be), region = 148  ;;  %v1411_v5 = vsel (!%p16999_p7), %vm1410_vm1, %v1406_v2, 0.0  ;;  %v1414_v7 = vsel (!%p16999_p7), %vm1410_vm1, %v1407_v6, 0.0  ;;  %s21697_s8 = sld [smem:[#allocation23_spill]] (!%p16999_p7) }
  0x81   : > { %1412 = vadd.xlane.f32.xlu0 (!%p16999_p7), %v1411_v5 }
  0x85   : > { %v1456_v3 = vld [vmem:[%s21695_s3] sm:$0xff] (!%p16999_p7)  ;;  %v1457_v4 = vld [vmem:[%s21695_s3 + $0x8] sm:$0xff] (!%p16999_p7)  ;;  %1415 = vadd.xlane.f32.xlu0 (!%p16999_p7), %v1414_v7 }
  0x86   : > { %1458 = vst.msk [vmem:[#allocation3] sm:$0xff] (!%p16999_p7), %vm1410_vm1, %v1456_v3  ;;  %1459 = vst.msk [vmem:[#allocation3 + $0x8] sm:$0xff] (!%p16999_p7), %vm1410_vm1, %v1457_v4  ;;  %v17000_v25 = vld [vmem:[%s21696_s13] ss:$0 sm:$0xff] (!%p16999_p7) }
  0x87   : > { %v17001_v27 = vld [vmem:[%s21697_s8] ss:$0 sm:$0xff] }
 0x10e   : > { %v1413_v8 = vpop.xlane.xlu0 %1412 }
 0x10f   : > { %v1418_v9 = vmul.f32 0.015625, %v1413_v8 }
 0x111   : > { %v1420_v10 = vsub.f32 %v1406_v2, %v1418_v9 }
 0x112   : > { %v1416_v11 = vpop.xlane.xlu0 %1415 }
 0x113   : > { %v1419_v12 = vmul.f32 0.015625, %v1416_v11  ;;  %v1422_v13 = vmul.f32 %v1420_v10, %v1420_v10 }
 0x115   : > { %v1421_v14 = vsub.f32 %v1407_v6, %v1419_v12  ;;  %v1424_v15 = vsel %vm1410_vm1, %v1422_v13, 0.0 }
 0x116   : > { %1425 = vadd.xlane.f32.xlu1 %v1424_v15 }
 0x117   : > { %v1423_v16 = vmul.f32 %v1421_v14, %v1421_v14 }
 0x119   : > { %v1427_v17 = vsel %vm1410_vm1, %v1423_v16, 0.0 }
 0x11a   : > { %1428 = vadd.xlane.f32.xlu1 %v1427_v17 }
 0x1a3   : > { %v1426_v18 = vpop.xlane.xlu1 %1425 }
 0x1a4   : > { %v1430_v19 = vmul.f32 0.015625, %v1426_v18 }
 0x1a6   : > { %v1432_v20 = vadd.f32 1e-05, %v1430_v19 }
 0x1a7   : > { %v1429_v21 = vpop.xlane.xlu1 %1428 }
 0x1a8   : > { %19062 = vrsqrt.f32 %v1432_v20  ;;  %v1431_v22 = vmul.f32 0.015625, %v1429_v21 }
 0x1aa   : > { %v1433_v23 = vadd.f32 1e-05, %v1431_v22 }
 0x1ac   : > { %19064 = vrsqrt.f32 %v1433_v23 }
 0x1b2   : > { %v19063_v24 = vpop.eup %19062 }
 0x1b3   : > { %v1436_v26 = vmul.f32 %v19063_v24, %v1420_v10 }
 0x1b5   : > { %v1444_v28 = vmul.f32 %v17000_v25, %v1436_v26 }
 0x1b6   : > { %v19065_v29 = vpop.eup %19064 }
 0x1b7   : > { %v1452_v30 = vadd.f32 %v17001_v27, %v1444_v28  ;;  %v1437_v31 = vmul.f32 %v19065_v29, %v1421_v14 }
 0x1b9   : > { %1454 = vst.msk [vmem:[#allocation2] sm:$0xff] %vm1410_vm1, %v1452_v30  ;;  %v1445_v32 = vmul.f32 %v17000_v25, %v1437_v31 }
 0x1bb   : > { %v1453_v33 = vadd.f32 %v17001_v27, %v1445_v32 }
 0x1bd   : > { %1455 = vst.msk [vmem:[#allocation2 + $0x8] sm:$0xff] %vm1410_vm1, %v1453_v33 }
 0x1be PF: > { %s21698_s14 = sld [smem:[#allocation30_spill]] }
 0x1c4   : > { %p17002_p8 = scmp.ge.s32.totalorder %s21698_s14, 6 }
 0x1c5   : > { %s21699_s16 = sld [smem:[#allocation31_spill]] (!%p17002_p8)  ;;  %v19616_v36 = vmov (!%p17002_p8), 0   ;;  %vm1550_vm2 = vcmask (!%p17002_p8), 523264   ;;  %v1464_v43 = vld [vmem:[#allocation2] sm:$0xff] (!%p17002_p8)  ;;  %s21700_s18 = sld [smem:[#allocation32_spill]] (!%p17002_p8)  ;;  %v1465_v44 = vld [vmem:[#allocation2 + $0x8] sm:$0xff] (!%p17002_p8)  ;;  %v1500_v47 = vlaneseq (!%p17002_p8) }
 0x1c6   : > { %1463 = sbr.rel (%p17002_p8) target bundleno = 6838 (0x1ab6), region = 152  ;;  %1586 = vmatprep.mubr.bf16.mxu0 (!%p17002_p8), %v19616_v36  ;;  %v1498_v45 = vpack.c.bf16 (!%p17002_p8), %v1465_v44, %v1464_v43  ;;  %v19617_v46 = vmov (!%p17002_p8), 0.0   ;;  %vm19618_vm3 = vmmov (!%p17002_p8), 0   ;;  %s19619_s7 = smov (!%p17002_p8), 64   ;;  %vm1602_vm4 = vcmask (!%p17002_p8), 64512  }
 0x1c7   : > { %18308 = vmatprep.subr.mxu1 (!%p17002_p8), %v19617_v46  ;;  %v19928_v48 = vshrl.u32 (!%p17002_p8), %v1500_v47, 7  ;;  %18310 = vmatprep.mubr.msk.f32.mxu1 (!%p17002_p8), %vm19618_vm3, %v19617_v46  ;;  %s19620_s11 = smov (!%p17002_p8), 56   ;;  %s19621_s22 = smov (!%p17002_p8), 120  }
 0x1c8   : > { %s21701_s23 = sld [smem:[#allocation6_spill]] (!%p17002_p8)  ;;  %s19622_s21 = smov (!%p17002_p8), 112  }
 0x1c9   : > { %v19935_v49 = vsub.s32 (!%p17002_p8), 0, %v19928_v48  ;;  %v19940_v52 = vsub.s32 (!%p17002_p8), 1, %v19928_v48  ;;  %s19623_s13 = smov (!%p17002_p8), 48   ;;  %s19624_s8 = smov (!%p17002_p8), 40  }
 0x1ca   : > { %s19625_s14 = smov (!%p17002_p8), 104  }
 0x1cb   : > { %v19066_v34 = vld [vmem:[%s21699_s16 + $0x4] ss:$8 sps:$4 sm:$0xff] (!%p17002_p8)   ;;  %v19068_v35 = vld [vmem:[%s21699_s16] ss:$8 sps:$4 sm:$0xff] (!%p17002_p8)   ;;  %v19069_v37 = vld [vmem:[%s21699_s16 + $0x14] ss:$8 sps:$4 sm:$0xff] (!%p17002_p8)  }
 0x1cc   : > { %1554 = vmatprep.subr.bf16.mxu0 (!%p17002_p8), %v19066_v34  ;;  %v19071_v38 = vld [vmem:[%s21699_s16 + $0x10] ss:$8 sps:$4 sm:$0xff] (!%p17002_p8)   ;;  %v19072_v39 = vld [vmem:[%s21699_s16 + $0x24] ss:$8 sps:$4 sm:$0xff] (!%p17002_p8)   ;;  %v19074_v40 = vld [vmem:[%s21699_s16 + $0x20] ss:$8 sps:$4 sm:$0xff] (!%p17002_p8)  }
 0x1cd   : > { %1555 = vmatpush1.bf16.msra.mxu0 %v19068_v35  ;;  %v19075_v41 = vld [vmem:[%s21699_s16 + $0x34] ss:$8 sps:$4 sm:$0xff]   ;;  %v19077_v42 = vld [vmem:[%s21699_s16 + $0x30] ss:$8 sps:$4 sm:$0xff]   ;;  %v1488_v50 = vld [vmem:[%s21700_s18] sm:$0x3] }
 0x1ce   : > { %1556 = vmatprep.subr.bf16.mxu0 %v19069_v37  ;;  %v1503_v51 = vrot.slane %v1488_v50, %v19935_v49  ;;  %v1507_v56 = vrot.slane %v1488_v50, %v19940_v52  ;;  %v19983_v4 = vld [vmem:[%s21701_s23] ss:$0 sm:$0xff]  ;;  %v19987_v8 = vld [vmem:[%s21701_s23 + $0x1] ss:$0 sm:$0xff]  ;;  %s19626_s16 = smov 32   ;;  %s21702_s18 = sld [smem:[#allocation33_spill]] }
 0x1d1   : > { %1557 = vmatpush1.bf16.msra.mxu0 %v19071_v38 }
 0x1d2   : > { %1558 = vmatprep.subr.bf16.mxu0 %v19072_v39 }
 0x1d5   : > { %1559 = vmatpush1.bf16.msra.mxu0 %v19074_v40 }
 0x1d6   : > { %1560 = vmatprep.subr.bf16.mxu0 %v19075_v41 }
 0x1d9   : > { %1561 = vmatpush1.bf16.msra.mxu0 %v19077_v42 }
 0x1da   : > { %18333 = vmatprep.subr.mxu0 %v19617_v46 }
 0x1dc   : > { %17013 = vmatmul.mubr.msk.bf16.vlgmr.msra.gmra.mrb[0].mxu0 %vm1550_vm2, %v1498_v45 }
 0x1dd   : > { %18335 = vmatprep.mubr.msk.f32.mxu0 %vm19618_vm3, %v19617_v46 }
 0x2af   : > { %v1588_v53 = vpop.f32.mrb[0].mxu0 }
 0x2b0   : > { %v19942_v54 = vadd.f32 %v1588_v53, %v1503_v51  ;;  %v1590_v55 = vpop.f32.mrb[1].mxu0 }
 0x2b1   : > { %v1592_v57 = vpop.f32.mrb[2].mxu0  ;;  %v19971_v3 = vadd.f32 %v1590_v55, %v1507_v56 }
 0x2b2   : > { %v19945_v58 = vadd.f32 %v1592_v57, %v1503_v51  ;;  %v1594_v59 = vpop.f32.mrb[3].mxu0  ;;  %1600 = vrot.lane.b32.xlu0 %v19942_v54, %s19619_s7  ;;  %v19961_v0 = vmul.f32 0.35355338, %v19942_v54 }
 0x2b3   : > { %v19948_v60 = vadd.f32 %v1594_v59, %v1507_v56 }
 0x2b4   : > { %2004 = vrot.lane.b32.xlu1 %v19945_v58, %s19620_s11  ;;  %v19954_v61 = vmul.f32 0.35355338, %v19945_v58 }
 0x2b6   : > { %1679 = vrot.lane.b32.xlu0 %v19945_v58, %s19619_s7  ;;  %s19627_s7 = smov 96  }
 0x2b8   : > { %2002 = vrot.lane.b32.xlu1 %v19954_v61, %s19621_s22 }
 0x324   : > { %v1601_v62 = vpop.permute.xlu0 %1600 }
 0x325   : > { %18309 = vmatpush3.xpose.msk.msra.mxu1 %vm1602_vm4, %v1601_v62 }
 0x326   : > { %v2005_v63 = vpop.permute.xlu1 %2004  ;;  %18313 = vmatprep.subr.mxu1 %v19617_v46 }
 0x327   : > { %18334 = vmatpush3.xpose.msk.msra.mxu0 %vm1602_vm4, %v2005_v63 }
 0x328   : > { %v1680_v1 = vpop.permute.xlu0 %1679  ;;  %18311 = vmatmul.mubr.msk.f32.vlgmr.msra.gmra.mrb[0].mxu1 %vm1602_vm4, %v19961_v0  ;;  %18343 = vmatprep.subr.mxu0 %v19617_v46 }
 0x329   : > { %18314 = vmatpush3.xpose.msk.msra.mxu1 %vm1602_vm4, %v1680_v1  ;;  %18315 = vmatprep.mubr.msk.f32.mxu1 %vm19618_vm3, %v19617_v46 }
 0x32a   : > { %v2003_v2 = vpop.permute.xlu1 %2002  ;;  %18318 = vmatprep.subr.mxu1 %v19617_v46 }
 0x32b   : > { %18336 = vmatmul.mubr.msk.f32.vlgmr.msra.gmra.mrb[4].mxu0 %vm1602_vm4, %v2003_v2 }
 0x32c   : > { %18316 = vmatmul.mubr.msk.f32.vlgmr.msra.gmra.mrb[2].mxu1 %vm1602_vm4, %v19954_v61  ;;  %18345 = vmatprep.mubr.msk.f32.mxu0 %vm19618_vm3, %v19617_v46 }
 0x32d   : > { %18319 = vmatpush3.msra.mxu1 %v19971_v3  ;;  %18320 = vmatprep.mubr.msk.f32.mxu1 %vm19618_vm3, %v19617_v46 }
 0x32e   : > { %18323 = vmatprep.subr.mxu1 %v19617_v46 }
 0x3fb   : > { %v1674_v5 = vpop.f32.mrb[0].mxu1 }
 0x3fc   : > { %v1675_v6 = vadd.f32 %v19983_v4, %v1674_v5  ;;  %v18312_v7 = vpop.f32.mrb[1].mxu1 }
 0x3fe   : > { %v2076_v9 = vpop.f32.mrb[4].mxu0  ;;  %v1756_v10 = vsel %vm1602_vm4, %v1675_v6, -inf }
 0x3ff   : > { %v18337_v11 = vpop.f32.mrb[5].mxu0  ;;  %1757 = vmax.xlane.f32.xlu0 %v1756_v10  ;;  %v1752_v12 = vpop.f32.mrb[2].mxu1  ;;  %v2077_v16 = vadd.f32 %v19987_v8, %v2076_v9 }
 0x400   : > { %v1753_v13 = vadd.f32 %v19987_v8, %v1752_v12  ;;  %v18317_v14 = vpop.f32.mrb[3].mxu1 }
 0x401   : > { %v2083_v17 = vsel %vm1602_vm4, %v2077_v16, -inf }
 0x402   : > { %v1759_v15 = vsel %vm1602_vm4, %v1753_v13, -inf }
 0x403   : > { %1760 = vmax.xlane.f32.xlu1 %v1759_v15 }
 0x414   : > { %1926 = vrot.lane.b32.xlu1 %v19942_v54, %s19620_s11  ;;  %s19628_s11 = smov 24  }
 0x438   : > { %2084 = vmax.xlane.f32.xlu1 %v2083_v17 }
 0x449   : > { %2180 = vrot.lane.b32.xlu1 %v19948_v60, %s19621_s22 }
 0x44d   : > { %2418 = vrot.lane.b32.xlu1 %v19961_v0, %s19622_s21 }
 0x451   : > { %2498 = vrot.lane.b32.xlu1 %v19945_v58, %s19623_s13 }
 0x48c   : > { %v1758_v18 = vpop.xlane.xlu0 %1757 }
 0x48d   : > { %v1762_v19 = vsub.f32 %v1675_v6, %v1758_v18 }
 0x48f   : > { %v1764_v20 = vmul.f32 1.442695, %v1762_v19 }
 0x490   : > { %v1761_v21 = vpop.xlane.xlu1 %1760 }
 0x491   : > { %19206 = vpow2.f32 %v1764_v20  ;;  %v1763_v22 = vsub.f32 %v1753_v13, %v1761_v21 }
 0x493   : > { %v1766_v23 = vmul.f32 1.442695, %v1763_v22 }
 0x494   : > { %v1927_v28 = vpop.permute.xlu1 %1926 }
 0x495   : > { %19208 = vpow2.f32 %v1766_v23 }
 0x49b   : > { %v19207_v24 = vpop.eup %19206 }
 0x49c   : > { %v1768_v25 = vsel %vm1602_vm4, %v19207_v24, 0.0 }
 0x49d   : > { %1769 = vadd.xlane.f32.xlu0 %v1768_v25 }
 0x49f   : > { %v19209_v26 = vpop.eup %19208 }
 0x4a0   : > { %v1771_v27 = vsel %vm1602_vm4, %v19209_v26, 0.0 }
 0x4a1   : > { %1772 = vadd.xlane.f32.xlu0 %v1771_v27 }
 0x4b7   : > { %1924 = vrot.lane.b32.xlu0 %v19961_v0, %s19621_s22 }
 0x4c5   : > { %v2085_v29 = vpop.xlane.xlu1 %2084 }
 0x4c6   : > { %v2087_v30 = vsub.f32 %v2077_v16, %v2085_v29 }
 0x4c8   : > { %v2090_v31 = vmul.f32 1.442695, %v2087_v30 }
 0x4c9   : > { %v2181_v32 = vpop.permute.xlu1 %2180 }
 0x4ca   : > { %19210 = vpow2.f32 %v2090_v31  ;;  %18344 = vmatpush3.msra.mxu0 %v2181_v32 }
 0x4cb   : > { %18358 = vmatprep.subr.mxu0 %v19617_v46 }
 0x4cd   : > { %v2419_v45 = vpop.permute.xlu1 %2418 }
 0x4d1   : > { %v2499_v51 = vpop.permute.xlu1 %2498 }
 0x4d4   : > { %v19211_v33 = vpop.eup %19210 }
 0x4d5   : > { %v2095_v34 = vsel %vm1602_vm4, %v19211_v33, 0.0 }
 0x4d6   : > { %2096 = vadd.xlane.f32.xlu0 %v2095_v34 }
 0x4ec   : > { %2420 = vrot.lane.b32.xlu0 %v19942_v54, %s19623_s13  ;;  %s19631_s13 = smov 80  }
 0x4f0   : > { %2496 = vrot.lane.b32.xlu0 %v19954_v61, %s19622_s21 }
 0x52a   : > { %v1770_v35 = vpop.xlane.xlu0 %1769 }
 0x52b   : > { %19212 = vrcp.f32 %v1770_v35 }
 0x52e   : > { %v1773_v37 = vpop.xlane.xlu0 %1772 }
 0x52f   : > { %19214 = vrcp.f32 %v1773_v37 }
 0x532   : > { %v1925_v42 = vpop.permute.xlu0 %1924 }
 0x535   : > { %v19213_v38 = vpop.eup %19212 }
 0x536   : > { %v1775_v39 = vmul.f32 %v19213_v38, %v19207_v24 }
 0x538   : > { %18321 = vmatmul.mubr.msk.f32.vlgmr.msra.gmra.mrb[4].mxu1 %vm1602_vm4, %v1775_v39 }
 0x539   : > { %v19215_v40 = vpop.eup %19214  ;;  %18324 = vmatpush3.msra.mxu1 %v19948_v60  ;;  %18325 = vmatprep.mubr.msk.f32.mxu1 %vm19618_vm3, %v19617_v46 }
 0x53a   : > { %v1777_v41 = vmul.f32 %v19215_v40, %v19209_v26  ;;  %18328 = vmatprep.subr.mxu1 %v19617_v46 }
 0x53c   : > { %18326 = vmatmul.mubr.msk.f32.vlgmr.msra.gmra.mrb[6].mxu1 %vm1602_vm4, %v1777_v41 }
 0x53d   : > { %18330 = vmatprep.mubr.msk.f32.mxu1 %vm19618_vm3, %v19617_v46 }
 0x540   : > { %18329 = vmatpush3.xpose.msk.msra.mxu1 %vm1602_vm4, %v1927_v28 }
 0x541   : > { %18338 = vmatprep.subr.mxu1 %v19617_v46 }
 0x543   : > { %18331 = vmatmul.mubr.msk.f32.vlgmr.msra.gmra.mrb[8].mxu1 %vm1602_vm4, %v1925_v42 }
 0x544   : > { %18340 = vmatprep.mubr.msk.f32.mxu1 %vm19618_vm3, %v19617_v46 }
 0x563   : > { %v2097_v43 = vpop.xlane.xlu0 %2096 }
 0x564   : > { %19216 = vrcp.f32 %v2097_v43  ;;  %v1490_v43 = vld [vmem:[%s21702_s18 + $0x8] sm:$0xff] }
 0x567   : > { %v2421_v50 = vpop.permute.xlu0 %2420 }
 0x56b   : > { %v2497_v53 = vpop.permute.xlu0 %2496 }
 0x56e   : > { %v19217_v44 = vpop.eup %19216 }
 0x56f   : > { %v2101_v47 = vmul.f32 %v19217_v44, %v19211_v33  ;;  %v1489_v44 = vld [vmem:[%s21702_s18] sm:$0xff] }
 0x571   : > { %18346 = vmatmul.mubr.msk.f32.vlgmr.msra.gmra.mrb[6].mxu0 %vm1602_vm4, %v2101_v47 }
 0x572   : > { %18359 = vmatpush3.xpose.msk.msra.mxu0 %vm1602_vm4, %v2421_v50  ;;  %18360 = vmatprep.mubr.msk.f32.mxu0 %vm19618_vm3, %v19617_v46 }
 0x573   : > { %18363 = vmatprep.subr.mxu0 %v19617_v46 }
 0x575   : > { %18361 = vmatmul.mubr.msk.f32.vlgmr.msra.gmra.mrb[8].mxu0 %vm1602_vm4, %v2419_v45 }
 0x576   : > { %18364 = vmatpush3.xpose.msk.msra.mxu0 %vm1602_vm4, %v2499_v51  ;;  %18365 = vmatprep.mubr.msk.f32.mxu0 %vm19618_vm3, %v19617_v46 }
 0x577   : > { %18373 = vmatprep.subr.mxu0 %v19617_v46 }
 0x579   : > { %18366 = vmatmul.mubr.msk.f32.vlgmr.msra.gmra.mrb[10].mxu0 %vm1602_vm4, %v2497_v53 }
 0x57a   : > { %18375 = vmatprep.mubr.msk.f32.mxu0 %vm19618_vm3, %v19617_v46 }
 0x60b   : > { %v20036_v55 = vpop.f32.mrb[4].mxu1 }
 0x60c   : > { %v18322_v56 = vpop.f32.mrb[5].mxu1 }
 0x60f   : > { %v20038_v57 = vpop.f32.mrb[6].mxu1 }
 0x610   : > { %v18327_v59 = vpop.f32.mrb[7].mxu1 }
 0x616   : > { %v1998_v62 = vpop.f32.mrb[8].mxu1 }
 0x617   : > { %v1999_v63 = vadd.f32 %v19983_v4, %v1998_v62  ;;  %v18332_v1 = vpop.f32.mrb[9].mxu1 }
 0x619   : > { %v2080_v2 = vsel %vm1602_vm4, %v1999_v63, -inf }
 0x61a   : > { %2081 = vmax.xlane.f32.xlu1 %v2080_v2 }
 0x644   : > { %v20042_v5 = vpop.f32.mrb[6].mxu0 }
 0x645   : > { %v18347_v6 = vpop.f32.mrb[7].mxu0 }
 0x648   : > { %v2492_v7 = vpop.f32.mrb[8].mxu0 }
 0x649   : > { %v2493_v9 = vadd.f32 %v19983_v4, %v2492_v7  ;;  %v18362_v10 = vpop.f32.mrb[9].mxu0 }
 0x64b   : > { %v2574_v11 = vsel %vm1602_vm4, %v2493_v9, -inf }
 0x64c   : > { %v2570_v12 = vpop.f32.mrb[10].mxu0  ;;  %2575 = vmax.xlane.f32.xlu1 %v2574_v11 }
 0x64d   : > { %v2571_v13 = vadd.f32 %v19987_v8, %v2570_v12  ;;  %v18367_v14 = vpop.f32.mrb[11].mxu0 }
 0x64f   : > { %v2577_v15 = vsel %vm1602_vm4, %v2571_v13, -inf }
 0x650   : > { %2578 = vmax.xlane.f32.xlu1 %v2577_v15 }
 0x6a7   : > { %v2082_v16 = vpop.xlane.xlu1 %2081 }
 0x6a8   : > { %v2086_v17 = vsub.f32 %v1999_v63, %v2082_v16 }
 0x6aa   : > { %v2088_v18 = vmul.f32 1.442695, %v2086_v17 }
 0x6ac   : > { %19218 = vpow2.f32 %v2088_v18 }
 0x6b6   : > { %v19219_v19 = vpop.eup %19218 }
 0x6b7   : > { %v2092_v20 = vsel %vm1602_vm4, %v19219_v19, 0.0 }
 0x6b8   : > { %2093 = vadd.xlane.f32.xlu0 %v2092_v20 }
 0x6ce   : > { %2103 = vrot.lane.b32.xlu0 %v19971_v3, %s19621_s22  ;;  %s19629_s22 = smov 88  }
 0x6d2   : > { %2672 = vrot.lane.b32.xlu0 %v19948_v60, %s19622_s21 }
 0x6d6   : > { %2833 = vrot.lane.b32.xlu0 %v19942_v54, %s19624_s8 }
 0x6d9   : > { %v2576_v21 = vpop.xlane.xlu1 %2575 }
 0x6da   : > { %2831 = vrot.lane.b32.xlu0 %v19961_v0, %s19625_s14  ;;  %v2580_v22 = vsub.f32 %v2493_v9, %v2576_v21 }
 0x6dc   : > { %v2582_v23 = vmul.f32 1.442695, %v2580_v22 }
 0x6dd   : > { %v2579_v24 = vpop.xlane.xlu1 %2578 }
 0x6de   : > { %19220 = vpow2.f32 %v2582_v23  ;;  %2911 = vrot.lane.b32.xlu0 %v19945_v58, %s19624_s8  ;;  %v2581_v25 = vsub.f32 %v2571_v13, %v2579_v24  ;;  %s19632_s8 = smov 8  }
 0x6e0   : > { %v2584_v26 = vmul.f32 1.442695, %v2581_v25 }
 0x6e2   : > { %19222 = vpow2.f32 %v2584_v26 }
 0x6e8   : > { %v19221_v27 = vpop.eup %19220 }
 0x6e9   : > { %v2586_v28 = vsel %vm1602_vm4, %v19221_v27, 0.0 }
 0x6ea   : > { %2587 = vadd.xlane.f32.xlu1 %v2586_v28 }
 0x6ec   : > { %v19223_v29 = vpop.eup %19222 }
 0x6ed   : > { %v2589_v30 = vsel %vm1602_vm4, %v19223_v29, 0.0 }
 0x6ee   : > { %2590 = vadd.xlane.f32.xlu1 %v2589_v30 }
 0x6ff   : > { %2596 = vrot.lane.b32.xlu1 %v19971_v3, %s19622_s21  ;;  %s19630_s21 = smov 16  }
 0x703   : > { %2909 = vrot.lane.b32.xlu1 %v19954_v61, %s19625_s14 }
 0x707   : > { %3246 = vrot.lane.b32.xlu1 %v19942_v54, %s19626_s16 }
 0x745   : > { %v2094_v31 = vpop.xlane.xlu0 %2093 }
 0x746   : > { %19224 = vrcp.f32 %v2094_v31 }
 0x749   : > { %v2104_v32 = vpop.permute.xlu0 %2103 }
 0x74a   : > { %18339 = vmatpush3.msra.mxu1 %v2104_v32 }
 0x74b   : > { %18348 = vmatprep.subr.mxu1 %v1490_v43 }
 0x74d   : > { %v2673_v33 = vpop.permute.xlu0 %2672 }
 0x74e   : > { %18374 = vmatpush3.msra.mxu0 %v2673_v33 }
 0x74f   : > { %18383 = vmatprep.subr.mxu0 %v19617_v46 }
 0x750   : > { %v19225_v34 = vpop.eup %19224 }
 0x751   : > { %v2099_v35 = vmul.f32 %v19225_v34, %v19219_v19  ;;  %v2834_v40 = vpop.permute.xlu0 %2833 }
 0x753   : > { %18341 = vmatmul.mubr.msk.f32.vlgmr.msra.gmra.mrb[10].mxu1 %vm1602_vm4, %v2099_v35 }
 0x754   : > { %18349 = vmatpush3.msra.mxu1 %v1490_v43 }
 0x755   : > { %v2832_v42 = vpop.permute.xlu0 %2831  ;;  %18353 = vmatprep.subr.mxu1 %v1489_v44 }
 0x759   : > { %v2912_v2 = vpop.permute.xlu0 %2911 }
 0x777   : > { %v2588_v37 = vpop.xlane.xlu1 %2587 }
 0x77b   : > { %v2591_v38 = vpop.xlane.xlu1 %2590 }
 0x77c   : > { %19226 = vrcp.f32 %v2591_v38 }
 0x77d   : > { %19228 = vrcp.f32 %v2588_v37 }
 0x77f   : > { %v2597_v51 = vpop.permute.xlu1 %2596 }
 0x783   : > { %v2910_v14 = vpop.permute.xlu1 %2909 }
 0x786   : > { %v19227_v39 = vpop.eup %19226 }
 0x787   : > { %v2595_v41 = vmul.f32 %v19227_v39, %v19223_v29  ;;  %v19229_v50 = vpop.eup %19228  ;;  %v3247_v15 = vpop.permute.xlu1 %3246 }
 0x788   : > { %v2593_v53 = vmul.f32 %v19229_v50, %v19221_v27 }
 0x789   : > { %18376 = vmatmul.mubr.msk.f32.vlgmr.msra.gmra.mrb[12].mxu0 %vm1602_vm4, %v2595_v41 }
 0x78a   : > { %18384 = vmatpush3.xpose.msk.msra.mxu0 %vm1602_vm4, %v2834_v40  ;;  %18385 = vmatprep.mubr.msk.f32.mxu0 %vm19618_vm3, %v19617_v46 }
 0x78b   : > { %18393 = vmatprep.subr.mxu0 %v19617_v46 }
 0x78d   : > { %18386 = vmatmul.mubr.msk.f32.vlgmr.msra.gmra.mrb[14].mxu0 %vm1602_vm4, %v2832_v42 }
 0x78e   : > { %18395 = vmatprep.mubr.msk.f32.mxu0 %vm19618_vm3, %v19617_v46 }
 0x826   : > { %v2175_v45 = vpop.f32.mrb[10].mxu1 }
 0x827   : > { %v18342_v47 = vpop.f32.mrb[11].mxu1  ;;  %18350 = vmatprep.mubr.msk.f32.mxu1 %vm1602_vm4, %v2175_v45 }
 0x828   : > { %18351 = vmatmul.mubr.msk.f32.vlgmr.msra.gmra.mrb[12].mxu1 %vm1602_vm4, %v20042_v5 }
 0x829   : > { %18355 = vmatprep.mubr.msk.f32.mxu1 %vm1602_vm4, %v20036_v55  ;;  %18354 = vmatpush3.msra.mxu1 %v1489_v44 }
 0x82a   : > { %18368 = vmatprep.subr.mxu1 %v19617_v46 }
 0x830   : > { %18356 = vmatmul.mubr.msk.f32.vlgmr.msra.gmra.mrb[12].mxu1 %vm1602_vm4, %v20038_v57  ;;  %v1491_v57 = vld [vmem:[%s21702_s18 + $0x10] sm:$0xff] }
 0x831   : > { %18369 = vmatpush3.msra.mxu1 %v2597_v51  ;;  %18370 = vmatprep.mubr.msk.f32.mxu1 %vm19618_vm3, %v19617_v46 }
 0x832   : > { %18378 = vmatprep.subr.mxu1 %v1491_v57 }
 0x834   : > { %18371 = vmatmul.mubr.msk.f32.vlgmr.msra.gmra.mrb[14].mxu1 %vm1602_vm4, %v2593_v53 }
 0x835   : > { %18379 = vmatpush3.msra.mxu1 %v1491_v57 }
 0x836   : > { %18388 = vmatprep.subr.mxu1 %v19617_v46 }
 0x85c   : > { %v2744_v56 = vpop.f32.mrb[12].mxu0 }
 0x85d   : > { %v18377_v59 = vpop.f32.mrb[13].mxu0 }
 0x860   : > { %v2905_v62 = vpop.f32.mrb[14].mxu0 }
 0x861   : > { %v2906_v55 = vadd.f32 %v19983_v4, %v2905_v62  ;;  %v18387_v63 = vpop.f32.mrb[15].mxu0 }
 0x863   : > { %v2987_v1 = vsel %vm1602_vm4, %v2906_v55, -inf }
 0x864   : > { %2988 = vmax.xlane.f32.xlu0 %v2987_v1 }
 0x87a   : > { %3009 = vrot.lane.b32.xlu0 %v19971_v3, %s19625_s14 }
 0x87e   : > { %3244 = vrot.lane.b32.xlu0 %v19961_v0, %s19627_s7 }
 0x882   : > { %3322 = vrot.lane.b32.xlu0 %v19954_v61, %s19627_s7 }
 0x8f1   : > { %v2989_v5 = vpop.xlane.xlu0 %2988 }
 0x8f2   : > { %v2993_v6 = vsub.f32 %v2906_v55, %v2989_v5 }
 0x8f4   : > { %v2995_v7 = vmul.f32 1.442695, %v2993_v6 }
 0x8f5   : > { %v3010_v9 = vpop.permute.xlu0 %3009 }
 0x8f6   : > { %19230 = vpow2.f32 %v2995_v7  ;;  %18394 = vmatpush3.msra.mxu0 %v3010_v9 }
 0x8f7   : > { %18408 = vmatprep.subr.mxu0 %v19617_v46 }
 0x8f9   : > { %v3245_v19 = vpop.permute.xlu0 %3244 }
 0x8fd   : > { %v3323_v21 = vpop.permute.xlu0 %3322 }
 0x900   : > { %v19231_v10 = vpop.eup %19230 }
 0x901   : > { %v2999_v11 = vsel %vm1602_vm4, %v19231_v10, 0.0 }
 0x902   : > { %3000 = vadd.xlane.f32.xlu1 %v2999_v11 }
 0x907   : > { %v2668_v12 = vpop.f32.mrb[14].mxu1 }
 0x908   : > { %v18372_v13 = vpop.f32.mrb[15].mxu1  ;;  %18380 = vmatprep.mubr.msk.f32.mxu1 %vm1602_vm4, %v2668_v12 }
 0x909   : > { %18381 = vmatmul.mubr.msk.f32.vlgmr.msra.gmra.mrb[12].mxu1 %vm1602_vm4, %v2744_v56 }
 0x90a   : > { %18389 = vmatpush3.xpose.msk.msra.mxu1 %vm1602_vm4, %v2912_v2  ;;  %18390 = vmatprep.mubr.msk.f32.mxu1 %vm19618_vm3, %v19617_v46  ;;  %v1492_v2 = vld [vmem:[%s21702_s18 + $0x18] sm:$0xff] }
 0x90b   : > { %18398 = vmatprep.subr.mxu1 %v19617_v46 }
 0x90d   : > { %18391 = vmatmul.mubr.msk.f32.vlgmr.msra.gmra.mrb[16].mxu1 %vm1602_vm4, %v2910_v14 }
 0x90e   : > { %18400 = vmatprep.mubr.msk.f32.mxu1 %vm19618_vm3, %v19617_v46 }
 0x913   : > { %3324 = vrot.lane.b32.xlu1 %v19945_v58, %s19626_s16  ;;  %s21703_s16 = sld [smem:[#allocation34_spill]] }
 0x98f   : > { %v3001_v16 = vpop.xlane.xlu1 %3000 }
 0x990   : > { %19232 = vrcp.f32 %v3001_v16 }
 0x993   : > { %v3325_v20 = vpop.permute.xlu1 %3324 }
 0x99a   : > { %v19233_v17 = vpop.eup %19232 }
 0x99b   : > { %v3006_v18 = vmul.f32 %v19233_v17, %v19231_v10  ;;  %v1493_v17 = vld [vmem:[%s21702_s18 + $0x20] sm:$0xff] }
 0x99d   : > { %18396 = vmatmul.mubr.msk.f32.vlgmr.msra.gmra.mrb[16].mxu0 %vm1602_vm4, %v3006_v18 }
 0x99e   : > { %18409 = vmatpush3.xpose.msk.msra.mxu0 %vm1602_vm4, %v3247_v15  ;;  %18410 = vmatprep.mubr.msk.f32.mxu0 %vm19618_vm3, %v19617_v46 }
 0x99f   : > { %18413 = vmatprep.subr.mxu0 %v19617_v46 }
 0x9a1   : > { %18411 = vmatmul.mubr.msk.f32.vlgmr.msra.gmra.mrb[18].mxu0 %vm1602_vm4, %v3245_v19 }
 0x9a2   : > { %18414 = vmatpush3.xpose.msk.msra.mxu0 %vm1602_vm4, %v3325_v20  ;;  %18415 = vmatprep.mubr.msk.f32.mxu0 %vm19618_vm3, %v19617_v46 }
 0x9a3   : > { %18423 = vmatprep.subr.mxu0 %v19617_v46 }
 0x9a5   : > { %18416 = vmatmul.mubr.msk.f32.vlgmr.msra.gmra.mrb[20].mxu0 %vm1602_vm4, %v3323_v21 }
 0x9a6   : > { %18425 = vmatprep.mubr.msk.f32.mxu0 %vm19618_vm3, %v19617_v46 }
 0x9e0   : > { %v2983_v22 = vpop.f32.mrb[16].mxu1 }
 0x9e1   : > { %v2984_v23 = vadd.f32 %v19987_v8, %v2983_v22  ;;  %v18392_v24 = vpop.f32.mrb[17].mxu1 }
 0x9e3   : > { %v2990_v25 = vsel %vm1602_vm4, %v2984_v23, -inf }
 0x9e4   : > { %2991 = vmax.xlane.f32.xlu1 %v2990_v25 }
 0xa70   : > { %v3081_v26 = vpop.f32.mrb[16].mxu0 }
 0xa71   : > { %v2992_v27 = vpop.xlane.xlu1 %2991  ;;  %v18397_v28 = vpop.f32.mrb[17].mxu0 }
 0xa72   : > { %v2994_v29 = vsub.f32 %v2984_v23, %v2992_v27 }
 0xa74   : > { %v2997_v30 = vmul.f32 1.442695, %v2994_v29  ;;  %v3318_v31 = vpop.f32.mrb[18].mxu0 }
 0xa75   : > { %v3319_v32 = vadd.f32 %v19983_v4, %v3318_v31  ;;  %v18412_v33 = vpop.f32.mrb[19].mxu0 }
 0xa76   : > { %19234 = vpow2.f32 %v2997_v30 }
 0xa77   : > { %v3400_v34 = vsel %vm1602_vm4, %v3319_v32, -inf }
 0xa78   : > { %v3396_v35 = vpop.f32.mrb[20].mxu0  ;;  %3401 = vmax.xlane.f32.xlu1 %v3400_v34 }
 0xa79   : > { %v3397_v37 = vadd.f32 %v19987_v8, %v3396_v35  ;;  %v18417_v38 = vpop.f32.mrb[21].mxu0 }
 0xa7b   : > { %v3403_v39 = vsel %vm1602_vm4, %v3397_v37, -inf }
 0xa7c   : > { %3404 = vmax.xlane.f32.xlu1 %v3403_v39 }
 0xa80   : > { %v19235_v40 = vpop.eup %19234 }
 0xa81   : > { %v3002_v41 = vsel %vm1602_vm4, %v19235_v40, 0.0 }
 0xa82   : > { %3003 = vadd.xlane.f32.xlu0 %v3002_v41 }
 0xa98   : > { %3085 = vrot.lane.b32.xlu0 %v19948_v60, %s19625_s14  ;;  %s19633_s14 = smov 72  }
 0xa9c   : > { %3498 = vrot.lane.b32.xlu0 %v19948_v60, %s19627_s7 }
 0xaa0   : > { %3659 = vrot.lane.b32.xlu0 %v19942_v54, %s19628_s11 }
 0xaa4   : > { %3657 = vrot.lane.b32.xlu0 %v19961_v0, %s19629_s22 }
 0xaa8   : > { %3737 = vrot.lane.b32.xlu0 %v19945_v58, %s19628_s11 }
 0xb05   : > { %v3402_v42 = vpop.xlane.xlu1 %3401 }
 0xb06   : > { %v3406_v43 = vsub.f32 %v3319_v32, %v3402_v42 }
 0xb08   : > { %v3408_v44 = vmul.f32 1.442695, %v3406_v43 }
 0xb09   : > { %v3405_v45 = vpop.xlane.xlu1 %3404 }
 0xb0a   : > { %19236 = vpow2.f32 %v3408_v44  ;;  %v3407_v47 = vsub.f32 %v3397_v37, %v3405_v45 }
 0xb0c   : > { %v3410_v50 = vmul.f32 1.442695, %v3407_v47 }
 0xb0e   : > { %19238 = vpow2.f32 %v3410_v50 }
 0xb0f   : > { %v3004_v51 = vpop.xlane.xlu0 %3003 }
 0xb10   : > { %19240 = vrcp.f32 %v3004_v51 }
 0xb13   : > { %v3086_v53 = vpop.permute.xlu0 %3085 }
 0xb14   : > { %v19237_v56 = vpop.eup %19236  ;;  %18399 = vmatpush3.msra.mxu1 %v3086_v53 }
 0xb15   : > { %v3412_v59 = vsel %vm1602_vm4, %v19237_v56, 0.0  ;;  %18403 = vmatprep.subr.mxu1 %v1492_v2 }
 0xb16   : > { %3413 = vadd.xlane.f32.xlu1 %v3412_v59 }
 0xb17   : > { %v3499_v62 = vpop.permute.xlu0 %3498 }
 0xb18   : > { %v19239_v55 = vpop.eup %19238  ;;  %18424 = vmatpush3.msra.mxu0 %v3499_v62 }
 0xb19   : > { %v3415_v63 = vsel %vm1602_vm4, %v19239_v55, 0.0  ;;  %18433 = vmatprep.subr.mxu0 %v19617_v46 }
 0xb1a   : > { %v19241_v1 = vpop.eup %19240  ;;  %3416 = vadd.xlane.f32.xlu1 %v3415_v63 }
 0xb1b   : > { %v3008_v57 = vmul.f32 %v19241_v1, %v19235_v40  ;;  %v3660_v9 = vpop.permute.xlu0 %3659 }
 0xb1d   : > { %18401 = vmatmul.mubr.msk.f32.vlgmr.msra.gmra.mrb[18].mxu1 %vm1602_vm4, %v3008_v57 }
 0xb1e   : > { %18405 = vmatprep.mubr.msk.f32.mxu1 %vm1602_vm4, %v3081_v26  ;;  %18404 = vmatpush3.msra.mxu1 %v1492_v2 }
 0xb1f   : > { %18418 = vmatprep.subr.mxu1 %v19617_v46  ;;  %v3658_v11 = vpop.permute.xlu0 %3657 }
 0xb23   : > { %v3738_v26 = vpop.permute.xlu0 %3737 }
 0xb2b   : > { %3422 = vrot.lane.b32.xlu1 %v19971_v3, %s19627_s7  ;;  %s21705_s7 = sld [smem:[#allocation36_spill]] }
 0xb2f   : > { %3735 = vrot.lane.b32.xlu1 %v19954_v61, %s19629_s22 }
 0xb33   : > { %4072 = vrot.lane.b32.xlu1 %v19942_v54, %s19630_s21 }
 0xba3   : > { %v3414_v5 = vpop.xlane.xlu1 %3413 }
 0xba7   : > { %v3417_v6 = vpop.xlane.xlu1 %3416 }
 0xba8   : > { %19242 = vrcp.f32 %v3417_v6 }
 0xba9   : > { %19244 = vrcp.f32 %v3414_v5 }
 0xbab   : > { %v3423_v14 = vpop.permute.xlu1 %3422 }
 0xbaf   : > { %v3736_v27 = vpop.permute.xlu1 %3735 }
 0xbb2   : > { %v19243_v7 = vpop.eup %19242 }
 0xbb3   : > { %v3421_v10 = vmul.f32 %v19243_v7, %v19239_v55  ;;  %v19245_v12 = vpop.eup %19244  ;;  %v4073_v39 = vpop.permute.xlu1 %4072 }
 0xbb4   : > { %v3419_v16 = vmul.f32 %v19245_v12, %v19237_v56 }
 0xbb5   : > { %18426 = vmatmul.mubr.msk.f32.vlgmr.msra.gmra.mrb[22].mxu0 %vm1602_vm4, %v3421_v10  ;;  %v1494_v10 = vld [vmem:[%s21702_s18 + $0x28] sm:$0xff] }
 0xbb6   : > { %18434 = vmatpush3.xpose.msk.msra.mxu0 %vm1602_vm4, %v3660_v9  ;;  %18435 = vmatprep.mubr.msk.f32.mxu0 %vm19618_vm3, %v19617_v46 }
 0xbb7   : > { %18443 = vmatprep.subr.mxu0 %v19617_v46 }
 0xbb9   : > { %18436 = vmatmul.mubr.msk.f32.vlgmr.msra.gmra.mrb[24].mxu0 %vm1602_vm4, %v3658_v11 }
 0xbba   : > { %18445 = vmatprep.mubr.msk.f32.mxu0 %vm19618_vm3, %v19617_v46 }
 0xbf0   : > { %v3157_v13 = vpop.f32.mrb[18].mxu1 }
 0xbf1   : > { %v18402_v15 = vpop.f32.mrb[19].mxu1  ;;  %18406 = vmatmul.mubr.msk.f32.vlgmr.msra.gmra.mrb[12].mxu1 %vm1602_vm4, %v3157_v13 }
 0xbf2   : > { %18419 = vmatpush3.msra.mxu1 %v3423_v14  ;;  %18420 = vmatprep.mubr.msk.f32.mxu1 %vm19618_vm3, %v19617_v46 }
 0xbf3   : > { %18428 = vmatprep.subr.mxu1 %v1493_v17 }
 0xbf5   : > { %18421 = vmatmul.mubr.msk.f32.vlgmr.msra.gmra.mrb[20].mxu1 %vm1602_vm4, %v3419_v16 }
 0xbf6   : > { %18429 = vmatpush3.msra.mxu1 %v1493_v17 }
 0xbf7   : > { %18438 = vmatprep.subr.mxu1 %v19617_v46 }
 0xc88   : > { %v3570_v18 = vpop.f32.mrb[22].mxu0 }
 0xc89   : > { %v18427_v19 = vpop.f32.mrb[23].mxu0 }
 0xc8c   : > { %v3731_v20 = vpop.f32.mrb[24].mxu0 }
 0xc8d   : > { %v3732_v21 = vadd.f32 %v19983_v4, %v3731_v20  ;;  %v18437_v22 = vpop.f32.mrb[25].mxu0 }
 0xc8f   : > { %v3813_v23 = vsel %vm1602_vm4, %v3732_v21, -inf }
 0xc90   : > { %3814 = vmax.xlane.f32.xlu0 %v3813_v23 }
 0xca6   : > { %3835 = vrot.lane.b32.xlu0 %v19971_v3, %s19629_s22 }
 0xcaa   : > { %4070 = vrot.lane.b32.xlu0 %v19961_v0, %s19631_s13 }
 0xcae   : > { %4148 = vrot.lane.b32.xlu0 %v19954_v61, %s19631_s13 }
 0xcc8   : > { %v3494_v24 = vpop.f32.mrb[20].mxu1 }
 0xcc9   : > { %v18422_v25 = vpop.f32.mrb[21].mxu1  ;;  %18430 = vmatprep.mubr.msk.f32.mxu1 %vm1602_vm4, %v3494_v24 }
 0xcca   : > { %18431 = vmatmul.mubr.msk.f32.vlgmr.msra.gmra.mrb[12].mxu1 %vm1602_vm4, %v3570_v18 }
 0xccb   : > { %18439 = vmatpush3.xpose.msk.msra.mxu1 %vm1602_vm4, %v3738_v26  ;;  %18440 = vmatprep.mubr.msk.f32.mxu1 %vm19618_vm3, %v19617_v46  ;;  %v1495_v26 = vld [vmem:[%s21702_s18 + $0x30] sm:$0xff] }
 0xccc   : > { %18448 = vmatprep.subr.mxu1 %v19617_v46 }
 0xcce   : > { %18441 = vmatmul.mubr.msk.f32.vlgmr.msra.gmra.mrb[22].mxu1 %vm1602_vm4, %v3736_v27 }
 0xccf   : > { %18450 = vmatprep.mubr.msk.f32.mxu1 %vm19618_vm3, %v19617_v46 }
 0xd1d   : > { %v3815_v28 = vpop.xlane.xlu0 %3814 }
 0xd1e   : > { %v3819_v29 = vsub.f32 %v3732_v21, %v3815_v28 }
 0xd20   : > { %v3821_v30 = vmul.f32 1.442695, %v3819_v29 }
 0xd21   : > { %v3836_v31 = vpop.permute.xlu0 %3835 }
 0xd22   : > { %19246 = vpow2.f32 %v3821_v30  ;;  %18444 = vmatpush3.msra.mxu0 %v3836_v31 }
 0xd23   : > { %18458 = vmatprep.subr.mxu0 %v19617_v46 }
 0xd25   : > { %v4071_v43 = vpop.permute.xlu0 %4070 }
 0xd29   : > { %v4149_v45 = vpop.permute.xlu0 %4148 }
 0xd2c   : > { %v19247_v32 = vpop.eup %19246 }
 0xd2d   : > { %v3825_v33 = vsel %vm1602_vm4, %v19247_v32, 0.0 }
 0xd2e   : > { %3826 = vadd.xlane.f32.xlu1 %v3825_v33 }
 0xd3f   : > { %4150 = vrot.lane.b32.xlu1 %v19945_v58, %s19630_s21 }
 0xda1   : > { %v3809_v34 = vpop.f32.mrb[22].mxu1 }
 0xda2   : > { %v3810_v35 = vadd.f32 %v19987_v8, %v3809_v34  ;;  %v18442_v37 = vpop.f32.mrb[23].mxu1 }
 0xda4   : > { %v3816_v38 = vsel %vm1602_vm4, %v3810_v35, -inf }
 0xda5   : > { %3817 = vmax.xlane.f32.xlu1 %v3816_v38 }
 0xdbb   : > { %v3827_v40 = vpop.xlane.xlu1 %3826 }
 0xdbc   : > { %19248 = vrcp.f32 %v3827_v40 }
 0xdbf   : > { %v4151_v44 = vpop.permute.xlu1 %4150 }
 0xdc6   : > { %v19249_v41 = vpop.eup %19248 }
 0xdc7   : > { %v3832_v42 = vmul.f32 %v19249_v41, %v19247_v32 }
 0xdc9   : > { %18446 = vmatmul.mubr.msk.f32.vlgmr.msra.gmra.mrb[26].mxu0 %vm1602_vm4, %v3832_v42 }
 0xdca   : > { %18459 = vmatpush3.xpose.msk.msra.mxu0 %vm1602_vm4, %v4073_v39  ;;  %18460 = vmatprep.mubr.msk.f32.mxu0 %vm19618_vm3, %v19617_v46 }
 0xdcb   : > { %18463 = vmatprep.subr.mxu0 %v19617_v46 }
 0xdcd   : > { %18461 = vmatmul.mubr.msk.f32.vlgmr.msra.gmra.mrb[28].mxu0 %vm1602_vm4, %v4071_v43 }
 0xdce   : > { %18464 = vmatpush3.xpose.msk.msra.mxu0 %vm1602_vm4, %v4151_v44  ;;  %18465 = vmatprep.mubr.msk.f32.mxu0 %vm19618_vm3, %v19617_v46 }
 0xdcf   : > { %18473 = vmatprep.subr.mxu0 %v19617_v46 }
 0xdd1   : > { %18466 = vmatmul.mubr.msk.f32.vlgmr.msra.gmra.mrb[30].mxu0 %vm1602_vm4, %v4149_v45 }
 0xdd2   : > { %18475 = vmatprep.mubr.msk.f32.mxu0 %vm19618_vm3, %v19617_v46 }
 0xe32   : > { %v3818_v47 = vpop.xlane.xlu1 %3817 }
 0xe33   : > { %v3820_v50 = vsub.f32 %v3810_v35, %v3818_v47 }
 0xe35   : > { %v3823_v51 = vmul.f32 1.442695, %v3820_v50 }
 0xe37   : > { %19250 = vpow2.f32 %v3823_v51 }
 0xe41   : > { %v19251_v53 = vpop.eup %19250 }
 0xe42   : > { %v3828_v56 = vsel %vm1602_vm4, %v19251_v53, 0.0 }
 0xe43   : > { %3829 = vadd.xlane.f32.xlu0 %v3828_v56 }
 0xe59   : > { %3911 = vrot.lane.b32.xlu0 %v19948_v60, %s19629_s22 }
 0xe5d   : > { %4324 = vrot.lane.b32.xlu0 %v19948_v60, %s19631_s13 }
 0xe61   : > { %4485 = vrot.lane.b32.xlu0 %v19942_v54, %s19632_s8 }
 0xe65   : > { %4563 = vrot.lane.b32.xlu0 %v19945_v58, %s19632_s8 }
 0xe69   : > { %4483 = vrot.lane.b32.xlu0 %v19961_v0, %s19633_s14 }
 0xe9c   : > { %v3907_v59 = vpop.f32.mrb[26].mxu0 }
 0xe9d   : > { %v18447_v62 = vpop.f32.mrb[27].mxu0 }
 0xea0   : > { %v4144_v55 = vpop.f32.mrb[28].mxu0 }
 0xea1   : > { %v4145_v63 = vadd.f32 %v19983_v4, %v4144_v55  ;;  %v18462_v1 = vpop.f32.mrb[29].mxu0 }
 0xea3   : > { %v4226_v57 = vsel %vm1602_vm4, %v4145_v63, -inf }
 0xea4   : > { %v4222_v2 = vpop.f32.mrb[30].mxu0  ;;  %4227 = vmax.xlane.f32.xlu1 %v4226_v57 }
 0xea5   : > { %v4223_v5 = vadd.f32 %v19987_v8, %v4222_v2  ;;  %v18467_v54 = vpop.f32.mrb[31].mxu0 }
 0xea6   : > { %v1496_v54 = vld [vmem:[%s21702_s18 + $0x38] sm:$0xff]  ;;  %s21704_s18 = sld [smem:[#allocation35_spill]] }
 0xea7   : > { %v4229_v58 = vsel %vm1602_vm4, %v4223_v5, -inf }
 0xea8   : > { %4230 = vmax.xlane.f32.xlu1 %v4229_v58 }
 0xed0   : > { %v3830_v6 = vpop.xlane.xlu0 %3829 }
 0xed1   : > { %19252 = vrcp.f32 %v3830_v6 }
 0xed4   : > { %v3912_v0 = vpop.permute.xlu0 %3911 }
 0xed5   : > { %18449 = vmatpush3.msra.mxu1 %v3912_v0 }
 0xed6   : > { %18453 = vmatprep.subr.mxu1 %v1494_v10 }
 0xed8   : > { %v4325_v7 = vpop.permute.xlu0 %4324 }
 0xed9   : > { %18474 = vmatpush3.msra.mxu0 %v4325_v7 }
 0xeda   : > { %18483 = vmatprep.subr.mxu0 %v19617_v46 }
 0xedb   : > { %v19253_v9 = vpop.eup %19252 }
 0xedc   : > { %v3834_v11 = vmul.f32 %v19253_v9, %v19251_v53  ;;  %v4486_v28 = vpop.permute.xlu0 %4485 }
 0xede   : > { %18451 = vmatmul.mubr.msk.f32.vlgmr.msra.gmra.mrb[24].mxu1 %vm1602_vm4, %v3834_v11 }
 0xedf   : > { %18455 = vmatprep.mubr.msk.f32.mxu1 %vm1602_vm4, %v3907_v59  ;;  %18454 = vmatpush3.msra.mxu1 %v1494_v10 }
 0xee0   : > { %18468 = vmatprep.subr.mxu1 %v19617_v46  ;;  %v4564_v31 = vpop.permute.xlu0 %4563 }
 0xee4   : > { %v4484_v33 = vpop.permute.xlu0 %4483 }
 0xf31   : > { %v4228_v12 = vpop.xlane.xlu1 %4227 }
 0xf32   : > { %v4232_v13 = vsub.f32 %v4145_v63, %v4228_v12 }
 0xf34   : > { %v4234_v14 = vmul.f32 1.442695, %v4232_v13 }
 0xf35   : > { %v4231_v15 = vpop.xlane.xlu1 %4230 }
 0xf36   : > { %19254 = vpow2.f32 %v4234_v14  ;;  %v4233_v16 = vsub.f32 %v4223_v5, %v4231_v15 }
 0xf38   : > { %v4236_v17 = vmul.f32 1.442695, %v4233_v16  ;;  %v19278_v16 = vld [vmem:[#allocation2 + $0x8] sm:$0xff] }
 0xf3a   : > { %19256 = vpow2.f32 %v4236_v17 }
 0xf40   : > { %v19255_v18 = vpop.eup %19254 }
 0xf41   : > { %v4238_v19 = vsel %vm1602_vm4, %v19255_v18, 0.0 }
 0xf42   : > { %4239 = vadd.xlane.f32.xlu1 %v4238_v19 }
 0xf44   : > { %v19257_v20 = vpop.eup %19256 }
 0xf45   : > { %v4241_v21 = vsel %vm1602_vm4, %v19257_v20, 0.0 }
 0xf46   : > { %4242 = vadd.xlane.f32.xlu1 %v4241_v21 }
 0xf57   : > { %4248 = vrot.lane.b32.xlu1 %v19971_v3, %s19631_s13 }
 0xf5b   : > { %4561 = vrot.lane.b32.xlu1 %v19954_v61, %s19633_s14 }
 0xfb1   : > { %v3983_v22 = vpop.f32.mrb[24].mxu1 }
 0xfb2   : > { %v18452_v23 = vpop.f32.mrb[25].mxu1  ;;  %18456 = vmatmul.mubr.msk.f32.vlgmr.msra.gmra.mrb[12].mxu1 %vm1602_vm4, %v3983_v22 }
 0xfb3   : > { %18470 = vmatprep.mubr.msk.f32.mxu1 %vm19618_vm3, %v19617_v46 }
 0xfcf   : > { %v4240_v24 = vpop.xlane.xlu1 %4239 }
 0xfd0   : > { %19258 = vrcp.f32 %v4240_v24 }
 0xfd3   : > { %v4243_v25 = vpop.xlane.xlu1 %4242 }
 0xfd4   : > { %19260 = vrcp.f32 %v4243_v25 }
 0xfd7   : > { %v4249_v27 = vpop.permute.xlu1 %4248 }
 0xfd8   : > { %18469 = vmatpush3.msra.mxu1 %v4249_v27 }
 0xfd9   : > { %18478 = vmatprep.subr.mxu1 %v1495_v26 }
 0xfda   : > { %v19259_v29 = vpop.eup %19258 }
 0xfdb   : > { %v4245_v30 = vmul.f32 %v19259_v29, %v19255_v18  ;;  %v4562_v39 = vpop.permute.xlu1 %4561  ;;  %v19279_v18 = vld [vmem:[#allocation2] sm:$0xff] }
 0xfdd   : > { %18471 = vmatmul.mubr.msk.f32.vlgmr.msra.gmra.mrb[26].mxu1 %vm1602_vm4, %v4245_v30 }
 0xfde   : > { %v19261_v61 = vpop.eup %19260  ;;  %18479 = vmatpush3.msra.mxu1 %v1495_v26 }
 0xfdf   : > { %v4247_v32 = vmul.f32 %v19261_v61, %v19257_v20  ;;  %18488 = vmatprep.subr.mxu1 %v19617_v46 }
 0xfe1   : > { %18476 = vmatmul.mubr.msk.f32.vlgmr.msra.gmra.mrb[32].mxu0 %vm1602_vm4, %v4247_v32  ;;  %v4954_v32 = vld [vmem:[%s19878_s28 + $0x40] sm:$0xff] }
 0xfe2   : > { %18484 = vmatpush3.xpose.msk.msra.mxu0 %vm1602_vm4, %v4486_v28  ;;  %18485 = vmatprep.mubr.msk.f32.mxu0 %vm19618_vm3, %v19617_v46 }
 0xfe3   : > { %18493 = vmatprep.subr.mxu0 %v19617_v46 }
 0xfe5   : > { %18486 = vmatmul.mubr.msk.f32.vlgmr.msra.gmra.mrb[34].mxu0 %vm1602_vm4, %v4484_v33  ;;  %v4953_v33 = vld [vmem:[%s19878_s28 + $0x8] sm:$0xff] }
 0xfe6   : > { %18495 = vmatprep.mubr.msk.f32.mxu0 %vm19618_vm3, %v19617_v46 }
0x10b0   : > { %v4320_v34 = vpop.f32.mrb[26].mxu1 }
0x10b1   : > { %v18472_v35 = vpop.f32.mrb[27].mxu1  ;;  %18480 = vmatprep.mubr.msk.f32.mxu1 %vm1602_vm4, %v4320_v34 }
0x10b2   : > { %v4955_v35 = vld [vmem:[%s19878_s28 + $0x48] sm:$0xff] }
0x10b4   : > { %v4396_v37 = vpop.f32.mrb[32].mxu0 }
0x10b5   : > { %v18477_v38 = vpop.f32.mrb[33].mxu0  ;;  %18481 = vmatmul.mubr.msk.f32.vlgmr.msra.gmra.mrb[12].mxu1 %vm1602_vm4, %v4396_v37 }
0x10b6   : > { %18489 = vmatpush3.xpose.msk.msra.mxu1 %vm1602_vm4, %v4564_v31  ;;  %18490 = vmatprep.mubr.msk.f32.mxu1 %vm19618_vm3, %v19617_v46  ;;  %v4952_v31 = vld [vmem:[%s19878_s28] sm:$0xff]  ;;  %v17083_v38 = vcombine.low %v4953_v33, %v4955_v35 }
0x10b7   : > { %18498 = vmatprep.subr.mxu1 %v19617_v46  ;;  %v17082_v34 = vcombine.high %v4952_v31, %v4954_v32  ;;  %v17081_v37 = vcombine.low %v4952_v31, %v4954_v32  ;;  %v5242_v31 = vld [vmem:[%s19878_s28 + $0xd8] sm:$0xff] }
0x10b8   : > { %v4557_v40 = vpop.f32.mrb[34].mxu0 }
0x10b9   : > { %v4558_v41 = vadd.f32 %v19983_v4, %v4557_v40  ;;  %v18487_v42 = vpop.f32.mrb[35].mxu0  ;;  %18491 = vmatmul.mubr.msk.f32.vlgmr.msra.gmra.mrb[28].mxu1 %vm1602_vm4, %v4562_v39  ;;  %v17084_v39 = vcombine.high %v4953_v33, %v4955_v35  ;;  %v4956_v40 = vld [vmem:[%s19878_s28 + $0x80] sm:$0xff]  ;;  %v5243_v35 = vld [vmem:[%s19878_s28 + $0x110] sm:$0xff] }
0x10ba   : > { %18500 = vmatprep.mubr.msk.f32.mxu1 %vm19618_vm3, %v19617_v46  ;;  %v4957_v42 = vld [vmem:[%s19878_s28 + $0x88] sm:$0xff] }
0x10bb   : > { %v4639_v43 = vsel %vm1602_vm4, %v4558_v41, -inf }
0x10bc   : > { %4640 = vmax.xlane.f32.xlu0 %v4639_v43 }
0x1149   : > { %v4641_v44 = vpop.xlane.xlu0 %4640 }
0x114a   : > { %v4645_v45 = vsub.f32 %v4558_v41, %v4641_v44  ;;  %v4958_v41 = vld [vmem:[%s19878_s28 + $0xc0] sm:$0xff]  ;;  %v4959_v44 = vld [vmem:[%s19878_s28 + $0xc8] sm:$0xff] }
0x114b   : > { %v17086_v43 = vcombine.high %v4956_v40, %v4958_v41 }
0x114c   : > { %v4647_v47 = vmul.f32 1.442695, %v4645_v45  ;;  %v17085_v45 = vcombine.low %v4956_v40, %v4958_v41 }
0x114e   : > { %19262 = vpow2.f32 %v4647_v47  ;;  %v17087_v47 = vcombine.low %v4957_v42, %v4959_v44 }
0x1158   : > { %v19263_v50 = vpop.eup %19262 }
0x1159   : > { %v4651_v51 = vsel %vm1602_vm4, %v19263_v50, 0.0 }
0x115a   : > { %4652 = vadd.xlane.f32.xlu0 %v4651_v51  ;;  %v4960_v51 = vld [vmem:[%s19878_s28 + $0x100] sm:$0xff] }
0x118c   : > { %v4635_v53 = vpop.f32.mrb[28].mxu1 }
0x118d   : > { %v4636_v4 = vadd.f32 %v19987_v8, %v4635_v53  ;;  %v18492_v56 = vpop.f32.mrb[29].mxu1  ;;  %v4962_v53 = vld [vmem:[%s19878_s28 + $0x140] sm:$0xff] }
0x118e   : > { %v17090_v56 = vcombine.high %v4960_v51, %v4962_v53 }
0x118f   : > { %v4642_v59 = vsel %vm1602_vm4, %v4636_v4, -inf }
0x1190   : > { %4643 = vmax.xlane.f32.xlu1 %v4642_v59  ;;  %v4963_v59 = vld [vmem:[%s19878_s28 + $0x148] sm:$0xff] }
0x11a1   : > { %4661 = vrot.lane.b32.xlu1 %v19971_v3, %s19633_s14 }
0x11e7   : > { %v4653_v46 = vpop.xlane.xlu0 %4652 }
0x11e8   : > { %19264 = vrcp.f32 %v4653_v46  ;;  %v17089_v46 = vcombine.low %v4960_v51, %v4962_v53 }
0x11f2   : > { %v19265_v55 = vpop.eup %19264 }
0x11f3   : > { %v4658_v57 = vmul.f32 %v19265_v55, %v19263_v50  ;;  %v17088_v50 = vcombine.high %v4957_v42, %v4959_v44  ;;  %v5249_v44 = vld [vmem:[%s19878_s28 + $0x1d0] sm:$0xff] }
0x121d   : > { %v4644_v62 = vpop.xlane.xlu1 %4643 }
0x121e   : > { %v4646_v63 = vsub.f32 %v4636_v4, %v4644_v62  ;;  %v4961_v4 = vld [vmem:[%s19878_s28 + $0x108] sm:$0xff] }
0x121f   : > { %v17091_v62 = vcombine.low %v4961_v4, %v4963_v59  ;;  %v17092_v55 = vcombine.high %v4961_v4, %v4963_v59 }
0x1220   : > { %v4649_v1 = vmul.f32 1.442695, %v4646_v63  ;;  %v4964_v63 = vld [vmem:[%s19878_s28 + $0x180] sm:$0xff] }
0x1221   : > { %v4662_v2 = vpop.permute.xlu1 %4661 }
0x1222   : > { %19266 = vpow2.f32 %v4649_v1  ;;  %18494 = vmatpush3.msra.mxu0 %v4662_v2  ;;  %v4966_v1 = vld [vmem:[%s19878_s28 + $0x1c0] sm:$0xff] }
0x1223   : > { %18496 = vmatmul.mubr.msk.f32.vlgmr.msra.gmra.mrb[36].mxu0 %vm1602_vm4, %v4658_v57  ;;  %5073 = vmatprep.subr.bf16.mxu0 %v17082_v34  ;;  %v4965_v57 = vld [vmem:[%s19878_s28 + $0x188] sm:$0xff]  ;;  %v17094_v2 = vcombine.high %v4964_v63, %v4966_v1 }
0x1224   : > { %5105 = vmatprep.mubr.bf16.mxu0 %v19616_v36  ;;  %5074 = vmatpush1.bf16.msra.mxu0 %v17081_v37  ;;  %v5244_v37 = vld [vmem:[%s19878_s28 + $0x118] sm:$0xff] }
0x1225   : > { %5075 = vmatprep.subr.bf16.mxu0 %v17086_v43  ;;  %v5247_v43 = vld [vmem:[%s19878_s28 + $0x190] sm:$0xff] }
0x1226   : > { %v17112_v53 = vcombine.high %v5247_v43, %v5249_v44 }
0x1228   : > { %5076 = vmatpush1.bf16.msra.mxu0 %v17085_v45  ;;  %v5248_v45 = vld [vmem:[%s19878_s28 + $0x198] sm:$0xff] }
0x1229   : > { %5077 = vmatprep.subr.bf16.mxu0 %v17090_v56  ;;  %v17111_v56 = vcombine.low %v5247_v43, %v5249_v44 }
0x122c   : > { %v19267_v8 = vpop.eup %19266  ;;  %5078 = vmatpush1.bf16.msra.mxu0 %v17089_v46  ;;  %v19078_v46 = vld [vmem:[%s19889_s29 + $0x140] sm:$0xff]  }
0x122d   : > { %v4654_v5 = vsel %vm1602_vm4, %v19267_v8, 0.0  ;;  %5079 = vmatprep.subr.bf16.mxu0 %v17094_v2  ;;  %v19084_v2 = vld [vmem:[%s19889_s29 + $0x108] sm:$0xff]  }
0x122e   : > { %4655 = vadd.xlane.f32.xlu0 %v4654_v5  ;;  %v17093_v5 = vcombine.low %v4964_v63, %v4966_v1  ;;  %v19081_v63 = vld [vmem:[%s19889_s29 + $0x180] sm:$0xff]   ;;  %v19082_v1 = vld [vmem:[%s19889_s29 + $0x148] sm:$0xff]  }
0x1230   : > { %5080 = vmatpush1.bf16.msra.mxu0 %v17093_v5  ;;  %v19086_v5 = vld [vmem:[%s19889_s29 + $0x150] sm:$0xff]  }
0x1244   : > { %4737 = vrot.lane.b32.xlu0 %v19948_v60, %s19633_s14  ;;  %v17078_v60 = vld [vmem:[%s21703_s16] ss:$0 sm:$0xff] }
0x12bb   : > { %v4656_v3 = vpop.xlane.xlu0 %4655 }
0x12bc   : > { %19268 = vrcp.f32 %v4656_v3 }
0x12bf   : > { %v4738_v58 = vpop.permute.xlu0 %4737 }
0x12c0   : > { %18499 = vmatpush3.msra.mxu1 %v4738_v58  ;;  %v5235_v58 = vld [vmem:[%s19878_s28 + $0x10] sm:$0xff] }
0x12c1   : > { %18503 = vmatprep.subr.mxu1 %v1496_v54 }
0x12c6   : > { %v19269_v6 = vpop.eup %19268 }
0x12c7   : > { %v4660_v0 = vmul.f32 %v19269_v6, %v19267_v8  ;;  %v4967_v8 = vld [vmem:[%s19878_s28 + $0x1c8] sm:$0xff]  ;;  %v5237_v6 = vld [vmem:[%s19878_s28 + $0x50] sm:$0xff] }
0x12c8   : > { %v17095_v3 = vcombine.low %v4965_v57, %v4967_v8 }
0x12c9   : > { %18501 = vmatmul.mubr.msk.f32.vlgmr.msra.gmra.mrb[30].mxu1 %vm1602_vm4, %v4660_v0  ;;  %v5236_v0 = vld [vmem:[%s19878_s28 + $0x18] sm:$0xff] }
0x12ca   : > { %18504 = vmatpush3.msra.mxu1 %v1496_v54  ;;  %v17096_v54 = vcombine.high %v4965_v57, %v4967_v8  ;;  %v19083_v57 = vld [vmem:[%s19889_s29 + $0x1c8] sm:$0xff]  }
0x12cb   : > { %5116 = vmatprep.subr.bf16.mxu1 %v17084_v39  ;;  %v19085_v8 = vld [vmem:[%s19889_s29 + $0x188] sm:$0xff]  }
0x12f6   : > { %v4733_v7 = vpop.f32.mrb[36].mxu0 }
0x12f7   : > { %v18497_v9 = vpop.f32.mrb[37].mxu0  ;;  %18505 = vmatprep.mubr.msk.f32.mxu1 %vm1602_vm4, %v4733_v7  ;;  %v17099_v7 = vcombine.low %v5235_v58, %v5237_v6 }
0x12f8   : > { %v17100_v9 = vcombine.high %v5235_v58, %v5237_v6  ;;  %v19089_v58 = vld [vmem:[%s19889_s29 + $0x190] sm:$0xff]   ;;  %v19090_v6 = vld [vmem:[%s19889_s29 + $0x158] sm:$0xff]  }
0x12fa   : > { %5353 = vmatprep.subr.bf16.mxu0 %v17100_v9  ;;  %v19093_v9 = vld [vmem:[%s19889_s29 + $0x198] sm:$0xff]  }
0x139c   : > { %v4809_v10 = vpop.f32.mrb[30].mxu1 }
0x139d   : > { %v18502_v11 = vpop.f32.mrb[31].mxu1  ;;  %18506 = vmatmul.mubr.msk.f32.vlgmr.msra.gmra.mrb[12].mxu1 %vm1602_vm4, %v4809_v10  ;;  %v5238_v10 = vld [vmem:[%s19878_s28 + $0x58] sm:$0xff] }
0x139e   : > { %5148 = vmatprep.mubr.bf16.mxu1 %v19616_v36  ;;  %5117 = vmatpush1.bf16.msra.mxu1 %v17083_v38  ;;  %v17101_v11 = vcombine.low %v5236_v0, %v5238_v10  ;;  %v5246_v38 = vld [vmem:[%s19878_s28 + $0x158] sm:$0xff] }
0x139f   : > { %5118 = vmatprep.subr.bf16.mxu1 %v17088_v50  ;;  %v17110_v42 = vcombine.high %v5244_v37, %v5246_v38  ;;  %v17109_v51 = vcombine.low %v5244_v37, %v5246_v38 }
0x13a2   : > { %5119 = vmatpush1.bf16.msra.mxu1 %v17087_v47  ;;  %v5250_v47 = vld [vmem:[%s19878_s28 + $0x1d8] sm:$0xff] }
0x13a3   : > { %5120 = vmatprep.subr.bf16.mxu1 %v17092_v55  ;;  %v17114_v4 = vcombine.high %v5248_v45, %v5250_v47  ;;  %v17113_v59 = vcombine.low %v5248_v45, %v5250_v47  ;;  %v19080_v55 = vld [vmem:[%s19889_s29 + $0x100] sm:$0xff]  }
0x13a6   : > { %5121 = vmatpush1.bf16.msra.mxu1 %v17091_v62  ;;  %v19079_v62 = vld [vmem:[%s19889_s29 + $0x1c0] sm:$0xff]  }
0x13a7   : > { %5122 = vmatprep.subr.bf16.mxu1 %v17096_v54  ;;  %v19088_v54 = vld [vmem:[%s19889_s29 + $0x110] sm:$0xff]  }
0x13aa   : > { %5123 = vmatpush1.bf16.msra.mxu1 %v17095_v3  ;;  %v19087_v3 = vld [vmem:[%s19889_s29 + $0x1d0] sm:$0xff]  }
0x1470   : > { %v18507_v12 = vpop.f32.mrb[12].mxu1 }
0x1471   : > { %v4903_v13 = vadd.f32 %v18507_v12, %v17078_v60  ;;  %v4885_v14 = vpop.f32.mrb[13].mxu1 }
0x1472   : > { %v4902_v15 = vadd.f32 %v17078_v60, %v4885_v14  ;;  %v17102_v60 = vcombine.high %v5236_v0, %v5238_v10  ;;  %v19091_v0 = vld [vmem:[%s19889_s29 + $0x1d8] sm:$0xff]   ;;  %v19094_v10 = vld [vmem:[%s19889_s29 + $0x160] sm:$0xff]  }
0x1473   : > { %v4905_v17 = vadd.f32 %v19278_v16, %v4903_v13 }
0x1474   : > { %v4904_v19 = vadd.f32 %v19279_v18, %v4902_v15  ;;  %5396 = vmatprep.subr.bf16.mxu1 %v17102_v60  ;;  %v19096_v60 = vld [vmem:[%s19889_s29 + $0x120] sm:$0xff]  }
0x1475   : > { %v4911_v20 = vsel %vm1550_vm2, %v4905_v17, 0.0 }
0x1476   : > { %4912 = vadd.xlane.f32.xlu0 %v4911_v20  ;;  %v4908_v21 = vsel %vm1550_vm2, %v4904_v19, 0.0 }
0x1477   : > { %4909 = vadd.xlane.f32.xlu1 %v4908_v21 }
0x1503   : > { %v4913_v22 = vpop.xlane.xlu0 %4912 }
0x1504   : > { %v4916_v23 = vmul.f32 0.015625, %v4913_v22  ;;  %v4910_v24 = vpop.xlane.xlu1 %4909  ;;  %v17080_v22 = vld [vmem:[%s21705_s7] ss:$0 sm:$0xff] }
0x1505   : > { %v4915_v25 = vmul.f32 0.015625, %v4910_v24 }
0x1506   : > { %v20269_v26 = vsub.f32 %v4905_v17, %v4916_v23 }
0x1507   : > { %v20271_v27 = vsub.f32 %v4904_v19, %v4915_v25  ;;  %v17079_v19 = vld [vmem:[%s21704_s18] ss:$0 sm:$0xff] }
0x1508   : > { %v4920_v28 = vmul.f32 %v20269_v26, %v20269_v26 }
0x1509   : > { %v4919_v29 = vmul.f32 %v20271_v27, %v20271_v27 }
0x150a   : > { %v4924_v30 = vsel %vm1550_vm2, %v4920_v28, 0.0  ;;  %v5239_v28 = vld [vmem:[%s19878_s28 + $0x90] sm:$0xff] }
0x150b   : > { %4925 = vadd.xlane.f32.xlu0 %v4924_v30  ;;  %v4921_v61 = vsel %vm1550_vm2, %v4919_v29, 0.0  ;;  %v5241_v30 = vld [vmem:[%s19878_s28 + $0xd0] sm:$0xff] }
0x150c   : > { %4922 = vadd.xlane.f32.xlu1 %v4921_v61  ;;  %v5240_v61 = vld [vmem:[%s19878_s28 + $0x98] sm:$0xff]  ;;  %v17103_v39 = vcombine.low %v5239_v28, %v5241_v30 }
0x150d   : > { %v17106_v34 = vcombine.high %v5240_v61, %v5242_v31  ;;  %v17105_v40 = vcombine.low %v5240_v61, %v5242_v31  ;;  %v4968_v61 = vld [vmem:[%s19881_s26] sm:$0xf]  ;;  %v20372_v31 = vsub.s32 3, %v19928_v48 }
0x1598   : > { %v4926_v12 = vpop.xlane.xlu0 %4925 }
0x1599   : > { %v4928_v13 = vmul.f32 0.015625, %v4926_v12  ;;  %v4923_v14 = vpop.xlane.xlu1 %4922  ;;  %v19097_v12 = vld [vmem:[%s19889_s29 + $0x1a0] sm:$0xff]  }
0x159a   : > { %v4927_v15 = vmul.f32 0.015625, %v4923_v14  ;;  %v19099_v14 = vld [vmem:[%s19889_s29 + $0x1e8] sm:$0xff]  }
0x159b   : > { %v4930_v16 = vadd.f32 1e-05, %v4928_v13  ;;  %v19098_v13 = vld [vmem:[%s19889_s29 + $0x168] sm:$0xff]  }
0x159c   : > { %v4929_v17 = vadd.f32 1e-05, %v4927_v15  ;;  %v19100_v15 = vld [vmem:[%s19889_s29 + $0x128] sm:$0xff]  }
0x159d   : > { %19270 = vrsqrt.f32 %v4930_v16  ;;  %v19101_v16 = vld [vmem:[%s19889_s29 + $0x1a8] sm:$0xff]  }
0x159e   : > { %19272 = vrsqrt.f32 %v4929_v17  ;;  %v19102_v17 = vld [vmem:[%s19889_s29 + $0x170] sm:$0xff]  }
0x15a7   : > { %v19271_v18 = vpop.eup %19270 }
0x15a8   : > { %v19273_v20 = vpop.eup %19272  ;;  %v4934_v21 = vmul.f32 %v19271_v18, %v20269_v26  ;;  %v17104_v26 = vcombine.high %v5239_v28, %v5241_v30  ;;  %v19103_v18 = vld [vmem:[%s19889_s29 + $0x1f0] sm:$0xff]   ;;  %v19111_v28 = vld [vmem:[%s19889_s29 + $0xc0] sm:$0xff]   ;;  %v20368_v30 = vsub.s32 2, %v19928_v48 }
0x15a9   : > { %v4933_v23 = vmul.f32 %v19273_v20, %v20271_v27  ;;  %v5245_v27 = vld [vmem:[%s19878_s28 + $0x150] sm:$0xff] }
0x15aa   : > { %v4942_v24 = vmul.f32 %v17079_v19, %v4934_v21  ;;  %v17108_v41 = vcombine.high %v5243_v35, %v5245_v27  ;;  %v17107_v50 = vcombine.low %v5243_v35, %v5245_v27  ;;  %v19105_v20 = vld [vmem:[%s19889_s29 + $0x1b0] sm:$0xff]   ;;  %v19106_v21 = vld [vmem:[%s19889_s29 + $0x178] sm:$0xff]   ;;  %v4977_v35 = vrot.slane %v4968_v61, %v19940_v52 }
0x15ab   : > { %v4941_v25 = vmul.f32 %v17079_v19, %v4933_v23  ;;  %v19104_v19 = vld [vmem:[%s19889_s29 + $0x130] sm:$0xff]   ;;  %v19108_v23 = vld [vmem:[%s19889_s29 + $0x138] sm:$0xff]   ;;  %v4985_v27 = vrot.slane %v4968_v61, %v20372_v31 }
0x15ac   : > { %v20304_v29 = vadd.f32 %v17080_v22, %v4942_v24  ;;  %v19109_v24 = vld [vmem:[%s19889_s29 + $0x1b8] sm:$0xff]  }
0x15ad   : > { %v20309_v32 = vadd.f32 %v17080_v22, %v4941_v25  ;;  %v19107_v22 = vld [vmem:[%s19889_s29 + $0x1f8] sm:$0xff]   ;;  %v19110_v25 = vld [vmem:[%s19889_s29 + $0x40] sm:$0xff]  }
0x15af   : > { %v20313_v33 = vpack.c.bf16 %v20304_v29, %v20309_v32 }
0x15b1   : > { %17097 = vmatmul.mubr.msk.bf16.vlgmr.msra.gmra.mrb[40].mxu0 %vm1550_vm2, %v20313_v33  ;;  %17098 = vmatmul.mubr.msk.bf16.vlgmr.msra.gmra.mrb[32].mxu1 %vm1550_vm2, %v20313_v33 }
0x15b2   : > { %5354 = vmatpush1.bf16.msra.mxu0 %v17099_v7  ;;  %5397 = vmatpush1.bf16.msra.mxu1 %v17101_v11  ;;  %v19092_v7 = vld [vmem:[%s19889_s29 + $0x118] sm:$0xff]   ;;  %v19095_v11 = vld [vmem:[%s19889_s29 + $0x1e0] sm:$0xff]  }
0x15b3   : > { %5355 = vmatprep.subr.bf16.mxu0 %v17104_v26  ;;  %5398 = vmatprep.subr.bf16.mxu1 %v17106_v34  ;;  %v4973_v26 = vrot.slane %v4968_v61, %v19935_v49  ;;  %v4981_v34 = vrot.slane %v4968_v61, %v20368_v30 }
0x15b4   : > { %5385 = vmatprep.mubr.bf16.mxu0 %v19616_v36  ;;  %5428 = vmatprep.mubr.bf16.mxu1 %v19616_v36 }
0x15b6   : > { %5356 = vmatpush1.bf16.msra.mxu0 %v17103_v39  ;;  %5399 = vmatpush1.bf16.msra.mxu1 %v17105_v40 }
0x15b7   : > { %5357 = vmatprep.subr.bf16.mxu0 %v17108_v41  ;;  %5400 = vmatprep.subr.bf16.mxu1 %v17110_v42 }
0x15ba   : > { %5358 = vmatpush1.bf16.msra.mxu0 %v17107_v50  ;;  %5401 = vmatpush1.bf16.msra.mxu1 %v17109_v51 }
0x15bb   : > { %5359 = vmatprep.subr.bf16.mxu0 %v17112_v53  ;;  %5402 = vmatprep.subr.bf16.mxu1 %v17114_v4 }
0x15be   : > { %5360 = vmatpush1.bf16.msra.mxu0 %v17111_v56  ;;  %5403 = vmatpush1.bf16.msra.mxu1 %v17113_v59 }
0x15bf   : > { %17765 = vmatprep.subr.bf16.mxu0 %v19078_v46  ;;  %17787 = vmatprep.subr.bf16.mxu1 %v19079_v62 }
0x15c1   : > { %17115 = vmatmul.mubr.msk.bf16.vlgmr.msra.gmra.mrb[44].mxu0 %vm1550_vm2, %v20313_v33  ;;  %17116 = vmatmul.mubr.msk.bf16.vlgmr.msra.gmra.mrb[36].mxu1 %vm1550_vm2, %v20313_v33 }
0x15c2   : > { %17766 = vmatpush3.bf16.msra.mxu0 %v19080_v55  ;;  %17788 = vmatpush3.bf16.msra.mxu1 %v19081_v63 }
0x15c3   : > { %17767 = vmatprep.subr.bf16.mxu0 %v19082_v1  ;;  %17789 = vmatprep.subr.bf16.mxu1 %v19083_v57 }
0x15c6   : > { %17768 = vmatpush3.bf16.msra.mxu0 %v19084_v2  ;;  %17790 = vmatpush3.bf16.msra.mxu1 %v19085_v8 }
0x15c7   : > { %17769 = vmatprep.subr.bf16.mxu0 %v19086_v5  ;;  %17791 = vmatprep.subr.bf16.mxu1 %v19087_v3 }
0x15ca   : > { %17770 = vmatpush3.bf16.msra.mxu0 %v19088_v54  ;;  %17792 = vmatpush3.bf16.msra.mxu1 %v19089_v58  ;;  %v5251_v58 = vld [vmem:[%s19881_s26 + $0x4] sm:$0xf] }
0x15cb   : > { %17771 = vmatprep.subr.bf16.mxu0 %v19090_v6  ;;  %17793 = vmatprep.subr.bf16.mxu1 %v19091_v0  ;;  %v5256_v6 = vrot.slane %v5251_v58, %v19935_v49  ;;  %v5264_v0 = vrot.slane %v5251_v58, %v20368_v30 }
0x15ce   : > { %17772 = vmatpush3.bf16.msra.mxu0 %v19092_v7  ;;  %17794 = vmatpush3.bf16.msra.mxu1 %v19093_v9  ;;  %v5260_v7 = vrot.slane %v5251_v58, %v19940_v52  ;;  %v5268_v9 = vrot.slane %v5251_v58, %v20372_v31  ;;  %v19133_v58 = vld [vmem:[%s19889_s29 + $0xa8] sm:$0xff]  }
0x15cf   : > { %17773 = vmatprep.subr.bf16.mxu0 %v19094_v10  ;;  %17795 = vmatprep.subr.bf16.mxu1 %v19095_v11 }
0x15d2   : > { %17774 = vmatpush3.bf16.msra.mxu0 %v19096_v60  ;;  %17796 = vmatpush3.bf16.msra.mxu1 %v19097_v12 }
0x15d3   : > { %17775 = vmatprep.subr.bf16.mxu0 %v19098_v13  ;;  %17797 = vmatprep.subr.bf16.mxu1 %v19099_v14 }
0x15d6   : > { %17776 = vmatpush3.bf16.msra.mxu0 %v19100_v15  ;;  %17798 = vmatpush3.bf16.msra.mxu1 %v19101_v16 }
0x15d7   : > { %17777 = vmatprep.subr.bf16.mxu0 %v19102_v17  ;;  %17799 = vmatprep.subr.bf16.mxu1 %v19103_v18 }
0x15da   : > { %17778 = vmatpush3.bf16.msra.mxu0 %v19104_v19  ;;  %17800 = vmatpush3.bf16.msra.mxu1 %v19105_v20 }
0x15db   : > { %17779 = vmatprep.subr.bf16.mxu0 %v19106_v21  ;;  %17801 = vmatprep.subr.bf16.mxu1 %v19107_v22 }
0x15de   : > { %17780 = vmatpush3.bf16.msra.mxu0 %v19108_v23  ;;  %17802 = vmatpush3.bf16.msra.mxu1 %v19109_v24 }
0x15df   : > { %17809 = vmatprep.subr.bf16.mxu0 %v19110_v25  ;;  %17831 = vmatprep.subr.bf16.mxu1 %v19111_v28 }
0x1684   : > { %v5107_v37 = vpop.f32.mrb[40].mxu0  ;;  %v5150_v38 = vpop.f32.mrb[32].mxu1 }
0x1685   : > { %v5108_v39 = vadd.f32 %v5107_v37, %v4973_v26  ;;  %v5151_v40 = vadd.f32 %v5150_v38, %v4981_v34  ;;  %v5109_v41 = vpop.f32.mrb[41].mxu0  ;;  %v5152_v42 = vpop.f32.mrb[33].mxu1 }
0x1686   : > { %v5110_v43 = vadd.f32 %v5109_v41, %v4977_v35  ;;  %v5153_v44 = vadd.f32 %v5152_v42, %v4985_v27  ;;  %v5111_v45 = vpop.f32.mrb[42].mxu0  ;;  %v5154_v47 = vpop.f32.mrb[34].mxu1  ;;  %v19112_v42 = vld [vmem:[%s19889_s29] sm:$0xff]  }
0x1687   : > { %v5112_v48 = vadd.f32 %v5111_v45, %v4973_v26  ;;  %v5155_v50 = vadd.f32 %v5154_v47, %v4981_v34  ;;  %v5113_v51 = vpop.f32.mrb[43].mxu0  ;;  %v5156_v53 = vpop.f32.mrb[35].mxu1  ;;  %v5159_v59 = vmax.f32 %v5108_v39, 0.0  ;;  %v5161_v46 = vmax.f32 %v5151_v40, 0.0  ;;  %v19115_v45 = vld [vmem:[%s19889_s29 + $0xc8] sm:$0xff]  }
0x1688   : > { %v5114_v4 = vadd.f32 %v5113_v51, %v4977_v35  ;;  %v5157_v56 = vadd.f32 %v5156_v53, %v4985_v27  ;;  %v5160_v63 = vmax.f32 %v5110_v43, 0.0  ;;  %v5162_v1 = vmax.f32 %v5153_v44, 0.0  ;;  %v19113_v43 = vld [vmem:[%s19889_s29 + $0x80] sm:$0xff]   ;;  %v19114_v44 = vld [vmem:[%s19889_s29 + $0x48] sm:$0xff]   ;;  %v19119_v51 = vld [vmem:[%s19889_s29 + $0xd0] sm:$0xff]  }
0x1689   : > { %v5163_v62 = vmax.f32 %v5112_v48, 0.0  ;;  %v5165_v55 = vmax.f32 %v5155_v50, 0.0  ;;  %v19116_v47 = vld [vmem:[%s19889_s29 + $0x8] sm:$0xff]   ;;  %v19118_v50 = vld [vmem:[%s19889_s29 + $0x50] sm:$0xff]  }
0x168a   : > { %v5164_v57 = vmax.f32 %v5114_v4, 0.0  ;;  %v5166_v2 = vmax.f32 %v5157_v56, 0.0  ;;  %v19117_v48 = vld [vmem:[%s19889_s29 + $0x88] sm:$0xff]   ;;  %v19120_v53 = vld [vmem:[%s19889_s29 + $0x10] sm:$0xff]   ;;  %v19122_v56 = vld [vmem:[%s19889_s29 + $0x58] sm:$0xff]  }
0x168b   : > { %v20378_v8 = vpack.c.bf16 %v5163_v62, %v5159_v59  ;;  %v20380_v5 = vpack.c.bf16 %v5165_v55, %v5161_v46  ;;  %v19121_v4 = vld [vmem:[%s19889_s29 + $0x90] sm:$0xff]   ;;  %v19123_v59 = vld [vmem:[%s19889_s29 + $0xd8] sm:$0xff]   ;;  %v19126_v55 = vld [vmem:[%s19889_s29 + $0x60] sm:$0xff]  }
0x168c   : > { %v5168_v3 = vpack.c.bf16 %v5164_v57, %v5160_v63  ;;  %v5170_v54 = vpack.c.bf16 %v5166_v2, %v5162_v1  ;;  %v19124_v46 = vld [vmem:[%s19889_s29 + $0x18] sm:$0xff]   ;;  %v19127_v63 = vld [vmem:[%s19889_s29 + $0xe0] sm:$0xff]   ;;  %v19130_v2 = vld [vmem:[%s19889_s29 + $0x68] sm:$0xff]  }
0x168d   : > { %v19125_v62 = vld [vmem:[%s19889_s29 + $0x98] sm:$0xff]   ;;  %v19128_v1 = vld [vmem:[%s19889_s29 + $0x20] sm:$0xff]  }
0x168e   : > { %v19129_v57 = vld [vmem:[%s19889_s29 + $0xa0] sm:$0xff]  }
0x1694   : > { %v5387_v10 = vpop.f32.mrb[44].mxu0  ;;  %v5430_v11 = vpop.f32.mrb[36].mxu1 }
0x1695   : > { %v5388_v60 = vadd.f32 %v5387_v10, %v5256_v6  ;;  %v5431_v12 = vadd.f32 %v5430_v11, %v5264_v0  ;;  %v5389_v13 = vpop.f32.mrb[45].mxu0  ;;  %v5432_v14 = vpop.f32.mrb[37].mxu1  ;;  %v19138_v10 = vld [vmem:[%s19889_s29 + $0x78] sm:$0xff]  }
0x1696   : > { %v5390_v15 = vadd.f32 %v5389_v13, %v5260_v7  ;;  %v5433_v16 = vadd.f32 %v5432_v14, %v5268_v9  ;;  %v5391_v17 = vpop.f32.mrb[46].mxu0  ;;  %v5434_v18 = vpop.f32.mrb[38].mxu1  ;;  %v19139_v11 = vld [vmem:[%s19889_s29 + $0xf8] sm:$0xff]   ;;  %v6064_v13 = vld [vmem:[%s19878_s28 + $0x28] sm:$0xff] }
0x1697   : > { %v5392_v19 = vadd.f32 %v5391_v17, %v5256_v6  ;;  %v5435_v20 = vadd.f32 %v5434_v18, %v5264_v0  ;;  %v5393_v21 = vpop.f32.mrb[47].mxu0  ;;  %v5436_v22 = vpop.f32.mrb[39].mxu1  ;;  %v5439_v25 = vmax.f32 %v5388_v60, 0.0  ;;  %v5441_v28 = vmax.f32 %v5431_v12, 0.0  ;;  %v19134_v6 = vld [vmem:[%s19889_s29 + $0x70] sm:$0xff]   ;;  %v6063_v60 = vld [vmem:[%s19878_s28 + $0x20] sm:$0xff] }
0x1698   : > { %v5394_v23 = vadd.f32 %v5393_v21, %v5260_v7  ;;  %v5437_v24 = vadd.f32 %v5436_v22, %v5268_v9  ;;  %v5440_v34 = vmax.f32 %v5390_v15, 0.0  ;;  %v5442_v35 = vmax.f32 %v5433_v16, 0.0  ;;  %v19135_v0 = vld [vmem:[%s19889_s29 + $0xf0] sm:$0xff]   ;;  %v6065_v12 = vld [vmem:[%s19878_s28 + $0x60] sm:$0xff]  ;;  %v6066_v14 = vld [vmem:[%s19878_s28 + $0x68] sm:$0xff] }
0x1699   : > { %v5443_v61 = vmax.f32 %v5392_v19, 0.0  ;;  %v5445_v26 = vmax.f32 %v5435_v20, 0.0  ;;  %v19136_v7 = vld [vmem:[%s19889_s29 + $0x30] sm:$0xff]   ;;  %v19140_v15 = vld [vmem:[%s19889_s29 + $0x38] sm:$0xff]   ;;  %v17182_v17 = vcombine.high %v6063_v60, %v6065_v12  ;;  %v17184_v18 = vcombine.high %v6064_v13, %v6066_v14  ;;  %v6067_v19 = vld [vmem:[%s19878_s28 + $0xa0] sm:$0xff] }
0x169a   : > { %v5444_v27 = vmax.f32 %v5394_v23, 0.0  ;;  %v5446_v37 = vmax.f32 %v5437_v24, 0.0  ;;  %v19137_v9 = vld [vmem:[%s19889_s29 + $0xb0] sm:$0xff]   ;;  %v19141_v16 = vld [vmem:[%s19889_s29 + $0xb8] sm:$0xff]   ;;  %v6069_v20 = vld [vmem:[%s19878_s28 + $0xe0] sm:$0xff]  ;;  %v17181_v23 = vcombine.low %v6063_v60, %v6065_v12  ;;  %v17183_v24 = vcombine.low %v6064_v13, %v6066_v14 }
0x169b   : > { %v5447_v38 = vpack.c.bf16 %v5443_v61, %v5439_v25  ;;  %v5449_v39 = vpack.c.bf16 %v5445_v26, %v5441_v28  ;;  %v6068_v21 = vld [vmem:[%s19878_s28 + $0xa8] sm:$0xff]  ;;  %v17186_v25 = vcombine.high %v6067_v19, %v6069_v20  ;;  %v6071_v61 = vld [vmem:[%s19878_s28 + $0x120] sm:$0xff]  ;;  %v19166_v13 = vld [vmem:[%s19889_s29 + $0x270] sm:$0xff]  }
0x169c   : > { %v5448_v40 = vpack.c.bf16 %v5444_v27, %v5440_v34  ;;  %v5450_v41 = vpack.c.bf16 %v5446_v37, %v5442_v35  ;;  %v6070_v22 = vld [vmem:[%s19878_s28 + $0xe8] sm:$0xff]  ;;  %v6073_v26 = vld [vmem:[%s19878_s28 + $0x160] sm:$0xff]  ;;  %v17185_v27 = vcombine.low %v6067_v19, %v6069_v20  ;;  %v19167_v14 = vld [vmem:[%s19889_s29 + $0x2f0] sm:$0xff]  }
0x169d   : > { %v17188_v28 = vcombine.high %v6068_v21, %v6070_v22  ;;  %v6072_v34 = vld [vmem:[%s19878_s28 + $0x128] sm:$0xff]  ;;  %v17187_v37 = vcombine.low %v6068_v21, %v6070_v22  ;;  %v19172_v19 = vld [vmem:[%s19889_s29 + $0x238] sm:$0xff]   ;;  %v20474_v21 = vld [vmem:[%s19878_s28 + $0x30] sm:$0xff] }
0x169e   : > { %5739 = vmatprep.mubr.bf16.mxu0 %v5448_v40  ;;  %5780 = vmatprep.mubr.bf16.mxu1 %v5450_v41  ;;  %v6074_v35 = vld [vmem:[%s19878_s28 + $0x168] sm:$0xff]  ;;  %v6075_v40 = vld [vmem:[%s19878_s28 + $0x1a0] sm:$0xff]  ;;  %v19173_v20 = vld [vmem:[%s19889_s29 + $0x2b8] sm:$0xff]  }
0x169f   : > { %5740 = vmatmul.mubr.bf16.vlgmr.msra.gmra.mrb[48].mxu0 %v5447_v38  ;;  %5781 = vmatmul.mubr.bf16.vlgmr.msra.gmra.mrb[40].mxu1 %v5449_v39  ;;  %v17190_v38 = vcombine.high %v6071_v61, %v6073_v26  ;;  %v17192_v39 = vcombine.high %v6072_v34, %v6074_v35  ;;  %v6077_v41 = vld [vmem:[%s19878_s28 + $0x1e0] sm:$0xff]  ;;  %v19164_v60 = vld [vmem:[%s19889_s29 + $0x228] sm:$0xff]   ;;  %v20477_v22 = vld [vmem:[%s19878_s28 + $0x70] sm:$0xff] }
0x16a0   : > { %17810 = vmatpush3.bf16.msra.mxu0 %v19112_v42  ;;  %17832 = vmatpush3.bf16.msra.mxu1 %v19113_v43  ;;  %v6076_v42 = vld [vmem:[%s19878_s28 + $0x1a8] sm:$0xff] }
0x16a1   : > { %6013 = vmatprep.mubr.bf16.mxu0 %v5168_v3  ;;  %6054 = vmatprep.mubr.bf16.mxu1 %v5170_v54  ;;  %v19131_v3 = vld [vmem:[%s19889_s29 + $0xe8] sm:$0xff]  }
0x16a2   : > { %17811 = vmatprep.subr.bf16.mxu0 %v19114_v44  ;;  %17833 = vmatprep.subr.bf16.mxu1 %v19115_v45  ;;  %v19132_v54 = vld [vmem:[%s19889_s29 + $0x28] sm:$0xff]   ;;  %v17194_v44 = vcombine.high %v6075_v40, %v6077_v41 }
0x16a3   : > { %v6078_v43 = vld [vmem:[%s19878_s28 + $0x1e8] sm:$0xff] }
0x16a4   : > { %17812 = vmatpush3.bf16.msra.mxu0 %v19116_v47  ;;  %17834 = vmatpush3.bf16.msra.mxu1 %v19117_v48  ;;  %v17196_v45 = vcombine.high %v6076_v42, %v6078_v43  ;;  %v17193_v47 = vcombine.low %v6075_v40, %v6077_v41  ;;  %v17195_v48 = vcombine.low %v6076_v42, %v6078_v43  ;;  %v19165_v12 = vld [vmem:[%s19889_s29 + $0x2a8] sm:$0xff]  }
0x16a5   : > { %17813 = vmatprep.subr.bf16.mxu0 %v19118_v50  ;;  %17835 = vmatprep.subr.bf16.mxu1 %v19119_v51  ;;  %v19142_v50 = vld [vmem:[%s19889_s29 + $0x240] sm:$0xff]  }
0x16a6   : > { %v19143_v51 = vld [vmem:[%s19889_s29 + $0x2c0] sm:$0xff]  }
0x16a8   : > { %17814 = vmatpush3.bf16.msra.mxu0 %v19120_v53  ;;  %17836 = vmatpush3.bf16.msra.mxu1 %v19121_v4  ;;  %v19144_v53 = vld [vmem:[%s19889_s29 + $0x200] sm:$0xff]  }
0x16a9   : > { %17815 = vmatprep.subr.bf16.mxu0 %v19122_v56  ;;  %17837 = vmatprep.subr.bf16.mxu1 %v19123_v59  ;;  %v19145_v4 = vld [vmem:[%s19889_s29 + $0x280] sm:$0xff]   ;;  %v19146_v56 = vld [vmem:[%s19889_s29 + $0x248] sm:$0xff]  }
0x16aa   : > { %v19147_v59 = vld [vmem:[%s19889_s29 + $0x2c8] sm:$0xff]  }
0x16ac   : > { %17816 = vmatpush3.bf16.msra.mxu0 %v19124_v46  ;;  %17838 = vmatpush3.bf16.msra.mxu1 %v19125_v62  ;;  %v19148_v46 = vld [vmem:[%s19889_s29 + $0x208] sm:$0xff]  }
0x16ad   : > { %17817 = vmatprep.subr.bf16.mxu0 %v19126_v55  ;;  %17839 = vmatprep.subr.bf16.mxu1 %v19127_v63  ;;  %v19149_v62 = vld [vmem:[%s19889_s29 + $0x288] sm:$0xff]   ;;  %v19150_v55 = vld [vmem:[%s19889_s29 + $0x250] sm:$0xff]  }
0x16ae   : > { %v19151_v63 = vld [vmem:[%s19889_s29 + $0x2d0] sm:$0xff]  }
0x16b0   : > { %17818 = vmatpush3.bf16.msra.mxu0 %v19128_v1  ;;  %17840 = vmatpush3.bf16.msra.mxu1 %v19129_v57  ;;  %v19152_v1 = vld [vmem:[%s19889_s29 + $0x210] sm:$0xff]  }
0x16b1   : > { %17819 = vmatprep.subr.bf16.mxu0 %v19130_v2  ;;  %17841 = vmatprep.subr.bf16.mxu1 %v19131_v3  ;;  %v19153_v57 = vld [vmem:[%s19889_s29 + $0x290] sm:$0xff]   ;;  %v19154_v2 = vld [vmem:[%s19889_s29 + $0x258] sm:$0xff]  }
0x16b2   : > { %v19155_v3 = vld [vmem:[%s19889_s29 + $0x2d8] sm:$0xff]  }
0x16b4   : > { %17820 = vmatpush3.bf16.msra.mxu0 %v19132_v54  ;;  %17842 = vmatpush3.bf16.msra.mxu1 %v19133_v58  ;;  %v19156_v54 = vld [vmem:[%s19889_s29 + $0x218] sm:$0xff]  }
0x16b5   : > { %17821 = vmatprep.subr.bf16.mxu0 %v19134_v6  ;;  %17843 = vmatprep.subr.bf16.mxu1 %v19135_v0  ;;  %v19157_v58 = vld [vmem:[%s19889_s29 + $0x298] sm:$0xff]   ;;  %v19158_v6 = vld [vmem:[%s19889_s29 + $0x260] sm:$0xff]  }
0x16b6   : > { %v19159_v0 = vld [vmem:[%s19889_s29 + $0x2e0] sm:$0xff]  }
0x16b8   : > { %17822 = vmatpush3.bf16.msra.mxu0 %v19136_v7  ;;  %17844 = vmatpush3.bf16.msra.mxu1 %v19137_v9  ;;  %v19160_v7 = vld [vmem:[%s19889_s29 + $0x220] sm:$0xff]  }
0x16b9   : > { %17823 = vmatprep.subr.bf16.mxu0 %v19138_v10  ;;  %17845 = vmatprep.subr.bf16.mxu1 %v19139_v11  ;;  %v19161_v9 = vld [vmem:[%s19889_s29 + $0x2a0] sm:$0xff]   ;;  %v19162_v10 = vld [vmem:[%s19889_s29 + $0x268] sm:$0xff]  }
0x16ba   : > { %v19163_v11 = vld [vmem:[%s19889_s29 + $0x2e8] sm:$0xff]  }
0x16bc   : > { %17824 = vmatpush3.bf16.msra.mxu0 %v19140_v15  ;;  %17846 = vmatpush3.bf16.msra.mxu1 %v19141_v16  ;;  %v19168_v15 = vld [vmem:[%s19889_s29 + $0x230] sm:$0xff]  }
0x16bd   : > { %6181 = vmatprep.subr.bf16.mxu0 %v17182_v17  ;;  %6224 = vmatprep.subr.bf16.mxu1 %v17184_v18  ;;  %v19169_v16 = vld [vmem:[%s19889_s29 + $0x2b0] sm:$0xff]   ;;  %v19170_v17 = vld [vmem:[%s19889_s29 + $0x278] sm:$0xff]  }
0x16be   : > { %v19171_v18 = vld [vmem:[%s19889_s29 + $0x2f8] sm:$0xff]  }
0x16bf   : > { %6014 = vmatmul.mubr.bf16.vlgmr.msra.gmra.mrb[52].mxu0 %v20378_v8  ;;  %6055 = vmatmul.mubr.bf16.vlgmr.msra.gmra.mrb[44].mxu1 %v20380_v5  ;;  %v17189_v8 = vcombine.low %v6071_v61, %v6073_v26  ;;  %v17191_v5 = vcombine.low %v6072_v34, %v6074_v35 }
0x16c0   : > { %6182 = vmatpush1.bf16.msra.mxu0 %v17181_v23  ;;  %6225 = vmatpush1.bf16.msra.mxu1 %v17183_v24  ;;  %v20480_v23 = vld [vmem:[%s19878_s28 + $0x38] sm:$0xff]  ;;  %v17232_v24 = vcombine.high %v20474_v21, %v20477_v22 }
0x16c1   : > { %6183 = vmatprep.subr.bf16.mxu0 %v17186_v25  ;;  %6226 = vmatprep.subr.bf16.mxu1 %v17188_v28  ;;  %v20485_v25 = vld [vmem:[%s19878_s28 + $0x78] sm:$0xff]  ;;  %v17231_v28 = vcombine.low %v20474_v21, %v20477_v22 }
0x16c2   : > { %6213 = vmatprep.mubr.bf16.mxu0 %v19616_v36  ;;  %6256 = vmatprep.mubr.bf16.mxu1 %v19616_v36  ;;  %v17233_v61 = vcombine.low %v20480_v23, %v20485_v25  ;;  %v17234_v26 = vcombine.high %v20480_v23, %v20485_v25 }
0x16c4   : > { %6184 = vmatpush1.bf16.msra.mxu0 %v17185_v27  ;;  %6227 = vmatpush1.bf16.msra.mxu1 %v17187_v37 }
0x16c5   : > { %6185 = vmatprep.subr.bf16.mxu0 %v17190_v38  ;;  %6228 = vmatprep.subr.bf16.mxu1 %v17192_v39 }
0x16c8   : > { %6186 = vmatpush1.bf16.msra.mxu0 %v17189_v8  ;;  %6229 = vmatpush1.bf16.msra.mxu1 %v17191_v5 }
0x16c9   : > { %6187 = vmatprep.subr.bf16.mxu0 %v17194_v44  ;;  %6230 = vmatprep.subr.bf16.mxu1 %v17196_v45 }
0x16cc   : > { %6188 = vmatpush1.bf16.msra.mxu0 %v17193_v47  ;;  %6231 = vmatpush1.bf16.msra.mxu1 %v17195_v48 }
0x16cd   : > { %17853 = vmatprep.subr.bf16.mxu0 %v19142_v50  ;;  %17875 = vmatprep.subr.bf16.mxu1 %v19143_v51 }
0x16cf   : > { %17197 = vmatmul.mubr.msk.bf16.vlgmr.msra.gmra.mrb[56].mxu0 %vm1550_vm2, %v20313_v33  ;;  %17198 = vmatmul.mubr.msk.bf16.vlgmr.msra.gmra.mrb[48].mxu1 %vm1550_vm2, %v20313_v33 }
0x16d0   : > { %17854 = vmatpush3.bf16.msra.mxu0 %v19144_v53  ;;  %17876 = vmatpush3.bf16.msra.mxu1 %v19145_v4 }
0x16d1   : > { %17855 = vmatprep.subr.bf16.mxu0 %v19146_v56  ;;  %17877 = vmatprep.subr.bf16.mxu1 %v19147_v59 }
0x16d4   : > { %17856 = vmatpush3.bf16.msra.mxu0 %v19148_v46  ;;  %17878 = vmatpush3.bf16.msra.mxu1 %v19149_v62 }
0x16d5   : > { %17857 = vmatprep.subr.bf16.mxu0 %v19150_v55  ;;  %17879 = vmatprep.subr.bf16.mxu1 %v19151_v63 }
0x16d8   : > { %17858 = vmatpush3.bf16.msra.mxu0 %v19152_v1  ;;  %17880 = vmatpush3.bf16.msra.mxu1 %v19153_v57 }
0x16d9   : > { %17859 = vmatprep.subr.bf16.mxu0 %v19154_v2  ;;  %17881 = vmatprep.subr.bf16.mxu1 %v19155_v3 }
0x16dc   : > { %17860 = vmatpush3.bf16.msra.mxu0 %v19156_v54  ;;  %17882 = vmatpush3.bf16.msra.mxu1 %v19157_v58  ;;  %v6079_v54 = vld [vmem:[%s19881_s26 + $0x8] sm:$0xf] }
0x16dd   : > { %17861 = vmatprep.subr.bf16.mxu0 %v19158_v6  ;;  %17883 = vmatprep.subr.bf16.mxu1 %v19159_v0  ;;  %v6084_v58 = vrot.slane %v6079_v54, %v19935_v49  ;;  %v6092_v6 = vrot.slane %v6079_v54, %v20368_v30  ;;  %v6088_v0 = vrot.slane %v6079_v54, %v19940_v52 }
0x16e0   : > { %17862 = vmatpush3.bf16.msra.mxu0 %v19160_v7  ;;  %17884 = vmatpush3.bf16.msra.mxu1 %v19161_v9  ;;  %v6096_v7 = vrot.slane %v6079_v54, %v20372_v31  ;;  %v6633_v54 = vld [vmem:[%s19878_s28 + $0x1f0] sm:$0xff] }
0x16e1   : > { %17863 = vmatprep.subr.bf16.mxu0 %v19162_v10  ;;  %17885 = vmatprep.subr.bf16.mxu1 %v19163_v11 }
0x16e4   : > { %17864 = vmatpush3.bf16.msra.mxu0 %v19164_v60  ;;  %17886 = vmatpush3.bf16.msra.mxu1 %v19165_v12 }
0x16e5   : > { %17865 = vmatprep.subr.bf16.mxu0 %v19166_v13  ;;  %17887 = vmatprep.subr.bf16.mxu1 %v19167_v14 }
0x16e8   : > { %17866 = vmatpush3.bf16.msra.mxu0 %v19168_v15  ;;  %17888 = vmatpush3.bf16.msra.mxu1 %v19169_v16 }
0x16e9   : > { %17867 = vmatprep.subr.bf16.mxu0 %v19170_v17  ;;  %17889 = vmatprep.subr.bf16.mxu1 %v19171_v18 }
0x16ec   : > { %17868 = vmatpush3.bf16.msra.mxu0 %v19172_v19  ;;  %17890 = vmatpush3.bf16.msra.mxu1 %v19173_v20 }
0x16ed   : > { %6737 = vmatprep.subr.bf16.mxu0 %v17232_v24  ;;  %6780 = vmatprep.subr.bf16.mxu1 %v17234_v26 }
0x1772   : > { %v17781_v34 = vpop.f32.mrb[48].mxu0  ;;  %v17803_v35 = vpop.f32.mrb[40].mxu1 }
0x1773   : > { %v17782_v27 = vpop.f32.mrb[49].mxu0  ;;  %v17804_v37 = vpop.f32.mrb[41].mxu1 }
0x1774   : > { %v17783_v38 = vadd.f32 %v17782_v27, %v17781_v34  ;;  %v17805_v39 = vadd.f32 %v17804_v37, %v17803_v35  ;;  %v17784_v40 = vpop.f32.mrb[50].mxu0  ;;  %v17806_v41 = vpop.f32.mrb[42].mxu1 }
0x1775   : > { %v17785_v42 = vpop.f32.mrb[51].mxu0  ;;  %v17807_v43 = vpop.f32.mrb[43].mxu1 }
0x1776   : > { %v5783_v8 = vadd.f32 %v17805_v39, %v17783_v38  ;;  %v17786_v5 = vadd.f32 %v17785_v42, %v17784_v40  ;;  %v17808_v44 = vadd.f32 %v17807_v43, %v17806_v41  ;;  %v6623_v39 = vld [vmem:[%s19878_s28 + $0xb0] sm:$0xff] }
0x1777   : > { %v6625_v40 = vld [vmem:[%s19878_s28 + $0xf0] sm:$0xff] }
0x1778   : > { %v5786_v45 = vadd.f32 %v17808_v44, %v17786_v5  ;;  %v6624_v5 = vld [vmem:[%s19878_s28 + $0xb8] sm:$0xff] }
0x1779   : > { %v6626_v44 = vld [vmem:[%s19878_s28 + $0xf8] sm:$0xff] }
0x1792   : > { %v17825_v47 = vpop.f32.mrb[52].mxu0  ;;  %v17847_v48 = vpop.f32.mrb[44].mxu1 }
0x1793   : > { %v17826_v50 = vpop.f32.mrb[53].mxu0  ;;  %v17848_v51 = vpop.f32.mrb[45].mxu1 }
0x1794   : > { %v17827_v53 = vadd.f32 %v17826_v50, %v17825_v47  ;;  %v17849_v4 = vadd.f32 %v17848_v51, %v17847_v48  ;;  %v17828_v56 = vpop.f32.mrb[54].mxu0  ;;  %v17850_v59 = vpop.f32.mrb[46].mxu1  ;;  %v17236_v51 = vcombine.high %v6623_v39, %v6625_v40 }
0x1795   : > { %v17829_v46 = vpop.f32.mrb[55].mxu0  ;;  %v17851_v62 = vpop.f32.mrb[47].mxu1 }
0x1796   : > { %v6016_v55 = vadd.f32 %v17827_v53, %v5783_v8  ;;  %v17830_v63 = vadd.f32 %v17829_v46, %v17828_v56  ;;  %v17852_v1 = vadd.f32 %v17851_v62, %v17850_v59  ;;  %v17238_v53 = vcombine.high %v6624_v5, %v6626_v44  ;;  %v6629_v56 = vld [vmem:[%s19878_s28 + $0x170] sm:$0xff]  ;;  %v6628_v59 = vld [vmem:[%s19878_s28 + $0x138] sm:$0xff] }
0x1797   : > { %v6630_v46 = vld [vmem:[%s19878_s28 + $0x178] sm:$0xff]  ;;  %v17235_v62 = vcombine.low %v6623_v39, %v6625_v40  ;;  %v19198_v39 = vld [vmem:[%s19889_s29 + $0x370] sm:$0xff]  }
0x1798   : > { %v20493_v57 = vadd.f32 %v17849_v4, %v6016_v55  ;;  %v6019_v2 = vadd.f32 %v17830_v63, %v5786_v45  ;;  %v6627_v4 = vld [vmem:[%s19878_s28 + $0x130] sm:$0xff]  ;;  %v17237_v55 = vcombine.low %v6624_v5, %v6626_v44  ;;  %v17241_v22 = vcombine.low %v6628_v59, %v6630_v46  ;;  %v19204_v5 = vld [vmem:[%s19889_s29 + $0x338] sm:$0xff]  }
0x1799   : > { %v17240_v63 = vcombine.high %v6627_v4, %v6629_v56  ;;  %v17239_v21 = vcombine.low %v6627_v4, %v6629_v56  ;;  %v19199_v40 = vld [vmem:[%s19889_s29 + $0x3f0] sm:$0xff]   ;;  %v19205_v44 = vld [vmem:[%s19889_s29 + $0x3b8] sm:$0xff]  }
0x179a   : > { %v20495_v3 = vadd.f32 %v17852_v1, %v6019_v2  ;;  %v17242_v1 = vcombine.high %v6628_v59, %v6630_v46  ;;  %v6631_v2 = vld [vmem:[%s19878_s28 + $0x1b0] sm:$0xff] }
0x179b   : > { %v17244_v23 = vcombine.high %v6631_v2, %v6633_v54 }
0x17a2   : > { %v6215_v9 = vpop.f32.mrb[56].mxu0  ;;  %v6258_v10 = vpop.f32.mrb[48].mxu1 }
0x17a3   : > { %v6216_v11 = vadd.f32 %v6215_v9, %v6084_v58  ;;  %v6259_v60 = vadd.f32 %v6258_v10, %v6092_v6  ;;  %v6217_v12 = vpop.f32.mrb[57].mxu0  ;;  %v6260_v13 = vpop.f32.mrb[49].mxu1  ;;  %v19177_v9 = vld [vmem:[%s19889_s29 + $0x380] sm:$0xff]   ;;  %v19178_v10 = vld [vmem:[%s19889_s29 + $0x348] sm:$0xff]  }
0x17a4   : > { %v6218_v14 = vadd.f32 %v6217_v12, %v6088_v0  ;;  %v6261_v15 = vadd.f32 %v6260_v13, %v6096_v7  ;;  %v6219_v16 = vpop.f32.mrb[58].mxu0  ;;  %v6262_v17 = vpop.f32.mrb[50].mxu1  ;;  %v19181_v12 = vld [vmem:[%s19889_s29 + $0x388] sm:$0xff]   ;;  %v19182_v13 = vld [vmem:[%s19889_s29 + $0x350] sm:$0xff]  }
0x17a5   : > { %v6220_v18 = vadd.f32 %v6219_v16, %v6084_v58  ;;  %v6263_v19 = vadd.f32 %v6262_v17, %v6092_v6  ;;  %v6221_v20 = vpop.f32.mrb[59].mxu0  ;;  %v6264_v24 = vpop.f32.mrb[51].mxu1  ;;  %v6267_v35 = vmax.f32 %v6216_v11, 0.0  ;;  %v6269_v27 = vmax.f32 %v6259_v60, 0.0  ;;  %v6632_v58 = vld [vmem:[%s19878_s28 + $0x1b8] sm:$0xff]  ;;  %v19179_v11 = vld [vmem:[%s19889_s29 + $0x3c8] sm:$0xff]  }
0x17a6   : > { %v6222_v26 = vadd.f32 %v6221_v20, %v6088_v0  ;;  %v6265_v34 = vadd.f32 %v6264_v24, %v6096_v7  ;;  %v6268_v41 = vmax.f32 %v6218_v14, 0.0  ;;  %v6270_v42 = vmax.f32 %v6261_v15, 0.0  ;;  %v6634_v6 = vld [vmem:[%s19878_s28 + $0x1f8] sm:$0xff]  ;;  %v19175_v0 = vld [vmem:[%s19889_s29 + $0x3c0] sm:$0xff]   ;;  %v19180_v60 = vld [vmem:[%s19889_s29 + $0x308] sm:$0xff]  }
0x17a7   : > { %v6271_v37 = vmax.f32 %v6220_v18, 0.0  ;;  %v6273_v38 = vmax.f32 %v6263_v19, 0.0  ;;  %v17246_v25 = vcombine.high %v6632_v58, %v6634_v6  ;;  %v19176_v7 = vld [vmem:[%s19889_s29 + $0x300] sm:$0xff]   ;;  %v19183_v14 = vld [vmem:[%s19889_s29 + $0x3d0] sm:$0xff]   ;;  %v19187_v17 = vld [vmem:[%s19889_s29 + $0x3d8] sm:$0xff]  }
0x17a8   : > { %v6272_v43 = vmax.f32 %v6222_v26, 0.0  ;;  %v6274_v8 = vmax.f32 %v6265_v34, 0.0  ;;  %v19184_v15 = vld [vmem:[%s19889_s29 + $0x310] sm:$0xff]   ;;  %v19188_v18 = vld [vmem:[%s19889_s29 + $0x318] sm:$0xff]   ;;  %v19190_v20 = vld [vmem:[%s19889_s29 + $0x360] sm:$0xff]  }
0x17a9   : > { %v6275_v45 = vpack.c.bf16 %v6271_v37, %v6267_v35  ;;  %v6277_v47 = vpack.c.bf16 %v6273_v38, %v6269_v27  ;;  %v19185_v16 = vld [vmem:[%s19889_s29 + $0x390] sm:$0xff]   ;;  %v19189_v19 = vld [vmem:[%s19889_s29 + $0x398] sm:$0xff]   ;;  %v19191_v24 = vld [vmem:[%s19889_s29 + $0x3e0] sm:$0xff]  }
0x17aa   : > { %v6276_v48 = vpack.c.bf16 %v6272_v43, %v6268_v41  ;;  %v6278_v50 = vpack.c.bf16 %v6274_v8, %v6270_v42  ;;  %v19192_v26 = vld [vmem:[%s19889_s29 + $0x320] sm:$0xff]   ;;  %v19194_v35 = vld [vmem:[%s19889_s29 + $0x368] sm:$0xff]   ;;  %v19200_v41 = vld [vmem:[%s19889_s29 + $0x330] sm:$0xff]  }
0x17ab   : > { %v19193_v34 = vld [vmem:[%s19889_s29 + $0x3a0] sm:$0xff]   ;;  %v19195_v27 = vld [vmem:[%s19889_s29 + $0x3e8] sm:$0xff]   ;;  %v19201_v42 = vld [vmem:[%s19889_s29 + $0x3b0] sm:$0xff]  }
0x17ac   : > { %6567 = vmatprep.mubr.bf16.mxu0 %v6276_v48  ;;  %6608 = vmatprep.mubr.bf16.mxu1 %v6278_v50  ;;  %v19196_v37 = vld [vmem:[%s19889_s29 + $0x328] sm:$0xff]   ;;  %v19202_v43 = vld [vmem:[%s19889_s29 + $0x378] sm:$0xff]  }
0x17ad   : > { %6568 = vmatmul.mubr.bf16.vlgmr.msra.gmra.mrb[60].mxu0 %v6275_v45  ;;  %6609 = vmatmul.mubr.bf16.vlgmr.msra.gmra.mrb[52].mxu1 %v6277_v47  ;;  %v19197_v38 = vld [vmem:[%s19889_s29 + $0x3a8] sm:$0xff]   ;;  %v19203_v8 = vld [vmem:[%s19889_s29 + $0x3f8] sm:$0xff]  }
0x17ae   : > { %6738 = vmatpush1.bf16.msra.mxu0 %v17231_v28  ;;  %6781 = vmatpush1.bf16.msra.mxu1 %v17233_v61  ;;  %v17243_v28 = vcombine.low %v6631_v2, %v6633_v54  ;;  %v17245_v61 = vcombine.low %v6632_v58, %v6634_v6  ;;  %v6635_v58 = vld [vmem:[%s19881_s26 + $0xc] sm:$0xf] }
0x17af   : > { %6739 = vmatprep.subr.bf16.mxu0 %v17236_v51  ;;  %6782 = vmatprep.subr.bf16.mxu1 %v17238_v53  ;;  %v6640_v6 = vrot.slane %v6635_v58, %v19935_v49 }
0x17b0   : > { %6769 = vmatprep.mubr.bf16.mxu0 %v19616_v36  ;;  %6812 = vmatprep.mubr.bf16.mxu1 %v19616_v36  ;;  %v19174_v36 = vld [vmem:[%s19889_s29 + $0x340] sm:$0xff]  }
0x17b2   : > { %6740 = vmatpush1.bf16.msra.mxu0 %v17235_v62  ;;  %6783 = vmatpush1.bf16.msra.mxu1 %v17237_v55 }
0x17b3   : > { %6741 = vmatprep.subr.bf16.mxu0 %v17240_v63  ;;  %6784 = vmatprep.subr.bf16.mxu1 %v17242_v1 }
0x17b6   : > { %6742 = vmatpush1.bf16.msra.mxu0 %v17239_v21  ;;  %6785 = vmatpush1.bf16.msra.mxu1 %v17241_v22  ;;  %v6648_v21 = vrot.slane %v6635_v58, %v20368_v30  ;;  %v6644_v22 = vrot.slane %v6635_v58, %v19940_v52 }
0x17b7   : > { %6743 = vmatprep.subr.bf16.mxu0 %v17244_v23  ;;  %6786 = vmatprep.subr.bf16.mxu1 %v17246_v25  ;;  %v6652_v23 = vrot.slane %v6635_v58, %v20372_v31 }
0x17ba   : > { %6744 = vmatpush1.bf16.msra.mxu0 %v17243_v28  ;;  %6787 = vmatpush1.bf16.msra.mxu1 %v17245_v61 }
0x17bb   : > { %17897 = vmatprep.subr.bf16.mxu0 %v19174_v36  ;;  %17919 = vmatprep.subr.bf16.mxu1 %v19175_v0 }
0x17bd   : > { %17247 = vmatmul.mubr.msk.bf16.vlgmr.msra.gmra.mrb[64].mxu0 %vm1550_vm2, %v20313_v33  ;;  %17248 = vmatmul.mubr.msk.bf16.vlgmr.msra.gmra.mrb[56].mxu1 %vm1550_vm2, %v20313_v33  ;;  %v19186_v33 = vld [vmem:[%s19889_s29 + $0x358] sm:$0xff]  }
0x17be   : > { %17898 = vmatpush3.bf16.msra.mxu0 %v19176_v7  ;;  %17920 = vmatpush3.bf16.msra.mxu1 %v19177_v9 }
0x17bf   : > { %17899 = vmatprep.subr.bf16.mxu0 %v19178_v10  ;;  %17921 = vmatprep.subr.bf16.mxu1 %v19179_v11 }
0x17c2   : > { %17900 = vmatpush3.bf16.msra.mxu0 %v19180_v60  ;;  %17922 = vmatpush3.bf16.msra.mxu1 %v19181_v12 }
0x17c3   : > { %17901 = vmatprep.subr.bf16.mxu0 %v19182_v13  ;;  %17923 = vmatprep.subr.bf16.mxu1 %v19183_v14 }
0x17c6   : > { %17902 = vmatpush3.bf16.msra.mxu0 %v19184_v15  ;;  %17924 = vmatpush3.bf16.msra.mxu1 %v19185_v16 }
0x17c7   : > { %17903 = vmatprep.subr.bf16.mxu0 %v19186_v33  ;;  %17925 = vmatprep.subr.bf16.mxu1 %v19187_v17 }
0x17ca   : > { %17904 = vmatpush3.bf16.msra.mxu0 %v19188_v18  ;;  %17926 = vmatpush3.bf16.msra.mxu1 %v19189_v19 }
0x17cb   : > { %17905 = vmatprep.subr.bf16.mxu0 %v19190_v20  ;;  %17927 = vmatprep.subr.bf16.mxu1 %v19191_v24 }
0x17ce   : > { %17906 = vmatpush3.bf16.msra.mxu0 %v19192_v26  ;;  %17928 = vmatpush3.bf16.msra.mxu1 %v19193_v34 }
0x17cf   : > { %17907 = vmatprep.subr.bf16.mxu0 %v19194_v35  ;;  %17929 = vmatprep.subr.bf16.mxu1 %v19195_v27 }
0x17d2   : > { %17908 = vmatpush3.bf16.msra.mxu0 %v19196_v37  ;;  %17930 = vmatpush3.bf16.msra.mxu1 %v19197_v38 }
0x17d3   : > { %17909 = vmatprep.subr.bf16.mxu0 %v19198_v39  ;;  %17931 = vmatprep.subr.bf16.mxu1 %v19199_v40 }
0x17d6   : > { %17910 = vmatpush3.bf16.msra.mxu0 %v19200_v41  ;;  %17932 = vmatpush3.bf16.msra.mxu1 %v19201_v42 }
0x17d7   : > { %17911 = vmatprep.subr.bf16.mxu0 %v19202_v43  ;;  %17933 = vmatprep.subr.bf16.mxu1 %v19203_v8 }
0x17da   : > { %17912 = vmatpush3.bf16.msra.mxu0 %v19204_v5  ;;  %17934 = vmatpush3.bf16.msra.mxu1 %v19205_v44 }
0x1880   : > { %v17869_v45 = vpop.f32.mrb[60].mxu0  ;;  %v17891_v47 = vpop.f32.mrb[52].mxu1 }
0x1881   : > { %v17870_v48 = vpop.f32.mrb[61].mxu0  ;;  %v17892_v50 = vpop.f32.mrb[53].mxu1 }
0x1882   : > { %v17871_v51 = vadd.f32 %v17870_v48, %v17869_v45  ;;  %v17893_v53 = vadd.f32 %v17892_v50, %v17891_v47  ;;  %v17872_v4 = vpop.f32.mrb[62].mxu0  ;;  %v17894_v56 = vpop.f32.mrb[54].mxu1  ;;  %v17281_v45 = vld [vmem:[%s19886_s24] ss:$0 sm:$0xff] }
0x1883   : > { %v17873_v59 = vpop.f32.mrb[63].mxu0  ;;  %v17895_v46 = vpop.f32.mrb[55].mxu1 }
0x1884   : > { %v6611_v62 = vadd.f32 %v17893_v53, %v17871_v51  ;;  %v17874_v55 = vadd.f32 %v17873_v59, %v17872_v4  ;;  %v17896_v63 = vadd.f32 %v17895_v46, %v17894_v56 }
0x1886   : > { %v6617_v1 = vadd.f32 %v6611_v62, %v20493_v57  ;;  %v6614_v2 = vadd.f32 %v17896_v63, %v17874_v55 }
0x1888   : > { %v6618_v54 = vadd.f32 %v6614_v2, %v20495_v3 }
0x1890   : > { %v6771_v25 = vpop.f32.mrb[64].mxu0  ;;  %v6814_v28 = vpop.f32.mrb[56].mxu1 }
0x1891   : > { %v6772_v61 = vadd.f32 %v6771_v25, %v6640_v6  ;;  %v6815_v36 = vadd.f32 %v6814_v28, %v6648_v21  ;;  %v6773_v0 = vpop.f32.mrb[65].mxu0  ;;  %v6816_v7 = vpop.f32.mrb[57].mxu1 }
0x1892   : > { %v6774_v9 = vadd.f32 %v6773_v0, %v6644_v22  ;;  %v6817_v57 = vadd.f32 %v6816_v7, %v6652_v23  ;;  %v6775_v10 = vpop.f32.mrb[66].mxu0  ;;  %v6818_v11 = vpop.f32.mrb[58].mxu1  ;;  %v17282_v0 = vld [vmem:[%s19893_s19] ss:$0 sm:$0xff] }
0x1893   : > { %v6776_v3 = vadd.f32 %v6775_v10, %v6640_v6  ;;  %v6819_v60 = vadd.f32 %v6818_v11, %v6648_v21  ;;  %v6777_v12 = vpop.f32.mrb[67].mxu0  ;;  %v6820_v49 = vpop.f32.mrb[59].mxu1  ;;  %v6823_v14 = vmax.f32 %v6772_v61, 0.0  ;;  %v6825_v52 = vmax.f32 %v6815_v36, 0.0 }
0x1894   : > { %v6778_v13 = vadd.f32 %v6777_v12, %v6644_v22  ;;  %v6821_v30 = vadd.f32 %v6820_v49, %v6652_v23  ;;  %v6824_v16 = vmax.f32 %v6774_v9, 0.0  ;;  %v6826_v33 = vmax.f32 %v6817_v57, 0.0  ;;  %v17283_v57 = vld [vmem:[%s19897_s25] ss:$0 sm:$0xff] }
0x1895   : > { %v6827_v15 = vmax.f32 %v6776_v3, 0.0  ;;  %v6829_v31 = vmax.f32 %v6819_v60, 0.0 }
0x1896   : > { %v6828_v17 = vmax.f32 %v6778_v13, 0.0  ;;  %v6830_v18 = vmax.f32 %v6821_v30, 0.0 }
0x1897   : > { %v6831_v19 = vpack.c.bf16 %v6827_v15, %v6823_v14  ;;  %v6833_v20 = vpack.c.bf16 %v6829_v31, %v6825_v52 }
0x1898   : > { %v6832_v24 = vpack.c.bf16 %v6828_v17, %v6824_v16  ;;  %v6834_v26 = vpack.c.bf16 %v6830_v18, %v6826_v33 }
0x189a   : > { %7123 = vmatprep.mubr.bf16.mxu0 %v6832_v24  ;;  %7164 = vmatprep.mubr.bf16.mxu1 %v6834_v26 }
0x189b   : > { %7124 = vmatmul.mubr.bf16.vlgmr.msra.gmra.mrb[68].mxu0 %v6831_v19  ;;  %7165 = vmatmul.mubr.bf16.vlgmr.msra.gmra.mrb[60].mxu1 %v6833_v20 }
0x196e   : > { %v17913_v34 = vpop.f32.mrb[68].mxu0  ;;  %v17935_v35 = vpop.f32.mrb[60].mxu1 }
0x196f   : > { %v17914_v27 = vpop.f32.mrb[69].mxu0  ;;  %v17936_v37 = vpop.f32.mrb[61].mxu1 }
0x1970   : > { %v17915_v38 = vadd.f32 %v17914_v27, %v17913_v34  ;;  %v17937_v39 = vadd.f32 %v17936_v37, %v17935_v35  ;;  %v17916_v40 = vpop.f32.mrb[70].mxu0  ;;  %v17938_v41 = vpop.f32.mrb[62].mxu1 }
0x1971   : > { %v17917_v42 = vpop.f32.mrb[71].mxu0  ;;  %v17939_v43 = vpop.f32.mrb[63].mxu1 }
0x1972   : > { %v7167_v8 = vadd.f32 %v17937_v39, %v17915_v38  ;;  %v17918_v5 = vadd.f32 %v17917_v42, %v17916_v40  ;;  %v17940_v44 = vadd.f32 %v17939_v43, %v17938_v41 }
0x1974   : > { %v7173_v47 = vadd.f32 %v7167_v8, %v6617_v1  ;;  %v7170_v48 = vadd.f32 %v17940_v44, %v17918_v5 }
0x1976   : > { %v7174_v50 = vadd.f32 %v7170_v48, %v6618_v54  ;;  %v7182_v51 = vadd.f32 %v17281_v45, %v7173_v47 }
0x1978   : > { %v7184_v53 = vadd.f32 %v7182_v51, %v20309_v32  ;;  %v7183_v4 = vadd.f32 %v17281_v45, %v7174_v50 }
0x197a   : > { %v7188_v56 = vsel %vm1550_vm2, %v7184_v53, 0.0  ;;  %v7185_v59 = vadd.f32 %v7183_v4, %v20304_v29 }
0x197b   : > { %7189 = vadd.xlane.f32.xlu1 %v7188_v56 }
0x197c   : > { %v7191_v46 = vsel %vm1550_vm2, %v7185_v59, 0.0 }
0x197d   : > { %7192 = vadd.xlane.f32.xlu0 %v7191_v46 }
0x1a08   : > { %v7190_v62 = vpop.xlane.xlu1 %7189 }
0x1a09   : > { %v7194_v55 = vmul.f32 0.015625, %v7190_v62 }
0x1a0a   : > { %v7193_v63 = vpop.xlane.xlu0 %7192 }
0x1a0b   : > { %v7196_v2 = vsub.f32 %v7184_v53, %v7194_v55  ;;  %v7195_v58 = vmul.f32 0.015625, %v7193_v63 }
0x1a0d   : > { %v7197_v1 = vsub.f32 %v7185_v59, %v7195_v58  ;;  %v7198_v54 = vmul.f32 %v7196_v2, %v7196_v2 }
0x1a0f   : > { %v7200_v6 = vsel %vm1550_vm2, %v7198_v54, 0.0  ;;  %v7199_v32 = vmul.f32 %v7197_v1, %v7197_v1 }
0x1a10   : > { %7201 = vadd.xlane.f32.xlu1 %v7200_v6 }
0x1a11   : > { %v7203_v21 = vsel %vm1550_vm2, %v7199_v32, 0.0 }
0x1a12   : > { %7204 = vadd.xlane.f32.xlu0 %v7203_v21 }
0x1a9d   : > { %v7202_v29 = vpop.xlane.xlu1 %7201 }
0x1a9e   : > { %v7206_v22 = vmul.f32 0.015625, %v7202_v29 }
0x1a9f   : > { %v7205_v23 = vpop.xlane.xlu0 %7204 }
0x1aa0   : > { %v7208_v25 = vadd.f32 1e-05, %v7206_v22  ;;  %v7207_v28 = vmul.f32 0.015625, %v7205_v23 }
0x1aa2   : > { %19274 = vrsqrt.f32 %v7208_v25  ;;  %v7209_v61 = vadd.f32 1e-05, %v7207_v28 }
0x1aa4   : > { %19276 = vrsqrt.f32 %v7209_v61 }
0x1aac   : > { %v19275_v36 = vpop.eup %19274 }
0x1aad   : > { %v7212_v7 = vmul.f32 %v19275_v36, %v7196_v2 }
0x1aae   : > { %v19277_v9 = vpop.eup %19276 }
0x1aaf   : > { %v7220_v10 = vmul.f32 %v17282_v0, %v7212_v7  ;;  %v7213_v11 = vmul.f32 %v19277_v9, %v7197_v1 }
0x1ab1   : > { %v7228_v3 = vadd.f32 %v17283_v57, %v7220_v10  ;;  %v7221_v60 = vmul.f32 %v17282_v0, %v7213_v11 }
0x1ab3   : > { %7230 = vst.msk [vmem:[#allocation2] sm:$0xff] %vm1550_vm2, %v7228_v3  ;;  %v7229_v12 = vadd.f32 %v17283_v57, %v7221_v60 }
0x1ab5   : > { %7231 = vst.msk [vmem:[#allocation2 + $0x8] sm:$0xff] %vm1550_vm2, %v7229_v12 }
0x1ab6 PF: > { %s21706_s11 = sld [smem:[#allocation30_spill]] }
0x1abc   : > { %p17284_p9 = scmp.lt.s32.totalorder %s21706_s11, 6 }
0x1abd   : > { %s21707_s22 = sld [smem:[#allocation31_spill]] (!%p17284_p9)  ;;  %v19634_v30 = vmov (!%p17284_p9), 0   ;;  %vm7310_vm5 = vcmask (!%p17284_p9), 523264   ;;  %v7236_v17 = vld [vmem:[#allocation3] sm:$0xff] (!%p17284_p9)  ;;  %s21708_s21 = sld [smem:[#allocation32_spill]] (!%p17284_p9)  ;;  %v7237_v18 = vld [vmem:[#allocation3 + $0x8] sm:$0xff] (!%p17284_p9)  ;;  %v7260_v24 = vlaneseq (!%p17284_p9) }
0x1abe   : > { %7235 = sbr.rel (%p17284_p9) target bundleno = 18654 (0x48de), region = 156  ;;  %7346 = vmatprep.mubr.bf16.mxu0 (!%p17284_p9), %v19634_v30  ;;  %v7258_v19 = vpack.c.bf16 (!%p17284_p9), %v7237_v18, %v7236_v17  ;;  %v19635_v20 = vmov (!%p17284_p9), 0.0   ;;  %vm19636_vm6 = vmmov (!%p17284_p9), 0   ;;  %s19637_s13 = smov (!%p17284_p9), 64   ;;  %vm7362_vm7 = vcmask (!%p17284_p9), 64512  }
0x1abf   : > { %18508 = vmatprep.subr.mxu1 (!%p17284_p9), %v19635_v20  ;;  %v20589_v26 = vshrl.u32 (!%p17284_p9), %v7260_v24, 7  ;;  %18510 = vmatprep.mubr.msk.f32.mxu1 (!%p17284_p9), %vm19636_vm6, %v19635_v20  ;;  %s19638_s8 = smov (!%p17284_p9), 56   ;;  %s19639_s14 = smov (!%p17284_p9), 120  }
0x1ac0   : > { %s21709_s16 = sld [smem:[#allocation7_spill]] (!%p17284_p9)  ;;  %s19640_s18 = smov (!%p17284_p9), 112  }
0x1ac1   : > { %v20596_v34 = vsub.s32 (!%p17284_p9), 0, %v20589_v26  ;;  %v20601_v37 = vsub.s32 (!%p17284_p9), 1, %v20589_v26  ;;  %s19641_s7 = smov (!%p17284_p9), 48   ;;  %s21637_s11 = smov (!%p17284_p9), 40  }
0x1ac2   : > { %s21710_s1 = sld [smem:[#allocation33_spill]] (!%p17284_p9)  ;;  %s21641_s2 = smov (!%p17284_p9), 96  }
0x1ac3   : > { %v19280_v49 = vld [vmem:[%s21707_s22 + $0x4] ss:$8 sps:$4 sm:$0xff] (!%p17284_p9)   ;;  %v19282_v13 = vld [vmem:[%s21707_s22] ss:$8 sps:$4 sm:$0xff] (!%p17284_p9)   ;;  %v19283_v14 = vld [vmem:[%s21707_s22 + $0x14] ss:$8 sps:$4 sm:$0xff] (!%p17284_p9)  }
0x1ac4   : > { %7314 = vmatprep.subr.bf16.mxu0 (!%p17284_p9), %v19280_v49  ;;  %v19285_v52 = vld [vmem:[%s21707_s22 + $0x10] ss:$8 sps:$4 sm:$0xff] (!%p17284_p9)   ;;  %v19286_v15 = vld [vmem:[%s21707_s22 + $0x24] ss:$8 sps:$4 sm:$0xff] (!%p17284_p9)   ;;  %v19288_v31 = vld [vmem:[%s21707_s22 + $0x20] ss:$8 sps:$4 sm:$0xff] (!%p17284_p9)  }
0x1ac5   : > { %7315 = vmatpush1.bf16.msra.mxu0 %v19282_v13  ;;  %v19289_v16 = vld [vmem:[%s21707_s22 + $0x34] ss:$8 sps:$4 sm:$0xff]   ;;  %v19291_v33 = vld [vmem:[%s21707_s22 + $0x30] ss:$8 sps:$4 sm:$0xff]   ;;  %v7248_v35 = vld [vmem:[%s21708_s21] sm:$0x3] }
0x1ac6   : > { %7316 = vmatprep.subr.bf16.mxu0 %v19283_v14  ;;  %v7263_v27 = vrot.slane %v7248_v35, %v20596_v34  ;;  %v7267_v41 = vrot.slane %v7248_v35, %v20601_v37  ;;  %v20646_v4 = vld [vmem:[%s21709_s16] sm:$0xff]  ;;  %v20650_v62 = vld [vmem:[%s21709_s16 + $0x8] sm:$0xff]  ;;  %s19643_s22 = smov 104   ;;  %s21633_s21 = smov 32  }
0x1ac7   : > { %s21635_s10 = smov 24  }
0x1ac9   : > { %7317 = vmatpush1.bf16.msra.mxu0 %v19285_v52 }
0x1aca   : > { %7318 = vmatprep.subr.bf16.mxu0 %v19286_v15 }
0x1acd   : > { %7319 = vmatpush1.bf16.msra.mxu0 %v19288_v31 }
0x1ace   : > { %7320 = vmatprep.subr.bf16.mxu0 %v19289_v16 }
0x1ad1   : > { %7321 = vmatpush1.bf16.msra.mxu0 %v19291_v33 }
0x1ad2   : > { %18533 = vmatprep.subr.mxu0 %v19635_v20 }
0x1ad4   : > { %17293 = vmatmul.mubr.msk.bf16.vlgmr.msra.gmra.mrb[0].mxu0 %vm7310_vm5, %v7258_v19 }
0x1ad5   : > { %18535 = vmatprep.mubr.msk.f32.mxu0 %vm19636_vm6, %v19635_v20 }
0x1ba7   : > { %v7348_v38 = vpop.f32.mrb[0].mxu0 }
0x1ba8   : > { %v20603_v39 = vadd.f32 %v7348_v38, %v7263_v27  ;;  %v7350_v40 = vpop.f32.mrb[1].mxu0 }
0x1ba9   : > { %v7352_v42 = vpop.f32.mrb[2].mxu0  ;;  %v20634_v53 = vadd.f32 %v7350_v40, %v7267_v41 }
0x1baa   : > { %v20606_v43 = vadd.f32 %v7352_v42, %v7263_v27  ;;  %v7354_v8 = vpop.f32.mrb[3].mxu0  ;;  %7360 = vrot.lane.b32.xlu0 %v20603_v39, %s19637_s13  ;;  %v20624_v48 = vmul.f32 0.35355338, %v20603_v39 }
0x1bab   : > { %v20610_v5 = vadd.f32 %v7354_v8, %v7267_v41 }
0x1bac   : > { %7764 = vrot.lane.b32.xlu1 %v20606_v43, %s19638_s8  ;;  %v20617_v44 = vmul.f32 0.35355338, %v20606_v43 }
0x1bae   : > { %7439 = vrot.lane.b32.xlu0 %v20606_v43, %s19637_s13 }
0x1bb0   : > { %7762 = vrot.lane.b32.xlu1 %v20617_v44, %s19639_s14 }
0x1c1c   : > { %v7361_v45 = vpop.permute.xlu0 %7360 }
0x1c1d   : > { %18509 = vmatpush3.xpose.msk.msra.mxu1 %vm7362_vm7, %v7361_v45 }
0x1c1e   : > { %v7765_v47 = vpop.permute.xlu1 %7764  ;;  %18513 = vmatprep.subr.mxu1 %v19635_v20 }
0x1c1f   : > { %18534 = vmatpush3.xpose.msk.msra.mxu0 %vm7362_vm7, %v7765_v47 }
0x1c20   : > { %v7440_v50 = vpop.permute.xlu0 %7439  ;;  %18511 = vmatmul.mubr.msk.f32.vlgmr.msra.gmra.mrb[0].mxu1 %vm7362_vm7, %v20624_v48  ;;  %18543 = vmatprep.subr.mxu0 %v19635_v20 }
0x1c21   : > { %18514 = vmatpush3.xpose.msk.msra.mxu1 %vm7362_vm7, %v7440_v50  ;;  %18515 = vmatprep.mubr.msk.f32.mxu1 %vm19636_vm6, %v19635_v20 }
0x1c22   : > { %v7763_v51 = vpop.permute.xlu1 %7762  ;;  %18518 = vmatprep.subr.mxu1 %v19635_v20 }
0x1c23   : > { %18536 = vmatmul.mubr.msk.f32.vlgmr.msra.gmra.mrb[4].mxu0 %vm7362_vm7, %v7763_v51 }
0x1c24   : > { %18516 = vmatmul.mubr.msk.f32.vlgmr.msra.gmra.mrb[2].mxu1 %vm7362_vm7, %v20617_v44  ;;  %18545 = vmatprep.mubr.msk.f32.mxu0 %vm19636_vm6, %v19635_v20 }
0x1c25   : > { %18519 = vmatpush3.msra.mxu1 %v20634_v53  ;;  %18520 = vmatprep.mubr.msk.f32.mxu1 %vm19636_vm6, %v19635_v20 }
0x1c26   : > { %18523 = vmatprep.subr.mxu1 %v19635_v20 }
0x1cf3   : > { %v7434_v56 = vpop.f32.mrb[0].mxu1 }
0x1cf4   : > { %v7435_v59 = vadd.f32 %v7434_v56, %v20646_v4  ;;  %v18512_v46 = vpop.f32.mrb[1].mxu1 }
0x1cf6   : > { %v7836_v55 = vpop.f32.mrb[4].mxu0  ;;  %v7516_v63 = vsel %vm7362_vm7, %v7435_v59, -inf }
0x1cf7   : > { %v18537_v2 = vpop.f32.mrb[5].mxu0  ;;  %7517 = vmax.xlane.f32.xlu0 %v7516_v63  ;;  %v7512_v58 = vpop.f32.mrb[2].mxu1  ;;  %v7837_v32 = vadd.f32 %v7836_v55, %v20650_v62 }
0x1cf8   : > { %v7513_v1 = vadd.f32 %v7512_v58, %v20650_v62  ;;  %v18517_v54 = vpop.f32.mrb[3].mxu1 }
0x1cf9   : > { %v7843_v21 = vsel %vm7362_vm7, %v7837_v32, -inf }
0x1cfa   : > { %v7519_v6 = vsel %vm7362_vm7, %v7513_v1, -inf }
0x1cfb   : > { %7520 = vmax.xlane.f32.xlu1 %v7519_v6 }
0x1d0c   : > { %7686 = vrot.lane.b32.xlu1 %v20603_v39, %s19638_s8 }
0x1d30   : > { %7844 = vmax.xlane.f32.xlu1 %v7843_v21 }
0x1d41   : > { %7940 = vrot.lane.b32.xlu1 %v20610_v5, %s19639_s14 }
0x1d45   : > { %8178 = vrot.lane.b32.xlu1 %v20624_v48, %s19640_s18 }
0x1d49   : > { %8258 = vrot.lane.b32.xlu1 %v20606_v43, %s19641_s7 }
0x1d84   : > { %v7518_v29 = vpop.xlane.xlu0 %7517 }
0x1d85   : > { %v7522_v22 = vsub.f32 %v7435_v59, %v7518_v29 }
0x1d87   : > { %v7524_v23 = vmul.f32 1.442695, %v7522_v22 }
0x1d88   : > { %v7521_v25 = vpop.xlane.xlu1 %7520 }
0x1d89   : > { %19428 = vpow2.f32 %v7524_v23  ;;  %v7523_v28 = vsub.f32 %v7513_v1, %v7521_v25 }
0x1d8b   : > { %v7526_v61 = vmul.f32 1.442695, %v7523_v28 }
0x1d8c   : > { %v7687_v57 = vpop.permute.xlu1 %7686 }
0x1d8d   : > { %19430 = vpow2.f32 %v7526_v61 }
0x1d93   : > { %v19429_v36 = vpop.eup %19428 }
0x1d94   : > { %v7528_v0 = vsel %vm7362_vm7, %v19429_v36, 0.0 }
0x1d95   : > { %7529 = vadd.xlane.f32.xlu0 %v7528_v0 }
0x1d97   : > { %v19431_v7 = vpop.eup %19430 }
0x1d98   : > { %v7531_v9 = vsel %vm7362_vm7, %v19431_v7, 0.0 }
0x1d99   : > { %7532 = vadd.xlane.f32.xlu0 %v7531_v9 }
0x1daf   : > { %7684 = vrot.lane.b32.xlu0 %v20624_v48, %s19639_s14 }
0x1dbd   : > { %v7845_v10 = vpop.xlane.xlu1 %7844 }
0x1dbe   : > { %v7847_v11 = vsub.f32 %v7837_v32, %v7845_v10 }
0x1dc0   : > { %v7850_v3 = vmul.f32 1.442695, %v7847_v11 }
0x1dc1   : > { %v7941_v60 = vpop.permute.xlu1 %7940 }
0x1dc2   : > { %19432 = vpow2.f32 %v7850_v3  ;;  %18544 = vmatpush3.msra.mxu0 %v7941_v60 }
0x1dc3   : > { %18558 = vmatprep.subr.mxu0 %v19635_v20 }
0x1dc5   : > { %v8179_v19 = vpop.permute.xlu1 %8178 }
0x1dc9   : > { %v8259_v27 = vpop.permute.xlu1 %8258 }
0x1dcc   : > { %v19433_v12 = vpop.eup %19432 }
0x1dcd   : > { %v7855_v49 = vsel %vm7362_vm7, %v19433_v12, 0.0 }
0x1dce   : > { %7856 = vadd.xlane.f32.xlu0 %v7855_v49 }
0x1de4   : > { %8180 = vrot.lane.b32.xlu0 %v20603_v39, %s19641_s7 }
0x1de8   : > { %8256 = vrot.lane.b32.xlu0 %v20617_v44, %s19640_s18 }
0x1e22   : > { %v7530_v13 = vpop.xlane.xlu0 %7529 }
0x1e23   : > { %19434 = vrcp.f32 %v7530_v13 }
0x1e26   : > { %v7533_v14 = vpop.xlane.xlu0 %7532 }
0x1e27   : > { %19436 = vrcp.f32 %v7533_v14 }
0x1e2a   : > { %v7685_v33 = vpop.permute.xlu0 %7684 }
0x1e2d   : > { %v19435_v52 = vpop.eup %19434 }
0x1e2e   : > { %v7535_v15 = vmul.f32 %v19435_v52, %v19429_v36 }
0x1e30   : > { %18521 = vmatmul.mubr.msk.f32.vlgmr.msra.gmra.mrb[4].mxu1 %vm7362_vm7, %v7535_v15 }
0x1e31   : > { %v19437_v31 = vpop.eup %19436  ;;  %18524 = vmatpush3.msra.mxu1 %v20610_v5  ;;  %18525 = vmatprep.mubr.msk.f32.mxu1 %vm19636_vm6, %v19635_v20 }
0x1e32   : > { %v7537_v16 = vmul.f32 %v19437_v31, %v19431_v7  ;;  %18528 = vmatprep.subr.mxu1 %v19635_v20 }
0x1e34   : > { %18526 = vmatmul.mubr.msk.f32.vlgmr.msra.gmra.mrb[6].mxu1 %vm7362_vm7, %v7537_v16 }
0x1e35   : > { %18530 = vmatprep.mubr.msk.f32.mxu1 %vm19636_vm6, %v19635_v20 }
0x1e38   : > { %18529 = vmatpush3.xpose.msk.msra.mxu1 %vm7362_vm7, %v7687_v57 }
0x1e39   : > { %18538 = vmatprep.subr.mxu1 %v19635_v20 }
0x1e3b   : > { %18531 = vmatmul.mubr.msk.f32.vlgmr.msra.gmra.mrb[8].mxu1 %vm7362_vm7, %v7685_v33 }
0x1e3c   : > { %18540 = vmatprep.mubr.msk.f32.mxu1 %vm19636_vm6, %v19635_v20 }
0x1e5b   : > { %v7857_v17 = vpop.xlane.xlu0 %7856 }
0x1e5c   : > { %19438 = vrcp.f32 %v7857_v17  ;;  %v7250_v17 = vld [vmem:[%s21710_s1 + $0x8] sm:$0xff] }
0x1e5f   : > { %v8181_v35 = vpop.permute.xlu0 %8180 }
0x1e63   : > { %v8257_v38 = vpop.permute.xlu0 %8256 }
0x1e66   : > { %v19439_v18 = vpop.eup %19438 }
0x1e67   : > { %v7861_v24 = vmul.f32 %v19439_v18, %v19433_v12  ;;  %v7249_v18 = vld [vmem:[%s21710_s1] sm:$0xff] }
0x1e69   : > { %18546 = vmatmul.mubr.msk.f32.vlgmr.msra.gmra.mrb[6].mxu0 %vm7362_vm7, %v7861_v24 }
0x1e6a   : > { %18559 = vmatpush3.xpose.msk.msra.mxu0 %vm7362_vm7, %v8181_v35  ;;  %18560 = vmatprep.mubr.msk.f32.mxu0 %vm19636_vm6, %v19635_v20 }
0x1e6b   : > { %18563 = vmatprep.subr.mxu0 %v19635_v20 }
0x1e6d   : > { %18561 = vmatmul.mubr.msk.f32.vlgmr.msra.gmra.mrb[8].mxu0 %vm7362_vm7, %v8179_v19 }
0x1e6e   : > { %18564 = vmatpush3.xpose.msk.msra.mxu0 %vm7362_vm7, %v8259_v27  ;;  %18565 = vmatprep.mubr.msk.f32.mxu0 %vm19636_vm6, %v19635_v20 }
0x1e6f   : > { %18573 = vmatprep.subr.mxu0 %v19635_v20 }
0x1e71   : > { %18566 = vmatmul.mubr.msk.f32.vlgmr.msra.gmra.mrb[10].mxu0 %vm7362_vm7, %v8257_v38 }
0x1e72   : > { %18575 = vmatprep.mubr.msk.f32.mxu0 %vm19636_vm6, %v19635_v20 }
0x1f03   : > { %v20701_v40 = vpop.f32.mrb[4].mxu1 }
0x1f04   : > { %v18522_v41 = vpop.f32.mrb[5].mxu1 }
0x1f07   : > { %v20703_v42 = vpop.f32.mrb[6].mxu1 }
0x1f08   : > { %v18527_v8 = vpop.f32.mrb[7].mxu1 }
0x1f0e   : > { %v7758_v45 = vpop.f32.mrb[8].mxu1 }
0x1f0f   : > { %v7759_v47 = vadd.f32 %v7758_v45, %v20646_v4  ;;  %v18532_v50 = vpop.f32.mrb[9].mxu1 }
0x1f11   : > { %v7840_v51 = vsel %vm7362_vm7, %v7759_v47, -inf }
0x1f12   : > { %7841 = vmax.xlane.f32.xlu1 %v7840_v51 }
0x1f3c   : > { %v20707_v56 = vpop.f32.mrb[6].mxu0 }
0x1f3d   : > { %v18547_v59 = vpop.f32.mrb[7].mxu0 }
0x1f40   : > { %v8252_v46 = vpop.f32.mrb[8].mxu0 }
0x1f41   : > { %v8253_v55 = vadd.f32 %v8252_v46, %v20646_v4  ;;  %v18562_v63 = vpop.f32.mrb[9].mxu0 }
0x1f43   : > { %v8334_v2 = vsel %vm7362_vm7, %v8253_v55, -inf }
0x1f44   : > { %v8330_v58 = vpop.f32.mrb[10].mxu0  ;;  %8335 = vmax.xlane.f32.xlu1 %v8334_v2 }
0x1f45   : > { %v8331_v1 = vadd.f32 %v8330_v58, %v20650_v62  ;;  %v18567_v54 = vpop.f32.mrb[11].mxu0 }
0x1f47   : > { %v8337_v6 = vsel %vm7362_vm7, %v8331_v1, -inf }
0x1f48   : > { %8338 = vmax.xlane.f32.xlu1 %v8337_v6 }
0x1f9f   : > { %v7842_v32 = vpop.xlane.xlu1 %7841 }
0x1fa0   : > { %v7846_v21 = vsub.f32 %v7759_v47, %v7842_v32 }
0x1fa2   : > { %v7848_v29 = vmul.f32 1.442695, %v7846_v21 }
0x1fa4   : > { %19440 = vpow2.f32 %v7848_v29 }
0x1fae   : > { %v19441_v22 = vpop.eup %19440 }
0x1faf   : > { %v7852_v23 = vsel %vm7362_vm7, %v19441_v22, 0.0 }
0x1fb0   : > { %7853 = vadd.xlane.f32.xlu0 %v7852_v23 }
0x1fc6   : > { %7863 = vrot.lane.b32.xlu0 %v20634_v53, %s19639_s14 }
0x1fca   : > { %8432 = vrot.lane.b32.xlu0 %v20610_v5, %s19640_s18 }
0x1fce   : > { %8593 = vrot.lane.b32.xlu0 %v20603_v39, %s21637_s11 }
0x1fd1   : > { %v8336_v25 = vpop.xlane.xlu1 %8335 }
0x1fd2   : > { %8591 = vrot.lane.b32.xlu0 %v20624_v48, %s19643_s22  ;;  %v8340_v28 = vsub.f32 %v8253_v55, %v8336_v25 }
0x1fd4   : > { %v8342_v61 = vmul.f32 1.442695, %v8340_v28 }
0x1fd5   : > { %v8339_v36 = vpop.xlane.xlu1 %8338 }
0x1fd6   : > { %19442 = vpow2.f32 %v8342_v61  ;;  %8671 = vrot.lane.b32.xlu0 %v20606_v43, %s21637_s11  ;;  %v8341_v0 = vsub.f32 %v8331_v1, %v8339_v36  ;;  %s19649_s11 = smov 80  }
0x1fd8   : > { %v8344_v7 = vmul.f32 1.442695, %v8341_v0 }
0x1fda   : > { %19444 = vpow2.f32 %v8344_v7 }
0x1fe0   : > { %v19443_v9 = vpop.eup %19442 }
0x1fe1   : > { %v8346_v57 = vsel %vm7362_vm7, %v19443_v9, 0.0 }
0x1fe2   : > { %8347 = vadd.xlane.f32.xlu1 %v8346_v57 }
0x1fe4   : > { %v19445_v10 = vpop.eup %19444 }
0x1fe5   : > { %v8349_v11 = vsel %vm7362_vm7, %v19445_v10, 0.0 }
0x1fe6   : > { %8350 = vadd.xlane.f32.xlu1 %v8349_v11 }
0x1ff7   : > { %8356 = vrot.lane.b32.xlu1 %v20634_v53, %s19640_s18 }
0x1ffb   : > { %8669 = vrot.lane.b32.xlu1 %v20617_v44, %s19643_s22 }
0x1fff   : > { %9006 = vrot.lane.b32.xlu1 %v20603_v39, %s21633_s21 }
0x203d   : > { %v7854_v3 = vpop.xlane.xlu0 %7853 }
0x203e   : > { %19446 = vrcp.f32 %v7854_v3 }
0x2041   : > { %v7864_v60 = vpop.permute.xlu0 %7863 }
0x2042   : > { %18539 = vmatpush3.msra.mxu1 %v7864_v60 }
0x2043   : > { %18548 = vmatprep.subr.mxu1 %v7250_v17 }
0x2045   : > { %v8433_v12 = vpop.permute.xlu0 %8432 }
0x2046   : > { %18574 = vmatpush3.msra.mxu0 %v8433_v12 }
0x2047   : > { %18583 = vmatprep.subr.mxu0 %v19635_v20 }
0x2048   : > { %v19447_v49 = vpop.eup %19446 }
0x2049   : > { %v7859_v13 = vmul.f32 %v19447_v49, %v19441_v22  ;;  %v8594_v31 = vpop.permute.xlu0 %8593 }
0x204b   : > { %18541 = vmatmul.mubr.msk.f32.vlgmr.msra.gmra.mrb[10].mxu1 %vm7362_vm7, %v7859_v13 }
0x204c   : > { %18549 = vmatpush3.msra.mxu1 %v7250_v17 }
0x204d   : > { %v8592_v33 = vpop.permute.xlu0 %8591  ;;  %18553 = vmatprep.subr.mxu1 %v7249_v18 }
0x2051   : > { %v8672_v51 = vpop.permute.xlu0 %8671 }
0x206f   : > { %v8348_v14 = vpop.xlane.xlu1 %8347 }
0x2073   : > { %v8351_v52 = vpop.xlane.xlu1 %8350 }
0x2074   : > { %19448 = vrcp.f32 %v8351_v52 }
0x2075   : > { %19450 = vrcp.f32 %v8348_v14 }
0x2077   : > { %v8357_v27 = vpop.permute.xlu1 %8356 }
0x207b   : > { %v8670_v54 = vpop.permute.xlu1 %8669 }
0x207e   : > { %v19449_v15 = vpop.eup %19448 }
0x207f   : > { %v8355_v16 = vmul.f32 %v19449_v15, %v19445_v10  ;;  %v19451_v35 = vpop.eup %19450  ;;  %v9007_v6 = vpop.permute.xlu1 %9006 }
0x2080   : > { %v8353_v38 = vmul.f32 %v19451_v35, %v19443_v9 }
0x2081   : > { %18576 = vmatmul.mubr.msk.f32.vlgmr.msra.gmra.mrb[12].mxu0 %vm7362_vm7, %v8355_v16 }
0x2082   : > { %18584 = vmatpush3.xpose.msk.msra.mxu0 %vm7362_vm7, %v8594_v31  ;;  %18585 = vmatprep.mubr.msk.f32.mxu0 %vm19636_vm6, %v19635_v20 }
0x2083   : > { %18593 = vmatprep.subr.mxu0 %v19635_v20 }
0x2085   : > { %18586 = vmatmul.mubr.msk.f32.vlgmr.msra.gmra.mrb[14].mxu0 %vm7362_vm7, %v8592_v33 }
0x2086   : > { %18595 = vmatprep.mubr.msk.f32.mxu0 %vm19636_vm6, %v19635_v20 }
0x211e   : > { %v7935_v19 = vpop.f32.mrb[10].mxu1 }
0x211f   : > { %v18542_v24 = vpop.f32.mrb[11].mxu1  ;;  %18550 = vmatprep.mubr.msk.f32.mxu1 %vm7362_vm7, %v7935_v19 }
0x2120   : > { %18551 = vmatmul.mubr.msk.f32.vlgmr.msra.gmra.mrb[12].mxu1 %vm7362_vm7, %v20707_v56 }
0x2121   : > { %18555 = vmatprep.mubr.msk.f32.mxu1 %vm7362_vm7, %v20701_v40  ;;  %18554 = vmatpush3.msra.mxu1 %v7249_v18 }
0x2122   : > { %18568 = vmatprep.subr.mxu1 %v19635_v20 }
0x2128   : > { %18556 = vmatmul.mubr.msk.f32.vlgmr.msra.gmra.mrb[12].mxu1 %vm7362_vm7, %v20703_v42  ;;  %v7251_v42 = vld [vmem:[%s21710_s1 + $0x10] sm:$0xff] }
0x2129   : > { %18569 = vmatpush3.msra.mxu1 %v8357_v27  ;;  %18570 = vmatprep.mubr.msk.f32.mxu1 %vm19636_vm6, %v19635_v20 }
0x212a   : > { %18578 = vmatprep.subr.mxu1 %v7251_v42 }
0x212c   : > { %18571 = vmatmul.mubr.msk.f32.vlgmr.msra.gmra.mrb[14].mxu1 %vm7362_vm7, %v8353_v38 }
0x212d   : > { %18579 = vmatpush3.msra.mxu1 %v7251_v42 }
0x212e   : > { %18588 = vmatprep.subr.mxu1 %v19635_v20 }
0x2154   : > { %v8504_v41 = vpop.f32.mrb[12].mxu0 }
0x2155   : > { %v18577_v8 = vpop.f32.mrb[13].mxu0 }
0x2158   : > { %v8665_v45 = vpop.f32.mrb[14].mxu0 }
0x2159   : > { %v8666_v40 = vadd.f32 %v8665_v45, %v20646_v4  ;;  %v18587_v47 = vpop.f32.mrb[15].mxu0 }
0x215b   : > { %v8747_v50 = vsel %vm7362_vm7, %v8666_v40, -inf }
0x215c   : > { %8748 = vmax.xlane.f32.xlu0 %v8747_v50 }
0x2172   : > { %8769 = vrot.lane.b32.xlu0 %v20634_v53, %s19643_s22 }
0x2176   : > { %9004 = vrot.lane.b32.xlu0 %v20624_v48, %s21641_s2 }
0x217a   : > { %9082 = vrot.lane.b32.xlu0 %v20617_v44, %s21641_s2 }
0x21e9   : > { %v8749_v56 = vpop.xlane.xlu0 %8748 }
0x21ea   : > { %v8753_v59 = vsub.f32 %v8666_v40, %v8749_v56 }
0x21ec   : > { %v8755_v46 = vmul.f32 1.442695, %v8753_v59 }
0x21ed   : > { %v8770_v55 = vpop.permute.xlu0 %8769 }
0x21ee   : > { %19452 = vpow2.f32 %v8755_v46  ;;  %18594 = vmatpush3.msra.mxu0 %v8770_v55 }
0x21ef   : > { %18608 = vmatprep.subr.mxu0 %v19635_v20 }
0x21f1   : > { %v9005_v22 = vpop.permute.xlu0 %9004 }
0x21f5   : > { %v9083_v25 = vpop.permute.xlu0 %9082 }
0x21f8   : > { %v19453_v63 = vpop.eup %19452 }
0x21f9   : > { %v8759_v2 = vsel %vm7362_vm7, %v19453_v63, 0.0 }
0x21fa   : > { %8760 = vadd.xlane.f32.xlu1 %v8759_v2 }
0x21ff   : > { %v8428_v58 = vpop.f32.mrb[14].mxu1 }
0x2200   : > { %v18572_v1 = vpop.f32.mrb[15].mxu1  ;;  %18580 = vmatprep.mubr.msk.f32.mxu1 %vm7362_vm7, %v8428_v58 }
0x2201   : > { %18581 = vmatmul.mubr.msk.f32.vlgmr.msra.gmra.mrb[12].mxu1 %vm7362_vm7, %v8504_v41 }
0x2202   : > { %18589 = vmatpush3.xpose.msk.msra.mxu1 %vm7362_vm7, %v8672_v51  ;;  %18590 = vmatprep.mubr.msk.f32.mxu1 %vm19636_vm6, %v19635_v20  ;;  %v7252_v51 = vld [vmem:[%s21710_s1 + $0x18] sm:$0xff] }
0x2203   : > { %18598 = vmatprep.subr.mxu1 %v19635_v20 }
0x2205   : > { %18591 = vmatmul.mubr.msk.f32.vlgmr.msra.gmra.mrb[16].mxu1 %vm7362_vm7, %v8670_v54 }
0x2206   : > { %18600 = vmatprep.mubr.msk.f32.mxu1 %vm19636_vm6, %v19635_v20 }
0x220b   : > { %9084 = vrot.lane.b32.xlu1 %v20606_v43, %s21633_s21  ;;  %s19647_s21 = smov 88  }
0x2287   : > { %v8761_v32 = vpop.xlane.xlu1 %8760 }
0x2288   : > { %19454 = vrcp.f32 %v8761_v32 }
0x228b   : > { %v9085_v23 = vpop.permute.xlu1 %9084 }
0x2292   : > { %v19455_v21 = vpop.eup %19454 }
0x2293   : > { %v8766_v29 = vmul.f32 %v19455_v21, %v19453_v63  ;;  %v7253_v21 = vld [vmem:[%s21710_s1 + $0x20] sm:$0xff] }
0x2295   : > { %18596 = vmatmul.mubr.msk.f32.vlgmr.msra.gmra.mrb[16].mxu0 %vm7362_vm7, %v8766_v29 }
0x2296   : > { %18609 = vmatpush3.xpose.msk.msra.mxu0 %vm7362_vm7, %v9007_v6  ;;  %18610 = vmatprep.mubr.msk.f32.mxu0 %vm19636_vm6, %v19635_v20 }
0x2297   : > { %18613 = vmatprep.subr.mxu0 %v19635_v20 }
0x2299   : > { %18611 = vmatmul.mubr.msk.f32.vlgmr.msra.gmra.mrb[18].mxu0 %vm7362_vm7, %v9005_v22 }
0x229a   : > { %18614 = vmatpush3.xpose.msk.msra.mxu0 %vm7362_vm7, %v9085_v23  ;;  %18615 = vmatprep.mubr.msk.f32.mxu0 %vm19636_vm6, %v19635_v20 }
0x229b   : > { %18623 = vmatprep.subr.mxu0 %v19635_v20 }
0x229d   : > { %18616 = vmatmul.mubr.msk.f32.vlgmr.msra.gmra.mrb[20].mxu0 %vm7362_vm7, %v9083_v25 }
0x229e   : > { %18625 = vmatprep.mubr.msk.f32.mxu0 %vm19636_vm6, %v19635_v20 }
0x22d8   : > { %v8743_v28 = vpop.f32.mrb[16].mxu1 }
0x22d9   : > { %v8744_v61 = vadd.f32 %v8743_v28, %v20650_v62  ;;  %v18592_v36 = vpop.f32.mrb[17].mxu1 }
0x22db   : > { %v8750_v0 = vsel %vm7362_vm7, %v8744_v61, -inf }
0x22dc   : > { %8751 = vmax.xlane.f32.xlu1 %v8750_v0 }
0x2368   : > { %v8841_v7 = vpop.f32.mrb[16].mxu0 }
0x2369   : > { %v8752_v9 = vpop.xlane.xlu1 %8751  ;;  %v18597_v57 = vpop.f32.mrb[17].mxu0 }
0x236a   : > { %v8754_v10 = vsub.f32 %v8744_v61, %v8752_v9 }
0x236c   : > { %v8757_v11 = vmul.f32 1.442695, %v8754_v10  ;;  %v9078_v3 = vpop.f32.mrb[18].mxu0 }
0x236d   : > { %v9079_v60 = vadd.f32 %v9078_v3, %v20646_v4  ;;  %v18612_v12 = vpop.f32.mrb[19].mxu0 }
0x236e   : > { %19456 = vpow2.f32 %v8757_v11 }
0x236f   : > { %v9160_v49 = vsel %vm7362_vm7, %v9079_v60, -inf }
0x2370   : > { %v9156_v13 = vpop.f32.mrb[20].mxu0  ;;  %9161 = vmax.xlane.f32.xlu1 %v9160_v49 }
0x2371   : > { %v9157_v14 = vadd.f32 %v9156_v13, %v20650_v62  ;;  %v18617_v52 = vpop.f32.mrb[21].mxu0 }
0x2373   : > { %v9163_v15 = vsel %vm7362_vm7, %v9157_v14, -inf }
0x2374   : > { %9164 = vmax.xlane.f32.xlu1 %v9163_v15 }
0x2378   : > { %v19457_v31 = vpop.eup %19456 }
0x2379   : > { %v8762_v16 = vsel %vm7362_vm7, %v19457_v31, 0.0 }
0x237a   : > { %8763 = vadd.xlane.f32.xlu0 %v8762_v16 }
0x2390   : > { %8845 = vrot.lane.b32.xlu0 %v20610_v5, %s19643_s22 }
0x2394   : > { %9258 = vrot.lane.b32.xlu0 %v20610_v5, %s21641_s2 }
0x2398   : > { %9419 = vrot.lane.b32.xlu0 %v20603_v39, %s21635_s10 }
0x239c   : > { %9417 = vrot.lane.b32.xlu0 %v20624_v48, %s19647_s21 }
0x23a0   : > { %9497 = vrot.lane.b32.xlu0 %v20606_v43, %s21635_s10  ;;  %s21639_s10 = smov 16  }
0x23fd   : > { %v9162_v33 = vpop.xlane.xlu1 %9161 }
0x23fe   : > { %v9166_v17 = vsub.f32 %v9079_v60, %v9162_v33 }
0x2400   : > { %v9168_v18 = vmul.f32 1.442695, %v9166_v17 }
0x2401   : > { %v9165_v19 = vpop.xlane.xlu1 %9164 }
0x2402   : > { %19458 = vpow2.f32 %v9168_v18  ;;  %v9167_v24 = vsub.f32 %v9157_v14, %v9165_v19 }
0x2404   : > { %v9170_v35 = vmul.f32 1.442695, %v9167_v24 }
0x2406   : > { %19460 = vpow2.f32 %v9170_v35 }
0x2407   : > { %v8764_v27 = vpop.xlane.xlu0 %8763 }
0x2408   : > { %19462 = vrcp.f32 %v8764_v27 }
0x240b   : > { %v8846_v38 = vpop.permute.xlu0 %8845 }
0x240c   : > { %v19459_v41 = vpop.eup %19458  ;;  %18599 = vmatpush3.msra.mxu1 %v8846_v38 }
0x240d   : > { %v9172_v8 = vsel %vm7362_vm7, %v19459_v41, 0.0  ;;  %18603 = vmatprep.subr.mxu1 %v7252_v51 }
0x240e   : > { %9173 = vadd.xlane.f32.xlu1 %v9172_v8 }
0x240f   : > { %v9259_v45 = vpop.permute.xlu0 %9258 }
0x2410   : > { %v19461_v40 = vpop.eup %19460  ;;  %18624 = vmatpush3.msra.mxu0 %v9259_v45 }
0x2411   : > { %v9175_v47 = vsel %vm7362_vm7, %v19461_v40, 0.0  ;;  %18633 = vmatprep.subr.mxu0 %v19635_v20 }
0x2412   : > { %v19463_v50 = vpop.eup %19462  ;;  %9176 = vadd.xlane.f32.xlu1 %v9175_v47 }
0x2413   : > { %v8768_v42 = vmul.f32 %v19463_v50, %v19457_v31  ;;  %v9420_v55 = vpop.permute.xlu0 %9419 }
0x2415   : > { %18601 = vmatmul.mubr.msk.f32.vlgmr.msra.gmra.mrb[18].mxu1 %vm7362_vm7, %v8768_v42 }
0x2416   : > { %18605 = vmatprep.mubr.msk.f32.mxu1 %vm7362_vm7, %v8841_v7  ;;  %18604 = vmatpush3.msra.mxu1 %v7252_v51 }
0x2417   : > { %18618 = vmatprep.subr.mxu1 %v19635_v20  ;;  %v9418_v2 = vpop.permute.xlu0 %9417 }
0x241b   : > { %v9498_v7 = vpop.permute.xlu0 %9497 }
0x2423   : > { %9182 = vrot.lane.b32.xlu1 %v20634_v53, %s21641_s2  ;;  %s19651_s2 = smov 72  }
0x2427   : > { %9495 = vrot.lane.b32.xlu1 %v20617_v44, %s19647_s21 }
0x242b   : > { %9832 = vrot.lane.b32.xlu1 %v20603_v39, %s21639_s10 }
0x249b   : > { %v9174_v56 = vpop.xlane.xlu1 %9173 }
0x249f   : > { %v9177_v59 = vpop.xlane.xlu1 %9176 }
0x24a0   : > { %19464 = vrcp.f32 %v9177_v59 }
0x24a1   : > { %19466 = vrcp.f32 %v9174_v56 }
0x24a3   : > { %v9183_v54 = vpop.permute.xlu1 %9182 }
0x24a7   : > { %v9496_v9 = vpop.permute.xlu1 %9495 }
0x24aa   : > { %v19465_v46 = vpop.eup %19464 }
0x24ab   : > { %v9181_v63 = vmul.f32 %v19465_v46, %v19461_v40  ;;  %v19467_v58 = vpop.eup %19466  ;;  %v9833_v15 = vpop.permute.xlu1 %9832 }
0x24ac   : > { %v9179_v32 = vmul.f32 %v19467_v58, %v19459_v41 }
0x24ad   : > { %18626 = vmatmul.mubr.msk.f32.vlgmr.msra.gmra.mrb[22].mxu0 %vm7362_vm7, %v9181_v63  ;;  %v7254_v63 = vld [vmem:[%s21710_s1 + $0x28] sm:$0xff] }
0x24ae   : > { %18634 = vmatpush3.xpose.msk.msra.mxu0 %vm7362_vm7, %v9420_v55  ;;  %18635 = vmatprep.mubr.msk.f32.mxu0 %vm19636_vm6, %v19635_v20 }
0x24af   : > { %18643 = vmatprep.subr.mxu0 %v19635_v20 }
0x24b1   : > { %18636 = vmatmul.mubr.msk.f32.vlgmr.msra.gmra.mrb[24].mxu0 %vm7362_vm7, %v9418_v2 }
0x24b2   : > { %18645 = vmatprep.mubr.msk.f32.mxu0 %vm19636_vm6, %v19635_v20 }
0x24e8   : > { %v8917_v1 = vpop.f32.mrb[18].mxu1 }
0x24e9   : > { %v18602_v6 = vpop.f32.mrb[19].mxu1  ;;  %18606 = vmatmul.mubr.msk.f32.vlgmr.msra.gmra.mrb[12].mxu1 %vm7362_vm7, %v8917_v1 }
0x24ea   : > { %18619 = vmatpush3.msra.mxu1 %v9183_v54  ;;  %18620 = vmatprep.mubr.msk.f32.mxu1 %vm19636_vm6, %v19635_v20 }
0x24eb   : > { %18628 = vmatprep.subr.mxu1 %v7253_v21 }
0x24ed   : > { %18621 = vmatmul.mubr.msk.f32.vlgmr.msra.gmra.mrb[20].mxu1 %vm7362_vm7, %v9179_v32 }
0x24ee   : > { %18629 = vmatpush3.msra.mxu1 %v7253_v21 }
0x24ef   : > { %18638 = vmatprep.subr.mxu1 %v19635_v20 }
0x2580   : > { %v9330_v29 = vpop.f32.mrb[22].mxu0 }
0x2581   : > { %v18627_v22 = vpop.f32.mrb[23].mxu0 }
0x2584   : > { %v9491_v23 = vpop.f32.mrb[24].mxu0 }
0x2585   : > { %v9492_v25 = vadd.f32 %v9491_v23, %v20646_v4  ;;  %v18637_v28 = vpop.f32.mrb[25].mxu0 }
0x2587   : > { %v9573_v61 = vsel %vm7362_vm7, %v9492_v25, -inf }
0x2588   : > { %9574 = vmax.xlane.f32.xlu0 %v9573_v61 }
0x259e   : > { %9595 = vrot.lane.b32.xlu0 %v20634_v53, %s19647_s21 }
0x25a2   : > { %9830 = vrot.lane.b32.xlu0 %v20624_v48, %s19649_s11 }
0x25a6   : > { %9908 = vrot.lane.b32.xlu0 %v20617_v44, %s19649_s11 }
0x25c0   : > { %v9254_v36 = vpop.f32.mrb[20].mxu1 }
0x25c1   : > { %v18622_v0 = vpop.f32.mrb[21].mxu1  ;;  %18630 = vmatprep.mubr.msk.f32.mxu1 %vm7362_vm7, %v9254_v36 }
0x25c2   : > { %18631 = vmatmul.mubr.msk.f32.vlgmr.msra.gmra.mrb[12].mxu1 %vm7362_vm7, %v9330_v29 }
0x25c3   : > { %18639 = vmatpush3.xpose.msk.msra.mxu1 %vm7362_vm7, %v9498_v7  ;;  %18640 = vmatprep.mubr.msk.f32.mxu1 %vm19636_vm6, %v19635_v20  ;;  %v7255_v7 = vld [vmem:[%s21710_s1 + $0x30] sm:$0xff] }
0x25c4   : > { %18648 = vmatprep.subr.mxu1 %v19635_v20 }
0x25c6   : > { %18641 = vmatmul.mubr.msk.f32.vlgmr.msra.gmra.mrb[22].mxu1 %vm7362_vm7, %v9496_v9 }
0x25c7   : > { %18650 = vmatprep.mubr.msk.f32.mxu1 %vm19636_vm6, %v19635_v20 }
0x2615   : > { %v9575_v57 = vpop.xlane.xlu0 %9574 }
0x2616   : > { %v9579_v10 = vsub.f32 %v9492_v25, %v9575_v57 }
0x2618   : > { %v9581_v11 = vmul.f32 1.442695, %v9579_v10 }
0x2619   : > { %v9596_v3 = vpop.permute.xlu0 %9595 }
0x261a   : > { %19468 = vpow2.f32 %v9581_v11  ;;  %18644 = vmatpush3.msra.mxu0 %v9596_v3 }
0x261b   : > { %18658 = vmatprep.subr.mxu0 %v19635_v20 }
0x261d   : > { %v9831_v17 = vpop.permute.xlu0 %9830 }
0x2621   : > { %v9909_v19 = vpop.permute.xlu0 %9908 }
0x2624   : > { %v19469_v60 = vpop.eup %19468 }
0x2625   : > { %v9585_v12 = vsel %vm7362_vm7, %v19469_v60, 0.0 }
0x2626   : > { %9586 = vadd.xlane.f32.xlu1 %v9585_v12 }
0x2637   : > { %9910 = vrot.lane.b32.xlu1 %v20606_v43, %s21639_s10  ;;  %s21643_s10 = smov 8  }
0x2699   : > { %v9569_v49 = vpop.f32.mrb[22].mxu1 }
0x269a   : > { %v9570_v13 = vadd.f32 %v9569_v49, %v20650_v62  ;;  %v18642_v14 = vpop.f32.mrb[23].mxu1 }
0x269c   : > { %v9576_v52 = vsel %vm7362_vm7, %v9570_v13, -inf }
0x269d   : > { %9577 = vmax.xlane.f32.xlu1 %v9576_v52 }
0x26b3   : > { %v9587_v31 = vpop.xlane.xlu1 %9586 }
0x26b4   : > { %19470 = vrcp.f32 %v9587_v31 }
0x26b7   : > { %v9911_v18 = vpop.permute.xlu1 %9910 }
0x26be   : > { %v19471_v16 = vpop.eup %19470 }
0x26bf   : > { %v9592_v33 = vmul.f32 %v19471_v16, %v19469_v60 }
0x26c1   : > { %18646 = vmatmul.mubr.msk.f32.vlgmr.msra.gmra.mrb[26].mxu0 %vm7362_vm7, %v9592_v33 }
0x26c2   : > { %18659 = vmatpush3.xpose.msk.msra.mxu0 %vm7362_vm7, %v9833_v15  ;;  %18660 = vmatprep.mubr.msk.f32.mxu0 %vm19636_vm6, %v19635_v20 }
0x26c3   : > { %18663 = vmatprep.subr.mxu0 %v19635_v20 }
0x26c5   : > { %18661 = vmatmul.mubr.msk.f32.vlgmr.msra.gmra.mrb[28].mxu0 %vm7362_vm7, %v9831_v17 }
0x26c6   : > { %18664 = vmatpush3.xpose.msk.msra.mxu0 %vm7362_vm7, %v9911_v18  ;;  %18665 = vmatprep.mubr.msk.f32.mxu0 %vm19636_vm6, %v19635_v20 }
0x26c7   : > { %18673 = vmatprep.subr.mxu0 %v19635_v20 }
0x26c9   : > { %18666 = vmatmul.mubr.msk.f32.vlgmr.msra.gmra.mrb[30].mxu0 %vm7362_vm7, %v9909_v19 }
0x26ca   : > { %18675 = vmatprep.mubr.msk.f32.mxu0 %vm19636_vm6, %v19635_v20 }
0x272a   : > { %v9578_v24 = vpop.xlane.xlu1 %9577 }
0x272b   : > { %v9580_v35 = vsub.f32 %v9570_v13, %v9578_v24 }
0x272d   : > { %v9583_v27 = vmul.f32 1.442695, %v9580_v35 }
0x272f   : > { %19472 = vpow2.f32 %v9583_v27 }
0x2739   : > { %v19473_v38 = vpop.eup %19472 }
0x273a   : > { %v9588_v41 = vsel %vm7362_vm7, %v19473_v38, 0.0 }
0x273b   : > { %9589 = vadd.xlane.f32.xlu0 %v9588_v41 }
0x2751   : > { %9671 = vrot.lane.b32.xlu0 %v20610_v5, %s19647_s21 }
0x2755   : > { %10084 = vrot.lane.b32.xlu0 %v20610_v5, %s19649_s11 }
0x2759   : > { %10245 = vrot.lane.b32.xlu0 %v20603_v39, %s21643_s10 }
0x275d   : > { %10323 = vrot.lane.b32.xlu0 %v20606_v43, %s21643_s10  ;;  %s21711_s10 = sld [smem:[#allocation34_spill]] }
0x2761   : > { %10243 = vrot.lane.b32.xlu0 %v20624_v48, %s19651_s2 }
0x2794   : > { %v9667_v8 = vpop.f32.mrb[26].mxu0 }
0x2795   : > { %v18647_v45 = vpop.f32.mrb[27].mxu0 }
0x2798   : > { %v9904_v40 = vpop.f32.mrb[28].mxu0 }
0x2799   : > { %v9905_v47 = vadd.f32 %v9904_v40, %v20646_v4  ;;  %v18662_v50 = vpop.f32.mrb[29].mxu0 }
0x279b   : > { %v9986_v42 = vsel %vm7362_vm7, %v9905_v47, -inf }
0x279c   : > { %v9982_v51 = vpop.f32.mrb[30].mxu0  ;;  %9987 = vmax.xlane.f32.xlu1 %v9986_v42 }
0x279d   : > { %v9983_v39 = vadd.f32 %v9982_v51, %v20650_v62  ;;  %v18667_v56 = vpop.f32.mrb[31].mxu0 }
0x279f   : > { %v9989_v43 = vsel %vm7362_vm7, %v9983_v39, -inf }
0x27a0   : > { %9990 = vmax.xlane.f32.xlu1 %v9989_v43  ;;  %v7256_v43 = vld [vmem:[%s21710_s1 + $0x38] sm:$0xff]  ;;  %s21712_s1 = sld [smem:[#allocation35_spill]] }
0x27c8   : > { %v9590_v59 = vpop.xlane.xlu0 %9589 }
0x27c9   : > { %19474 = vrcp.f32 %v9590_v59 }
0x27cc   : > { %v9672_v48 = vpop.permute.xlu0 %9671 }
0x27cd   : > { %18649 = vmatpush3.msra.mxu1 %v9672_v48 }
0x27ce   : > { %18653 = vmatprep.subr.mxu1 %v7254_v63 }
0x27d0   : > { %v10085_v46 = vpop.permute.xlu0 %10084 }
0x27d1   : > { %18674 = vmatpush3.msra.mxu0 %v10085_v46 }
0x27d2   : > { %18683 = vmatprep.subr.mxu0 %v19635_v20 }
0x27d3   : > { %v19475_v55 = vpop.eup %19474 }
0x27d4   : > { %v9594_v2 = vmul.f32 %v19475_v55, %v19473_v38  ;;  %v10246_v57 = vpop.permute.xlu0 %10245 }
0x27d6   : > { %18651 = vmatmul.mubr.msk.f32.vlgmr.msra.gmra.mrb[24].mxu1 %vm7362_vm7, %v9594_v2 }
0x27d7   : > { %18655 = vmatprep.mubr.msk.f32.mxu1 %vm7362_vm7, %v9667_v8  ;;  %18654 = vmatpush3.msra.mxu1 %v7254_v63 }
0x27d8   : > { %18668 = vmatprep.subr.mxu1 %v19635_v20  ;;  %v10324_v3 = vpop.permute.xlu0 %10323 }
0x27dc   : > { %v10244_v12 = vpop.permute.xlu0 %10243 }
0x2829   : > { %v9988_v58 = vpop.xlane.xlu1 %9987 }
0x282a   : > { %v9992_v1 = vsub.f32 %v9905_v47, %v9988_v58  ;;  %v17358_v58 = vld [vmem:[%s21711_s10] ss:$0 sm:$0xff]  ;;  %s21713_s10 = sld [smem:[#allocation36_spill]] }
0x282c   : > { %v9994_v54 = vmul.f32 1.442695, %v9992_v1 }
0x282d   : > { %v9991_v6 = vpop.xlane.xlu1 %9990 }
0x282e   : > { %19476 = vpow2.f32 %v9994_v54  ;;  %v9993_v32 = vsub.f32 %v9983_v39, %v9991_v6 }
0x2830   : > { %v9996_v21 = vmul.f32 1.442695, %v9993_v32 }
0x2832   : > { %19478 = vpow2.f32 %v9996_v21  ;;  %v19568_v21 = vld [vmem:[#allocation3 + $0x8] sm:$0xff] }
0x2838   : > { %v19477_v29 = vpop.eup %19476 }
0x2839   : > { %v9998_v22 = vsel %vm7362_vm7, %v19477_v29, 0.0 }
0x283a   : > { %9999 = vadd.xlane.f32.xlu1 %v9998_v22  ;;  %v19569_v22 = vld [vmem:[#allocation3] sm:$0xff] }
0x283c   : > { %v19479_v23 = vpop.eup %19478 }
0x283d   : > { %v10001_v25 = vsel %vm7362_vm7, %v19479_v23, 0.0 }
0x283e   : > { %10002 = vadd.xlane.f32.xlu1 %v10001_v25 }
0x284f   : > { %10008 = vrot.lane.b32.xlu1 %v20634_v53, %s19649_s11 }
0x2853   : > { %10321 = vrot.lane.b32.xlu1 %v20617_v44, %s19651_s2 }
0x28a9   : > { %v9743_v28 = vpop.f32.mrb[24].mxu1 }
0x28aa   : > { %v18652_v61 = vpop.f32.mrb[25].mxu1  ;;  %18656 = vmatmul.mubr.msk.f32.vlgmr.msra.gmra.mrb[12].mxu1 %vm7362_vm7, %v9743_v28 }
0x28ab   : > { %18670 = vmatprep.mubr.msk.f32.mxu1 %vm19636_vm6, %v19635_v20 }
0x28c7   : > { %v10000_v36 = vpop.xlane.xlu1 %9999 }
0x28c8   : > { %19480 = vrcp.f32 %v10000_v36 }
0x28cb   : > { %v10003_v0 = vpop.xlane.xlu1 %10002 }
0x28cc   : > { %19482 = vrcp.f32 %v10003_v0 }
0x28cf   : > { %v10009_v9 = vpop.permute.xlu1 %10008 }
0x28d0   : > { %18669 = vmatpush3.msra.mxu1 %v10009_v9 }
0x28d1   : > { %18678 = vmatprep.subr.mxu1 %v7255_v7 }
0x28d2   : > { %v19481_v10 = vpop.eup %19480 }
0x28d3   : > { %v10005_v11 = vmul.f32 %v19481_v10, %v19477_v29  ;;  %v10322_v15 = vpop.permute.xlu1 %10321 }
0x28d5   : > { %18671 = vmatmul.mubr.msk.f32.vlgmr.msra.gmra.mrb[26].mxu1 %vm7362_vm7, %v10005_v11 }
0x28d6   : > { %v19483_v44 = vpop.eup %19482  ;;  %18679 = vmatpush3.msra.mxu1 %v7255_v7 }
0x28d7   : > { %v10007_v60 = vmul.f32 %v19483_v44, %v19479_v23  ;;  %18688 = vmatprep.subr.mxu1 %v19635_v20 }
0x28d9   : > { %18676 = vmatmul.mubr.msk.f32.vlgmr.msra.gmra.mrb[32].mxu0 %vm7362_vm7, %v10007_v60  ;;  %v19292_v60 = vld [vmem:[%s19863_s5] sm:$0xff]  }
0x28da   : > { %18684 = vmatpush3.xpose.msk.msra.mxu0 %vm7362_vm7, %v10246_v57  ;;  %18685 = vmatprep.mubr.msk.f32.mxu0 %vm19636_vm6, %v19635_v20 }
0x28db   : > { %18693 = vmatprep.subr.mxu0 %v19635_v20 }
0x28dd   : > { %18686 = vmatmul.mubr.msk.f32.vlgmr.msra.gmra.mrb[34].mxu0 %vm7362_vm7, %v10244_v12  ;;  %v19293_v12 = vld [vmem:[%s19863_s5 + $0x8] sm:$0xff]  }
0x28de   : > { %18695 = vmatprep.mubr.msk.f32.mxu0 %vm19636_vm6, %v19635_v20 }
0x29a8   : > { %v10080_v49 = vpop.f32.mrb[26].mxu1 }
0x29a9   : > { %v18672_v13 = vpop.f32.mrb[27].mxu1  ;;  %18680 = vmatprep.mubr.msk.f32.mxu1 %vm7362_vm7, %v10080_v49  ;;  %v19294_v49 = vld [vmem:[%s19860_s17] sm:$0xff]  }
0x29aa   : > { %v19295_v13 = vld [vmem:[%s19863_s5 + $0x10] sm:$0xff]  }
0x29ac   : > { %v10156_v14 = vpop.f32.mrb[32].mxu0 }
0x29ad   : > { %v18677_v52 = vpop.f32.mrb[33].mxu0  ;;  %18681 = vmatmul.mubr.msk.f32.vlgmr.msra.gmra.mrb[12].mxu1 %vm7362_vm7, %v10156_v14  ;;  %v19296_v14 = vld [vmem:[%s19860_s17 + $0x8] sm:$0xff]  }
0x29ae   : > { %18689 = vmatpush3.xpose.msk.msra.mxu1 %vm7362_vm7, %v10324_v3  ;;  %18690 = vmatprep.mubr.msk.f32.mxu1 %vm19636_vm6, %v19635_v20  ;;  %v19297_v52 = vld [vmem:[%s19863_s5 + $0x18] sm:$0xff]   ;;  %s21714_s5 = sld [smem:[#allocation15_spill]] }
0x29af   : > { %18698 = vmatprep.subr.mxu1 %v19635_v20 }
0x29b0   : > { %v10317_v31 = vpop.f32.mrb[34].mxu0 }
0x29b1   : > { %v10318_v16 = vadd.f32 %v10317_v31, %v20646_v4  ;;  %v18687_v33 = vpop.f32.mrb[35].mxu0  ;;  %18691 = vmatmul.mubr.msk.f32.vlgmr.msra.gmra.mrb[28].mxu1 %vm7362_vm7, %v10322_v15  ;;  %v19298_v15 = vld [vmem:[%s19860_s17 + $0x10] sm:$0xff]   ;;  %v10711_v31 = vld [vmem:[#allocation2] sm:$0xff] }
0x29b2   : > { %18700 = vmatprep.mubr.msk.f32.mxu1 %vm19636_vm6, %v19635_v20 }
0x29b3   : > { %v10399_v17 = vsel %vm7362_vm7, %v10318_v16, -inf }
0x29b4   : > { %10400 = vmax.xlane.f32.xlu0 %v10399_v17  ;;  %v19299_v17 = vld [vmem:[%s19860_s17 + $0x18] sm:$0xff]   ;;  %s21715_s17 = scalar_lea.vmem %s19727_s6, %s21736_s0 }
0x2a41   : > { %v10401_v18 = vpop.xlane.xlu0 %10400 }
0x2a42   : > { %v10405_v19 = vsub.f32 %v10318_v16, %v10401_v18  ;;  %v10712_v16 = vld [vmem:[#allocation2 + $0x8] sm:$0xff] }
0x2a43   : > { %v10815_v33 = vpack.c.bf16 %v10712_v16, %v10711_v31 }
0x2a44   : > { %v10407_v24 = vmul.f32 1.442695, %v10405_v19 }
0x2a46   : > { %19484 = vpow2.f32 %v10407_v24 }
0x2a50   : > { %v19485_v35 = vpop.eup %19484 }
0x2a51   : > { %v10411_v27 = vsel %vm7362_vm7, %v19485_v35, 0.0 }
0x2a52   : > { %10412 = vadd.xlane.f32.xlu0 %v10411_v27 }
0x2a84   : > { %v10395_v38 = vpop.f32.mrb[28].mxu1 }
0x2a85   : > { %v10396_v4 = vadd.f32 %v10395_v38, %v20650_v62  ;;  %v18692_v41 = vpop.f32.mrb[29].mxu1 }
0x2a86   : > { %v17359_v41 = vld [vmem:[%s21712_s1] ss:$0 sm:$0xff]  ;;  %s21716_s1 = scalar_lea.vmem %s21714_s5, %s21736_s0 }
0x2a87   : > { %v10402_v8 = vsel %vm7362_vm7, %v10396_v4, -inf }
0x2a88   : > { %10403 = vmax.xlane.f32.xlu1 %v10402_v8 }
0x2a99   : > { %10421 = vrot.lane.b32.xlu1 %v20634_v53, %s19651_s2 }
0x2adf   : > { %v10413_v45 = vpop.xlane.xlu0 %10412 }
0x2ae0   : > { %19486 = vrcp.f32 %v10413_v45 }
0x2aea   : > { %v19487_v47 = vpop.eup %19486 }
0x2aeb   : > { %v10418_v51 = vmul.f32 %v19487_v47, %v19485_v35  ;;  %v17360_v47 = vld [vmem:[%s21713_s10] ss:$0 sm:$0xff] }
0x2b15   : > { %v10404_v40 = vpop.xlane.xlu1 %10403 }
0x2b16   : > { %v10406_v50 = vsub.f32 %v10396_v4, %v10404_v40 }
0x2b18   : > { %v10409_v42 = vmul.f32 1.442695, %v10406_v50 }
0x2b19   : > { %v10422_v39 = vpop.permute.xlu1 %10421 }
0x2b1a   : > { %19488 = vpow2.f32 %v10409_v42  ;;  %18694 = vmatpush3.msra.mxu0 %v10422_v39 }
0x2b1b   : > { %18696 = vmatmul.mubr.msk.f32.vlgmr.msra.gmra.mrb[36].mxu0 %vm7362_vm7, %v10418_v51  ;;  %18708 = vmatprep.subr.bf16.mxu0 %v19635_v20 }
0x2b1c   : > { %18716 = vmatprep.mubr.msk.bf16.mxu0 %vm19636_vm6, %v19635_v20  ;;  %18709 = vmatpush3.bf16.msra.mxu0 %v19294_v49 }
0x2b1d   : > { %18710 = vmatprep.subr.bf16.mxu0 %v19635_v20 }
0x2b20   : > { %18711 = vmatpush3.bf16.msra.mxu0 %v19296_v14 }
0x2b21   : > { %18712 = vmatprep.subr.bf16.mxu0 %v19635_v20 }
0x2b24   : > { %v19489_v62 = vpop.eup %19488  ;;  %18713 = vmatpush3.bf16.msra.mxu0 %v19298_v15 }
0x2b25   : > { %v10414_v53 = vsel %vm7362_vm7, %v19489_v62, 0.0  ;;  %18714 = vmatprep.subr.bf16.mxu0 %v19635_v20 }
0x2b26   : > { %10415 = vadd.xlane.f32.xlu0 %v10414_v53  ;;  %v17367_v53 = vld [vmem:[%s21715_s17] ss:$0 sm:$0xff] }
0x2b28   : > { %18715 = vmatpush3.bf16.msra.mxu0 %v19299_v17 }
0x2b29   : > { %18732 = vmatprep.subr.mxu0 %v19635_v20 }
0x2b3c   : > { %10497 = vrot.lane.b32.xlu0 %v20610_v5, %s19651_s2 }
0x2bb3   : > { %v10416_v56 = vpop.xlane.xlu0 %10415 }
0x2bb4   : > { %19490 = vrcp.f32 %v10416_v56 }
0x2bb7   : > { %v10498_v59 = vpop.permute.xlu0 %10497 }
0x2bb8   : > { %18699 = vmatpush3.msra.mxu1 %v10498_v59 }
0x2bb9   : > { %18703 = vmatprep.subr.mxu1 %v7256_v43 }
0x2bbe   : > { %v19491_v48 = vpop.eup %19490 }
0x2bbf   : > { %v10420_v46 = vmul.f32 %v19491_v48, %v19489_v62 }
0x2bc1   : > { %18701 = vmatmul.mubr.msk.f32.vlgmr.msra.gmra.mrb[30].mxu1 %vm7362_vm7, %v10420_v46 }
0x2bc2   : > { %18704 = vmatpush3.msra.mxu1 %v7256_v43 }
0x2bc3   : > { %18720 = vmatprep.subr.bf16.mxu1 %v19635_v20 }
0x2bee   : > { %v10493_v55 = vpop.f32.mrb[36].mxu0 }
0x2bef   : > { %v18697_v63 = vpop.f32.mrb[37].mxu0  ;;  %18705 = vmatprep.mubr.msk.f32.mxu1 %vm7362_vm7, %v10493_v55 }
0x2bf0   : > { %v17361_v63 = vld [vmem:[%s21716_s1] ss:$0 sm:$0xff] }
0x2c94   : > { %v10569_v2 = vpop.f32.mrb[30].mxu1 }
0x2c95   : > { %v18702_v5 = vpop.f32.mrb[31].mxu1  ;;  %18706 = vmatmul.mubr.msk.f32.vlgmr.msra.gmra.mrb[12].mxu1 %vm7362_vm7, %v10569_v2 }
0x2c96   : > { %18728 = vmatprep.mubr.msk.bf16.mxu1 %vm19636_vm6, %v19635_v20  ;;  %18721 = vmatpush3.bf16.msra.mxu1 %v19292_v60 }
0x2c97   : > { %18722 = vmatprep.subr.bf16.mxu1 %v19635_v20 }
0x2c9a   : > { %18723 = vmatpush3.bf16.msra.mxu1 %v19293_v12 }
0x2c9b   : > { %18724 = vmatprep.subr.bf16.mxu1 %v19635_v20 }
0x2c9e   : > { %18725 = vmatpush3.bf16.msra.mxu1 %v19295_v13 }
0x2c9f   : > { %18726 = vmatprep.subr.bf16.mxu1 %v19635_v20 }
0x2ca2   : > { %18727 = vmatpush3.bf16.msra.mxu1 %v19297_v52 }
0x2ca3   : > { %18742 = vmatprep.subr.mxu1 %v19635_v20 }
0x2ca5   : > { %18729 = vmatmul.mubr.msk.bf16.vlgmr.msra.gmra.mrb[32].mxu1 %vm7310_vm5, %v10815_v33 }
0x2ca6   : > { %18744 = vmatprep.mubr.msk.f32.mxu1 %vm19636_vm6, %v19635_v20 }
0x2d68   : > { %v18707_v1 = vpop.f32.mrb[12].mxu1 }
0x2d69   : > { %v10663_v54 = vadd.f32 %v18707_v1, %v17358_v58  ;;  %v10645_v6 = vpop.f32.mrb[13].mxu1 }
0x2d6a   : > { %v10662_v32 = vadd.f32 %v17358_v58, %v10645_v6 }
0x2d6b   : > { %v10665_v29 = vadd.f32 %v19568_v21, %v10663_v54 }
0x2d6c   : > { %v10664_v23 = vadd.f32 %v19569_v22, %v10662_v32 }
0x2d6d   : > { %v10671_v25 = vsel %vm7310_vm5, %v10665_v29, 0.0 }
0x2d6e   : > { %10672 = vadd.xlane.f32.xlu0 %v10671_v25  ;;  %v10668_v28 = vsel %vm7310_vm5, %v10664_v23, 0.0 }
0x2d6f   : > { %10669 = vadd.xlane.f32.xlu1 %v10668_v28 }
0x2d78   : > { %v10883_v56 = vpop.f32.mrb[32].mxu1 }
0x2d79   : > { %v20979_v43 = vadd.f32 %v17367_v53, %v10883_v56  ;;  %v18730_v59 = vpop.f32.mrb[33].mxu1 }
0x2d7a   : > { %v10886_v48 = vpop.f32.mrb[34].mxu1 }
0x2d7b   : > { %v20981_v46 = vadd.f32 %v17367_v53, %v10886_v48  ;;  %v18731_v55 = vpop.f32.mrb[35].mxu1 }
0x2dfb   : > { %v10673_v61 = vpop.xlane.xlu0 %10672 }
0x2dfc   : > { %v10676_v36 = vmul.f32 0.015625, %v10673_v61  ;;  %v10670_v0 = vpop.xlane.xlu1 %10669 }
0x2dfd   : > { %v10675_v7 = vmul.f32 0.015625, %v10670_v0 }
0x2dfe   : > { %v10678_v9 = vsub.f32 %v10665_v29, %v10676_v36 }
0x2dff   : > { %v10677_v57 = vsub.f32 %v10664_v23, %v10675_v7 }
0x2e00   : > { %v10680_v10 = vmul.f32 %v10678_v9, %v10678_v9 }
0x2e01   : > { %v10679_v11 = vmul.f32 %v10677_v57, %v10677_v57 }
0x2e02   : > { %v10684_v44 = vsel %vm7310_vm5, %v10680_v10, 0.0 }
0x2e03   : > { %10685 = vadd.xlane.f32.xlu0 %v10684_v44  ;;  %v10681_v3 = vsel %vm7310_vm5, %v10679_v11, 0.0 }
0x2e04   : > { %10682 = vadd.xlane.f32.xlu1 %v10681_v3 }
0x2e90   : > { %v10686_v18 = vpop.xlane.xlu0 %10685 }
0x2e91   : > { %v10688_v19 = vmul.f32 0.015625, %v10686_v18  ;;  %v10683_v24 = vpop.xlane.xlu1 %10682 }
0x2e92   : > { %v10687_v35 = vmul.f32 0.015625, %v10683_v24 }
0x2e93   : > { %v10690_v27 = vadd.f32 1e-05, %v10688_v19 }
0x2e94   : > { %v10689_v38 = vadd.f32 1e-05, %v10687_v35 }
0x2e95   : > { %19492 = vrsqrt.f32 %v10690_v27 }
0x2e96   : > { %19494 = vrsqrt.f32 %v10689_v38 }
0x2e9f   : > { %v19493_v4 = vpop.eup %19492 }
0x2ea0   : > { %v19495_v8 = vpop.eup %19494  ;;  %v10694_v45 = vmul.f32 %v19493_v4, %v10678_v9 }
0x2ea1   : > { %v10693_v40 = vmul.f32 %v19495_v8, %v10677_v57 }
0x2ea2   : > { %v10702_v50 = vmul.f32 %v17359_v41, %v10694_v45 }
0x2ea3   : > { %v10701_v42 = vmul.f32 %v17359_v41, %v10693_v40 }
0x2ea4   : > { %v20967_v51 = vadd.f32 %v17360_v47, %v10702_v50 }
0x2ea5   : > { %v20969_v39 = vadd.f32 %v17360_v47, %v10701_v42 }
0x2ea7   : > { %v10740_v62 = vpack.c.bf16 %v20967_v51, %v20969_v39 }
0x2ea9   : > { %18717 = vmatmul.mubr.msk.bf16.vlgmr.msra.gmra.mrb[40].mxu0 %vm7310_vm5, %v10740_v62 }
0x2eaa   : > { %18734 = vmatprep.mubr.msk.f32.mxu0 %vm19636_vm6, %v19635_v20  ;;  %18733 = vmatpush3.xpose.msk.msra.mxu0 %vm7362_vm7, %v20979_v43 }
0x2eab   : > { %18737 = vmatprep.subr.mxu0 %v19635_v20 }
0x2f7c   : > { %v10808_v2 = vpop.f32.mrb[40].mxu0 }
0x2f7d   : > { %v10809_v5 = vadd.f32 %v17361_v63, %v10808_v2  ;;  %v18718_v58 = vpop.f32.mrb[41].mxu0 }
0x2f7e   : > { %v10811_v1 = vpop.f32.mrb[42].mxu0 }
0x2f7f   : > { %v20989_v54 = vmul.f32 0.35355338, %v10809_v5  ;;  %v10812_v6 = vadd.f32 %v17361_v63, %v10811_v1  ;;  %v18719_v32 = vpop.f32.mrb[43].mxu0 }
0x2f81   : > { %18735 = vmatmul.mubr.msk.f32.vlgmr.msra.gmra.mrb[38].mxu0 %vm7362_vm7, %v20989_v54  ;;  %v20997_v21 = vmul.f32 0.35355338, %v10812_v6 }
0x2f82   : > { %18738 = vmatpush3.xpose.msk.msra.mxu0 %vm7362_vm7, %v20981_v46  ;;  %18739 = vmatprep.mubr.msk.f32.mxu0 %vm19636_vm6, %v19635_v20 }
0x2f83   : > { %18747 = vmatprep.subr.mxu0 %v19635_v20 }
0x2f85   : > { %18740 = vmatmul.mubr.msk.f32.vlgmr.msra.gmra.mrb[44].mxu0 %vm7362_vm7, %v20997_v21 }
0x2f86   : > { %18749 = vmatprep.mubr.msk.f32.mxu0 %vm19636_vm6, %v19635_v20 }
0x3054   : > { %v10964_v29 = vpop.f32.mrb[38].mxu0 }
0x3055   : > { %v18736_v22 = vpop.f32.mrb[39].mxu0  ;;  %v11044_v61 = vsel %vm7362_vm7, %v10964_v29, -inf }
0x3058   : > { %v11040_v23 = vpop.f32.mrb[44].mxu0 }
0x3059   : > { %v18741_v25 = vpop.f32.mrb[45].mxu0  ;;  %v11047_v28 = vsel %vm7362_vm7, %v11040_v23, -inf }
0x305a   : > { %11048 = vmax.xlane.f32.xlu1 %v11047_v28 }
0x306b   : > { %11142 = vrot.lane.b32.xlu1 %v20981_v46, %s19637_s13 }
0x306f   : > { %11296 = vrot.lane.b32.xlu1 %v20997_v21, %s19639_s14 }
0x3093   : > { %11045 = vmax.xlane.f32.xlu1 %v11044_v61 }
0x30a4   : > { %11220 = vrot.lane.b32.xlu1 %v20979_v43, %s19639_s14 }
0x30a8   : > { %11218 = vrot.lane.b32.xlu1 %v20989_v54, %s19639_s14 }
0x30ac   : > { %11712 = vrot.lane.b32.xlu1 %v20979_v43, %s19640_s18 }
0x30e7   : > { %v11049_v36 = vpop.xlane.xlu1 %11048 }
0x30e8   : > { %v11051_v0 = vsub.f32 %v11040_v23, %v11049_v36 }
0x30ea   : > { %v11054_v7 = vmul.f32 1.442695, %v11051_v0 }
0x30eb   : > { %v11143_v9 = vpop.permute.xlu1 %11142 }
0x30ec   : > { %19496 = vpow2.f32 %v11054_v7  ;;  %18748 = vmatpush3.msra.mxu0 %v11143_v9 }
0x30ed   : > { %18757 = vmatprep.subr.mxu0 %v19635_v20 }
0x30ef   : > { %v11297_v11 = vpop.permute.xlu1 %11296 }
0x30f6   : > { %v19497_v57 = vpop.eup %19496 }
0x30f7   : > { %v11059_v10 = vsel %vm7362_vm7, %v19497_v57, 0.0 }
0x30f8   : > { %11060 = vadd.xlane.f32.xlu0 %v11059_v10 }
0x310e   : > { %11298 = vrot.lane.b32.xlu0 %v20981_v46, %s19639_s14  ;;  %s21719_s14 = smov 32  }
0x3120   : > { %v11046_v44 = vpop.xlane.xlu1 %11045 }
0x3121   : > { %v11050_v3 = vsub.f32 %v10964_v29, %v11046_v44 }
0x3123   : > { %v11052_v60 = vmul.f32 1.442695, %v11050_v3 }
0x3124   : > { %v11221_v17 = vpop.permute.xlu1 %11220 }
0x3125   : > { %19498 = vpow2.f32 %v11052_v60 }
0x3128   : > { %v11219_v19 = vpop.permute.xlu1 %11218 }
0x312c   : > { %v11713_v48 = vpop.permute.xlu1 %11712 }
0x312f   : > { %v19499_v12 = vpop.eup %19498 }
0x3130   : > { %v11056_v49 = vsel %vm7362_vm7, %v19499_v12, 0.0 }
0x3131   : > { %11057 = vadd.xlane.f32.xlu0 %v11056_v49  ;;  %v10731_v49 = vld [vmem:[%s19869_s15] sm:$0xff] }
0x3147   : > { %11066 = vrot.lane.b32.xlu0 %v20979_v43, %s19637_s13  ;;  %s21717_s13 = smov 96  }
0x3185   : > { %v11061_v13 = vpop.xlane.xlu0 %11060 }
0x3186   : > { %19500 = vrcp.f32 %v11061_v13 }
0x3189   : > { %v11299_v15 = vpop.permute.xlu0 %11298 }
0x3190   : > { %v19501_v14 = vpop.eup %19500 }
0x3191   : > { %v11065_v52 = vmul.f32 %v19501_v14, %v19497_v57 }
0x3193   : > { %18750 = vmatmul.mubr.msk.f32.vlgmr.msra.gmra.mrb[46].mxu0 %vm7362_vm7, %v11065_v52 }
0x3194   : > { %18758 = vmatpush3.xpose.msk.msra.mxu0 %vm7362_vm7, %v11299_v15  ;;  %18759 = vmatprep.mubr.msk.f32.mxu0 %vm19636_vm6, %v19635_v20 }
0x3195   : > { %18767 = vmatprep.subr.mxu0 %v19635_v20 }
0x3197   : > { %18760 = vmatmul.mubr.msk.f32.vlgmr.msra.gmra.mrb[48].mxu0 %vm7362_vm7, %v11297_v11 }
0x3198   : > { %18769 = vmatprep.mubr.msk.f32.mxu0 %vm19636_vm6, %v19635_v20 }
0x31be   : > { %v11058_v31 = vpop.xlane.xlu0 %11057 }
0x31bf   : > { %19502 = vrcp.f32 %v11058_v31 }
0x31c2   : > { %v11067_v16 = vpop.permute.xlu0 %11066 }
0x31c3   : > { %18743 = vmatpush3.msra.mxu1 %v11067_v16 }
0x31c4   : > { %18752 = vmatprep.subr.mxu1 %v19635_v20 }
0x31c9   : > { %v19503_v33 = vpop.eup %19502 }
0x31ca   : > { %v11063_v18 = vmul.f32 %v19503_v33, %v19499_v12  ;;  %v10732_v12 = vld [vmem:[%s19869_s15 + $0x8] sm:$0xff] }
0x31cc   : > { %18745 = vmatmul.mubr.msk.f32.vlgmr.msra.gmra.mrb[36].mxu1 %vm7362_vm7, %v11063_v18 }
0x31cd   : > { %18753 = vmatpush3.xpose.msk.msra.mxu1 %vm7362_vm7, %v11221_v17  ;;  %18754 = vmatprep.mubr.msk.f32.mxu1 %vm19636_vm6, %v19635_v20 }
0x31ce   : > { %18762 = vmatprep.subr.mxu1 %v19635_v20 }
0x31d0   : > { %18755 = vmatmul.mubr.msk.f32.vlgmr.msra.gmra.mrb[38].mxu1 %vm7362_vm7, %v11219_v19 }
0x31d1   : > { %18764 = vmatprep.mubr.msk.f32.mxu1 %vm19636_vm6, %v19635_v20 }
0x3266   : > { %v21040_v24 = vpop.f32.mrb[46].mxu0 }
0x3267   : > { %v18751_v35 = vpop.f32.mrb[47].mxu0 }
0x326a   : > { %v11370_v27 = vpop.f32.mrb[48].mxu0 }
0x326b   : > { %v18761_v38 = vpop.f32.mrb[49].mxu0  ;;  %v11377_v4 = vsel %vm7362_vm7, %v11370_v27, -inf }
0x326c   : > { %11378 = vmax.xlane.f32.xlu0 %v11377_v4 }
0x3282   : > { %11472 = vrot.lane.b32.xlu0 %v20981_v46, %s19638_s8 }
0x3286   : > { %11710 = vrot.lane.b32.xlu0 %v20989_v54, %s19640_s18 }
0x328a   : > { %11788 = vrot.lane.b32.xlu0 %v20997_v21, %s19640_s18 }
0x329f   : > { %v21049_v41 = vpop.f32.mrb[36].mxu1 }
0x32a0   : > { %v18746_v8 = vpop.f32.mrb[37].mxu1 }
0x32a1   : > { %v10733_v8 = vld [vmem:[%s19869_s15 + $0x10] sm:$0xff] }
0x32a3   : > { %v11292_v45 = vpop.f32.mrb[38].mxu1 }
0x32a4   : > { %v18756_v40 = vpop.f32.mrb[39].mxu1  ;;  %v11374_v59 = vsel %vm7362_vm7, %v11292_v45, -inf }
0x32f9   : > { %v11379_v47 = vpop.xlane.xlu0 %11378 }
0x32fa   : > { %v11381_v50 = vsub.f32 %v11370_v27, %v11379_v47 }
0x32fc   : > { %v11384_v42 = vmul.f32 1.442695, %v11381_v50 }
0x32fd   : > { %v11473_v62 = vpop.permute.xlu0 %11472 }
0x32fe   : > { %19504 = vpow2.f32 %v11384_v42  ;;  %18768 = vmatpush3.msra.mxu0 %v11473_v62 }
0x32ff   : > { %18782 = vmatprep.subr.mxu0 %v19635_v20 }
0x3301   : > { %v11711_v5 = vpop.permute.xlu0 %11710 }
0x3305   : > { %v11789_v1 = vpop.permute.xlu0 %11788 }
0x3308   : > { %v19505_v53 = vpop.eup %19504 }
0x3309   : > { %v11389_v56 = vsel %vm7362_vm7, %v19505_v53, 0.0 }
0x330a   : > { %11390 = vadd.xlane.f32.xlu1 %v11389_v56 }
0x331b   : > { %11790 = vrot.lane.b32.xlu1 %v20981_v46, %s19640_s18  ;;  %s21720_s18 = smov 24  }
0x333f   : > { %11375 = vmax.xlane.f32.xlu1 %v11374_v59 }
0x3397   : > { %v11391_v55 = vpop.xlane.xlu1 %11390 }
0x3398   : > { %19506 = vrcp.f32 %v11391_v55 }
0x339b   : > { %v11791_v58 = vpop.permute.xlu1 %11790 }
0x33a2   : > { %v19507_v63 = vpop.eup %19506 }
0x33a3   : > { %v11395_v2 = vmul.f32 %v19507_v63, %v19505_v53 }
0x33a5   : > { %18770 = vmatmul.mubr.msk.f32.vlgmr.msra.gmra.mrb[50].mxu0 %vm7362_vm7, %v11395_v2 }
0x33a6   : > { %18783 = vmatpush3.xpose.msk.msra.mxu0 %vm7362_vm7, %v11713_v48  ;;  %18784 = vmatprep.mubr.msk.f32.mxu0 %vm19636_vm6, %v19635_v20 }
0x33a7   : > { %18787 = vmatprep.subr.mxu0 %v19635_v20 }
0x33a9   : > { %18785 = vmatmul.mubr.msk.f32.vlgmr.msra.gmra.mrb[52].mxu0 %vm7362_vm7, %v11711_v5 }
0x33aa   : > { %18788 = vmatpush3.xpose.msk.msra.mxu0 %vm7362_vm7, %v11791_v58  ;;  %18789 = vmatprep.mubr.msk.f32.mxu0 %vm19636_vm6, %v19635_v20 }
0x33ab   : > { %18797 = vmatprep.subr.mxu0 %v19635_v20 }
0x33ad   : > { %18790 = vmatmul.mubr.msk.f32.vlgmr.msra.gmra.mrb[54].mxu0 %vm7362_vm7, %v11789_v1 }
0x33ae   : > { %18799 = vmatprep.mubr.msk.f32.mxu0 %vm19636_vm6, %v19635_v20 }
0x33cc   : > { %v11376_v6 = vpop.xlane.xlu1 %11375 }
0x33cd   : > { %v11380_v32 = vsub.f32 %v11292_v45, %v11376_v6 }
0x33cf   : > { %v11382_v29 = vmul.f32 1.442695, %v11380_v32 }
0x33d1   : > { %19508 = vpow2.f32 %v11382_v29 }
0x33db   : > { %v19509_v22 = vpop.eup %19508 }
0x33dc   : > { %v11386_v23 = vsel %vm7362_vm7, %v19509_v22, 0.0 }
0x33dd   : > { %11387 = vadd.xlane.f32.xlu0 %v11386_v23 }
0x33f3   : > { %11396 = vrot.lane.b32.xlu0 %v20979_v43, %s19638_s8  ;;  %s21718_s8 = smov 40  }
0x33f7   : > { %11964 = vrot.lane.b32.xlu0 %v20981_v46, %s19641_s7 }
0x33fb   : > { %12125 = vrot.lane.b32.xlu0 %v20979_v43, %s19643_s22 }
0x33ff   : > { %12123 = vrot.lane.b32.xlu0 %v20989_v54, %s19643_s22 }
0x3403   : > { %12203 = vrot.lane.b32.xlu0 %v20981_v46, %s19643_s22 }
0x346a   : > { %v11388_v25 = vpop.xlane.xlu0 %11387 }
0x346b   : > { %19510 = vrcp.f32 %v11388_v25 }
0x346e   : > { %v11397_v28 = vpop.permute.xlu0 %11396 }
0x346f   : > { %18763 = vmatpush3.msra.mxu1 %v11397_v28 }
0x3470   : > { %18772 = vmatprep.subr.mxu1 %v10732_v12 }
0x3472   : > { %v11965_v61 = vpop.permute.xlu0 %11964 }
0x3473   : > { %18798 = vmatpush3.msra.mxu0 %v11965_v61 }
0x3474   : > { %18807 = vmatprep.subr.mxu0 %v19635_v20 }
0x3475   : > { %v19511_v36 = vpop.eup %19510 }
0x3476   : > { %v11393_v0 = vmul.f32 %v19511_v36, %v19509_v22  ;;  %v12126_v50 = vpop.permute.xlu0 %12125 }
0x3478   : > { %18765 = vmatmul.mubr.msk.f32.vlgmr.msra.gmra.mrb[40].mxu1 %vm7362_vm7, %v11393_v0  ;;  %v11544_v7 = vpop.f32.mrb[50].mxu0 }
0x3479   : > { %v18771_v9 = vpop.f32.mrb[51].mxu0  ;;  %18773 = vmatpush3.msra.mxu1 %v10732_v12 }
0x347a   : > { %18777 = vmatprep.subr.mxu1 %v10731_v49 }
0x347c   : > { %v11784_v57 = vpop.f32.mrb[52].mxu0 }
0x347d   : > { %v18786_v10 = vpop.f32.mrb[53].mxu0  ;;  %v11866_v11 = vsel %vm7362_vm7, %v11784_v57, -inf }
0x347e   : > { %11867 = vmax.xlane.f32.xlu1 %v11866_v11 }
0x3480   : > { %v11862_v44 = vpop.f32.mrb[54].mxu0 }
0x3481   : > { %v18791_v3 = vpop.f32.mrb[55].mxu0  ;;  %v11869_v60 = vsel %vm7362_vm7, %v11862_v44, -inf }
0x3482   : > { %11870 = vmax.xlane.f32.xlu1 %v11869_v60 }
0x350b   : > { %v11868_v13 = vpop.xlane.xlu1 %11867 }
0x350c   : > { %v11872_v14 = vsub.f32 %v11784_v57, %v11868_v13 }
0x350e   : > { %v11874_v52 = vmul.f32 1.442695, %v11872_v14 }
0x350f   : > { %v11871_v15 = vpop.xlane.xlu1 %11870 }
0x3510   : > { %19512 = vpow2.f32 %v11874_v52  ;;  %v11873_v31 = vsub.f32 %v11862_v44, %v11871_v15 }
0x3512   : > { %v11876_v16 = vmul.f32 1.442695, %v11873_v31 }
0x3514   : > { %19514 = vpow2.f32 %v11876_v16 }
0x351a   : > { %v19513_v33 = vpop.eup %19512 }
0x351b   : > { %v11878_v17 = vsel %vm7362_vm7, %v19513_v33, 0.0 }
0x351c   : > { %11879 = vadd.xlane.f32.xlu1 %v11878_v17 }
0x351e   : > { %v19515_v18 = vpop.eup %19514 }
0x351f   : > { %v11881_v19 = vsel %vm7362_vm7, %v19515_v18, 0.0 }
0x3520   : > { %11882 = vadd.xlane.f32.xlu1 %v11881_v19 }
0x3531   : > { %11888 = vrot.lane.b32.xlu1 %v20979_v43, %s19641_s7  ;;  %s21721_s7 = smov 16  }
0x3535   : > { %12201 = vrot.lane.b32.xlu1 %v20997_v21, %s19643_s22  ;;  %s21725_s22 = scalar_lea.vmem %s19747_s4, %s21736_s0 }
0x3539   : > { %12538 = vrot.lane.b32.xlu1 %v20979_v43, %s21717_s13 }
0x354b   : > { %v11468_v35 = vpop.f32.mrb[40].mxu1 }
0x354c   : > { %v18766_v27 = vpop.f32.mrb[41].mxu1  ;;  %18774 = vmatprep.mubr.msk.f32.mxu1 %vm7362_vm7, %v11468_v35 }
0x354d   : > { %18775 = vmatmul.mubr.msk.f32.vlgmr.msra.gmra.mrb[42].mxu1 %vm7362_vm7, %v11544_v7 }
0x354e   : > { %18779 = vmatprep.mubr.msk.f32.mxu1 %vm7362_vm7, %v21049_v41  ;;  %18778 = vmatpush3.msra.mxu1 %v10731_v49 }
0x354f   : > { %18792 = vmatprep.subr.mxu1 %v19635_v20 }
0x3555   : > { %18780 = vmatmul.mubr.msk.f32.vlgmr.msra.gmra.mrb[42].mxu1 %vm7362_vm7, %v21040_v24  ;;  %v12124_v24 = vpop.permute.xlu0 %12123 }
0x3556   : > { %18794 = vmatprep.mubr.msk.f32.mxu1 %vm19636_vm6, %v19635_v20 }
0x3559   : > { %v12204_v59 = vpop.permute.xlu0 %12203 }
0x35a9   : > { %v11880_v38 = vpop.xlane.xlu1 %11879 }
0x35aa   : > { %19516 = vrcp.f32 %v11880_v38  ;;  %v10734_v38 = vld [vmem:[%s19869_s15 + $0x18] sm:$0xff] }
0x35ad   : > { %v11883_v4 = vpop.xlane.xlu1 %11882 }
0x35ae   : > { %19518 = vrcp.f32 %v11883_v4 }
0x35b1   : > { %v11889_v45 = vpop.permute.xlu1 %11888 }
0x35b2   : > { %18793 = vmatpush3.msra.mxu1 %v11889_v45 }
0x35b3   : > { %18802 = vmatprep.subr.mxu1 %v10733_v8 }
0x35b4   : > { %v19517_v40 = vpop.eup %19516 }
0x35b5   : > { %v11885_v47 = vmul.f32 %v19517_v40, %v19513_v33  ;;  %v12202_v55 = vpop.permute.xlu1 %12201 }
0x35b7   : > { %18795 = vmatmul.mubr.msk.f32.vlgmr.msra.gmra.mrb[44].mxu1 %vm7362_vm7, %v11885_v47 }
0x35b8   : > { %v19519_v41 = vpop.eup %19518  ;;  %18803 = vmatpush3.msra.mxu1 %v10733_v8 }
0x35b9   : > { %v11887_v42 = vmul.f32 %v19519_v41, %v19515_v18  ;;  %18812 = vmatprep.subr.mxu1 %v19635_v20  ;;  %v12539_v61 = vpop.permute.xlu1 %12538 }
0x35bb   : > { %18800 = vmatmul.mubr.msk.f32.vlgmr.msra.gmra.mrb[56].mxu0 %vm7362_vm7, %v11887_v42 }
0x35bc   : > { %18808 = vmatpush3.xpose.msk.msra.mxu0 %vm7362_vm7, %v12126_v50  ;;  %18809 = vmatprep.mubr.msk.f32.mxu0 %vm19636_vm6, %v19635_v20 }
0x35bd   : > { %18817 = vmatprep.subr.mxu0 %v19635_v20 }
0x35bf   : > { %18810 = vmatmul.mubr.msk.f32.vlgmr.msra.gmra.mrb[58].mxu0 %vm7362_vm7, %v12124_v24 }
0x35c0   : > { %18819 = vmatprep.mubr.msk.f32.mxu0 %vm19636_vm6, %v19635_v20 }
0x368a   : > { %v11960_v62 = vpop.f32.mrb[44].mxu1 }
0x368b   : > { %v18796_v53 = vpop.f32.mrb[45].mxu1  ;;  %18804 = vmatprep.mubr.msk.f32.mxu1 %vm7362_vm7, %v11960_v62 }
0x368e   : > { %v12036_v56 = vpop.f32.mrb[56].mxu0 }
0x368f   : > { %v18801_v48 = vpop.f32.mrb[57].mxu0  ;;  %18805 = vmatmul.mubr.msk.f32.vlgmr.msra.gmra.mrb[42].mxu1 %vm7362_vm7, %v12036_v56 }
0x3690   : > { %18813 = vmatpush3.xpose.msk.msra.mxu1 %vm7362_vm7, %v12204_v59  ;;  %18814 = vmatprep.mubr.msk.f32.mxu1 %vm19636_vm6, %v19635_v20 }
0x3691   : > { %18822 = vmatprep.subr.mxu1 %v19635_v20 }
0x3692   : > { %v12197_v63 = vpop.f32.mrb[58].mxu0 }
0x3693   : > { %v18811_v2 = vpop.f32.mrb[59].mxu0  ;;  %18815 = vmatmul.mubr.msk.f32.vlgmr.msra.gmra.mrb[46].mxu1 %vm7362_vm7, %v12202_v55  ;;  %v12279_v5 = vsel %vm7362_vm7, %v12197_v63, -inf  ;;  %v10735_v55 = vld [vmem:[%s19869_s15 + $0x20] sm:$0xff] }
0x3694   : > { %12280 = vmax.xlane.f32.xlu0 %v12279_v5  ;;  %18824 = vmatprep.mubr.msk.f32.mxu1 %vm19636_vm6, %v19635_v20 }
0x36aa   : > { %12301 = vrot.lane.b32.xlu0 %v20979_v43, %s21718_s8 }
0x36ae   : > { %12536 = vrot.lane.b32.xlu0 %v20989_v54, %s21717_s13 }
0x36b2   : > { %12614 = vrot.lane.b32.xlu0 %v20997_v21, %s21717_s13 }
0x3721   : > { %v12281_v58 = vpop.xlane.xlu0 %12280 }
0x3722   : > { %v12285_v1 = vsub.f32 %v12197_v63, %v12281_v58 }
0x3724   : > { %v12287_v6 = vmul.f32 1.442695, %v12285_v1 }
0x3725   : > { %v12302_v32 = vpop.permute.xlu0 %12301 }
0x3726   : > { %19520 = vpow2.f32 %v12287_v6  ;;  %18818 = vmatpush3.msra.mxu0 %v12302_v32 }
0x3727   : > { %18832 = vmatprep.subr.mxu0 %v19635_v20 }
0x3729   : > { %v12537_v9 = vpop.permute.xlu0 %12536 }
0x372d   : > { %v12615_v10 = vpop.permute.xlu0 %12614 }
0x3730   : > { %v19521_v29 = vpop.eup %19520 }
0x3731   : > { %v12291_v22 = vsel %vm7362_vm7, %v19521_v29, 0.0 }
0x3732   : > { %12292 = vadd.xlane.f32.xlu1 %v12291_v22 }
0x3743   : > { %12616 = vrot.lane.b32.xlu1 %v20981_v46, %s21717_s13 }
0x3766   : > { %v12275_v23 = vpop.f32.mrb[46].mxu1 }
0x3767   : > { %v18816_v25 = vpop.f32.mrb[47].mxu1  ;;  %v12282_v28 = vsel %vm7362_vm7, %v12275_v23, -inf }
0x3768   : > { %12283 = vmax.xlane.f32.xlu1 %v12282_v28 }
0x37bf   : > { %v12293_v36 = vpop.xlane.xlu1 %12292 }
0x37c0   : > { %19522 = vrcp.f32 %v12293_v36 }
0x37c3   : > { %v12617_v57 = vpop.permute.xlu1 %12616 }
0x37ca   : > { %v19523_v0 = vpop.eup %19522 }
0x37cb   : > { %v12298_v7 = vmul.f32 %v19523_v0, %v19521_v29 }
0x37cd   : > { %18820 = vmatmul.mubr.msk.f32.vlgmr.msra.gmra.mrb[60].mxu0 %vm7362_vm7, %v12298_v7 }
0x37ce   : > { %18833 = vmatpush3.xpose.msk.msra.mxu0 %vm7362_vm7, %v12539_v61  ;;  %18834 = vmatprep.mubr.msk.f32.mxu0 %vm19636_vm6, %v19635_v20 }
0x37cf   : > { %18837 = vmatprep.subr.mxu0 %v19635_v20 }
0x37d1   : > { %18835 = vmatmul.mubr.msk.f32.vlgmr.msra.gmra.mrb[62].mxu0 %vm7362_vm7, %v12537_v9 }
0x37d2   : > { %18838 = vmatpush3.xpose.msk.msra.mxu0 %vm7362_vm7, %v12617_v57  ;;  %18839 = vmatprep.mubr.msk.f32.mxu0 %vm19636_vm6, %v19635_v20 }
0x37d3   : > { %18847 = vmatprep.subr.mxu0 %v19635_v20 }
0x37d5   : > { %18840 = vmatmul.mubr.msk.f32.vlgmr.msra.gmra.mrb[64].mxu0 %vm7362_vm7, %v12615_v10 }
0x37d6   : > { %18849 = vmatprep.mubr.msk.f32.mxu0 %vm19636_vm6, %v19635_v20 }
0x37f5   : > { %v12284_v11 = vpop.xlane.xlu1 %12283 }
0x37f6   : > { %v12286_v44 = vsub.f32 %v12275_v23, %v12284_v11 }
0x37f8   : > { %v12289_v3 = vmul.f32 1.442695, %v12286_v44 }
0x37fa   : > { %19524 = vpow2.f32 %v12289_v3 }
0x3804   : > { %v19525_v60 = vpop.eup %19524 }
0x3805   : > { %v12294_v12 = vsel %vm7362_vm7, %v19525_v60, 0.0 }
0x3806   : > { %12295 = vadd.xlane.f32.xlu0 %v12294_v12 }
0x381c   : > { %12377 = vrot.lane.b32.xlu0 %v20981_v46, %s21718_s8 }
0x3820   : > { %12790 = vrot.lane.b32.xlu0 %v20981_v46, %s21719_s14 }
0x3824   : > { %12951 = vrot.lane.b32.xlu0 %v20979_v43, %s19647_s21 }
0x3828   : > { %12949 = vrot.lane.b32.xlu0 %v20989_v54, %s19647_s21 }
0x382c   : > { %13029 = vrot.lane.b32.xlu0 %v20981_v46, %s19647_s21 }
0x3893   : > { %v12296_v49 = vpop.xlane.xlu0 %12295 }
0x3894   : > { %19526 = vrcp.f32 %v12296_v49 }
0x3897   : > { %v12378_v13 = vpop.permute.xlu0 %12377 }
0x3898   : > { %18823 = vmatpush3.msra.mxu1 %v12378_v13 }
0x3899   : > { %18827 = vmatprep.subr.mxu1 %v10734_v38 }
0x389b   : > { %v12791_v14 = vpop.permute.xlu0 %12790 }
0x389c   : > { %18848 = vmatpush3.msra.mxu0 %v12791_v14 }
0x389d   : > { %18857 = vmatprep.subr.mxu0 %v19635_v20 }
0x389e   : > { %v19527_v52 = vpop.eup %19526 }
0x389f   : > { %v12300_v15 = vmul.f32 %v19527_v52, %v19525_v60  ;;  %v12952_v1 = vpop.permute.xlu0 %12951 }
0x38a0   : > { %v12373_v31 = vpop.f32.mrb[60].mxu0 }
0x38a1   : > { %v18821_v16 = vpop.f32.mrb[61].mxu0  ;;  %18825 = vmatmul.mubr.msk.f32.vlgmr.msra.gmra.mrb[48].mxu1 %vm7362_vm7, %v12300_v15 }
0x38a2   : > { %18829 = vmatprep.mubr.msk.f32.mxu1 %vm7362_vm7, %v12373_v31  ;;  %18828 = vmatpush3.msra.mxu1 %v10734_v38 }
0x38a3   : > { %18842 = vmatprep.subr.mxu1 %v19635_v20  ;;  %v12950_v32 = vpop.permute.xlu0 %12949 }
0x38a4   : > { %v12610_v33 = vpop.f32.mrb[62].mxu0 }
0x38a5   : > { %v18836_v17 = vpop.f32.mrb[63].mxu0  ;;  %v12692_v18 = vsel %vm7362_vm7, %v12610_v33, -inf }
0x38a6   : > { %12693 = vmax.xlane.f32.xlu1 %v12692_v18 }
0x38a7   : > { %v13030_v25 = vpop.permute.xlu0 %13029 }
0x38a8   : > { %v12688_v19 = vpop.f32.mrb[64].mxu0 }
0x38a9   : > { %v18841_v35 = vpop.f32.mrb[65].mxu0  ;;  %v12695_v27 = vsel %vm7362_vm7, %v12688_v19, -inf }
0x38aa   : > { %12696 = vmax.xlane.f32.xlu1 %v12695_v27 }
0x3933   : > { %v12694_v4 = vpop.xlane.xlu1 %12693 }
0x3934   : > { %v12698_v8 = vsub.f32 %v12610_v33, %v12694_v4 }
0x3936   : > { %v12700_v45 = vmul.f32 1.442695, %v12698_v8 }
0x3937   : > { %v12697_v40 = vpop.xlane.xlu1 %12696 }
0x3938   : > { %19528 = vpow2.f32 %v12700_v45  ;;  %v12699_v47 = vsub.f32 %v12688_v19, %v12697_v40 }
0x393a   : > { %v12702_v41 = vmul.f32 1.442695, %v12699_v47 }
0x393c   : > { %19530 = vpow2.f32 %v12702_v41 }
0x3942   : > { %v19529_v50 = vpop.eup %19528 }
0x3943   : > { %v12704_v42 = vsel %vm7362_vm7, %v19529_v50, 0.0 }
0x3944   : > { %12705 = vadd.xlane.f32.xlu1 %v12704_v42 }
0x3946   : > { %v19531_v24 = vpop.eup %19530 }
0x3947   : > { %v12707_v62 = vsel %vm7362_vm7, %v19531_v24, 0.0 }
0x3948   : > { %12708 = vadd.xlane.f32.xlu1 %v12707_v62 }
0x3959   : > { %12714 = vrot.lane.b32.xlu1 %v20979_v43, %s21719_s14 }
0x395d   : > { %13027 = vrot.lane.b32.xlu1 %v20997_v21, %s19647_s21 }
0x3961   : > { %13364 = vrot.lane.b32.xlu1 %v20979_v43, %s19649_s11 }
0x3974   : > { %v12449_v53 = vpop.f32.mrb[48].mxu1 }
0x3975   : > { %v18826_v56 = vpop.f32.mrb[49].mxu1  ;;  %18830 = vmatmul.mubr.msk.f32.vlgmr.msra.gmra.mrb[42].mxu1 %vm7362_vm7, %v12449_v53 }
0x3976   : > { %18844 = vmatprep.mubr.msk.f32.mxu1 %vm19636_vm6, %v19635_v20  ;;  %v10736_v56 = vld [vmem:[%s19869_s15 + $0x28] sm:$0xff] }
0x39d1   : > { %v12706_v59 = vpop.xlane.xlu1 %12705 }
0x39d2   : > { %19532 = vrcp.f32 %v12706_v59 }
0x39d5   : > { %v12709_v48 = vpop.xlane.xlu1 %12708 }
0x39d6   : > { %19534 = vrcp.f32 %v12709_v48 }
0x39d9   : > { %v12715_v63 = vpop.permute.xlu1 %12714 }
0x39da   : > { %18843 = vmatpush3.msra.mxu1 %v12715_v63 }
0x39db   : > { %18852 = vmatprep.subr.mxu1 %v10735_v55 }
0x39dc   : > { %v19533_v2 = vpop.eup %19532 }
0x39dd   : > { %v12711_v5 = vmul.f32 %v19533_v2, %v19529_v50  ;;  %v13028_v61 = vpop.permute.xlu1 %13027 }
0x39df   : > { %18845 = vmatmul.mubr.msk.f32.vlgmr.msra.gmra.mrb[50].mxu1 %vm7362_vm7, %v12711_v5 }
0x39e0   : > { %v19535_v58 = vpop.eup %19534  ;;  %18853 = vmatpush3.msra.mxu1 %v10735_v55 }
0x39e1   : > { %v12713_v6 = vmul.f32 %v19535_v58, %v19531_v24  ;;  %18862 = vmatprep.subr.mxu1 %v19635_v20  ;;  %v13365_v13 = vpop.permute.xlu1 %13364 }
0x39e3   : > { %18850 = vmatmul.mubr.msk.f32.vlgmr.msra.gmra.mrb[66].mxu0 %vm7362_vm7, %v12713_v6 }
0x39e4   : > { %18858 = vmatpush3.xpose.msk.msra.mxu0 %vm7362_vm7, %v12952_v1  ;;  %18859 = vmatprep.mubr.msk.f32.mxu0 %vm19636_vm6, %v19635_v20 }
0x39e5   : > { %18867 = vmatprep.subr.mxu0 %v19635_v20 }
0x39e7   : > { %18860 = vmatmul.mubr.msk.f32.vlgmr.msra.gmra.mrb[68].mxu0 %vm7362_vm7, %v12950_v32 }
0x39e8   : > { %18869 = vmatprep.mubr.msk.f32.mxu0 %vm19636_vm6, %v19635_v20 }
0x3ab2   : > { %v12786_v29 = vpop.f32.mrb[50].mxu1 }
0x3ab3   : > { %v18846_v22 = vpop.f32.mrb[51].mxu1  ;;  %18854 = vmatprep.mubr.msk.f32.mxu1 %vm7362_vm7, %v12786_v29 }
0x3ab6   : > { %v12862_v23 = vpop.f32.mrb[66].mxu0 }
0x3ab7   : > { %v18851_v28 = vpop.f32.mrb[67].mxu0  ;;  %18855 = vmatmul.mubr.msk.f32.vlgmr.msra.gmra.mrb[42].mxu1 %vm7362_vm7, %v12862_v23 }
0x3ab8   : > { %18863 = vmatpush3.xpose.msk.msra.mxu1 %vm7362_vm7, %v13030_v25  ;;  %18864 = vmatprep.mubr.msk.f32.mxu1 %vm19636_vm6, %v19635_v20  ;;  %v10737_v28 = vld [vmem:[%s19869_s15 + $0x30] sm:$0xff] }
0x3ab9   : > { %18872 = vmatprep.subr.mxu1 %v19635_v20 }
0x3aba   : > { %v13023_v36 = vpop.f32.mrb[68].mxu0 }
0x3abb   : > { %v18861_v0 = vpop.f32.mrb[69].mxu0  ;;  %18865 = vmatmul.mubr.msk.f32.vlgmr.msra.gmra.mrb[52].mxu1 %vm7362_vm7, %v13028_v61  ;;  %v13105_v7 = vsel %vm7362_vm7, %v13023_v36, -inf }
0x3abc   : > { %13106 = vmax.xlane.f32.xlu0 %v13105_v7  ;;  %18874 = vmatprep.mubr.msk.f32.mxu1 %vm19636_vm6, %v19635_v20 }
0x3ad2   : > { %13127 = vrot.lane.b32.xlu0 %v20979_v43, %s21720_s18 }
0x3ad6   : > { %13362 = vrot.lane.b32.xlu0 %v20989_v54, %s19649_s11 }
0x3ada   : > { %13440 = vrot.lane.b32.xlu0 %v20997_v21, %s19649_s11 }
0x3b49   : > { %v13107_v9 = vpop.xlane.xlu0 %13106 }
0x3b4a   : > { %v13111_v57 = vsub.f32 %v13023_v36, %v13107_v9 }
0x3b4c   : > { %v13113_v10 = vmul.f32 1.442695, %v13111_v57 }
0x3b4d   : > { %v13128_v11 = vpop.permute.xlu0 %13127 }
0x3b4e   : > { %19536 = vpow2.f32 %v13113_v10  ;;  %18868 = vmatpush3.msra.mxu0 %v13128_v11 }
0x3b4f   : > { %18882 = vmatprep.subr.mxu0 %v19635_v20 }
0x3b51   : > { %v13363_v31 = vpop.permute.xlu0 %13362 }
0x3b55   : > { %v13441_v33 = vpop.permute.xlu0 %13440 }
0x3b58   : > { %v19537_v44 = vpop.eup %19536 }
0x3b59   : > { %v13117_v3 = vsel %vm7362_vm7, %v19537_v44, 0.0 }
0x3b5a   : > { %13118 = vadd.xlane.f32.xlu1 %v13117_v3 }
0x3b6b   : > { %13442 = vrot.lane.b32.xlu1 %v20981_v46, %s19649_s11  ;;  %s21723_s11 = scalar_lea.vmem %s19737_s20, %s21736_s0 }
0x3b8e   : > { %v13101_v60 = vpop.f32.mrb[52].mxu1 }
0x3b8f   : > { %v18866_v12 = vpop.f32.mrb[53].mxu1  ;;  %v13108_v49 = vsel %vm7362_vm7, %v13101_v60, -inf }
0x3b90   : > { %13109 = vmax.xlane.f32.xlu1 %v13108_v49 }
0x3be7   : > { %v13119_v14 = vpop.xlane.xlu1 %13118 }
0x3be8   : > { %19538 = vrcp.f32 %v13119_v14 }
0x3beb   : > { %v13443_v16 = vpop.permute.xlu1 %13442 }
0x3bf2   : > { %v19539_v52 = vpop.eup %19538 }
0x3bf3   : > { %v13124_v15 = vmul.f32 %v19539_v52, %v19537_v44 }
0x3bf5   : > { %18870 = vmatmul.mubr.msk.f32.vlgmr.msra.gmra.mrb[70].mxu0 %vm7362_vm7, %v13124_v15 }
0x3bf6   : > { %18883 = vmatpush3.xpose.msk.msra.mxu0 %vm7362_vm7, %v13365_v13  ;;  %18884 = vmatprep.mubr.msk.f32.mxu0 %vm19636_vm6, %v19635_v20 }
0x3bf7   : > { %18887 = vmatprep.subr.mxu0 %v19635_v20 }
0x3bf9   : > { %18885 = vmatmul.mubr.msk.f32.vlgmr.msra.gmra.mrb[72].mxu0 %vm7362_vm7, %v13363_v31 }
0x3bfa   : > { %18888 = vmatpush3.xpose.msk.msra.mxu0 %vm7362_vm7, %v13443_v16  ;;  %18889 = vmatprep.mubr.msk.f32.mxu0 %vm19636_vm6, %v19635_v20 }
0x3bfb   : > { %18897 = vmatprep.subr.mxu0 %v19635_v20 }
0x3bfd   : > { %18890 = vmatmul.mubr.msk.f32.vlgmr.msra.gmra.mrb[74].mxu0 %vm7362_vm7, %v13441_v33 }
0x3bfe   : > { %18899 = vmatprep.mubr.msk.f32.mxu0 %vm19636_vm6, %v19635_v20 }
0x3c1d   : > { %v13110_v17 = vpop.xlane.xlu1 %13109 }
0x3c1e   : > { %v13112_v18 = vsub.f32 %v13101_v60, %v13110_v17 }
0x3c20   : > { %v13115_v19 = vmul.f32 1.442695, %v13112_v18 }
0x3c22   : > { %19540 = vpow2.f32 %v13115_v19 }
0x3c2c   : > { %v19541_v35 = vpop.eup %19540 }
0x3c2d   : > { %v13120_v27 = vsel %vm7362_vm7, %v19541_v35, 0.0 }
0x3c2e   : > { %13121 = vadd.xlane.f32.xlu0 %v13120_v27 }
0x3c44   : > { %13203 = vrot.lane.b32.xlu0 %v20981_v46, %s21720_s18 }
0x3c48   : > { %13616 = vrot.lane.b32.xlu0 %v20981_v46, %s21721_s7 }
0x3c4c   : > { %13777 = vrot.lane.b32.xlu0 %v20979_v43, %s19651_s2 }
0x3c50   : > { %13855 = vrot.lane.b32.xlu0 %v20981_v46, %s19651_s2 }
0x3c54   : > { %13775 = vrot.lane.b32.xlu0 %v20989_v54, %s19651_s2 }
0x3cbb   : > { %v13122_v38 = vpop.xlane.xlu0 %13121 }
0x3cbc   : > { %19542 = vrcp.f32 %v13122_v38 }
0x3cbf   : > { %v13204_v4 = vpop.permute.xlu0 %13203 }
0x3cc0   : > { %18873 = vmatpush3.msra.mxu1 %v13204_v4 }
0x3cc1   : > { %18877 = vmatprep.subr.mxu1 %v10736_v56 }
0x3cc3   : > { %v13617_v8 = vpop.permute.xlu0 %13616 }
0x3cc4   : > { %18898 = vmatpush3.msra.mxu0 %v13617_v8 }
0x3cc5   : > { %18907 = vmatprep.subr.mxu0 %v19635_v20 }
0x3cc6   : > { %v19543_v45 = vpop.eup %19542 }
0x3cc7   : > { %v13126_v40 = vmul.f32 %v19543_v45, %v19541_v35  ;;  %v13778_v36 = vpop.permute.xlu0 %13777 }
0x3cc8   : > { %v13199_v47 = vpop.f32.mrb[70].mxu0 }
0x3cc9   : > { %v18871_v41 = vpop.f32.mrb[71].mxu0  ;;  %18875 = vmatmul.mubr.msk.f32.vlgmr.msra.gmra.mrb[54].mxu1 %vm7362_vm7, %v13126_v40 }
0x3cca   : > { %18879 = vmatprep.mubr.msk.f32.mxu1 %vm7362_vm7, %v13199_v47  ;;  %18878 = vmatpush3.msra.mxu1 %v10736_v56  ;;  %v10738_v41 = vld [vmem:[%s19869_s15 + $0x38] sm:$0xff]  ;;  %s21724_s15 = scalar_lea.vmem %s19742_s27, %s21736_s0 }
0x3ccb   : > { %18892 = vmatprep.subr.mxu1 %v19635_v20  ;;  %v13856_v9 = vpop.permute.xlu0 %13855 }
0x3ccc   : > { %v13436_v50 = vpop.f32.mrb[72].mxu0 }
0x3ccd   : > { %v18886_v42 = vpop.f32.mrb[73].mxu0  ;;  %v13518_v54 = vsel %vm7362_vm7, %v13436_v50, -inf }
0x3cce   : > { %13519 = vmax.xlane.f32.xlu1 %v13518_v54 }
0x3ccf   : > { %v13776_v10 = vpop.permute.xlu0 %13775 }
0x3cd0   : > { %v13514_v24 = vpop.f32.mrb[74].mxu0 }
0x3cd1   : > { %v18891_v62 = vpop.f32.mrb[75].mxu0  ;;  %v13521_v53 = vsel %vm7362_vm7, %v13514_v24, -inf }
0x3cd2   : > { %13522 = vmax.xlane.f32.xlu1 %v13521_v53 }
0x3d5b   : > { %v13520_v59 = vpop.xlane.xlu1 %13519 }
0x3d5c   : > { %v13524_v48 = vsub.f32 %v13436_v50, %v13520_v59 }
0x3d5e   : > { %v13526_v55 = vmul.f32 1.442695, %v13524_v48 }
0x3d5f   : > { %v13523_v63 = vpop.xlane.xlu1 %13522 }
0x3d60   : > { %19544 = vpow2.f32 %v13526_v55  ;;  %v13525_v2 = vsub.f32 %v13514_v24, %v13523_v63 }
0x3d62   : > { %v13528_v5 = vmul.f32 1.442695, %v13525_v2 }
0x3d64   : > { %19546 = vpow2.f32 %v13528_v5 }
0x3d6a   : > { %v19545_v58 = vpop.eup %19544 }
0x3d6b   : > { %v13530_v1 = vsel %vm7362_vm7, %v19545_v58, 0.0 }
0x3d6c   : > { %13531 = vadd.xlane.f32.xlu1 %v13530_v1 }
0x3d6e   : > { %v19547_v6 = vpop.eup %19546 }
0x3d6f   : > { %v13533_v32 = vsel %vm7362_vm7, %v19547_v6, 0.0 }
0x3d70   : > { %13534 = vadd.xlane.f32.xlu1 %v13533_v32 }
0x3d81   : > { %13540 = vrot.lane.b32.xlu1 %v20979_v43, %s21721_s7 }
0x3d85   : > { %13853 = vrot.lane.b32.xlu1 %v20997_v21, %s19651_s2  ;;  %s21722_s2 = smov 8  }
0x3d9c   : > { %v13275_v29 = vpop.f32.mrb[54].mxu1 }
0x3d9d   : > { %v18876_v22 = vpop.f32.mrb[55].mxu1  ;;  %18880 = vmatmul.mubr.msk.f32.vlgmr.msra.gmra.mrb[42].mxu1 %vm7362_vm7, %v13275_v29 }
0x3d9e   : > { %18894 = vmatprep.mubr.msk.f32.mxu1 %vm19636_vm6, %v19635_v20 }
0x3df9   : > { %v13532_v23 = vpop.xlane.xlu1 %13531 }
0x3dfa   : > { %19548 = vrcp.f32 %v13532_v23 }
0x3dfd   : > { %v13535_v25 = vpop.xlane.xlu1 %13534 }
0x3dfe   : > { %19550 = vrcp.f32 %v13535_v25 }
0x3e01   : > { %v13541_v61 = vpop.permute.xlu1 %13540 }
0x3e02   : > { %18893 = vmatpush3.msra.mxu1 %v13541_v61 }
0x3e03   : > { %18902 = vmatprep.subr.mxu1 %v10737_v28 }
0x3e04   : > { %v19549_v0 = vpop.eup %19548 }
0x3e05   : > { %v13537_v7 = vmul.f32 %v19549_v0, %v19545_v58  ;;  %v13854_v12 = vpop.permute.xlu1 %13853  ;;  %v14245_v0 = vld [vmem:[%s19878_s28 + $0x40] sm:$0xff] }
0x3e07   : > { %18895 = vmatmul.mubr.msk.f32.vlgmr.msra.gmra.mrb[56].mxu1 %vm7362_vm7, %v13537_v7  ;;  %v14244_v7 = vld [vmem:[%s19878_s28 + $0x8] sm:$0xff] }
0x3e08   : > { %v19551_v21 = vpop.eup %19550  ;;  %18903 = vmatpush3.msra.mxu1 %v10737_v28 }
0x3e09   : > { %v13539_v57 = vmul.f32 %v19551_v21, %v19547_v6  ;;  %18912 = vmatprep.subr.mxu1 %v19635_v20 }
0x3e0b   : > { %18900 = vmatmul.mubr.msk.f32.vlgmr.msra.gmra.mrb[76].mxu0 %vm7362_vm7, %v13539_v57 }
0x3e0c   : > { %18908 = vmatpush3.xpose.msk.msra.mxu0 %vm7362_vm7, %v13778_v36  ;;  %18909 = vmatprep.mubr.msk.f32.mxu0 %vm19636_vm6, %v19635_v20  ;;  %v14243_v36 = vld [vmem:[%s19878_s28] sm:$0xff] }
0x3e0d   : > { %18917 = vmatprep.subr.mxu0 %v19635_v20  ;;  %v17441_v21 = vcombine.high %v14243_v36, %v14245_v0  ;;  %v17440_v57 = vcombine.low %v14243_v36, %v14245_v0  ;;  %v14533_v36 = vld [vmem:[%s19878_s28 + $0xd8] sm:$0xff] }
0x3e0f   : > { %18910 = vmatmul.mubr.msk.f32.vlgmr.msra.gmra.mrb[78].mxu0 %vm7362_vm7, %v13776_v10 }
0x3e10   : > { %18919 = vmatprep.mubr.msk.f32.mxu0 %vm19636_vm6, %v19635_v20 }
0x3eda   : > { %v13612_v11 = vpop.f32.mrb[56].mxu1 }
0x3edb   : > { %v18896_v44 = vpop.f32.mrb[57].mxu1  ;;  %18904 = vmatprep.mubr.msk.f32.mxu1 %vm7362_vm7, %v13612_v11 }
0x3edc   : > { %v14247_v44 = vld [vmem:[%s19878_s28 + $0x80] sm:$0xff] }
0x3ede   : > { %v13688_v3 = vpop.f32.mrb[76].mxu0 }
0x3edf   : > { %v18901_v60 = vpop.f32.mrb[77].mxu0  ;;  %18905 = vmatmul.mubr.msk.f32.vlgmr.msra.gmra.mrb[42].mxu1 %vm7362_vm7, %v13688_v3  ;;  %v14249_v3 = vld [vmem:[%s19878_s28 + $0xc0] sm:$0xff] }
0x3ee0   : > { %18913 = vmatpush3.xpose.msk.msra.mxu1 %vm7362_vm7, %v13856_v9  ;;  %18914 = vmatprep.mubr.msk.f32.mxu1 %vm19636_vm6, %v19635_v20  ;;  %v14246_v9 = vld [vmem:[%s19878_s28 + $0x48] sm:$0xff] }
0x3ee1   : > { %18922 = vmatprep.subr.mxu1 %v19635_v20  ;;  %v17442_v10 = vcombine.low %v14244_v7, %v14246_v9  ;;  %v17443_v11 = vcombine.high %v14244_v7, %v14246_v9  ;;  %v14248_v60 = vld [vmem:[%s19878_s28 + $0x88] sm:$0xff]  ;;  %v14534_v9 = vld [vmem:[%s19878_s28 + $0x110] sm:$0xff] }
0x3ee2   : > { %v13849_v49 = vpop.f32.mrb[78].mxu0 }
0x3ee3   : > { %v18911_v13 = vpop.f32.mrb[79].mxu0  ;;  %18915 = vmatmul.mubr.msk.f32.vlgmr.msra.gmra.mrb[58].mxu1 %vm7362_vm7, %v13854_v12  ;;  %v13931_v14 = vsel %vm7362_vm7, %v13849_v49, -inf  ;;  %v17445_v12 = vcombine.high %v14247_v44, %v14249_v3 }
0x3ee4   : > { %13932 = vmax.xlane.f32.xlu0 %v13931_v14  ;;  %18924 = vmatprep.mubr.msk.f32.mxu1 %vm19636_vm6, %v19635_v20  ;;  %v17444_v13 = vcombine.low %v14247_v44, %v14249_v3 }
0x3f71   : > { %v13933_v52 = vpop.xlane.xlu0 %13932 }
0x3f72   : > { %v13937_v15 = vsub.f32 %v13849_v49, %v13933_v52  ;;  %v14250_v49 = vld [vmem:[%s19878_s28 + $0xc8] sm:$0xff] }
0x3f73   : > { %v17446_v14 = vcombine.low %v14248_v60, %v14250_v49  ;;  %v17447_v52 = vcombine.high %v14248_v60, %v14250_v49  ;;  %v14540_v49 = vld [vmem:[%s19878_s28 + $0x1d0] sm:$0xff] }
0x3f74   : > { %v13939_v31 = vmul.f32 1.442695, %v13937_v15  ;;  %v14251_v15 = vld [vmem:[%s19878_s28 + $0x100] sm:$0xff] }
0x3f76   : > { %19552 = vpow2.f32 %v13939_v31  ;;  %v14253_v31 = vld [vmem:[%s19878_s28 + $0x140] sm:$0xff] }
0x3f80   : > { %v19553_v16 = vpop.eup %19552 }
0x3f81   : > { %v13943_v33 = vsel %vm7362_vm7, %v19553_v16, 0.0 }
0x3f82   : > { %13944 = vadd.xlane.f32.xlu0 %v13943_v33  ;;  %v17449_v33 = vcombine.high %v14251_v15, %v14253_v31 }
0x3fb6   : > { %v13927_v17 = vpop.f32.mrb[58].mxu1 }
0x3fb7   : > { %v18916_v18 = vpop.f32.mrb[59].mxu1  ;;  %v13934_v19 = vsel %vm7362_vm7, %v13927_v17, -inf }
0x3fb8   : > { %13935 = vmax.xlane.f32.xlu1 %v13934_v19  ;;  %v17448_v18 = vcombine.low %v14251_v15, %v14253_v31 }
0x3fc9   : > { %13953 = vrot.lane.b32.xlu1 %v20979_v43, %s21722_s2 }
0x400f   : > { %v13945_v35 = vpop.xlane.xlu0 %13944 }
0x4010   : > { %19554 = vrcp.f32 %v13945_v35 }
0x401a   : > { %v19555_v20 = vpop.eup %19554 }
0x401b   : > { %v13950_v8 = vmul.f32 %v19555_v20, %v19553_v16  ;;  %v14252_v16 = vld [vmem:[%s19878_s28 + $0x108] sm:$0xff]  ;;  %v14257_v20 = vld [vmem:[%s19878_s28 + $0x1c0] sm:$0xff] }
0x4045   : > { %v13936_v27 = vpop.xlane.xlu1 %13935 }
0x4046   : > { %v13938_v38 = vsub.f32 %v13927_v17, %v13936_v27  ;;  %v14254_v17 = vld [vmem:[%s19878_s28 + $0x148] sm:$0xff]  ;;  %v14255_v27 = vld [vmem:[%s19878_s28 + $0x180] sm:$0xff] }
0x4047   : > { %v17450_v19 = vcombine.low %v14252_v16, %v14254_v17  ;;  %v17451_v35 = vcombine.high %v14252_v16, %v14254_v17 }
0x4048   : > { %v13941_v4 = vmul.f32 1.442695, %v13938_v38  ;;  %v14256_v38 = vld [vmem:[%s19878_s28 + $0x188] sm:$0xff] }
0x4049   : > { %v13954_v45 = vpop.permute.xlu1 %13953 }
0x404a   : > { %19556 = vpow2.f32 %v13941_v4  ;;  %18918 = vmatpush3.msra.mxu0 %v13954_v45  ;;  %v17453_v4 = vcombine.high %v14255_v27, %v14257_v20  ;;  %v17452_v45 = vcombine.low %v14255_v27, %v14257_v20  ;;  %v19303_v27 = vld [vmem:[%s19889_s29 + $0x180] sm:$0xff]   ;;  %v19304_v20 = vld [vmem:[%s19889_s29 + $0x148] sm:$0xff]  }
0x404b   : > { %18920 = vmatmul.mubr.msk.f32.vlgmr.msra.gmra.mrb[80].mxu0 %vm7362_vm7, %v13950_v8  ;;  %14364 = vmatprep.subr.bf16.mxu0 %v17441_v21  ;;  %v14258_v8 = vld [vmem:[%s19878_s28 + $0x1c8] sm:$0xff] }
0x404c   : > { %14396 = vmatprep.mubr.bf16.mxu0 %v19634_v30  ;;  %14365 = vmatpush1.bf16.msra.mxu0 %v17440_v57  ;;  %v14535_v57 = vld [vmem:[%s19878_s28 + $0x118] sm:$0xff] }
0x404d   : > { %14366 = vmatprep.subr.bf16.mxu0 %v17445_v12  ;;  %v14538_v12 = vld [vmem:[%s19878_s28 + $0x190] sm:$0xff] }
0x404e   : > { %v17471_v31 = vcombine.high %v14538_v12, %v14540_v49 }
0x4050   : > { %14367 = vmatpush1.bf16.msra.mxu0 %v17444_v13  ;;  %v14539_v13 = vld [vmem:[%s19878_s28 + $0x198] sm:$0xff] }
0x4051   : > { %14368 = vmatprep.subr.bf16.mxu0 %v17449_v33  ;;  %v17470_v33 = vcombine.low %v14538_v12, %v14540_v49 }
0x4054   : > { %v19557_v40 = vpop.eup %19556  ;;  %14369 = vmatpush1.bf16.msra.mxu0 %v17448_v18  ;;  %v19300_v18 = vld [vmem:[%s19889_s29 + $0x140] sm:$0xff]  }
0x4055   : > { %v13946_v47 = vsel %vm7362_vm7, %v19557_v40, 0.0  ;;  %14370 = vmatprep.subr.bf16.mxu0 %v17453_v4  ;;  %v19306_v4 = vld [vmem:[%s19889_s29 + $0x108] sm:$0xff]  }
0x4056   : > { %13947 = vadd.xlane.f32.xlu0 %v13946_v47  ;;  %v17455_v47 = vcombine.high %v14256_v38, %v14258_v8 }
0x4058   : > { %14371 = vmatpush1.bf16.msra.mxu0 %v17452_v45  ;;  %v19308_v45 = vld [vmem:[%s19889_s29 + $0x150] sm:$0xff]  }
0x406c   : > { %14029 = vrot.lane.b32.xlu0 %v20981_v46, %s21722_s2  ;;  %v17437_v46 = vld [vmem:[%s21723_s11] ss:$0 sm:$0xff] }
0x40e3   : > { %v13948_v43 = vpop.xlane.xlu0 %13947 }
0x40e4   : > { %19558 = vrcp.f32 %v13948_v43  ;;  %v14526_v43 = vld [vmem:[%s19878_s28 + $0x10] sm:$0xff] }
0x40e7   : > { %v14030_v50 = vpop.permute.xlu0 %14029 }
0x40e8   : > { %18923 = vmatpush3.msra.mxu1 %v14030_v50  ;;  %v14527_v50 = vld [vmem:[%s19878_s28 + $0x18] sm:$0xff] }
0x40e9   : > { %18927 = vmatprep.subr.mxu1 %v10738_v41 }
0x40ee   : > { %v19559_v42 = vpop.eup %19558 }
0x40ef   : > { %v13952_v54 = vmul.f32 %v19559_v42, %v19557_v40  ;;  %v17454_v40 = vcombine.low %v14256_v38, %v14258_v8  ;;  %v19305_v38 = vld [vmem:[%s19889_s29 + $0x1c8] sm:$0xff]  }
0x40f0   : > { %v19307_v8 = vld [vmem:[%s19889_s29 + $0x188] sm:$0xff]  }
0x40f1   : > { %18925 = vmatmul.mubr.msk.f32.vlgmr.msra.gmra.mrb[60].mxu1 %vm7362_vm7, %v13952_v54 }
0x40f2   : > { %18928 = vmatpush3.msra.mxu1 %v10738_v41  ;;  %v14528_v41 = vld [vmem:[%s19878_s28 + $0x50] sm:$0xff] }
0x40f3   : > { %14407 = vmatprep.subr.bf16.mxu1 %v17443_v11  ;;  %v17458_v42 = vcombine.low %v14526_v43, %v14528_v41  ;;  %v17459_v54 = vcombine.high %v14526_v43, %v14528_v41  ;;  %v19311_v43 = vld [vmem:[%s19889_s29 + $0x190] sm:$0xff]   ;;  %v19312_v41 = vld [vmem:[%s19889_s29 + $0x158] sm:$0xff]  }
0x40f5   : > { %14644 = vmatprep.subr.bf16.mxu0 %v17459_v54  ;;  %v19315_v54 = vld [vmem:[%s19889_s29 + $0x198] sm:$0xff]  }
0x411e   : > { %v14025_v24 = vpop.f32.mrb[80].mxu0 }
0x411f   : > { %v18921_v62 = vpop.f32.mrb[81].mxu0  ;;  %18929 = vmatprep.mubr.msk.f32.mxu1 %vm7362_vm7, %v14025_v24  ;;  %v14529_v24 = vld [vmem:[%s19878_s28 + $0x58] sm:$0xff] }
0x4120   : > { %v17460_v62 = vcombine.low %v14527_v50, %v14529_v24 }
0x41c4   : > { %v14101_v53 = vpop.f32.mrb[60].mxu1 }
0x41c5   : > { %v18926_v56 = vpop.f32.mrb[61].mxu1  ;;  %18930 = vmatmul.mubr.msk.f32.vlgmr.msra.gmra.mrb[42].mxu1 %vm7362_vm7, %v14101_v53  ;;  %v17461_v53 = vcombine.high %v14527_v50, %v14529_v24  ;;  %v19313_v50 = vld [vmem:[%s19889_s29 + $0x1d8] sm:$0xff]   ;;  %v19316_v24 = vld [vmem:[%s19889_s29 + $0x160] sm:$0xff]  }
0x41c6   : > { %14439 = vmatprep.mubr.bf16.mxu1 %v19634_v30  ;;  %14408 = vmatpush1.bf16.msra.mxu1 %v17442_v10  ;;  %v14537_v10 = vld [vmem:[%s19878_s28 + $0x158] sm:$0xff] }
0x41c7   : > { %14409 = vmatprep.subr.bf16.mxu1 %v17447_v52  ;;  %v17469_v60 = vcombine.high %v14535_v57, %v14537_v10  ;;  %v17468_v15 = vcombine.low %v14535_v57, %v14537_v10 }
0x41ca   : > { %14410 = vmatpush1.bf16.msra.mxu1 %v17446_v14  ;;  %v14541_v14 = vld [vmem:[%s19878_s28 + $0x1d8] sm:$0xff] }
0x41cb   : > { %14411 = vmatprep.subr.bf16.mxu1 %v17451_v35  ;;  %v17473_v16 = vcombine.high %v14539_v13, %v14541_v14  ;;  %v17472_v17 = vcombine.low %v14539_v13, %v14541_v14  ;;  %v19302_v35 = vld [vmem:[%s19889_s29 + $0x100] sm:$0xff]  }
0x41ce   : > { %14412 = vmatpush1.bf16.msra.mxu1 %v17450_v19  ;;  %v19301_v19 = vld [vmem:[%s19889_s29 + $0x1c0] sm:$0xff]  }
0x41cf   : > { %14413 = vmatprep.subr.bf16.mxu1 %v17455_v47  ;;  %v19310_v47 = vld [vmem:[%s19889_s29 + $0x110] sm:$0xff]  }
0x41d2   : > { %14414 = vmatpush1.bf16.msra.mxu1 %v17454_v40  ;;  %v19309_v40 = vld [vmem:[%s19889_s29 + $0x1d0] sm:$0xff]  }
0x41d3   : > { %14687 = vmatprep.subr.bf16.mxu1 %v17461_v53  ;;  %v19318_v53 = vld [vmem:[%s19889_s29 + $0x120] sm:$0xff]  }
0x4298   : > { %v18931_v59 = vpop.f32.mrb[42].mxu1 }
0x4299   : > { %v14195_v48 = vadd.f32 %v18931_v59, %v17437_v46  ;;  %v14177_v55 = vpop.f32.mrb[43].mxu1 }
0x429a   : > { %v14194_v63 = vadd.f32 %v17437_v46, %v14177_v55 }
0x429b   : > { %v14197_v2 = vadd.f32 %v14195_v48, %v20967_v51 }
0x429c   : > { %v14196_v5 = vadd.f32 %v14194_v63, %v20969_v39 }
0x429d   : > { %v14203_v58 = vsel %vm7310_vm5, %v14197_v2, 0.0 }
0x429e   : > { %14204 = vadd.xlane.f32.xlu0 %v14203_v58  ;;  %v14200_v1 = vsel %vm7310_vm5, %v14196_v5, 0.0 }
0x429f   : > { %14201 = vadd.xlane.f32.xlu1 %v14200_v1 }
0x432b   : > { %v14205_v6 = vpop.xlane.xlu0 %14204 }
0x432c   : > { %v14207_v32 = vmul.f32 0.015625, %v14205_v6  ;;  %v14202_v29 = vpop.xlane.xlu1 %14201  ;;  %v17439_v6 = vld [vmem:[%s21725_s22] ss:$0 sm:$0xff] }
0x432d   : > { %v14206_v22 = vmul.f32 0.015625, %v14202_v29 }
0x432e   : > { %v21291_v23 = vsub.f32 %v14197_v2, %v14207_v32 }
0x432f   : > { %v21293_v25 = vsub.f32 %v14196_v5, %v14206_v22  ;;  %v17438_v5 = vld [vmem:[%s21724_s15] ss:$0 sm:$0xff] }
0x4330   : > { %v14211_v51 = vmul.f32 %v21291_v23, %v21291_v23 }
0x4331   : > { %v14210_v39 = vmul.f32 %v21293_v25, %v21293_v25 }
0x4332   : > { %v14215_v28 = vsel %vm7310_vm5, %v14211_v51, 0.0  ;;  %v14530_v51 = vld [vmem:[%s19878_s28 + $0x90] sm:$0xff] }
0x4333   : > { %14216 = vadd.xlane.f32.xlu0 %v14215_v28  ;;  %v14212_v61 = vsel %vm7310_vm5, %v14210_v39, 0.0  ;;  %v14532_v28 = vld [vmem:[%s19878_s28 + $0xd0] sm:$0xff] }
0x4334   : > { %14213 = vadd.xlane.f32.xlu1 %v14212_v61  ;;  %v14531_v61 = vld [vmem:[%s19878_s28 + $0x98] sm:$0xff]  ;;  %v17462_v11 = vcombine.low %v14530_v51, %v14532_v28 }
0x4335   : > { %v17465_v21 = vcombine.high %v14531_v61, %v14533_v36  ;;  %v17464_v44 = vcombine.low %v14531_v61, %v14533_v36  ;;  %v14259_v61 = vld [vmem:[%s19881_s26] sm:$0xf]  ;;  %v21398_v36 = vsub.s32 3, %v20589_v26 }
0x43c0   : > { %v14217_v56 = vpop.xlane.xlu0 %14216 }
0x43c1   : > { %v14219_v46 = vmul.f32 0.015625, %v14217_v56  ;;  %v14214_v59 = vpop.xlane.xlu1 %14213  ;;  %v19319_v56 = vld [vmem:[%s19889_s29 + $0x1a0] sm:$0xff]  }
0x43c2   : > { %v14218_v48 = vmul.f32 0.015625, %v14214_v59  ;;  %v19321_v59 = vld [vmem:[%s19889_s29 + $0x1e8] sm:$0xff]  }
0x43c3   : > { %v14221_v55 = vadd.f32 1e-05, %v14219_v46  ;;  %v19320_v46 = vld [vmem:[%s19889_s29 + $0x168] sm:$0xff]  }
0x43c4   : > { %v14220_v63 = vadd.f32 1e-05, %v14218_v48  ;;  %v19322_v48 = vld [vmem:[%s19889_s29 + $0x128] sm:$0xff]  }
0x43c5   : > { %19560 = vrsqrt.f32 %v14221_v55  ;;  %v19323_v55 = vld [vmem:[%s19889_s29 + $0x1a8] sm:$0xff]  }
0x43c6   : > { %19562 = vrsqrt.f32 %v14220_v63  ;;  %v19324_v63 = vld [vmem:[%s19889_s29 + $0x170] sm:$0xff]  }
0x43cf   : > { %v19561_v2 = vpop.eup %19560 }
0x43d0   : > { %v19563_v58 = vpop.eup %19562  ;;  %v14225_v1 = vmul.f32 %v19561_v2, %v21291_v23  ;;  %v17463_v23 = vcombine.high %v14530_v51, %v14532_v28  ;;  %v19325_v2 = vld [vmem:[%s19889_s29 + $0x1f0] sm:$0xff]   ;;  %v19333_v51 = vld [vmem:[%s19889_s29 + $0xc0] sm:$0xff]   ;;  %v21394_v28 = vsub.s32 2, %v20589_v26 }
0x43d1   : > { %v14224_v32 = vmul.f32 %v19563_v58, %v21293_v25  ;;  %v14536_v25 = vld [vmem:[%s19878_s28 + $0x150] sm:$0xff] }
0x43d2   : > { %v14233_v29 = vmul.f32 %v17438_v5, %v14225_v1  ;;  %v17467_v3 = vcombine.high %v14534_v9, %v14536_v25  ;;  %v17466_v52 = vcombine.low %v14534_v9, %v14536_v25  ;;  %v19327_v58 = vld [vmem:[%s19889_s29 + $0x1b0] sm:$0xff]   ;;  %v19328_v1 = vld [vmem:[%s19889_s29 + $0x178] sm:$0xff]   ;;  %v14268_v9 = vrot.slane %v14259_v61, %v20601_v37 }
0x43d3   : > { %v14232_v22 = vmul.f32 %v17438_v5, %v14224_v32  ;;  %v19326_v5 = vld [vmem:[%s19889_s29 + $0x130] sm:$0xff]   ;;  %v19330_v32 = vld [vmem:[%s19889_s29 + $0x138] sm:$0xff]   ;;  %v14276_v25 = vrot.slane %v14259_v61, %v21398_v36 }
0x43d4   : > { %v21330_v39 = vadd.f32 %v17439_v6, %v14233_v29  ;;  %v19331_v29 = vld [vmem:[%s19889_s29 + $0x1b8] sm:$0xff]  }
0x43d5   : > { %v21335_v0 = vadd.f32 %v17439_v6, %v14232_v22  ;;  %v19329_v6 = vld [vmem:[%s19889_s29 + $0x1f8] sm:$0xff]   ;;  %v19332_v22 = vld [vmem:[%s19889_s29 + $0x40] sm:$0xff]  }
0x43d7   : > { %v21339_v7 = vpack.c.bf16 %v21330_v39, %v21335_v0 }
0x43d9   : > { %17456 = vmatmul.mubr.msk.bf16.vlgmr.msra.gmra.mrb[84].mxu0 %vm7310_vm5, %v21339_v7  ;;  %17457 = vmatmul.mubr.msk.bf16.vlgmr.msra.gmra.mrb[64].mxu1 %vm7310_vm5, %v21339_v7 }
0x43da   : > { %14645 = vmatpush1.bf16.msra.mxu0 %v17458_v42  ;;  %14688 = vmatpush1.bf16.msra.mxu1 %v17460_v62  ;;  %v19314_v42 = vld [vmem:[%s19889_s29 + $0x118] sm:$0xff]   ;;  %v19317_v62 = vld [vmem:[%s19889_s29 + $0x1e0] sm:$0xff]  }
0x43db   : > { %14646 = vmatprep.subr.bf16.mxu0 %v17463_v23  ;;  %14689 = vmatprep.subr.bf16.mxu1 %v17465_v21  ;;  %v14264_v23 = vrot.slane %v14259_v61, %v20596_v34  ;;  %v14272_v21 = vrot.slane %v14259_v61, %v21394_v28 }
0x43dc   : > { %14676 = vmatprep.mubr.bf16.mxu0 %v19634_v30  ;;  %14719 = vmatprep.mubr.bf16.mxu1 %v19634_v30 }
0x43de   : > { %14647 = vmatpush1.bf16.msra.mxu0 %v17462_v11  ;;  %14690 = vmatpush1.bf16.msra.mxu1 %v17464_v44 }
0x43df   : > { %14648 = vmatprep.subr.bf16.mxu0 %v17467_v3  ;;  %14691 = vmatprep.subr.bf16.mxu1 %v17469_v60 }
0x43e2   : > { %14649 = vmatpush1.bf16.msra.mxu0 %v17466_v52  ;;  %14692 = vmatpush1.bf16.msra.mxu1 %v17468_v15 }
0x43e3   : > { %14650 = vmatprep.subr.bf16.mxu0 %v17471_v31  ;;  %14693 = vmatprep.subr.bf16.mxu1 %v17473_v16 }
0x43e6   : > { %14651 = vmatpush1.bf16.msra.mxu0 %v17470_v33  ;;  %14694 = vmatpush1.bf16.msra.mxu1 %v17472_v17 }
0x43e7   : > { %18127 = vmatprep.subr.bf16.mxu0 %v19300_v18  ;;  %18149 = vmatprep.subr.bf16.mxu1 %v19301_v19 }
0x43e9   : > { %17474 = vmatmul.mubr.msk.bf16.vlgmr.msra.gmra.mrb[88].mxu0 %vm7310_vm5, %v21339_v7  ;;  %17475 = vmatmul.mubr.msk.bf16.vlgmr.msra.gmra.mrb[68].mxu1 %vm7310_vm5, %v21339_v7 }
0x43ea   : > { %18128 = vmatpush3.bf16.msra.mxu0 %v19302_v35  ;;  %18150 = vmatpush3.bf16.msra.mxu1 %v19303_v27 }
0x43eb   : > { %18129 = vmatprep.subr.bf16.mxu0 %v19304_v20  ;;  %18151 = vmatprep.subr.bf16.mxu1 %v19305_v38 }
0x43ee   : > { %18130 = vmatpush3.bf16.msra.mxu0 %v19306_v4  ;;  %18152 = vmatpush3.bf16.msra.mxu1 %v19307_v8 }
0x43ef   : > { %18131 = vmatprep.subr.bf16.mxu0 %v19308_v45  ;;  %18153 = vmatprep.subr.bf16.mxu1 %v19309_v40 }
0x43f2   : > { %18132 = vmatpush3.bf16.msra.mxu0 %v19310_v47  ;;  %18154 = vmatpush3.bf16.msra.mxu1 %v19311_v43  ;;  %v14542_v43 = vld [vmem:[%s19881_s26 + $0x4] sm:$0xf] }
0x43f3   : > { %18133 = vmatprep.subr.bf16.mxu0 %v19312_v41  ;;  %18155 = vmatprep.subr.bf16.mxu1 %v19313_v50  ;;  %v14547_v41 = vrot.slane %v14542_v43, %v20596_v34  ;;  %v14555_v50 = vrot.slane %v14542_v43, %v21394_v28 }
0x43f6   : > { %18134 = vmatpush3.bf16.msra.mxu0 %v19314_v42  ;;  %18156 = vmatpush3.bf16.msra.mxu1 %v19315_v54  ;;  %v14551_v42 = vrot.slane %v14542_v43, %v20601_v37  ;;  %v14559_v54 = vrot.slane %v14542_v43, %v21398_v36  ;;  %v19355_v43 = vld [vmem:[%s19889_s29 + $0xa8] sm:$0xff]  }
0x43f7   : > { %18135 = vmatprep.subr.bf16.mxu0 %v19316_v24  ;;  %18157 = vmatprep.subr.bf16.mxu1 %v19317_v62 }
0x43fa   : > { %18136 = vmatpush3.bf16.msra.mxu0 %v19318_v53  ;;  %18158 = vmatpush3.bf16.msra.mxu1 %v19319_v56 }
0x43fb   : > { %18137 = vmatprep.subr.bf16.mxu0 %v19320_v46  ;;  %18159 = vmatprep.subr.bf16.mxu1 %v19321_v59 }
0x43fe   : > { %18138 = vmatpush3.bf16.msra.mxu0 %v19322_v48  ;;  %18160 = vmatpush3.bf16.msra.mxu1 %v19323_v55 }
0x43ff   : > { %18139 = vmatprep.subr.bf16.mxu0 %v19324_v63  ;;  %18161 = vmatprep.subr.bf16.mxu1 %v19325_v2 }
0x4402   : > { %18140 = vmatpush3.bf16.msra.mxu0 %v19326_v5  ;;  %18162 = vmatpush3.bf16.msra.mxu1 %v19327_v58 }
0x4403   : > { %18141 = vmatprep.subr.bf16.mxu0 %v19328_v1  ;;  %18163 = vmatprep.subr.bf16.mxu1 %v19329_v6 }
0x4406   : > { %18142 = vmatpush3.bf16.msra.mxu0 %v19330_v32  ;;  %18164 = vmatpush3.bf16.msra.mxu1 %v19331_v29 }
0x4407   : > { %18171 = vmatprep.subr.bf16.mxu0 %v19332_v22  ;;  %18193 = vmatprep.subr.bf16.mxu1 %v19333_v51 }
0x44ac   : > { %v14398_v57 = vpop.f32.mrb[84].mxu0  ;;  %v14441_v10 = vpop.f32.mrb[64].mxu1 }
0x44ad   : > { %v14399_v11 = vadd.f32 %v14398_v57, %v14264_v23  ;;  %v14442_v44 = vadd.f32 %v14441_v10, %v14272_v21  ;;  %v14400_v3 = vpop.f32.mrb[85].mxu0  ;;  %v14443_v60 = vpop.f32.mrb[65].mxu1 }
0x44ae   : > { %v14401_v12 = vadd.f32 %v14400_v3, %v14268_v9  ;;  %v14444_v49 = vadd.f32 %v14443_v60, %v14276_v25  ;;  %v14402_v13 = vpop.f32.mrb[86].mxu0  ;;  %v14445_v14 = vpop.f32.mrb[66].mxu1  ;;  %v19334_v60 = vld [vmem:[%s19889_s29] sm:$0xff]  }
0x44af   : > { %v14403_v26 = vadd.f32 %v14402_v13, %v14264_v23  ;;  %v14446_v52 = vadd.f32 %v14445_v14, %v14272_v21  ;;  %v14404_v15 = vpop.f32.mrb[87].mxu0  ;;  %v14447_v31 = vpop.f32.mrb[67].mxu1  ;;  %v14450_v17 = vmax.f32 %v14399_v11, 0.0  ;;  %v14452_v18 = vmax.f32 %v14442_v44, 0.0  ;;  %v19337_v13 = vld [vmem:[%s19889_s29 + $0xc8] sm:$0xff]  }
0x44b0   : > { %v14405_v16 = vadd.f32 %v14404_v15, %v14268_v9  ;;  %v14448_v33 = vadd.f32 %v14447_v31, %v14276_v25  ;;  %v14451_v27 = vmax.f32 %v14401_v12, 0.0  ;;  %v14453_v20 = vmax.f32 %v14444_v49, 0.0  ;;  %v19335_v12 = vld [vmem:[%s19889_s29 + $0x80] sm:$0xff]   ;;  %v19336_v49 = vld [vmem:[%s19889_s29 + $0x48] sm:$0xff]   ;;  %v19341_v15 = vld [vmem:[%s19889_s29 + $0xd0] sm:$0xff]  }
0x44b1   : > { %v14454_v19 = vmax.f32 %v14403_v26, 0.0  ;;  %v14456_v35 = vmax.f32 %v14446_v52, 0.0  ;;  %v19338_v14 = vld [vmem:[%s19889_s29 + $0x8] sm:$0xff]   ;;  %v19340_v52 = vld [vmem:[%s19889_s29 + $0x50] sm:$0xff]  }
0x44b2   : > { %v14455_v38 = vmax.f32 %v14405_v16, 0.0  ;;  %v14457_v4 = vmax.f32 %v14448_v33, 0.0  ;;  %v19339_v26 = vld [vmem:[%s19889_s29 + $0x88] sm:$0xff]   ;;  %v19342_v31 = vld [vmem:[%s19889_s29 + $0x10] sm:$0xff]   ;;  %v19344_v33 = vld [vmem:[%s19889_s29 + $0x58] sm:$0xff]  }
0x44b3   : > { %v21404_v8 = vpack.c.bf16 %v14454_v19, %v14450_v17  ;;  %v21406_v45 = vpack.c.bf16 %v14456_v35, %v14452_v18  ;;  %v19343_v16 = vld [vmem:[%s19889_s29 + $0x90] sm:$0xff]   ;;  %v19345_v17 = vld [vmem:[%s19889_s29 + $0xd8] sm:$0xff]   ;;  %v19348_v35 = vld [vmem:[%s19889_s29 + $0x60] sm:$0xff]  }
0x44b4   : > { %v14459_v40 = vpack.c.bf16 %v14455_v38, %v14451_v27  ;;  %v14461_v47 = vpack.c.bf16 %v14457_v4, %v14453_v20  ;;  %v19346_v18 = vld [vmem:[%s19889_s29 + $0x18] sm:$0xff]   ;;  %v19349_v27 = vld [vmem:[%s19889_s29 + $0xe0] sm:$0xff]   ;;  %v19352_v4 = vld [vmem:[%s19889_s29 + $0x68] sm:$0xff]  }
0x44b5   : > { %v19347_v19 = vld [vmem:[%s19889_s29 + $0x98] sm:$0xff]   ;;  %v19350_v20 = vld [vmem:[%s19889_s29 + $0x20] sm:$0xff]  }
0x44b6   : > { %v19351_v38 = vld [vmem:[%s19889_s29 + $0xa0] sm:$0xff]  }
0x44bc   : > { %v14678_v24 = vpop.f32.mrb[88].mxu0  ;;  %v14721_v62 = vpop.f32.mrb[68].mxu1 }
0x44bd   : > { %v14679_v53 = vadd.f32 %v14678_v24, %v14547_v41  ;;  %v14722_v56 = vadd.f32 %v14721_v62, %v14555_v50  ;;  %v14680_v46 = vpop.f32.mrb[89].mxu0  ;;  %v14723_v59 = vpop.f32.mrb[69].mxu1  ;;  %v19360_v24 = vld [vmem:[%s19889_s29 + $0x78] sm:$0xff]  }
0x44be   : > { %v14681_v48 = vadd.f32 %v14680_v46, %v14551_v42  ;;  %v14724_v55 = vadd.f32 %v14723_v59, %v14559_v54  ;;  %v14682_v63 = vpop.f32.mrb[90].mxu0  ;;  %v14725_v2 = vpop.f32.mrb[70].mxu1  ;;  %v19361_v62 = vld [vmem:[%s19889_s29 + $0xf8] sm:$0xff]   ;;  %v15355_v46 = vld [vmem:[%s19878_s28 + $0x28] sm:$0xff] }
0x44bf   : > { %v14683_v5 = vadd.f32 %v14682_v63, %v14547_v41  ;;  %v14726_v58 = vadd.f32 %v14725_v2, %v14555_v50  ;;  %v14684_v1 = vpop.f32.mrb[91].mxu0  ;;  %v14727_v6 = vpop.f32.mrb[71].mxu1  ;;  %v14730_v22 = vmax.f32 %v14679_v53, 0.0  ;;  %v14732_v51 = vmax.f32 %v14722_v56, 0.0  ;;  %v19356_v41 = vld [vmem:[%s19889_s29 + $0x70] sm:$0xff]   ;;  %v15354_v53 = vld [vmem:[%s19878_s28 + $0x20] sm:$0xff] }
0x44c0   : > { %v14685_v32 = vadd.f32 %v14684_v1, %v14551_v42  ;;  %v14728_v29 = vadd.f32 %v14727_v6, %v14559_v54  ;;  %v14731_v21 = vmax.f32 %v14681_v48, 0.0  ;;  %v14733_v9 = vmax.f32 %v14724_v55, 0.0  ;;  %v19357_v50 = vld [vmem:[%s19889_s29 + $0xf0] sm:$0xff]   ;;  %v15356_v56 = vld [vmem:[%s19878_s28 + $0x60] sm:$0xff]  ;;  %v15357_v59 = vld [vmem:[%s19878_s28 + $0x68] sm:$0xff] }
0x44c1   : > { %v14734_v61 = vmax.f32 %v14683_v5, 0.0  ;;  %v14736_v23 = vmax.f32 %v14726_v58, 0.0  ;;  %v19358_v42 = vld [vmem:[%s19889_s29 + $0x30] sm:$0xff]   ;;  %v19362_v48 = vld [vmem:[%s19889_s29 + $0x38] sm:$0xff]   ;;  %v17541_v63 = vcombine.high %v15354_v53, %v15356_v56  ;;  %v17543_v2 = vcombine.high %v15355_v46, %v15357_v59  ;;  %v15358_v5 = vld [vmem:[%s19878_s28 + $0xa0] sm:$0xff] }
0x44c2   : > { %v14735_v25 = vmax.f32 %v14685_v32, 0.0  ;;  %v14737_v57 = vmax.f32 %v14728_v29, 0.0  ;;  %v19359_v54 = vld [vmem:[%s19889_s29 + $0xb0] sm:$0xff]   ;;  %v19363_v55 = vld [vmem:[%s19889_s29 + $0xb8] sm:$0xff]   ;;  %v15360_v58 = vld [vmem:[%s19878_s28 + $0xe0] sm:$0xff]  ;;  %v17540_v32 = vcombine.low %v15354_v53, %v15356_v56  ;;  %v17542_v29 = vcombine.low %v15355_v46, %v15357_v59 }
0x44c3   : > { %v14738_v10 = vpack.c.bf16 %v14734_v61, %v14730_v22  ;;  %v14740_v11 = vpack.c.bf16 %v14736_v23, %v14732_v51  ;;  %v15359_v1 = vld [vmem:[%s19878_s28 + $0xa8] sm:$0xff]  ;;  %v17545_v22 = vcombine.high %v15358_v5, %v15360_v58  ;;  %v15362_v61 = vld [vmem:[%s19878_s28 + $0x120] sm:$0xff]  ;;  %v19388_v46 = vld [vmem:[%s19889_s29 + $0x270] sm:$0xff]  }
0x44c4   : > { %v14739_v44 = vpack.c.bf16 %v14735_v25, %v14731_v21  ;;  %v14741_v3 = vpack.c.bf16 %v14737_v57, %v14733_v9  ;;  %v15361_v6 = vld [vmem:[%s19878_s28 + $0xe8] sm:$0xff]  ;;  %v15364_v23 = vld [vmem:[%s19878_s28 + $0x160] sm:$0xff]  ;;  %v17544_v25 = vcombine.low %v15358_v5, %v15360_v58  ;;  %v19389_v59 = vld [vmem:[%s19889_s29 + $0x2f0] sm:$0xff]  }
0x44c5   : > { %v17547_v51 = vcombine.high %v15359_v1, %v15361_v6  ;;  %v15363_v21 = vld [vmem:[%s19878_s28 + $0x128] sm:$0xff]  ;;  %v17546_v57 = vcombine.low %v15359_v1, %v15361_v6  ;;  %v19394_v5 = vld [vmem:[%s19889_s29 + $0x238] sm:$0xff]   ;;  %v21500_v1 = vld [vmem:[%s19878_s28 + $0x30] sm:$0xff] }
0x44c6   : > { %15030 = vmatprep.mubr.bf16.mxu0 %v14739_v44  ;;  %15071 = vmatprep.mubr.bf16.mxu1 %v14741_v3  ;;  %v15365_v9 = vld [vmem:[%s19878_s28 + $0x168] sm:$0xff]  ;;  %v15366_v44 = vld [vmem:[%s19878_s28 + $0x1a0] sm:$0xff]  ;;  %v19395_v58 = vld [vmem:[%s19889_s29 + $0x2b8] sm:$0xff]  }
0x44c7   : > { %15031 = vmatmul.mubr.bf16.vlgmr.msra.gmra.mrb[92].mxu0 %v14738_v10  ;;  %15072 = vmatmul.mubr.bf16.vlgmr.msra.gmra.mrb[72].mxu1 %v14740_v11  ;;  %v17549_v10 = vcombine.high %v15362_v61, %v15364_v23  ;;  %v17551_v11 = vcombine.high %v15363_v21, %v15365_v9  ;;  %v15368_v3 = vld [vmem:[%s19878_s28 + $0x1e0] sm:$0xff]  ;;  %v19386_v53 = vld [vmem:[%s19889_s29 + $0x228] sm:$0xff]   ;;  %v21503_v6 = vld [vmem:[%s19878_s28 + $0x70] sm:$0xff] }
0x44c8   : > { %18172 = vmatpush3.bf16.msra.mxu0 %v19334_v60  ;;  %18194 = vmatpush3.bf16.msra.mxu1 %v19335_v12  ;;  %v15367_v60 = vld [vmem:[%s19878_s28 + $0x1a8] sm:$0xff] }
0x44c9   : > { %15304 = vmatprep.mubr.bf16.mxu0 %v14459_v40  ;;  %15345 = vmatprep.mubr.bf16.mxu1 %v14461_v47  ;;  %v19353_v40 = vld [vmem:[%s19889_s29 + $0xe8] sm:$0xff]  }
0x44ca   : > { %18173 = vmatprep.subr.bf16.mxu0 %v19336_v49  ;;  %18195 = vmatprep.subr.bf16.mxu1 %v19337_v13  ;;  %v19354_v47 = vld [vmem:[%s19889_s29 + $0x28] sm:$0xff]   ;;  %v17553_v49 = vcombine.high %v15366_v44, %v15368_v3 }
0x44cb   : > { %v15369_v12 = vld [vmem:[%s19878_s28 + $0x1e8] sm:$0xff] }
0x44cc   : > { %18174 = vmatpush3.bf16.msra.mxu0 %v19338_v14  ;;  %18196 = vmatpush3.bf16.msra.mxu1 %v19339_v26  ;;  %v17555_v13 = vcombine.high %v15367_v60, %v15369_v12  ;;  %v17552_v14 = vcombine.low %v15366_v44, %v15368_v3  ;;  %v17554_v26 = vcombine.low %v15367_v60, %v15369_v12  ;;  %v19387_v56 = vld [vmem:[%s19889_s29 + $0x2a8] sm:$0xff]  }
0x44cd   : > { %18175 = vmatprep.subr.bf16.mxu0 %v19340_v52  ;;  %18197 = vmatprep.subr.bf16.mxu1 %v19341_v15  ;;  %v19364_v52 = vld [vmem:[%s19889_s29 + $0x240] sm:$0xff]  }
0x44ce   : > { %v19365_v15 = vld [vmem:[%s19889_s29 + $0x2c0] sm:$0xff]  }
0x44d0   : > { %18176 = vmatpush3.bf16.msra.mxu0 %v19342_v31  ;;  %18198 = vmatpush3.bf16.msra.mxu1 %v19343_v16  ;;  %v19366_v31 = vld [vmem:[%s19889_s29 + $0x200] sm:$0xff]  }
0x44d1   : > { %18177 = vmatprep.subr.bf16.mxu0 %v19344_v33  ;;  %18199 = vmatprep.subr.bf16.mxu1 %v19345_v17  ;;  %v19367_v16 = vld [vmem:[%s19889_s29 + $0x280] sm:$0xff]   ;;  %v19368_v33 = vld [vmem:[%s19889_s29 + $0x248] sm:$0xff]  }
0x44d2   : > { %v19369_v17 = vld [vmem:[%s19889_s29 + $0x2c8] sm:$0xff]  }
0x44d4   : > { %18178 = vmatpush3.bf16.msra.mxu0 %v19346_v18  ;;  %18200 = vmatpush3.bf16.msra.mxu1 %v19347_v19  ;;  %v19370_v18 = vld [vmem:[%s19889_s29 + $0x208] sm:$0xff]  }
0x44d5   : > { %18179 = vmatprep.subr.bf16.mxu0 %v19348_v35  ;;  %18201 = vmatprep.subr.bf16.mxu1 %v19349_v27  ;;  %v19371_v19 = vld [vmem:[%s19889_s29 + $0x288] sm:$0xff]   ;;  %v19372_v35 = vld [vmem:[%s19889_s29 + $0x250] sm:$0xff]  }
0x44d6   : > { %v19373_v27 = vld [vmem:[%s19889_s29 + $0x2d0] sm:$0xff]  }
0x44d8   : > { %18180 = vmatpush3.bf16.msra.mxu0 %v19350_v20  ;;  %18202 = vmatpush3.bf16.msra.mxu1 %v19351_v38  ;;  %v19374_v20 = vld [vmem:[%s19889_s29 + $0x210] sm:$0xff]  }
0x44d9   : > { %18181 = vmatprep.subr.bf16.mxu0 %v19352_v4  ;;  %18203 = vmatprep.subr.bf16.mxu1 %v19353_v40  ;;  %v19375_v38 = vld [vmem:[%s19889_s29 + $0x290] sm:$0xff]   ;;  %v19376_v4 = vld [vmem:[%s19889_s29 + $0x258] sm:$0xff]  }
0x44da   : > { %v19377_v40 = vld [vmem:[%s19889_s29 + $0x2d8] sm:$0xff]  }
0x44dc   : > { %18182 = vmatpush3.bf16.msra.mxu0 %v19354_v47  ;;  %18204 = vmatpush3.bf16.msra.mxu1 %v19355_v43  ;;  %v19378_v47 = vld [vmem:[%s19889_s29 + $0x218] sm:$0xff]  }
0x44dd   : > { %18183 = vmatprep.subr.bf16.mxu0 %v19356_v41  ;;  %18205 = vmatprep.subr.bf16.mxu1 %v19357_v50  ;;  %v19379_v43 = vld [vmem:[%s19889_s29 + $0x298] sm:$0xff]   ;;  %v19380_v41 = vld [vmem:[%s19889_s29 + $0x260] sm:$0xff]  }
0x44de   : > { %v19381_v50 = vld [vmem:[%s19889_s29 + $0x2e0] sm:$0xff]  }
0x44e0   : > { %18184 = vmatpush3.bf16.msra.mxu0 %v19358_v42  ;;  %18206 = vmatpush3.bf16.msra.mxu1 %v19359_v54  ;;  %v19382_v42 = vld [vmem:[%s19889_s29 + $0x220] sm:$0xff]  }
0x44e1   : > { %18185 = vmatprep.subr.bf16.mxu0 %v19360_v24  ;;  %18207 = vmatprep.subr.bf16.mxu1 %v19361_v62  ;;  %v19383_v54 = vld [vmem:[%s19889_s29 + $0x2a0] sm:$0xff]   ;;  %v19384_v24 = vld [vmem:[%s19889_s29 + $0x268] sm:$0xff]  }
0x44e2   : > { %v19385_v62 = vld [vmem:[%s19889_s29 + $0x2e8] sm:$0xff]  }
0x44e4   : > { %18186 = vmatpush3.bf16.msra.mxu0 %v19362_v48  ;;  %18208 = vmatpush3.bf16.msra.mxu1 %v19363_v55  ;;  %v19390_v48 = vld [vmem:[%s19889_s29 + $0x230] sm:$0xff]  }
0x44e5   : > { %15472 = vmatprep.subr.bf16.mxu0 %v17541_v63  ;;  %15515 = vmatprep.subr.bf16.mxu1 %v17543_v2  ;;  %v19391_v55 = vld [vmem:[%s19889_s29 + $0x2b0] sm:$0xff]   ;;  %v19392_v63 = vld [vmem:[%s19889_s29 + $0x278] sm:$0xff]  }
0x44e6   : > { %v19393_v2 = vld [vmem:[%s19889_s29 + $0x2f8] sm:$0xff]  }
0x44e7   : > { %15305 = vmatmul.mubr.bf16.vlgmr.msra.gmra.mrb[96].mxu0 %v21404_v8  ;;  %15346 = vmatmul.mubr.bf16.vlgmr.msra.gmra.mrb[76].mxu1 %v21406_v45  ;;  %v17548_v8 = vcombine.low %v15362_v61, %v15364_v23  ;;  %v17550_v45 = vcombine.low %v15363_v21, %v15365_v9 }
0x44e8   : > { %15473 = vmatpush1.bf16.msra.mxu0 %v17540_v32  ;;  %15516 = vmatpush1.bf16.msra.mxu1 %v17542_v29  ;;  %v21506_v32 = vld [vmem:[%s19878_s28 + $0x38] sm:$0xff]  ;;  %v17591_v29 = vcombine.high %v21500_v1, %v21503_v6 }
0x44e9   : > { %15474 = vmatprep.subr.bf16.mxu0 %v17545_v22  ;;  %15517 = vmatprep.subr.bf16.mxu1 %v17547_v51  ;;  %v21511_v22 = vld [vmem:[%s19878_s28 + $0x78] sm:$0xff]  ;;  %v17590_v51 = vcombine.low %v21500_v1, %v21503_v6 }
0x44ea   : > { %15504 = vmatprep.mubr.bf16.mxu0 %v19634_v30  ;;  %15547 = vmatprep.mubr.bf16.mxu1 %v19634_v30  ;;  %v17592_v61 = vcombine.low %v21506_v32, %v21511_v22  ;;  %v17593_v23 = vcombine.high %v21506_v32, %v21511_v22 }
0x44ec   : > { %15475 = vmatpush1.bf16.msra.mxu0 %v17544_v25  ;;  %15518 = vmatpush1.bf16.msra.mxu1 %v17546_v57 }
0x44ed   : > { %15476 = vmatprep.subr.bf16.mxu0 %v17549_v10  ;;  %15519 = vmatprep.subr.bf16.mxu1 %v17551_v11 }
0x44f0   : > { %15477 = vmatpush1.bf16.msra.mxu0 %v17548_v8  ;;  %15520 = vmatpush1.bf16.msra.mxu1 %v17550_v45 }
0x44f1   : > { %15478 = vmatprep.subr.bf16.mxu0 %v17553_v49  ;;  %15521 = vmatprep.subr.bf16.mxu1 %v17555_v13 }
0x44f4   : > { %15479 = vmatpush1.bf16.msra.mxu0 %v17552_v14  ;;  %15522 = vmatpush1.bf16.msra.mxu1 %v17554_v26 }
0x44f5   : > { %18215 = vmatprep.subr.bf16.mxu0 %v19364_v52  ;;  %18237 = vmatprep.subr.bf16.mxu1 %v19365_v15 }
0x44f7   : > { %17556 = vmatmul.mubr.msk.bf16.vlgmr.msra.gmra.mrb[100].mxu0 %vm7310_vm5, %v21339_v7  ;;  %17557 = vmatmul.mubr.msk.bf16.vlgmr.msra.gmra.mrb[80].mxu1 %vm7310_vm5, %v21339_v7 }
0x44f8   : > { %18216 = vmatpush3.bf16.msra.mxu0 %v19366_v31  ;;  %18238 = vmatpush3.bf16.msra.mxu1 %v19367_v16 }
0x44f9   : > { %18217 = vmatprep.subr.bf16.mxu0 %v19368_v33  ;;  %18239 = vmatprep.subr.bf16.mxu1 %v19369_v17 }
0x44fc   : > { %18218 = vmatpush3.bf16.msra.mxu0 %v19370_v18  ;;  %18240 = vmatpush3.bf16.msra.mxu1 %v19371_v19 }
0x44fd   : > { %18219 = vmatprep.subr.bf16.mxu0 %v19372_v35  ;;  %18241 = vmatprep.subr.bf16.mxu1 %v19373_v27 }
0x4500   : > { %18220 = vmatpush3.bf16.msra.mxu0 %v19374_v20  ;;  %18242 = vmatpush3.bf16.msra.mxu1 %v19375_v38 }
0x4501   : > { %18221 = vmatprep.subr.bf16.mxu0 %v19376_v4  ;;  %18243 = vmatprep.subr.bf16.mxu1 %v19377_v40 }
0x4504   : > { %18222 = vmatpush3.bf16.msra.mxu0 %v19378_v47  ;;  %18244 = vmatpush3.bf16.msra.mxu1 %v19379_v43  ;;  %v15370_v47 = vld [vmem:[%s19881_s26 + $0x8] sm:$0xf] }
0x4505   : > { %18223 = vmatprep.subr.bf16.mxu0 %v19380_v41  ;;  %18245 = vmatprep.subr.bf16.mxu1 %v19381_v50  ;;  %v15375_v43 = vrot.slane %v15370_v47, %v20596_v34  ;;  %v15383_v41 = vrot.slane %v15370_v47, %v21394_v28  ;;  %v15379_v50 = vrot.slane %v15370_v47, %v20601_v37 }
0x4508   : > { %18224 = vmatpush3.bf16.msra.mxu0 %v19382_v42  ;;  %18246 = vmatpush3.bf16.msra.mxu1 %v19383_v54  ;;  %v15387_v42 = vrot.slane %v15370_v47, %v21398_v36  ;;  %v15924_v47 = vld [vmem:[%s19878_s28 + $0x1f0] sm:$0xff] }
0x4509   : > { %18225 = vmatprep.subr.bf16.mxu0 %v19384_v24  ;;  %18247 = vmatprep.subr.bf16.mxu1 %v19385_v62 }
0x450c   : > { %18226 = vmatpush3.bf16.msra.mxu0 %v19386_v53  ;;  %18248 = vmatpush3.bf16.msra.mxu1 %v19387_v56 }
0x450d   : > { %18227 = vmatprep.subr.bf16.mxu0 %v19388_v46  ;;  %18249 = vmatprep.subr.bf16.mxu1 %v19389_v59 }
0x4510   : > { %18228 = vmatpush3.bf16.msra.mxu0 %v19390_v48  ;;  %18250 = vmatpush3.bf16.msra.mxu1 %v19391_v55 }
0x4511   : > { %18229 = vmatprep.subr.bf16.mxu0 %v19392_v63  ;;  %18251 = vmatprep.subr.bf16.mxu1 %v19393_v2 }
0x4514   : > { %18230 = vmatpush3.bf16.msra.mxu0 %v19394_v5  ;;  %18252 = vmatpush3.bf16.msra.mxu1 %v19395_v58 }
0x4515   : > { %16028 = vmatprep.subr.bf16.mxu0 %v17591_v29  ;;  %16071 = vmatprep.subr.bf16.mxu1 %v17593_v23 }
0x459a   : > { %v18143_v21 = vpop.f32.mrb[92].mxu0  ;;  %v18165_v9 = vpop.f32.mrb[72].mxu1 }
0x459b   : > { %v18144_v25 = vpop.f32.mrb[93].mxu0  ;;  %v18166_v57 = vpop.f32.mrb[73].mxu1 }
0x459c   : > { %v18145_v10 = vadd.f32 %v18144_v25, %v18143_v21  ;;  %v18167_v11 = vadd.f32 %v18166_v57, %v18165_v9  ;;  %v18146_v44 = vpop.f32.mrb[94].mxu0  ;;  %v18168_v3 = vpop.f32.mrb[74].mxu1 }
0x459d   : > { %v18147_v60 = vpop.f32.mrb[95].mxu0  ;;  %v18169_v12 = vpop.f32.mrb[75].mxu1 }
0x459e   : > { %v15074_v8 = vadd.f32 %v18167_v11, %v18145_v10  ;;  %v18148_v45 = vadd.f32 %v18147_v60, %v18146_v44  ;;  %v18170_v49 = vadd.f32 %v18169_v12, %v18168_v3  ;;  %v15914_v11 = vld [vmem:[%s19878_s28 + $0xb0] sm:$0xff] }
0x459f   : > { %v15916_v44 = vld [vmem:[%s19878_s28 + $0xf0] sm:$0xff] }
0x45a0   : > { %v15077_v13 = vadd.f32 %v18170_v49, %v18148_v45  ;;  %v15915_v45 = vld [vmem:[%s19878_s28 + $0xb8] sm:$0xff] }
0x45a1   : > { %v15917_v49 = vld [vmem:[%s19878_s28 + $0xf8] sm:$0xff] }
0x45ba   : > { %v18187_v14 = vpop.f32.mrb[96].mxu0  ;;  %v18209_v26 = vpop.f32.mrb[76].mxu1 }
0x45bb   : > { %v18188_v52 = vpop.f32.mrb[97].mxu0  ;;  %v18210_v15 = vpop.f32.mrb[77].mxu1 }
0x45bc   : > { %v18189_v31 = vadd.f32 %v18188_v52, %v18187_v14  ;;  %v18211_v16 = vadd.f32 %v18210_v15, %v18209_v26  ;;  %v18190_v33 = vpop.f32.mrb[98].mxu0  ;;  %v18212_v17 = vpop.f32.mrb[78].mxu1  ;;  %v17595_v15 = vcombine.high %v15914_v11, %v15916_v44 }
0x45bd   : > { %v18191_v18 = vpop.f32.mrb[99].mxu0  ;;  %v18213_v19 = vpop.f32.mrb[79].mxu1 }
0x45be   : > { %v15307_v35 = vadd.f32 %v18189_v31, %v15074_v8  ;;  %v18192_v27 = vadd.f32 %v18191_v18, %v18190_v33  ;;  %v18214_v20 = vadd.f32 %v18213_v19, %v18212_v17  ;;  %v17597_v31 = vcombine.high %v15915_v45, %v15917_v49  ;;  %v15920_v33 = vld [vmem:[%s19878_s28 + $0x170] sm:$0xff]  ;;  %v15919_v17 = vld [vmem:[%s19878_s28 + $0x138] sm:$0xff] }
0x45bf   : > { %v15921_v18 = vld [vmem:[%s19878_s28 + $0x178] sm:$0xff]  ;;  %v17594_v19 = vcombine.low %v15914_v11, %v15916_v44  ;;  %v19420_v11 = vld [vmem:[%s19889_s29 + $0x370] sm:$0xff]  }
0x45c0   : > { %v21519_v38 = vadd.f32 %v18211_v16, %v15307_v35  ;;  %v15310_v4 = vadd.f32 %v18192_v27, %v15077_v13  ;;  %v15918_v16 = vld [vmem:[%s19878_s28 + $0x130] sm:$0xff]  ;;  %v17596_v35 = vcombine.low %v15915_v45, %v15917_v49  ;;  %v17600_v6 = vcombine.low %v15919_v17, %v15921_v18  ;;  %v19426_v45 = vld [vmem:[%s19889_s29 + $0x338] sm:$0xff]  }
0x45c1   : > { %v17599_v27 = vcombine.high %v15918_v16, %v15920_v33  ;;  %v17598_v1 = vcombine.low %v15918_v16, %v15920_v33  ;;  %v19421_v44 = vld [vmem:[%s19889_s29 + $0x3f0] sm:$0xff]   ;;  %v19427_v49 = vld [vmem:[%s19889_s29 + $0x3b8] sm:$0xff]  }
0x45c2   : > { %v21521_v40 = vadd.f32 %v18214_v20, %v15310_v4  ;;  %v17601_v20 = vcombine.high %v15919_v17, %v15921_v18  ;;  %v15922_v4 = vld [vmem:[%s19878_s28 + $0x1b0] sm:$0xff] }
0x45c3   : > { %v17603_v32 = vcombine.high %v15922_v4, %v15924_v47 }
0x45ca   : > { %v15506_v54 = vpop.f32.mrb[100].mxu0  ;;  %v15549_v24 = vpop.f32.mrb[80].mxu1 }
0x45cb   : > { %v15507_v62 = vadd.f32 %v15506_v54, %v15375_v43  ;;  %v15550_v53 = vadd.f32 %v15549_v24, %v15383_v41  ;;  %v15508_v56 = vpop.f32.mrb[101].mxu0  ;;  %v15551_v46 = vpop.f32.mrb[81].mxu1  ;;  %v19399_v54 = vld [vmem:[%s19889_s29 + $0x380] sm:$0xff]   ;;  %v19400_v24 = vld [vmem:[%s19889_s29 + $0x348] sm:$0xff]  }
0x45cc   : > { %v15509_v59 = vadd.f32 %v15508_v56, %v15379_v50  ;;  %v15552_v48 = vadd.f32 %v15551_v46, %v15387_v42  ;;  %v15510_v55 = vpop.f32.mrb[102].mxu0  ;;  %v15553_v63 = vpop.f32.mrb[82].mxu1  ;;  %v19403_v56 = vld [vmem:[%s19889_s29 + $0x388] sm:$0xff]   ;;  %v19404_v46 = vld [vmem:[%s19889_s29 + $0x350] sm:$0xff]  }
0x45cd   : > { %v15511_v2 = vadd.f32 %v15510_v55, %v15375_v43  ;;  %v15554_v5 = vadd.f32 %v15553_v63, %v15383_v41  ;;  %v15512_v58 = vpop.f32.mrb[103].mxu0  ;;  %v15555_v29 = vpop.f32.mrb[83].mxu1  ;;  %v15558_v9 = vmax.f32 %v15507_v62, 0.0  ;;  %v15560_v25 = vmax.f32 %v15550_v53, 0.0  ;;  %v15923_v43 = vld [vmem:[%s19878_s28 + $0x1b8] sm:$0xff]  ;;  %v19401_v62 = vld [vmem:[%s19889_s29 + $0x3c8] sm:$0xff]  }
0x45ce   : > { %v15513_v23 = vadd.f32 %v15512_v58, %v15379_v50  ;;  %v15556_v21 = vadd.f32 %v15555_v29, %v15387_v42  ;;  %v15559_v3 = vmax.f32 %v15509_v59, 0.0  ;;  %v15561_v60 = vmax.f32 %v15552_v48, 0.0  ;;  %v15925_v41 = vld [vmem:[%s19878_s28 + $0x1f8] sm:$0xff]  ;;  %v19397_v50 = vld [vmem:[%s19889_s29 + $0x3c0] sm:$0xff]   ;;  %v19402_v53 = vld [vmem:[%s19889_s29 + $0x308] sm:$0xff]  }
0x45cf   : > { %v15562_v57 = vmax.f32 %v15511_v2, 0.0  ;;  %v15564_v10 = vmax.f32 %v15554_v5, 0.0  ;;  %v17605_v22 = vcombine.high %v15923_v43, %v15925_v41  ;;  %v19398_v42 = vld [vmem:[%s19889_s29 + $0x300] sm:$0xff]   ;;  %v19405_v59 = vld [vmem:[%s19889_s29 + $0x3d0] sm:$0xff]   ;;  %v19409_v63 = vld [vmem:[%s19889_s29 + $0x3d8] sm:$0xff]  }
0x45d0   : > { %v15563_v12 = vmax.f32 %v15513_v23, 0.0  ;;  %v15565_v8 = vmax.f32 %v15556_v21, 0.0  ;;  %v19406_v48 = vld [vmem:[%s19889_s29 + $0x310] sm:$0xff]   ;;  %v19410_v2 = vld [vmem:[%s19889_s29 + $0x318] sm:$0xff]   ;;  %v19412_v58 = vld [vmem:[%s19889_s29 + $0x360] sm:$0xff]  }
0x45d1   : > { %v15566_v13 = vpack.c.bf16 %v15562_v57, %v15558_v9  ;;  %v15568_v14 = vpack.c.bf16 %v15564_v10, %v15560_v25  ;;  %v19407_v55 = vld [vmem:[%s19889_s29 + $0x390] sm:$0xff]   ;;  %v19411_v5 = vld [vmem:[%s19889_s29 + $0x398] sm:$0xff]   ;;  %v19413_v29 = vld [vmem:[%s19889_s29 + $0x3e0] sm:$0xff]  }
0x45d2   : > { %v15567_v26 = vpack.c.bf16 %v15563_v12, %v15559_v3  ;;  %v15569_v52 = vpack.c.bf16 %v15565_v8, %v15561_v60  ;;  %v19414_v23 = vld [vmem:[%s19889_s29 + $0x320] sm:$0xff]   ;;  %v19416_v9 = vld [vmem:[%s19889_s29 + $0x368] sm:$0xff]   ;;  %v19422_v3 = vld [vmem:[%s19889_s29 + $0x330] sm:$0xff]  }
0x45d3   : > { %v19415_v21 = vld [vmem:[%s19889_s29 + $0x3a0] sm:$0xff]   ;;  %v19417_v25 = vld [vmem:[%s19889_s29 + $0x3e8] sm:$0xff]   ;;  %v19423_v60 = vld [vmem:[%s19889_s29 + $0x3b0] sm:$0xff]  }
0x45d4   : > { %15858 = vmatprep.mubr.bf16.mxu0 %v15567_v26  ;;  %15899 = vmatprep.mubr.bf16.mxu1 %v15569_v52  ;;  %v19418_v57 = vld [vmem:[%s19889_s29 + $0x328] sm:$0xff]   ;;  %v19424_v12 = vld [vmem:[%s19889_s29 + $0x378] sm:$0xff]  }
0x45d5   : > { %15859 = vmatmul.mubr.bf16.vlgmr.msra.gmra.mrb[104].mxu0 %v15566_v13  ;;  %15900 = vmatmul.mubr.bf16.vlgmr.msra.gmra.mrb[84].mxu1 %v15568_v14  ;;  %v19419_v10 = vld [vmem:[%s19889_s29 + $0x3a8] sm:$0xff]   ;;  %v19425_v8 = vld [vmem:[%s19889_s29 + $0x3f8] sm:$0xff]  }
0x45d6   : > { %16029 = vmatpush1.bf16.msra.mxu0 %v17590_v51  ;;  %16072 = vmatpush1.bf16.msra.mxu1 %v17592_v61  ;;  %v17602_v51 = vcombine.low %v15922_v4, %v15924_v47  ;;  %v17604_v61 = vcombine.low %v15923_v43, %v15925_v41  ;;  %v15926_v43 = vld [vmem:[%s19881_s26 + $0xc] sm:$0xf] }
0x45d7   : > { %16030 = vmatprep.subr.bf16.mxu0 %v17595_v15  ;;  %16073 = vmatprep.subr.bf16.mxu1 %v17597_v31  ;;  %v15931_v41 = vrot.slane %v15926_v43, %v20596_v34 }
0x45d8   : > { %16060 = vmatprep.mubr.bf16.mxu0 %v19634_v30  ;;  %16103 = vmatprep.mubr.bf16.mxu1 %v19634_v30  ;;  %v19396_v30 = vld [vmem:[%s19889_s29 + $0x340] sm:$0xff]  }
0x45da   : > { %16031 = vmatpush1.bf16.msra.mxu0 %v17594_v19  ;;  %16074 = vmatpush1.bf16.msra.mxu1 %v17596_v35 }
0x45db   : > { %16032 = vmatprep.subr.bf16.mxu0 %v17599_v27  ;;  %16075 = vmatprep.subr.bf16.mxu1 %v17601_v20 }
0x45de   : > { %16033 = vmatpush1.bf16.msra.mxu0 %v17598_v1  ;;  %16076 = vmatpush1.bf16.msra.mxu1 %v17600_v6  ;;  %v15939_v1 = vrot.slane %v15926_v43, %v21394_v28  ;;  %v15935_v6 = vrot.slane %v15926_v43, %v20601_v37 }
0x45df   : > { %16034 = vmatprep.subr.bf16.mxu0 %v17603_v32  ;;  %16077 = vmatprep.subr.bf16.mxu1 %v17605_v22  ;;  %v15943_v32 = vrot.slane %v15926_v43, %v21398_v36 }
0x45e2   : > { %16035 = vmatpush1.bf16.msra.mxu0 %v17602_v51  ;;  %16078 = vmatpush1.bf16.msra.mxu1 %v17604_v61 }
0x45e3   : > { %18259 = vmatprep.subr.bf16.mxu0 %v19396_v30  ;;  %18281 = vmatprep.subr.bf16.mxu1 %v19397_v50 }
0x45e5   : > { %17606 = vmatmul.mubr.msk.bf16.vlgmr.msra.gmra.mrb[108].mxu0 %vm7310_vm5, %v21339_v7  ;;  %17607 = vmatmul.mubr.msk.bf16.vlgmr.msra.gmra.mrb[88].mxu1 %vm7310_vm5, %v21339_v7  ;;  %v19408_v7 = vld [vmem:[%s19889_s29 + $0x358] sm:$0xff]  }
0x45e6   : > { %18260 = vmatpush3.bf16.msra.mxu0 %v19398_v42  ;;  %18282 = vmatpush3.bf16.msra.mxu1 %v19399_v54 }
0x45e7   : > { %18261 = vmatprep.subr.bf16.mxu0 %v19400_v24  ;;  %18283 = vmatprep.subr.bf16.mxu1 %v19401_v62 }
0x45ea   : > { %18262 = vmatpush3.bf16.msra.mxu0 %v19402_v53  ;;  %18284 = vmatpush3.bf16.msra.mxu1 %v19403_v56 }
0x45eb   : > { %18263 = vmatprep.subr.bf16.mxu0 %v19404_v46  ;;  %18285 = vmatprep.subr.bf16.mxu1 %v19405_v59 }
0x45ee   : > { %18264 = vmatpush3.bf16.msra.mxu0 %v19406_v48  ;;  %18286 = vmatpush3.bf16.msra.mxu1 %v19407_v55 }
0x45ef   : > { %18265 = vmatprep.subr.bf16.mxu0 %v19408_v7  ;;  %18287 = vmatprep.subr.bf16.mxu1 %v19409_v63 }
0x45f2   : > { %18266 = vmatpush3.bf16.msra.mxu0 %v19410_v2  ;;  %18288 = vmatpush3.bf16.msra.mxu1 %v19411_v5 }
0x45f3   : > { %18267 = vmatprep.subr.bf16.mxu0 %v19412_v58  ;;  %18289 = vmatprep.subr.bf16.mxu1 %v19413_v29 }
0x45f6   : > { %18268 = vmatpush3.bf16.msra.mxu0 %v19414_v23  ;;  %18290 = vmatpush3.bf16.msra.mxu1 %v19415_v21 }
0x45f7   : > { %18269 = vmatprep.subr.bf16.mxu0 %v19416_v9  ;;  %18291 = vmatprep.subr.bf16.mxu1 %v19417_v25 }
0x45fa   : > { %18270 = vmatpush3.bf16.msra.mxu0 %v19418_v57  ;;  %18292 = vmatpush3.bf16.msra.mxu1 %v19419_v10 }
0x45fb   : > { %18271 = vmatprep.subr.bf16.mxu0 %v19420_v11  ;;  %18293 = vmatprep.subr.bf16.mxu1 %v19421_v44 }
0x45fe   : > { %18272 = vmatpush3.bf16.msra.mxu0 %v19422_v3  ;;  %18294 = vmatpush3.bf16.msra.mxu1 %v19423_v60 }
0x45ff   : > { %18273 = vmatprep.subr.bf16.mxu0 %v19424_v12  ;;  %18295 = vmatprep.subr.bf16.mxu1 %v19425_v8 }
0x4602   : > { %18274 = vmatpush3.bf16.msra.mxu0 %v19426_v45  ;;  %18296 = vmatpush3.bf16.msra.mxu1 %v19427_v49 }
0x46a8   : > { %v18231_v13 = vpop.f32.mrb[104].mxu0  ;;  %v18253_v14 = vpop.f32.mrb[84].mxu1 }
0x46a9   : > { %v18232_v26 = vpop.f32.mrb[105].mxu0  ;;  %v18254_v52 = vpop.f32.mrb[85].mxu1 }
0x46aa   : > { %v18233_v15 = vadd.f32 %v18232_v26, %v18231_v13  ;;  %v18255_v31 = vadd.f32 %v18254_v52, %v18253_v14  ;;  %v18234_v16 = vpop.f32.mrb[106].mxu0  ;;  %v18256_v33 = vpop.f32.mrb[86].mxu1  ;;  %v17640_v13 = vld [vmem:[%s19886_s24] ss:$0 sm:$0xff] }
0x46ab   : > { %v18235_v17 = vpop.f32.mrb[107].mxu0  ;;  %v18257_v18 = vpop.f32.mrb[87].mxu1 }
0x46ac   : > { %v15902_v19 = vadd.f32 %v18255_v31, %v18233_v15  ;;  %v18236_v35 = vadd.f32 %v18235_v17, %v18234_v16  ;;  %v18258_v27 = vadd.f32 %v18257_v18, %v18256_v33 }
0x46ae   : > { %v15908_v20 = vadd.f32 %v15902_v19, %v21519_v38  ;;  %v15905_v4 = vadd.f32 %v18258_v27, %v18236_v35 }
0x46b0   : > { %v15909_v47 = vadd.f32 %v15905_v4, %v21521_v40 }
0x46b8   : > { %v16062_v22 = vpop.f32.mrb[108].mxu0  ;;  %v16105_v51 = vpop.f32.mrb[88].mxu1 }
0x46b9   : > { %v16063_v61 = vadd.f32 %v16062_v22, %v15931_v41  ;;  %v16106_v30 = vadd.f32 %v16105_v51, %v15939_v1  ;;  %v16064_v50 = vpop.f32.mrb[109].mxu0  ;;  %v16107_v42 = vpop.f32.mrb[89].mxu1 }
0x46ba   : > { %v16065_v54 = vadd.f32 %v16064_v50, %v15935_v6  ;;  %v16108_v38 = vadd.f32 %v16107_v42, %v15943_v32  ;;  %v16066_v24 = vpop.f32.mrb[110].mxu0  ;;  %v16109_v62 = vpop.f32.mrb[90].mxu1  ;;  %v17641_v50 = vld [vmem:[%s19893_s19] ss:$0 sm:$0xff] }
0x46bb   : > { %v16067_v40 = vadd.f32 %v16066_v24, %v15931_v41  ;;  %v16110_v53 = vadd.f32 %v16109_v62, %v15939_v1  ;;  %v16068_v56 = vpop.f32.mrb[111].mxu0  ;;  %v16111_v34 = vpop.f32.mrb[91].mxu1  ;;  %v16114_v59 = vmax.f32 %v16063_v61, 0.0  ;;  %v16116_v37 = vmax.f32 %v16106_v30, 0.0 }
0x46bc   : > { %v16069_v46 = vadd.f32 %v16068_v56, %v15935_v6  ;;  %v16112_v28 = vadd.f32 %v16111_v34, %v15943_v32  ;;  %v16115_v55 = vmax.f32 %v16065_v54, 0.0  ;;  %v16117_v7 = vmax.f32 %v16108_v38, 0.0  ;;  %v17642_v38 = vld [vmem:[%s19897_s25] ss:$0 sm:$0xff] }
0x46bd   : > { %v16118_v48 = vmax.f32 %v16067_v40, 0.0  ;;  %v16120_v36 = vmax.f32 %v16110_v53, 0.0 }
0x46be   : > { %v16119_v63 = vmax.f32 %v16069_v46, 0.0  ;;  %v16121_v2 = vmax.f32 %v16112_v28, 0.0 }
0x46bf   : > { %v16122_v5 = vpack.c.bf16 %v16118_v48, %v16114_v59  ;;  %v16124_v58 = vpack.c.bf16 %v16120_v36, %v16116_v37 }
0x46c0   : > { %v16123_v29 = vpack.c.bf16 %v16119_v63, %v16115_v55  ;;  %v16125_v23 = vpack.c.bf16 %v16121_v2, %v16117_v7 }
0x46c2   : > { %16414 = vmatprep.mubr.bf16.mxu0 %v16123_v29  ;;  %16455 = vmatprep.mubr.bf16.mxu1 %v16125_v23 }
0x46c3   : > { %16415 = vmatmul.mubr.bf16.vlgmr.msra.gmra.mrb[112].mxu0 %v16122_v5  ;;  %16456 = vmatmul.mubr.bf16.vlgmr.msra.gmra.mrb[92].mxu1 %v16124_v58 }
0x4796   : > { %v18275_v21 = vpop.f32.mrb[112].mxu0  ;;  %v18297_v9 = vpop.f32.mrb[92].mxu1 }
0x4797   : > { %v18276_v25 = vpop.f32.mrb[113].mxu0  ;;  %v18298_v57 = vpop.f32.mrb[93].mxu1 }
0x4798   : > { %v18277_v10 = vadd.f32 %v18276_v25, %v18275_v21  ;;  %v18299_v11 = vadd.f32 %v18298_v57, %v18297_v9  ;;  %v18278_v44 = vpop.f32.mrb[114].mxu0  ;;  %v18300_v3 = vpop.f32.mrb[94].mxu1 }
0x4799   : > { %v18279_v60 = vpop.f32.mrb[115].mxu0  ;;  %v18301_v12 = vpop.f32.mrb[95].mxu1 }
0x479a   : > { %v16458_v8 = vadd.f32 %v18299_v11, %v18277_v10  ;;  %v18280_v45 = vadd.f32 %v18279_v60, %v18278_v44  ;;  %v18302_v49 = vadd.f32 %v18301_v12, %v18300_v3 }
0x479c   : > { %v16464_v14 = vadd.f32 %v16458_v8, %v15908_v20  ;;  %v16461_v26 = vadd.f32 %v18302_v49, %v18280_v45 }
0x479e   : > { %v16465_v52 = vadd.f32 %v16461_v26, %v15909_v47  ;;  %v16473_v15 = vadd.f32 %v17640_v13, %v16464_v14 }
0x47a0   : > { %v16475_v31 = vadd.f32 %v16473_v15, %v21335_v0  ;;  %v16474_v16 = vadd.f32 %v17640_v13, %v16465_v52 }
0x47a2   : > { %v16479_v33 = vsel %vm7310_vm5, %v16475_v31, 0.0  ;;  %v16476_v17 = vadd.f32 %v16474_v16, %v21330_v39 }
0x47a3   : > { %16480 = vadd.xlane.f32.xlu1 %v16479_v33 }
0x47a4   : > { %v16482_v18 = vsel %vm7310_vm5, %v16476_v17, 0.0 }
0x47a5   : > { %16483 = vadd.xlane.f32.xlu0 %v16482_v18 }
0x4830   : > { %v16481_v19 = vpop.xlane.xlu1 %16480 }
0x4831   : > { %v16485_v35 = vmul.f32 0.015625, %v16481_v19 }
0x4832   : > { %v16484_v27 = vpop.xlane.xlu0 %16483 }
0x4833   : > { %v16487_v4 = vsub.f32 %v16475_v31, %v16485_v35  ;;  %v16486_v43 = vmul.f32 0.015625, %v16484_v27 }
0x4835   : > { %v16488_v20 = vsub.f32 %v16476_v17, %v16486_v43  ;;  %v16489_v47 = vmul.f32 %v16487_v4, %v16487_v4 }
0x4837   : > { %v16491_v41 = vsel %vm7310_vm5, %v16489_v47, 0.0  ;;  %v16490_v0 = vmul.f32 %v16488_v20, %v16488_v20 }
0x4838   : > { %16492 = vadd.xlane.f32.xlu1 %v16491_v41 }
0x4839   : > { %v16494_v1 = vsel %vm7310_vm5, %v16490_v0, 0.0 }
0x483a   : > { %16495 = vadd.xlane.f32.xlu0 %v16494_v1 }
0x48c5   : > { %v16493_v39 = vpop.xlane.xlu1 %16492 }
0x48c6   : > { %v16497_v6 = vmul.f32 0.015625, %v16493_v39 }
0x48c7   : > { %v16496_v32 = vpop.xlane.xlu0 %16495 }
0x48c8   : > { %v16499_v22 = vadd.f32 1e-05, %v16497_v6  ;;  %v16498_v51 = vmul.f32 0.015625, %v16496_v32 }
0x48ca   : > { %19564 = vrsqrt.f32 %v16499_v22  ;;  %v16500_v61 = vadd.f32 1e-05, %v16498_v51 }
0x48cc   : > { %19566 = vrsqrt.f32 %v16500_v61 }
0x48d4   : > { %v19565_v30 = vpop.eup %19564 }
0x48d5   : > { %v16503_v42 = vmul.f32 %v19565_v30, %v16487_v4 }
0x48d6   : > { %v19567_v54 = vpop.eup %19566 }
0x48d7   : > { %v16511_v24 = vmul.f32 %v17641_v50, %v16503_v42  ;;  %v16504_v62 = vmul.f32 %v19567_v54, %v16488_v20 }
0x48d9   : > { %v16519_v40 = vadd.f32 %v17642_v38, %v16511_v24  ;;  %v16512_v53 = vmul.f32 %v17641_v50, %v16504_v62 }
0x48db   : > { %16521 = vst.msk [vmem:[#allocation3] sm:$0xff] %vm7310_vm5, %v16519_v40  ;;  %v16520_v56 = vadd.f32 %v17642_v38, %v16512_v53 }
0x48dd   : > { %16522 = vst.msk [vmem:[#allocation3 + $0x8] sm:$0xff] %vm7310_vm5, %v16520_v56 }
0x48de PF: > { %s21726_s29 = sld [smem:[#allocation30_spill]] }
0x48e4   : > { %p17643_p10 = scmp.ne.s32.totalorder %s21726_s29, 11 }
0x48e5   : > { %v16527_v34 = vld [vmem:[#allocation3] sm:$0xff] (!%p17643_p10)  ;;  %vm16531_vm8 = vcmask (!%p17643_p10), 523264   ;;  %v16528_v46 = vld [vmem:[#allocation3 + $0x8] sm:$0xff] (!%p17643_p10)  ;;  %s21727_s19 = sld [smem:[#allocation26_spill]] (!%p17643_p10)  ;;  %v19652_v21 = vmov (!%p17643_p10), 0.0   ;;  %s21728_s24 = sld [smem:[#allocation24_spill]] (!%p17643_p10) }
0x48e6   : > { %16526 = sbr.rel (%p17643_p10) target bundleno = 19198 (0x4afe), region = 160  ;;  %v16532_v28 = vsel (!%p17643_p10), %vm16531_vm8, %v16527_v34, 0.0  ;;  %v16535_v59 = vsel (!%p17643_p10), %vm16531_vm8, %v16528_v46, 0.0  ;;  %18932 = vmatprep.subr.bf16.mxu0 (!%p17643_p10), %v19652_v21  ;;  %vm19653_vm9 = vmmov (!%p17643_p10), 0   ;;  %s21729_s0 = sld [smem:[#allocation25_spill]] (!%p17643_p10) }
0x48e7   : > { %16533 = vadd.xlane.f32.xlu0 (!%p17643_p10), %v16532_v28  ;;  %18940 = vmatprep.mubr.msk.bf16.mxu0 (!%p17643_p10), %vm19653_vm9, %v19652_v21  ;;  %s21730_s26 = sld [smem:[#allocation27_spill]] (!%p17643_p10)  ;;  %s21731_s28 = sld [smem:[#allocation28_spill]] (!%p17643_p10) }
0x48eb   : > { %16536 = vadd.xlane.f32.xlu0 (!%p17643_p10), %v16535_v59  ;;  %v19570_v23 = vld [vmem:[%s21727_s19] sm:$0xff] (!%p17643_p10)   ;;  %v19571_v9 = vld [vmem:[%s21727_s19 + $0x8] sm:$0xff] (!%p17643_p10)   ;;  %v19572_v25 = vld [vmem:[%s21727_s19 + $0x10] sm:$0xff] (!%p17643_p10)  }
0x48ec   : > { %18933 = vmatpush3.bf16.msra.mxu0 (!%p17643_p10), %v19570_v23  ;;  %v19573_v57 = vld [vmem:[%s21727_s19 + $0x18] sm:$0xff] (!%p17643_p10)   ;;  %v17644_v49 = vld [vmem:[%s21728_s24] ss:$0 sm:$0xff] (!%p17643_p10) }
0x48ed   : > { %18934 = vmatprep.subr.bf16.mxu0 %v19652_v21  ;;  %v17645_v52 = vld [vmem:[%s21729_s0] ss:$0 sm:$0xff] }
0x48ee   : > { %v17646_v17 = vld [vmem:[%s21730_s26] ss:$0 sm:$0xff] }
0x48f0   : > { %18935 = vmatpush3.bf16.msra.mxu0 %v19571_v9 }
0x48f1   : > { %18936 = vmatprep.subr.bf16.mxu0 %v19652_v21 }
0x48f4   : > { %18937 = vmatpush3.bf16.msra.mxu0 %v19572_v25 }
0x48f5   : > { %18938 = vmatprep.subr.bf16.mxu0 %v19652_v21 }
0x48f8   : > { %18939 = vmatpush3.bf16.msra.mxu0 %v19573_v57 }
0x4974   : > { %v16534_v37 = vpop.xlane.xlu0 %16533 }
0x4975   : > { %v16539_v48 = vmul.f32 0.015625, %v16534_v37 }
0x4977   : > { %v16541_v36 = vsub.f32 %v16527_v34, %v16539_v48 }
0x4978   : > { %v16537_v55 = vpop.xlane.xlu0 %16536 }
0x4979   : > { %v16540_v7 = vmul.f32 0.015625, %v16537_v55  ;;  %v16543_v63 = vmul.f32 %v16541_v36, %v16541_v36 }
0x497b   : > { %v16542_v2 = vsub.f32 %v16528_v46, %v16540_v7  ;;  %v16545_v5 = vsel %vm16531_vm8, %v16543_v63, 0.0 }
0x497c   : > { %16546 = vadd.xlane.f32.xlu1 %v16545_v5 }
0x497d   : > { %v16544_v58 = vmul.f32 %v16542_v2, %v16542_v2 }
0x497f   : > { %v16548_v29 = vsel %vm16531_vm8, %v16544_v58, 0.0 }
0x4980   : > { %16549 = vadd.xlane.f32.xlu1 %v16548_v29 }
0x4a09   : > { %v16547_v10 = vpop.xlane.xlu1 %16546 }
0x4a0a   : > { %v16551_v11 = vmul.f32 0.015625, %v16547_v10 }
0x4a0c   : > { %v16553_v44 = vadd.f32 1e-05, %v16551_v11 }
0x4a0d   : > { %v16550_v3 = vpop.xlane.xlu1 %16549 }
0x4a0e   : > { %19574 = vrsqrt.f32 %v16553_v44  ;;  %v16552_v60 = vmul.f32 0.015625, %v16550_v3 }
0x4a10   : > { %v16554_v12 = vadd.f32 1e-05, %v16552_v60 }
0x4a12   : > { %19576 = vrsqrt.f32 %v16554_v12 }
0x4a18   : > { %v19575_v8 = vpop.eup %19574 }
0x4a19   : > { %v16557_v45 = vmul.f32 %v19575_v8, %v16541_v36 }
0x4a1b   : > { %v16565_v26 = vmul.f32 %v17644_v49, %v16557_v45 }
0x4a1c   : > { %v19577_v13 = vpop.eup %19576 }
0x4a1d   : > { %v16558_v14 = vmul.f32 %v19577_v13, %v16542_v2  ;;  %v16573_v31 = vadd.f32 %v17645_v52, %v16565_v26 }
0x4a1f   : > { %v16566_v15 = vmul.f32 %v17644_v49, %v16558_v14 }
0x4a21   : > { %v16574_v16 = vadd.f32 %v17645_v52, %v16566_v15 }
0x4a23   : > { %v16575_v33 = vpack.c.bf16 %v16574_v16, %v16573_v31 }
0x4a25   : > { %18941 = vmatmul.mubr.msk.bf16.vlgmr.msra.gmra.mrb[0].mxu0 %vm16531_vm8, %v16575_v33 }
0x4af8   : > { %v16652_v18 = vpop.f32.mrb[0].mxu0 }
0x4af9   : > { %v16653_v19 = vadd.f32 %v17646_v17, %v16652_v18  ;;  %v18942_v35 = vpop.f32.mrb[1].mxu0 }
0x4afa   : > { %v16655_v27 = vpop.f32.mrb[2].mxu0 }
0x4afb   : > { %16659 = vst [vmem:[%s21731_s28] sm:$0xff] %v16653_v19  ;;  %v16656_v4 = vadd.f32 %v17646_v17, %v16655_v27  ;;  %v18943_v43 = vpop.f32.mrb[3].mxu0 }
0x4afd   : > { %16660 = vst [vmem:[%s21731_s28 + $0x8] sm:$0xff] %v16656_v4 }
0x4afe PF: > { %s21732_s25 = sld [smem:[#allocation29_spill]] }
0x4b04   : > { %s71_s15 = sadd.s32 1, %s21732_s25  }
0x4b05   : > { %p68_p11 = scmp.ge.s32.totalorder %s71_s15, 14  }
0x4b07   :  { %70 = sbr.rel (!%p68_p11) target bundleno = 68 (0x44), region = 273 }

</bundles_post_ra>
